<compile_context>
chip_gen: v6e
topology: v6e:2x2x1
jax: 0.10.0
libtpu: 0.0.40
codegen_flags: <defaults>
</compile_context>

<pallas_src>
import jax
import jax.numpy as jnp
from jax.experimental import pallas as pl
from jax.experimental.pallas import tpu as pltpu

_LANE = 128
_BN_EPS = 1e-3  # nn.BatchNorm1d(eps=0.001) in the reference JasperBlock


def _round_up(n, m):
    return ((n + m - 1) // m) * m


def _apply_activation(y, act):
    if act is None:
        return y
    if act == "relu":
        return jnp.maximum(y, 0.0)
    if act == "hardtanh":
        return jnp.clip(y, 0.0, 20.0)
    if act == "selu":
        return jax.nn.selu(y)
    raise ValueError(f"unknown activation {act}")


# ----------------------------------------------------------------------------
# Fused whole-encoder kernel:
#   per conv layer: mask -> halo-pad (VMEM) -> bf16 im2col slab ->
#   one (B*L, K*Cin[+Cres]) matmul with BN folded into weights ->
#   combined bias (+ fused 1x1 residual conv contribution) -> activation
# ----------------------------------------------------------------------------
def _make_encoder_kernel(*, B, L, plan, act, use_mask, cmax):
    n_layers = len(plan)

    def kernel(*refs):
        lens_ref = refs[0]                       # (B,) int32 in SMEM (prefetch)
        x_ref = refs[1]                          # (B, L, feat_pad) f32
        wb = refs[2:2 + 2 * n_layers]            # (w_ref, b_ref) per conv layer
        out_ref = refs[2 + 2 * n_layers]         # (B, L, cout_last) f32
        xpad_ref = refs[3 + 2 * n_layers]        # (B, L+2*max_pad, cmax) f32
        col_ref = refs[4 + 2 * n_layers]         # (B*L, dmax) bf16 im2col slab

        # Sequence mask, hoisted: one iota + B compares reused by every layer
        # (stride=1 'same' convs keep lens unchanged; residual uses lens_orig).
        masks = None
        if use_mask:
            pos = jax.lax.broadcasted_iota(jnp.int32, (L, cmax), 0)
            masks = [pos < lens_ref[b] for b in range(B)]

        cur = None        # (B*L, C) f32 value: previous layer's activations
        res_rows = None   # per-batch masked block input (fused 1x1 residual)

        for li, spec in enumerate(plan):
            K, pad = spec["K"], spec["pad"]
            cin_p, cout_p = spec["cin_p"], spec["cout_p"]
            res_p = spec["res_cin_p"]
            w_ref, b_ref = wb[2 * li], wb[2 * li + 1]

            # ---- stage masked input into the halo'd VMEM scratch ----
            # Only the 2*pad halo rows are zeroed (not the whole scratch).
            zhalo = jnp.zeros((pad, cin_p), jnp.float32) if pad > 0 else None
            xb_rows = []
            for b in range(B):
                if li == 0:
                    xb = x_ref[b]                             # (L, cin_p) f32
                else:
                    xb = cur[b * L:(b + 1) * L, :]            # (L, cin_p) f32
                if use_mask:
                    xb = jnp.where(masks[b][:, :cin_p], xb, jnp.zeros_like(xb))
                if pad > 0:
                    xpad_ref[b, pl.ds(0, pad), pl.ds(0, cin_p)] = zhalo
                    xpad_ref[b, pl.ds(pad + L, pad), pl.ds(0, cin_p)] = zhalo
                xpad_ref[b, pl.ds(pad, L), pl.ds(0, cin_p)] = xb
                xb_rows.append(xb)
            if spec["save_res"]:
                # masked block input == residual 1x1 conv input (lens_orig).
                res_rows = xb_rows

            # ---- build bf16 im2col slab (B*L, K*cin_p [+ res_p]), once ----
            for b in range(B):
                for k in range(K):
                    col_ref[pl.ds(b * L, L), pl.ds(k * cin_p, cin_p)] = (
                        xpad_ref[b, pl.ds(k, L), pl.ds(0, cin_p)]
                        .astype(jnp.bfloat16))
                if spec["fuse_res"]:
                    col_ref[pl.ds(b * L, L), pl.ds(K * cin_p, res_p)] = (
                        res_rows[b].astype(jnp.bfloat16))
            d = K * cin_p + res_p

            # ---- one deep batch-merged MXU matmul, f32 accumulation ----
            y = jnp.dot(col_ref[pl.ds(0, B * L), pl.ds(0, d)], w_ref[...],
                        preferred_element_type=jnp.float32)
            # BN scale already folded into w; bias includes residual BN bias.
            y = _apply_activation(y + b_ref[...], act)

            if li == n_layers - 1:
                for b in range(B):                        # lane-dense stores
                    out_ref[b] = y[b * L:(b + 1) * L, :].astype(out_ref.dtype)
            else:
                cur = y                                   # stays in VMEM

    return kernel


# ----------------------------------------------------------------------------
# Parameter init: xavier_uniform conv weights (true fan dims), fresh-init
# eval BatchNorm folded into the weights, residual 1x1 conv fused onto the
# last conv's contraction rows, channel-padded to 128 lanes, cast to bf16.
# ----------------------------------------------------------------------------
def _xavier_uniform(key, K, cin, cout):
    fan_in, fan_out = cin * K, cout * K
    limit = (6.0 / (fan_in + fan_out)) ** 0.5
    return jax.random.uniform(key, (K, cin, cout), jnp.float32, -limit, limit)


def _fresh_bn_scale_bias(cout_pad):
    gamma = jnp.ones((1, cout_pad), jnp.float32)
    beta = jnp.zeros((1, cout_pad), jnp.float32)
    mean = jnp.zeros((1, cout_pad), jnp.float32)
    var = jnp.ones((1, cout_pad), jnp.float32)
    scale = gamma * jax.lax.rsqrt(var + _BN_EPS)
    bias = beta - mean * scale
    return scale, bias


def init_jasper_params(key, cfg):
    feat_in = cfg["input"]["features"] * cfg["input"].get("frame_splicing", 1)
    blocks = []
    for lcfg in cfg["jasper"]:
        K, filt, repeat = lcfg["kernel"][0], lcfg["filters"], lcfg["repeat"]
        has_res = lcfg["residual"]
        cin = feat_in
        block_in = feat_in
        layers = []
        for r in range(repeat):
            key, wk = jax.random.split(key)
            w = _xavier_uniform(wk, K, cin, filt)                # (K, Cin, Cout)
            cin_p, cout_p = _round_up(cin, _LANE), _round_up(filt, _LANE)
            wp = jnp.zeros((K, cin_p, cout_p), jnp.float32)
            wp = wp.at[:, :cin, :filt].set(w)
            scale, bias = _fresh_bn_scale_bias(cout_p)
            w2d = (wp * scale).reshape(K * cin_p, cout_p)        # fold BN scale
            if has_res and r == repeat - 1:
                key, wk = jax.random.split(key)
                wr = _xavier_uniform(wk, 1, block_in, filt)[0]   # (Cres, Cout)
                cres_p = _round_up(block_in, _LANE)
                wrp = jnp.zeros((cres_p, cout_p), jnp.float32)
                wrp = wrp.at[:block_in, :filt].set(wr)
                scale_r, bias_r = _fresh_bn_scale_bias(cout_p)
                # fuse residual 1x1 conv + its BN onto the contraction rows
                w2d = jnp.concatenate([w2d, wrp * scale_r], axis=0)
                bias = bias + bias_r
            layers.append((w2d.astype(jnp.bfloat16), bias))
            cin = filt
        blocks.append({"layers": layers})
        feat_in = filt
    return blocks


# ----------------------------------------------------------------------------
# Encoder forward (glue around the single fused pallas_call)
# ----------------------------------------------------------------------------
def jasper_encoder_forward(params, cfg, audio_signal, length):
    """audio_signal: (B, features, L) PyTorch NCL layout; length: (B,) int."""
    act = cfg["encoder"]["activation"]
    use_mask = cfg["encoder"].get("convmask", False)
    feat_true = cfg["input"]["features"] * cfg["input"].get("frame_splicing", 1)
    feat_pad = _round_up(feat_true, _LANE)

    B, _, L = audio_signal.shape
    assert L % 8 == 0, "time length must be a multiple of 8 sublanes"

    # one-time boundary layout change: NCL -> channels-last + 128-lane pad
    x = jnp.transpose(audio_signal, (0, 2, 1))
    x = jnp.pad(x, ((0, 0), (0, 0), (0, feat_pad - feat_true)))

    # static per-conv plan + flat (weight, bias) operand list
    plan, flat_params = [], []
    cin = feat_true
    lens_f = length.astype(jnp.float32)
    for bp, lcfg in zip(params, cfg["jasper"]):
        K = lcfg["kernel"][0]
        stride = lcfg["stride"][0]
        dilation = lcfg["dilation"][0]
        assert stride == 1 and dilation == 1, "only stride=1, dilation=1 supported"
        assert K % 2 == 1, "'same' halo placement assumes odd kernel size"
        assert not lcfg.get("residual_dense", False), "residual_dense unsupported"
        pad = (K // 2) * dilation                       # get_same_padding
        repeat = lcfg["repeat"]
        has_res = lcfg["residual"]
        block_in = cin
        for r, (w2d, bias) in enumerate(bp["layers"]):
            fuse_res = has_res and (r == repeat - 1)
            plan.append(dict(
                K=K, pad=pad,
                cin_p=_round_up(cin, _LANE),
                cout_p=_round_up(lcfg["filters"], _LANE),
                res_cin_p=_round_up(block_in, _LANE) if fuse_res else 0,
                fuse_res=fuse_res,
                save_res=has_res and (r == 0),
            ))
            flat_params += [w2d, bias]
            cin = lcfg["filters"]
            # matches MaskedConv1d.get_seq_len (float division)
            lens_f = (lens_f + 2 * pad - dilation * (K - 1) - 1) / stride + 1

    cmax = max(p["cin_p"] for p in plan)
    dmax = max(p["K"] * p["cin_p"] + p["res_cin_p"] for p in plan)
    max_pad = max(p["pad"] for p in plan)
    cout_last = plan[-1]["cout_p"]

    kernel = _make_encoder_kernel(B=B, L=L, plan=plan, act=act,
                                  use_mask=use_mask, cmax=cmax)

    in_specs = [pl.BlockSpec((B, L, feat_pad), lambda i, lens: (0, 0, 0))]
    for p in plan:
        d = p["K"] * p["cin_p"] + p["res_cin_p"]
        in_specs.append(pl.BlockSpec((d, p["cout_p"]), lambda i, lens: (0, 0)))
        in_specs.append(pl.BlockSpec((1, p["cout_p"]), lambda i, lens: (0, 0)))

    out = pl.pallas_call(
        kernel,
        out_shape=jax.ShapeDtypeStruct((B, L, cout_last), jnp.float32),
        grid_spec=pltpu.PrefetchScalarGridSpec(
            num_scalar_prefetch=1,                     # lens -> SMEM
            grid=(1,),                                 # whole encoder in one step
            in_specs=in_specs,
            out_specs=pl.BlockSpec((B, L, cout_last), lambda i, lens: (0, 0, 0)),
            scratch_shapes=[
                pltpu.VMEM((B, L + 2 * max_pad, cmax), jnp.float32),  # halo'd staging
                pltpu.VMEM((B * L, dmax), jnp.bfloat16),              # im2col slab
            ],
        ),
        compiler_params=pltpu.CompilerParams(
            dimension_semantics=("arbitrary",),
            vmem_limit_bytes=32 * 1024 * 1024,
        ),
    )(length.astype(jnp.int32), x, *flat_params)

    # strip channel padding, back to PyTorch NCL layout
    c_true = cfg["jasper"][-1]["filters"]
    y = jnp.transpose(out[:, :, :c_true], (0, 2, 1))
    return [y], lens_f


# ----------------------------------------------------------------------------
# Main
# ----------------------------------------------------------------------------
if __name__ == "__main__":
    cfg = {
        "encoder": {"activation": "relu", "convmask": True},
        "input": {"features": 32, "frame_splicing": 1},
        "init_mode": "xavier_uniform",
        "jasper": [
            {"filters": 32, "repeat": 1, "kernel": [5], "stride": [1],
             "dilation": [1], "dropout": 0.0, "residual": False},
            {"filters": 48, "repeat": 2, "kernel": [7], "stride": [1],
             "dilation": [1], "dropout": 0.0, "residual": True},
            {"filters": 64, "repeat": 2, "kernel": [11], "stride": [1],
             "dilation": [1], "dropout": 0.0, "residual": True},
        ],
    }

    key = jax.random.PRNGKey(0)
    k_in, k_param = jax.random.split(key)

    B, F, L = 2, 32, 64
    audio = jax.random.normal(k_in, (B, F, L), jnp.float32)
    length = jnp.array([64, 40], jnp.int32)

    params = init_jasper_params(k_param, cfg)

    fwd = jax.jit(lambda p, a, l: jasper_encoder_forward(p, cfg, a, l))
    s_input, lens_out = fwd(params, audio, length)
    jax.block_until_ready(s_input[0])
    jax.block_until_ready(lens_out)

    assert s_input[0].shape == (B, cfg["jasper"][-1]["filters"], L)
    print("KERNEL_OK")
</pallas_src>

<mosaic_0001>
module attributes {stable_mosaic.version = 11 : i64} {
  func.func @kernel(%arg0: i32, %arg1: memref<2xi32, #tpu.memory_space<smem>>, %arg2: memref<2x64x128xf32, #tpu.memory_space<vmem>>, %arg3: memref<640x128xbf16, #tpu.memory_space<vmem>>, %arg4: memref<1x128xf32, #tpu.memory_space<vmem>>, %arg5: memref<896x128xbf16, #tpu.memory_space<vmem>>, %arg6: memref<1x128xf32, #tpu.memory_space<vmem>>, %arg7: memref<1024x128xbf16, #tpu.memory_space<vmem>>, %arg8: memref<1x128xf32, #tpu.memory_space<vmem>>, %arg9: memref<1408x128xbf16, #tpu.memory_space<vmem>>, %arg10: memref<1x128xf32, #tpu.memory_space<vmem>>, %arg11: memref<1536x128xbf16, #tpu.memory_space<vmem>>, %arg12: memref<1x128xf32, #tpu.memory_space<vmem>>, %arg13: memref<2x64x128xf32, #tpu.memory_space<vmem>>, %arg14: memref<2x74x128xf32, #tpu.memory_space<vmem>>, %arg15: memref<128x1536xbf16, #tpu.memory_space<vmem>>) attributes {dimension_semantics = [#tpu.dimension_semantics<arbitrary>], iteration_bounds = array<i64: 1>, scalar_prefetch = 1 : i64, scratch_operands = 2 : i64, tpu.core_type = #tpu.core_type<tc>, window_params = [{pipeline_mode = #tpu.pipeline_mode<synchronous>, transform_indices = @transform_0, window_bounds = array<i64: 2, 64, 128>}, {pipeline_mode = #tpu.pipeline_mode<synchronous>, transform_indices = @transform_1, window_bounds = array<i64: 640, 128>}, {pipeline_mode = #tpu.pipeline_mode<synchronous>, transform_indices = @transform_2, window_bounds = array<i64: 1, 128>}, {pipeline_mode = #tpu.pipeline_mode<synchronous>, transform_indices = @transform_3, window_bounds = array<i64: 896, 128>}, {pipeline_mode = #tpu.pipeline_mode<synchronous>, transform_indices = @transform_4, window_bounds = array<i64: 1, 128>}, {pipeline_mode = #tpu.pipeline_mode<synchronous>, transform_indices = @transform_5, window_bounds = array<i64: 1024, 128>}, {pipeline_mode = #tpu.pipeline_mode<synchronous>, transform_indices = @transform_6, window_bounds = array<i64: 1, 128>}, {pipeline_mode = #tpu.pipeline_mode<synchronous>, transform_indices = @transform_7, window_bounds = array<i64: 1408, 128>}, {pipeline_mode = #tpu.pipeline_mode<synchronous>, transform_indices = @transform_8, window_bounds = array<i64: 1, 128>}, {pipeline_mode = #tpu.pipeline_mode<synchronous>, transform_indices = @transform_9, window_bounds = array<i64: 1536, 128>}, {pipeline_mode = #tpu.pipeline_mode<synchronous>, transform_indices = @transform_10, window_bounds = array<i64: 1, 128>}, {pipeline_mode = #tpu.pipeline_mode<synchronous>, transform_indices = @transform_11, window_bounds = array<i64: 2, 64, 128>}]} {
    %0 = tpu.iota {dimensions = array<i32: 0>} : vector<64x128xi32>
    %c0 = arith.constant 0 : index
    %1 = memref.load %arg1[%c0] : memref<2xi32, #tpu.memory_space<smem>>
    %2 = vector.broadcast %1 : i32 to vector<64x128xi32>
    %3 = arith.cmpi slt, %0, %2 : vector<64x128xi32>
    %c1 = arith.constant 1 : index
    %4 = memref.load %arg1[%c1] : memref<2xi32, #tpu.memory_space<smem>>
    %5 = vector.broadcast %4 : i32 to vector<64x128xi32>
    %6 = arith.cmpi slt, %0, %5 : vector<64x128xi32>
    %cst = arith.constant 0.000000e+00 : f32
    %7 = vector.broadcast %cst : f32 to vector<2x128xf32>
    %c0_0 = arith.constant 0 : index
    %c0_1 = arith.constant 0 : index
    %c0_2 = arith.constant 0 : index
    %8 = vector.load %arg2[%c0_0, %c0_1, %c0_2] : memref<2x64x128xf32, #tpu.memory_space<vmem>>, vector<1x64x128xf32>
    %9 = vector.shape_cast %8 : vector<1x64x128xf32> to vector<64x128xf32>
    %cst_3 = arith.constant 0.000000e+00 : f32
    %10 = vector.broadcast %cst_3 : f32 to vector<64x128xf32>
    %11 = arith.select %3, %9, %10 : vector<64x128xi1>, vector<64x128xf32>
    %c0_4 = arith.constant 0 : index
    %c0_5 = arith.constant 0 : index
    %c0_6 = arith.constant 0 : index
    %12 = vector.load %arg14[%c0_4, %c0_5, %c0_6] : memref<2x74x128xf32, #tpu.memory_space<vmem>>, vector<1x2x128xf32>
    %13 = vector.shape_cast %12 : vector<1x2x128xf32> to vector<2x128xf32>
    %14 = vector.shape_cast %7 : vector<2x128xf32> to vector<1x2x128xf32>
    tpu.vector_store %arg14[%c0_4, %c0_5, %c0_6], %14 {strides = array<i32>} : memref<2x74x128xf32, #tpu.memory_space<vmem>>, vector<1x2x128xf32>,
    %c0_7 = arith.constant 0 : index
    %c66 = arith.constant 66 : index
    %c0_8 = arith.constant 0 : index
    %15 = vector.load %arg14[%c0_7, %c66, %c0_8] : memref<2x74x128xf32, #tpu.memory_space<vmem>>, vector<1x2x128xf32>
    %16 = vector.shape_cast %15 : vector<1x2x128xf32> to vector<2x128xf32>
    %17 = vector.shape_cast %7 : vector<2x128xf32> to vector<1x2x128xf32>
    tpu.vector_store %arg14[%c0_7, %c66, %c0_8], %17 {strides = array<i32>} : memref<2x74x128xf32, #tpu.memory_space<vmem>>, vector<1x2x128xf32>,
    %c0_9 = arith.constant 0 : index
    %c2 = arith.constant 2 : index
    %c0_10 = arith.constant 0 : index
    %18 = vector.load %arg14[%c0_9, %c2, %c0_10] : memref<2x74x128xf32, #tpu.memory_space<vmem>>, vector<1x64x128xf32>
    %19 = vector.shape_cast %18 : vector<1x64x128xf32> to vector<64x128xf32>
    %20 = vector.shape_cast %11 : vector<64x128xf32> to vector<1x64x128xf32>
    tpu.vector_store %arg14[%c0_9, %c2, %c0_10], %20 {strides = array<i32>} : memref<2x74x128xf32, #tpu.memory_space<vmem>>, vector<1x64x128xf32>,
    %c1_11 = arith.constant 1 : index
    %c0_12 = arith.constant 0 : index
    %c0_13 = arith.constant 0 : index
    %21 = vector.load %arg2[%c1_11, %c0_12, %c0_13] : memref<2x64x128xf32, #tpu.memory_space<vmem>>, vector<1x64x128xf32>
    %22 = vector.shape_cast %21 : vector<1x64x128xf32> to vector<64x128xf32>
    %cst_14 = arith.constant 0.000000e+00 : f32
    %23 = vector.broadcast %cst_14 : f32 to vector<64x128xf32>
    %24 = arith.select %6, %22, %23 : vector<64x128xi1>, vector<64x128xf32>
    %c1_15 = arith.constant 1 : index
    %c0_16 = arith.constant 0 : index
    %c0_17 = arith.constant 0 : index
    %25 = vector.load %arg14[%c1_15, %c0_16, %c0_17] : memref<2x74x128xf32, #tpu.memory_space<vmem>>, vector<1x2x128xf32>
    %26 = vector.shape_cast %25 : vector<1x2x128xf32> to vector<2x128xf32>
    %27 = vector.shape_cast %7 : vector<2x128xf32> to vector<1x2x128xf32>
    tpu.vector_store %arg14[%c1_15, %c0_16, %c0_17], %27 {strides = array<i32>} : memref<2x74x128xf32, #tpu.memory_space<vmem>>, vector<1x2x128xf32>,
    %c1_18 = arith.constant 1 : index
    %c66_19 = arith.constant 66 : index
    %c0_20 = arith.constant 0 : index
    %28 = vector.load %arg14[%c1_18, %c66_19, %c0_20] : memref<2x74x128xf32, #tpu.memory_space<vmem>>, vector<1x2x128xf32>
    %29 = vector.shape_cast %28 : vector<1x2x128xf32> to vector<2x128xf32>
    %30 = vector.shape_cast %7 : vector<2x128xf32> to vector<1x2x128xf32>
    tpu.vector_store %arg14[%c1_18, %c66_19, %c0_20], %30 {strides = array<i32>} : memref<2x74x128xf32, #tpu.memory_space<vmem>>, vector<1x2x128xf32>,
    %c1_21 = arith.constant 1 : index
    %c2_22 = arith.constant 2 : index
    %c0_23 = arith.constant 0 : index
    %31 = vector.load %arg14[%c1_21, %c2_22, %c0_23] : memref<2x74x128xf32, #tpu.memory_space<vmem>>, vector<1x64x128xf32>
    %32 = vector.shape_cast %31 : vector<1x64x128xf32> to vector<64x128xf32>
    %33 = vector.shape_cast %24 : vector<64x128xf32> to vector<1x64x128xf32>
    tpu.vector_store %arg14[%c1_21, %c2_22, %c0_23], %33 {strides = array<i32>} : memref<2x74x128xf32, #tpu.memory_space<vmem>>, vector<1x64x128xf32>,
    %c0_24 = arith.constant 0 : index
    %c0_25 = arith.constant 0 : index
    %c0_26 = arith.constant 0 : index
    %34 = vector.load %arg14[%c0_24, %c0_25, %c0_26] : memref<2x74x128xf32, #tpu.memory_space<vmem>>, vector<1x64x128xf32>
    %35 = vector.shape_cast %34 : vector<1x64x128xf32> to vector<64x128xf32>
    %36 = arith.truncf %35 : vector<64x128xf32> to vector<64x128xbf16>
    %c0_27 = arith.constant 0 : index
    %c0_28 = arith.constant 0 : index
    %37 = vector.load %arg15[%c0_27, %c0_28] : memref<128x1536xbf16, #tpu.memory_space<vmem>>, vector<64x128xbf16>
    tpu.vector_store %arg15[%c0_27, %c0_28], %36 {strides = array<i32>} : memref<128x1536xbf16, #tpu.memory_space<vmem>>, vector<64x128xbf16>,
    %c0_29 = arith.constant 0 : index
    %c1_30 = arith.constant 1 : index
    %c0_31 = arith.constant 0 : index
    %38 = vector.load %arg14[%c0_29, %c1_30, %c0_31] : memref<2x74x128xf32, #tpu.memory_space<vmem>>, vector<1x64x128xf32>
    %39 = vector.shape_cast %38 : vector<1x64x128xf32> to vector<64x128xf32>
    %40 = arith.truncf %39 : vector<64x128xf32> to vector<64x128xbf16>
    %c0_32 = arith.constant 0 : index
    %c128 = arith.constant 128 : index
    %41 = vector.load %arg15[%c0_32, %c128] : memref<128x1536xbf16, #tpu.memory_space<vmem>>, vector<64x128xbf16>
    tpu.vector_store %arg15[%c0_32, %c128], %40 {strides = array<i32>} : memref<128x1536xbf16, #tpu.memory_space<vmem>>, vector<64x128xbf16>,
    %c0_33 = arith.constant 0 : index
    %c2_34 = arith.constant 2 : index
    %c0_35 = arith.constant 0 : index
    %42 = vector.load %arg14[%c0_33, %c2_34, %c0_35] : memref<2x74x128xf32, #tpu.memory_space<vmem>>, vector<1x64x128xf32>
    %43 = vector.shape_cast %42 : vector<1x64x128xf32> to vector<64x128xf32>
    %44 = arith.truncf %43 : vector<64x128xf32> to vector<64x128xbf16>
    %c0_36 = arith.constant 0 : index
    %c256 = arith.constant 256 : index
    %45 = vector.load %arg15[%c0_36, %c256] : memref<128x1536xbf16, #tpu.memory_space<vmem>>, vector<64x128xbf16>
    tpu.vector_store %arg15[%c0_36, %c256], %44 {strides = array<i32>} : memref<128x1536xbf16, #tpu.memory_space<vmem>>, vector<64x128xbf16>,
    %c0_37 = arith.constant 0 : index
    %c3 = arith.constant 3 : index
    %c0_38 = arith.constant 0 : index
    %46 = vector.load %arg14[%c0_37, %c3, %c0_38] : memref<2x74x128xf32, #tpu.memory_space<vmem>>, vector<1x64x128xf32>
    %47 = vector.shape_cast %46 : vector<1x64x128xf32> to vector<64x128xf32>
    %48 = arith.truncf %47 : vector<64x128xf32> to vector<64x128xbf16>
    %c0_39 = arith.constant 0 : index
    %c384 = arith.constant 384 : index
    %49 = vector.load %arg15[%c0_39, %c384] : memref<128x1536xbf16, #tpu.memory_space<vmem>>, vector<64x128xbf16>
    tpu.vector_store %arg15[%c0_39, %c384], %48 {strides = array<i32>} : memref<128x1536xbf16, #tpu.memory_space<vmem>>, vector<64x128xbf16>,
    %c0_40 = arith.constant 0 : index
    %c4 = arith.constant 4 : index
    %c0_41 = arith.constant 0 : index
    %50 = vector.load %arg14[%c0_40, %c4, %c0_41] : memref<2x74x128xf32, #tpu.memory_space<vmem>>, vector<1x64x128xf32>
    %51 = vector.shape_cast %50 : vector<1x64x128xf32> to vector<64x128xf32>
    %52 = arith.truncf %51 : vector<64x128xf32> to vector<64x128xbf16>
    %c0_42 = arith.constant 0 : index
    %c512 = arith.constant 512 : index
    %53 = vector.load %arg15[%c0_42, %c512] : memref<128x1536xbf16, #tpu.memory_space<vmem>>, vector<64x128xbf16>
    tpu.vector_store %arg15[%c0_42, %c512], %52 {strides = array<i32>} : memref<128x1536xbf16, #tpu.memory_space<vmem>>, vector<64x128xbf16>,
    %c1_43 = arith.constant 1 : index
    %c0_44 = arith.constant 0 : index
    %c0_45 = arith.constant 0 : index
    %54 = vector.load %arg14[%c1_43, %c0_44, %c0_45] : memref<2x74x128xf32, #tpu.memory_space<vmem>>, vector<1x64x128xf32>
    %55 = vector.shape_cast %54 : vector<1x64x128xf32> to vector<64x128xf32>
    %56 = arith.truncf %55 : vector<64x128xf32> to vector<64x128xbf16>
    %c64 = arith.constant 64 : index
    %c0_46 = arith.constant 0 : index
    %57 = vector.load %arg15[%c64, %c0_46] : memref<128x1536xbf16, #tpu.memory_space<vmem>>, vector<64x128xbf16>
    tpu.vector_store %arg15[%c64, %c0_46], %56 {strides = array<i32>} : memref<128x1536xbf16, #tpu.memory_space<vmem>>, vector<64x128xbf16>,
    %c1_47 = arith.constant 1 : index
    %c1_48 = arith.constant 1 : index
    %c0_49 = arith.constant 0 : index
    %58 = vector.load %arg14[%c1_47, %c1_48, %c0_49] : memref<2x74x128xf32, #tpu.memory_space<vmem>>, vector<1x64x128xf32>
    %59 = vector.shape_cast %58 : vector<1x64x128xf32> to vector<64x128xf32>
    %60 = arith.truncf %59 : vector<64x128xf32> to vector<64x128xbf16>
    %c64_50 = arith.constant 64 : index
    %c128_51 = arith.constant 128 : index
    %61 = vector.load %arg15[%c64_50, %c128_51] : memref<128x1536xbf16, #tpu.memory_space<vmem>>, vector<64x128xbf16>
    tpu.vector_store %arg15[%c64_50, %c128_51], %60 {strides = array<i32>} : memref<128x1536xbf16, #tpu.memory_space<vmem>>, vector<64x128xbf16>,
    %c1_52 = arith.constant 1 : index
    %c2_53 = arith.constant 2 : index
    %c0_54 = arith.constant 0 : index
    %62 = vector.load %arg14[%c1_52, %c2_53, %c0_54] : memref<2x74x128xf32, #tpu.memory_space<vmem>>, vector<1x64x128xf32>
    %63 = vector.shape_cast %62 : vector<1x64x128xf32> to vector<64x128xf32>
    %64 = arith.truncf %63 : vector<64x128xf32> to vector<64x128xbf16>
    %c64_55 = arith.constant 64 : index
    %c256_56 = arith.constant 256 : index
    %65 = vector.load %arg15[%c64_55, %c256_56] : memref<128x1536xbf16, #tpu.memory_space<vmem>>, vector<64x128xbf16>
    tpu.vector_store %arg15[%c64_55, %c256_56], %64 {strides = array<i32>} : memref<128x1536xbf16, #tpu.memory_space<vmem>>, vector<64x128xbf16>,
    %c1_57 = arith.constant 1 : index
    %c3_58 = arith.constant 3 : index
    %c0_59 = arith.constant 0 : index
    %66 = vector.load %arg14[%c1_57, %c3_58, %c0_59] : memref<2x74x128xf32, #tpu.memory_space<vmem>>, vector<1x64x128xf32>
    %67 = vector.shape_cast %66 : vector<1x64x128xf32> to vector<64x128xf32>
    %68 = arith.truncf %67 : vector<64x128xf32> to vector<64x128xbf16>
    %c64_60 = arith.constant 64 : index
    %c384_61 = arith.constant 384 : index
    %69 = vector.load %arg15[%c64_60, %c384_61] : memref<128x1536xbf16, #tpu.memory_space<vmem>>, vector<64x128xbf16>
    tpu.vector_store %arg15[%c64_60, %c384_61], %68 {strides = array<i32>} : memref<128x1536xbf16, #tpu.memory_space<vmem>>, vector<64x128xbf16>,
    %c1_62 = arith.constant 1 : index
    %c4_63 = arith.constant 4 : index
    %c0_64 = arith.constant 0 : index
    %70 = vector.load %arg14[%c1_62, %c4_63, %c0_64] : memref<2x74x128xf32, #tpu.memory_space<vmem>>, vector<1x64x128xf32>
    %71 = vector.shape_cast %70 : vector<1x64x128xf32> to vector<64x128xf32>
    %72 = arith.truncf %71 : vector<64x128xf32> to vector<64x128xbf16>
    %c64_65 = arith.constant 64 : index
    %c512_66 = arith.constant 512 : index
    %73 = vector.load %arg15[%c64_65, %c512_66] : memref<128x1536xbf16, #tpu.memory_space<vmem>>, vector<64x128xbf16>
    tpu.vector_store %arg15[%c64_65, %c512_66], %72 {strides = array<i32>} : memref<128x1536xbf16, #tpu.memory_space<vmem>>, vector<64x128xbf16>,
    %c0_67 = arith.constant 0 : index
    %c0_68 = arith.constant 0 : index
    %74 = vector.load %arg15[%c0_67, %c0_68] : memref<128x1536xbf16, #tpu.memory_space<vmem>>, vector<128x640xbf16>
    %c0_69 = arith.constant 0 : index
    %c0_70 = arith.constant 0 : index
    %75 = vector.load %arg3[%c0_69, %c0_70] : memref<640x128xbf16, #tpu.memory_space<vmem>>, vector<640x128xbf16>
    %cst_71 = arith.constant dense<0.000000e+00> : vector<128x128xf32>
    %76 = tpu.matmul %74, %75, %cst_71 {dimension_numbers = #tpu.dot_dimension_numbers<[1], [0], [0], [1], [0, 0, 1, 1], [], []>} : vector<128x640xbf16>, vector<640x128xbf16>, vector<128x128xf32> -> vector<128x128xf32>
    %c0_72 = arith.constant 0 : index
    %c0_73 = arith.constant 0 : index
    %77 = vector.load %arg4[%c0_72, %c0_73] : memref<1x128xf32, #tpu.memory_space<vmem>>, vector<1x128xf32>
    %78 = vector.broadcast %77 : vector<1x128xf32> to vector<128x128xf32>
    %79 = arith.addf %76, %78 : vector<128x128xf32>
    %cst_74 = arith.constant 0.000000e+00 : f32
    %80 = vector.broadcast %cst_74 : f32 to vector<128x128xf32>
    %81 = arith.maximumf %79, %80 : vector<128x128xf32>
    %cst_75 = arith.constant 0.000000e+00 : f32
    %82 = vector.broadcast %cst_75 : f32 to vector<3x128xf32>
    %83 = vector.extract_strided_slice %81 {offsets = [0, 0], sizes = [64, 128], strides = [1, 1]} : vector<128x128xf32> to vector<64x128xf32>
    %cst_76 = arith.constant 0.000000e+00 : f32
    %84 = vector.broadcast %cst_76 : f32 to vector<64x128xf32>
    %85 = arith.select %3, %83, %84 : vector<64x128xi1>, vector<64x128xf32>
    %c0_77 = arith.constant 0 : index
    %c0_78 = arith.constant 0 : index
    %c0_79 = arith.constant 0 : index
    %86 = vector.load %arg14[%c0_77, %c0_78, %c0_79] : memref<2x74x128xf32, #tpu.memory_space<vmem>>, vector<1x3x128xf32>
    %87 = vector.shape_cast %86 : vector<1x3x128xf32> to vector<3x128xf32>
    %88 = vector.shape_cast %82 : vector<3x128xf32> to vector<1x3x128xf32>
    tpu.vector_store %arg14[%c0_77, %c0_78, %c0_79], %88 {strides = array<i32>} : memref<2x74x128xf32, #tpu.memory_space<vmem>>, vector<1x3x128xf32>,
    %c0_80 = arith.constant 0 : index
    %c67 = arith.constant 67 : index
    %c0_81 = arith.constant 0 : index
    %89 = vector.load %arg14[%c0_80, %c67, %c0_81] : memref<2x74x128xf32, #tpu.memory_space<vmem>>, vector<1x3x128xf32>
    %90 = vector.shape_cast %89 : vector<1x3x128xf32> to vector<3x128xf32>
    %91 = vector.shape_cast %82 : vector<3x128xf32> to vector<1x3x128xf32>
    tpu.vector_store %arg14[%c0_80, %c67, %c0_81], %91 {strides = array<i32>} : memref<2x74x128xf32, #tpu.memory_space<vmem>>, vector<1x3x128xf32>,
    %c0_82 = arith.constant 0 : index
    %c3_83 = arith.constant 3 : index
    %c0_84 = arith.constant 0 : index
    %92 = vector.load %arg14[%c0_82, %c3_83, %c0_84] : memref<2x74x128xf32, #tpu.memory_space<vmem>>, vector<1x64x128xf32>
    %93 = vector.shape_cast %92 : vector<1x64x128xf32> to vector<64x128xf32>
    %94 = vector.shape_cast %85 : vector<64x128xf32> to vector<1x64x128xf32>
    tpu.vector_store %arg14[%c0_82, %c3_83, %c0_84], %94 {strides = array<i32>} : memref<2x74x128xf32, #tpu.memory_space<vmem>>, vector<1x64x128xf32>,
    %95 = vector.extract_strided_slice %81 {offsets = [64, 0], sizes = [64, 128], strides = [1, 1]} : vector<128x128xf32> to vector<64x128xf32>
    %cst_85 = arith.constant 0.000000e+00 : f32
    %96 = vector.broadcast %cst_85 : f32 to vector<64x128xf32>
    %97 = arith.select %6, %95, %96 : vector<64x128xi1>, vector<64x128xf32>
    %c1_86 = arith.constant 1 : index
    %c0_87 = arith.constant 0 : index
    %c0_88 = arith.constant 0 : index
    %98 = vector.load %arg14[%c1_86, %c0_87, %c0_88] : memref<2x74x128xf32, #tpu.memory_space<vmem>>, vector<1x3x128xf32>
    %99 = vector.shape_cast %98 : vector<1x3x128xf32> to vector<3x128xf32>
    %100 = vector.shape_cast %82 : vector<3x128xf32> to vector<1x3x128xf32>
    tpu.vector_store %arg14[%c1_86, %c0_87, %c0_88], %100 {strides = array<i32>} : memref<2x74x128xf32, #tpu.memory_space<vmem>>, vector<1x3x128xf32>,
    %c1_89 = arith.constant 1 : index
    %c67_90 = arith.constant 67 : index
    %c0_91 = arith.constant 0 : index
    %101 = vector.load %arg14[%c1_89, %c67_90, %c0_91] : memref<2x74x128xf32, #tpu.memory_space<vmem>>, vector<1x3x128xf32>
    %102 = vector.shape_cast %101 : vector<1x3x128xf32> to vector<3x128xf32>
    %103 = vector.shape_cast %82 : vector<3x128xf32> to vector<1x3x128xf32>
    tpu.vector_store %arg14[%c1_89, %c67_90, %c0_91], %103 {strides = array<i32>} : memref<2x74x128xf32, #tpu.memory_space<vmem>>, vector<1x3x128xf32>,
    %c1_92 = arith.constant 1 : index
    %c3_93 = arith.constant 3 : index
    %c0_94 = arith.constant 0 : index
    %104 = vector.load %arg14[%c1_92, %c3_93, %c0_94] : memref<2x74x128xf32, #tpu.memory_space<vmem>>, vector<1x64x128xf32>
    %105 = vector.shape_cast %104 : vector<1x64x128xf32> to vector<64x128xf32>
    %106 = vector.shape_cast %97 : vector<64x128xf32> to vector<1x64x128xf32>
    tpu.vector_store %arg14[%c1_92, %c3_93, %c0_94], %106 {strides = array<i32>} : memref<2x74x128xf32, #tpu.memory_space<vmem>>, vector<1x64x128xf32>,
    %c0_95 = arith.constant 0 : index
    %c0_96 = arith.constant 0 : index
    %c0_97 = arith.constant 0 : index
    %107 = vector.load %arg14[%c0_95, %c0_96, %c0_97] : memref<2x74x128xf32, #tpu.memory_space<vmem>>, vector<1x64x128xf32>
    %108 = vector.shape_cast %107 : vector<1x64x128xf32> to vector<64x128xf32>
    %109 = arith.truncf %108 : vector<64x128xf32> to vector<64x128xbf16>
    %c0_98 = arith.constant 0 : index
    %c0_99 = arith.constant 0 : index
    %110 = vector.load %arg15[%c0_98, %c0_99] : memref<128x1536xbf16, #tpu.memory_space<vmem>>, vector<64x128xbf16>
    tpu.vector_store %arg15[%c0_98, %c0_99], %109 {strides = array<i32>} : memref<128x1536xbf16, #tpu.memory_space<vmem>>, vector<64x128xbf16>,
    %c0_100 = arith.constant 0 : index
    %c1_101 = arith.constant 1 : index
    %c0_102 = arith.constant 0 : index
    %111 = vector.load %arg14[%c0_100, %c1_101, %c0_102] : memref<2x74x128xf32, #tpu.memory_space<vmem>>, vector<1x64x128xf32>
    %112 = vector.shape_cast %111 : vector<1x64x128xf32> to vector<64x128xf32>
    %113 = arith.truncf %112 : vector<64x128xf32> to vector<64x128xbf16>
    %c0_103 = arith.constant 0 : index
    %c128_104 = arith.constant 128 : index
    %114 = vector.load %arg15[%c0_103, %c128_104] : memref<128x1536xbf16, #tpu.memory_space<vmem>>, vector<64x128xbf16>
    tpu.vector_store %arg15[%c0_103, %c128_104], %113 {strides = array<i32>} : memref<128x1536xbf16, #tpu.memory_space<vmem>>, vector<64x128xbf16>,
    %c0_105 = arith.constant 0 : index
    %c2_106 = arith.constant 2 : index
    %c0_107 = arith.constant 0 : index
    %115 = vector.load %arg14[%c0_105, %c2_106, %c0_107] : memref<2x74x128xf32, #tpu.memory_space<vmem>>, vector<1x64x128xf32>
    %116 = vector.shape_cast %115 : vector<1x64x128xf32> to vector<64x128xf32>
    %117 = arith.truncf %116 : vector<64x128xf32> to vector<64x128xbf16>
    %c0_108 = arith.constant 0 : index
    %c256_109 = arith.constant 256 : index
    %118 = vector.load %arg15[%c0_108, %c256_109] : memref<128x1536xbf16, #tpu.memory_space<vmem>>, vector<64x128xbf16>
    tpu.vector_store %arg15[%c0_108, %c256_109], %117 {strides = array<i32>} : memref<128x1536xbf16, #tpu.memory_space<vmem>>, vector<64x128xbf16>,
    %c0_110 = arith.constant 0 : index
    %c3_111 = arith.constant 3 : index
    %c0_112 = arith.constant 0 : index
    %119 = vector.load %arg14[%c0_110, %c3_111, %c0_112] : memref<2x74x128xf32, #tpu.memory_space<vmem>>, vector<1x64x128xf32>
    %120 = vector.shape_cast %119 : vector<1x64x128xf32> to vector<64x128xf32>
    %121 = arith.truncf %120 : vector<64x128xf32> to vector<64x128xbf16>
    %c0_113 = arith.constant 0 : index
    %c384_114 = arith.constant 384 : index
    %122 = vector.load %arg15[%c0_113, %c384_114] : memref<128x1536xbf16, #tpu.memory_space<vmem>>, vector<64x128xbf16>
    tpu.vector_store %arg15[%c0_113, %c384_114], %121 {strides = array<i32>} : memref<128x1536xbf16, #tpu.memory_space<vmem>>, vector<64x128xbf16>,
    %c0_115 = arith.constant 0 : index
    %c4_116 = arith.constant 4 : index
    %c0_117 = arith.constant 0 : index
    %123 = vector.load %arg14[%c0_115, %c4_116, %c0_117] : memref<2x74x128xf32, #tpu.memory_space<vmem>>, vector<1x64x128xf32>
    %124 = vector.shape_cast %123 : vector<1x64x128xf32> to vector<64x128xf32>
    %125 = arith.truncf %124 : vector<64x128xf32> to vector<64x128xbf16>
    %c0_118 = arith.constant 0 : index
    %c512_119 = arith.constant 512 : index
    %126 = vector.load %arg15[%c0_118, %c512_119] : memref<128x1536xbf16, #tpu.memory_space<vmem>>, vector<64x128xbf16>
    tpu.vector_store %arg15[%c0_118, %c512_119], %125 {strides = array<i32>} : memref<128x1536xbf16, #tpu.memory_space<vmem>>, vector<64x128xbf16>,
    %c0_120 = arith.constant 0 : index
    %c5 = arith.constant 5 : index
    %c0_121 = arith.constant 0 : index
    %127 = vector.load %arg14[%c0_120, %c5, %c0_121] : memref<2x74x128xf32, #tpu.memory_space<vmem>>, vector<1x64x128xf32>
    %128 = vector.shape_cast %127 : vector<1x64x128xf32> to vector<64x128xf32>
    %129 = arith.truncf %128 : vector<64x128xf32> to vector<64x128xbf16>
    %c0_122 = arith.constant 0 : index
    %c640 = arith.constant 640 : index
    %130 = vector.load %arg15[%c0_122, %c640] : memref<128x1536xbf16, #tpu.memory_space<vmem>>, vector<64x128xbf16>
    tpu.vector_store %arg15[%c0_122, %c640], %129 {strides = array<i32>} : memref<128x1536xbf16, #tpu.memory_space<vmem>>, vector<64x128xbf16>,
    %c0_123 = arith.constant 0 : index
    %c6 = arith.constant 6 : index
    %c0_124 = arith.constant 0 : index
    %131 = vector.load %arg14[%c0_123, %c6, %c0_124] : memref<2x74x128xf32, #tpu.memory_space<vmem>>, vector<1x64x128xf32>
    %132 = vector.shape_cast %131 : vector<1x64x128xf32> to vector<64x128xf32>
    %133 = arith.truncf %132 : vector<64x128xf32> to vector<64x128xbf16>
    %c0_125 = arith.constant 0 : index
    %c768 = arith.constant 768 : index
    %134 = vector.load %arg15[%c0_125, %c768] : memref<128x1536xbf16, #tpu.memory_space<vmem>>, vector<64x128xbf16>
    tpu.vector_store %arg15[%c0_125, %c768], %133 {strides = array<i32>} : memref<128x1536xbf16, #tpu.memory_space<vmem>>, vector<64x128xbf16>,
    %c1_126 = arith.constant 1 : index
    %c0_127 = arith.constant 0 : index
    %c0_128 = arith.constant 0 : index
    %135 = vector.load %arg14[%c1_126, %c0_127, %c0_128] : memref<2x74x128xf32, #tpu.memory_space<vmem>>, vector<1x64x128xf32>
    %136 = vector.shape_cast %135 : vector<1x64x128xf32> to vector<64x128xf32>
    %137 = arith.truncf %136 : vector<64x128xf32> to vector<64x128xbf16>
    %c64_129 = arith.constant 64 : index
    %c0_130 = arith.constant 0 : index
    %138 = vector.load %arg15[%c64_129, %c0_130] : memref<128x1536xbf16, #tpu.memory_space<vmem>>, vector<64x128xbf16>
    tpu.vector_store %arg15[%c64_129, %c0_130], %137 {strides = array<i32>} : memref<128x1536xbf16, #tpu.memory_space<vmem>>, vector<64x128xbf16>,
    %c1_131 = arith.constant 1 : index
    %c1_132 = arith.constant 1 : index
    %c0_133 = arith.constant 0 : index
    %139 = vector.load %arg14[%c1_131, %c1_132, %c0_133] : memref<2x74x128xf32, #tpu.memory_space<vmem>>, vector<1x64x128xf32>
    %140 = vector.shape_cast %139 : vector<1x64x128xf32> to vector<64x128xf32>
    %141 = arith.truncf %140 : vector<64x128xf32> to vector<64x128xbf16>
    %c64_134 = arith.constant 64 : index
    %c128_135 = arith.constant 128 : index
    %142 = vector.load %arg15[%c64_134, %c128_135] : memref<128x1536xbf16, #tpu.memory_space<vmem>>, vector<64x128xbf16>
    tpu.vector_store %arg15[%c64_134, %c128_135], %141 {strides = array<i32>} : memref<128x1536xbf16, #tpu.memory_space<vmem>>, vector<64x128xbf16>,
    %c1_136 = arith.constant 1 : index
    %c2_137 = arith.constant 2 : index
    %c0_138 = arith.constant 0 : index
    %143 = vector.load %arg14[%c1_136, %c2_137, %c0_138] : memref<2x74x128xf32, #tpu.memory_space<vmem>>, vector<1x64x128xf32>
    %144 = vector.shape_cast %143 : vector<1x64x128xf32> to vector<64x128xf32>
    %145 = arith.truncf %144 : vector<64x128xf32> to vector<64x128xbf16>
    %c64_139 = arith.constant 64 : index
    %c256_140 = arith.constant 256 : index
    %146 = vector.load %arg15[%c64_139, %c256_140] : memref<128x1536xbf16, #tpu.memory_space<vmem>>, vector<64x128xbf16>
    tpu.vector_store %arg15[%c64_139, %c256_140], %145 {strides = array<i32>} : memref<128x1536xbf16, #tpu.memory_space<vmem>>, vector<64x128xbf16>,
    %c1_141 = arith.constant 1 : index
    %c3_142 = arith.constant 3 : index
    %c0_143 = arith.constant 0 : index
    %147 = vector.load %arg14[%c1_141, %c3_142, %c0_143] : memref<2x74x128xf32, #tpu.memory_space<vmem>>, vector<1x64x128xf32>
    %148 = vector.shape_cast %147 : vector<1x64x128xf32> to vector<64x128xf32>
    %149 = arith.truncf %148 : vector<64x128xf32> to vector<64x128xbf16>
    %c64_144 = arith.constant 64 : index
    %c384_145 = arith.constant 384 : index
    %150 = vector.load %arg15[%c64_144, %c384_145] : memref<128x1536xbf16, #tpu.memory_space<vmem>>, vector<64x128xbf16>
    tpu.vector_store %arg15[%c64_144, %c384_145], %149 {strides = array<i32>} : memref<128x1536xbf16, #tpu.memory_space<vmem>>, vector<64x128xbf16>,
    %c1_146 = arith.constant 1 : index
    %c4_147 = arith.constant 4 : index
    %c0_148 = arith.constant 0 : index
    %151 = vector.load %arg14[%c1_146, %c4_147, %c0_148] : memref<2x74x128xf32, #tpu.memory_space<vmem>>, vector<1x64x128xf32>
    %152 = vector.shape_cast %151 : vector<1x64x128xf32> to vector<64x128xf32>
    %153 = arith.truncf %152 : vector<64x128xf32> to vector<64x128xbf16>
    %c64_149 = arith.constant 64 : index
    %c512_150 = arith.constant 512 : index
    %154 = vector.load %arg15[%c64_149, %c512_150] : memref<128x1536xbf16, #tpu.memory_space<vmem>>, vector<64x128xbf16>
    tpu.vector_store %arg15[%c64_149, %c512_150], %153 {strides = array<i32>} : memref<128x1536xbf16, #tpu.memory_space<vmem>>, vector<64x128xbf16>,
    %c1_151 = arith.constant 1 : index
    %c5_152 = arith.constant 5 : index
    %c0_153 = arith.constant 0 : index
    %155 = vector.load %arg14[%c1_151, %c5_152, %c0_153] : memref<2x74x128xf32, #tpu.memory_space<vmem>>, vector<1x64x128xf32>
    %156 = vector.shape_cast %155 : vector<1x64x128xf32> to vector<64x128xf32>
    %157 = arith.truncf %156 : vector<64x128xf32> to vector<64x128xbf16>
    %c64_154 = arith.constant 64 : index
    %c640_155 = arith.constant 640 : index
    %158 = vector.load %arg15[%c64_154, %c640_155] : memref<128x1536xbf16, #tpu.memory_space<vmem>>, vector<64x128xbf16>
    tpu.vector_store %arg15[%c64_154, %c640_155], %157 {strides = array<i32>} : memref<128x1536xbf16, #tpu.memory_space<vmem>>, vector<64x128xbf16>,
    %c1_156 = arith.constant 1 : index
    %c6_157 = arith.constant 6 : index
    %c0_158 = arith.constant 0 : index
    %159 = vector.load %arg14[%c1_156, %c6_157, %c0_158] : memref<2x74x128xf32, #tpu.memory_space<vmem>>, vector<1x64x128xf32>
    %160 = vector.shape_cast %159 : vector<1x64x128xf32> to vector<64x128xf32>
    %161 = arith.truncf %160 : vector<64x128xf32> to vector<64x128xbf16>
    %c64_159 = arith.constant 64 : index
    %c768_160 = arith.constant 768 : index
    %162 = vector.load %arg15[%c64_159, %c768_160] : memref<128x1536xbf16, #tpu.memory_space<vmem>>, vector<64x128xbf16>
    tpu.vector_store %arg15[%c64_159, %c768_160], %161 {strides = array<i32>} : memref<128x1536xbf16, #tpu.memory_space<vmem>>, vector<64x128xbf16>,
    %c0_161 = arith.constant 0 : index
    %c0_162 = arith.constant 0 : index
    %163 = vector.load %arg15[%c0_161, %c0_162] : memref<128x1536xbf16, #tpu.memory_space<vmem>>, vector<128x896xbf16>
    %c0_163 = arith.constant 0 : index
    %c0_164 = arith.constant 0 : index
    %164 = vector.load %arg5[%c0_163, %c0_164] : memref<896x128xbf16, #tpu.memory_space<vmem>>, vector<896x128xbf16>
    %cst_165 = arith.constant dense<0.000000e+00> : vector<128x128xf32>
    %165 = tpu.matmul %163, %164, %cst_165 {dimension_numbers = #tpu.dot_dimension_numbers<[1], [0], [0], [1], [0, 0, 1, 1], [], []>} : vector<128x896xbf16>, vector<896x128xbf16>, vector<128x128xf32> -> vector<128x128xf32>
    %c0_166 = arith.constant 0 : index
    %c0_167 = arith.constant 0 : index
    %166 = vector.load %arg6[%c0_166, %c0_167] : memref<1x128xf32, #tpu.memory_space<vmem>>, vector<1x128xf32>
    %167 = vector.broadcast %166 : vector<1x128xf32> to vector<128x128xf32>
    %168 = arith.addf %165, %167 : vector<128x128xf32>
    %cst_168 = arith.constant 0.000000e+00 : f32
    %169 = vector.broadcast %cst_168 : f32 to vector<128x128xf32>
    %170 = arith.maximumf %168, %169 : vector<128x128xf32>
    %cst_169 = arith.constant 0.000000e+00 : f32
    %171 = vector.broadcast %cst_169 : f32 to vector<3x128xf32>
    %172 = vector.extract_strided_slice %170 {offsets = [0, 0], sizes = [64, 128], strides = [1, 1]} : vector<128x128xf32> to vector<64x128xf32>
    %cst_170 = arith.constant 0.000000e+00 : f32
    %173 = vector.broadcast %cst_170 : f32 to vector<64x128xf32>
    %174 = arith.select %3, %172, %173 : vector<64x128xi1>, vector<64x128xf32>
    %c0_171 = arith.constant 0 : index
    %c0_172 = arith.constant 0 : index
    %c0_173 = arith.constant 0 : index
    %175 = vector.load %arg14[%c0_171, %c0_172, %c0_173] : memref<2x74x128xf32, #tpu.memory_space<vmem>>, vector<1x3x128xf32>
    %176 = vector.shape_cast %175 : vector<1x3x128xf32> to vector<3x128xf32>
    %177 = vector.shape_cast %171 : vector<3x128xf32> to vector<1x3x128xf32>
    tpu.vector_store %arg14[%c0_171, %c0_172, %c0_173], %177 {strides = array<i32>} : memref<2x74x128xf32, #tpu.memory_space<vmem>>, vector<1x3x128xf32>,
    %c0_174 = arith.constant 0 : index
    %c67_175 = arith.constant 67 : index
    %c0_176 = arith.constant 0 : index
    %178 = vector.load %arg14[%c0_174, %c67_175, %c0_176] : memref<2x74x128xf32, #tpu.memory_space<vmem>>, vector<1x3x128xf32>
    %179 = vector.shape_cast %178 : vector<1x3x128xf32> to vector<3x128xf32>
    %180 = vector.shape_cast %171 : vector<3x128xf32> to vector<1x3x128xf32>
    tpu.vector_store %arg14[%c0_174, %c67_175, %c0_176], %180 {strides = array<i32>} : memref<2x74x128xf32, #tpu.memory_space<vmem>>, vector<1x3x128xf32>,
    %c0_177 = arith.constant 0 : index
    %c3_178 = arith.constant 3 : index
    %c0_179 = arith.constant 0 : index
    %181 = vector.load %arg14[%c0_177, %c3_178, %c0_179] : memref<2x74x128xf32, #tpu.memory_space<vmem>>, vector<1x64x128xf32>
    %182 = vector.shape_cast %181 : vector<1x64x128xf32> to vector<64x128xf32>
    %183 = vector.shape_cast %174 : vector<64x128xf32> to vector<1x64x128xf32>
    tpu.vector_store %arg14[%c0_177, %c3_178, %c0_179], %183 {strides = array<i32>} : memref<2x74x128xf32, #tpu.memory_space<vmem>>, vector<1x64x128xf32>,
    %184 = vector.extract_strided_slice %170 {offsets = [64, 0], sizes = [64, 128], strides = [1, 1]} : vector<128x128xf32> to vector<64x128xf32>
    %cst_180 = arith.constant 0.000000e+00 : f32
    %185 = vector.broadcast %cst_180 : f32 to vector<64x128xf32>
    %186 = arith.select %6, %184, %185 : vector<64x128xi1>, vector<64x128xf32>
    %c1_181 = arith.constant 1 : index
    %c0_182 = arith.constant 0 : index
    %c0_183 = arith.constant 0 : index
    %187 = vector.load %arg14[%c1_181, %c0_182, %c0_183] : memref<2x74x128xf32, #tpu.memory_space<vmem>>, vector<1x3x128xf32>
    %188 = vector.shape_cast %187 : vector<1x3x128xf32> to vector<3x128xf32>
    %189 = vector.shape_cast %171 : vector<3x128xf32> to vector<1x3x128xf32>
    tpu.vector_store %arg14[%c1_181, %c0_182, %c0_183], %189 {strides = array<i32>} : memref<2x74x128xf32, #tpu.memory_space<vmem>>, vector<1x3x128xf32>,
    %c1_184 = arith.constant 1 : index
    %c67_185 = arith.constant 67 : index
    %c0_186 = arith.constant 0 : index
    %190 = vector.load %arg14[%c1_184, %c67_185, %c0_186] : memref<2x74x128xf32, #tpu.memory_space<vmem>>, vector<1x3x128xf32>
    %191 = vector.shape_cast %190 : vector<1x3x128xf32> to vector<3x128xf32>
    %192 = vector.shape_cast %171 : vector<3x128xf32> to vector<1x3x128xf32>
    tpu.vector_store %arg14[%c1_184, %c67_185, %c0_186], %192 {strides = array<i32>} : memref<2x74x128xf32, #tpu.memory_space<vmem>>, vector<1x3x128xf32>,
    %c1_187 = arith.constant 1 : index
    %c3_188 = arith.constant 3 : index
    %c0_189 = arith.constant 0 : index
    %193 = vector.load %arg14[%c1_187, %c3_188, %c0_189] : memref<2x74x128xf32, #tpu.memory_space<vmem>>, vector<1x64x128xf32>
    %194 = vector.shape_cast %193 : vector<1x64x128xf32> to vector<64x128xf32>
    %195 = vector.shape_cast %186 : vector<64x128xf32> to vector<1x64x128xf32>
    tpu.vector_store %arg14[%c1_187, %c3_188, %c0_189], %195 {strides = array<i32>} : memref<2x74x128xf32, #tpu.memory_space<vmem>>, vector<1x64x128xf32>,
    %c0_190 = arith.constant 0 : index
    %c0_191 = arith.constant 0 : index
    %c0_192 = arith.constant 0 : index
    %196 = vector.load %arg14[%c0_190, %c0_191, %c0_192] : memref<2x74x128xf32, #tpu.memory_space<vmem>>, vector<1x64x128xf32>
    %197 = vector.shape_cast %196 : vector<1x64x128xf32> to vector<64x128xf32>
    %198 = arith.truncf %197 : vector<64x128xf32> to vector<64x128xbf16>
    %c0_193 = arith.constant 0 : index
    %c0_194 = arith.constant 0 : index
    %199 = vector.load %arg15[%c0_193, %c0_194] : memref<128x1536xbf16, #tpu.memory_space<vmem>>, vector<64x128xbf16>
    tpu.vector_store %arg15[%c0_193, %c0_194], %198 {strides = array<i32>} : memref<128x1536xbf16, #tpu.memory_space<vmem>>, vector<64x128xbf16>,
    %c0_195 = arith.constant 0 : index
    %c1_196 = arith.constant 1 : index
    %c0_197 = arith.constant 0 : index
    %200 = vector.load %arg14[%c0_195, %c1_196, %c0_197] : memref<2x74x128xf32, #tpu.memory_space<vmem>>, vector<1x64x128xf32>
    %201 = vector.shape_cast %200 : vector<1x64x128xf32> to vector<64x128xf32>
    %202 = arith.truncf %201 : vector<64x128xf32> to vector<64x128xbf16>
    %c0_198 = arith.constant 0 : index
    %c128_199 = arith.constant 128 : index
    %203 = vector.load %arg15[%c0_198, %c128_199] : memref<128x1536xbf16, #tpu.memory_space<vmem>>, vector<64x128xbf16>
    tpu.vector_store %arg15[%c0_198, %c128_199], %202 {strides = array<i32>} : memref<128x1536xbf16, #tpu.memory_space<vmem>>, vector<64x128xbf16>,
    %c0_200 = arith.constant 0 : index
    %c2_201 = arith.constant 2 : index
    %c0_202 = arith.constant 0 : index
    %204 = vector.load %arg14[%c0_200, %c2_201, %c0_202] : memref<2x74x128xf32, #tpu.memory_space<vmem>>, vector<1x64x128xf32>
    %205 = vector.shape_cast %204 : vector<1x64x128xf32> to vector<64x128xf32>
    %206 = arith.truncf %205 : vector<64x128xf32> to vector<64x128xbf16>
    %c0_203 = arith.constant 0 : index
    %c256_204 = arith.constant 256 : index
    %207 = vector.load %arg15[%c0_203, %c256_204] : memref<128x1536xbf16, #tpu.memory_space<vmem>>, vector<64x128xbf16>
    tpu.vector_store %arg15[%c0_203, %c256_204], %206 {strides = array<i32>} : memref<128x1536xbf16, #tpu.memory_space<vmem>>, vector<64x128xbf16>,
    %c0_205 = arith.constant 0 : index
    %c3_206 = arith.constant 3 : index
    %c0_207 = arith.constant 0 : index
    %208 = vector.load %arg14[%c0_205, %c3_206, %c0_207] : memref<2x74x128xf32, #tpu.memory_space<vmem>>, vector<1x64x128xf32>
    %209 = vector.shape_cast %208 : vector<1x64x128xf32> to vector<64x128xf32>
    %210 = arith.truncf %209 : vector<64x128xf32> to vector<64x128xbf16>
    %c0_208 = arith.constant 0 : index
    %c384_209 = arith.constant 384 : index
    %211 = vector.load %arg15[%c0_208, %c384_209] : memref<128x1536xbf16, #tpu.memory_space<vmem>>, vector<64x128xbf16>
    tpu.vector_store %arg15[%c0_208, %c384_209], %210 {strides = array<i32>} : memref<128x1536xbf16, #tpu.memory_space<vmem>>, vector<64x128xbf16>,
    %c0_210 = arith.constant 0 : index
    %c4_211 = arith.constant 4 : index
    %c0_212 = arith.constant 0 : index
    %212 = vector.load %arg14[%c0_210, %c4_211, %c0_212] : memref<2x74x128xf32, #tpu.memory_space<vmem>>, vector<1x64x128xf32>
    %213 = vector.shape_cast %212 : vector<1x64x128xf32> to vector<64x128xf32>
    %214 = arith.truncf %213 : vector<64x128xf32> to vector<64x128xbf16>
    %c0_213 = arith.constant 0 : index
    %c512_214 = arith.constant 512 : index
    %215 = vector.load %arg15[%c0_213, %c512_214] : memref<128x1536xbf16, #tpu.memory_space<vmem>>, vector<64x128xbf16>
    tpu.vector_store %arg15[%c0_213, %c512_214], %214 {strides = array<i32>} : memref<128x1536xbf16, #tpu.memory_space<vmem>>, vector<64x128xbf16>,
    %c0_215 = arith.constant 0 : index
    %c5_216 = arith.constant 5 : index
    %c0_217 = arith.constant 0 : index
    %216 = vector.load %arg14[%c0_215, %c5_216, %c0_217] : memref<2x74x128xf32, #tpu.memory_space<vmem>>, vector<1x64x128xf32>
    %217 = vector.shape_cast %216 : vector<1x64x128xf32> to vector<64x128xf32>
    %218 = arith.truncf %217 : vector<64x128xf32> to vector<64x128xbf16>
    %c0_218 = arith.constant 0 : index
    %c640_219 = arith.constant 640 : index
    %219 = vector.load %arg15[%c0_218, %c640_219] : memref<128x1536xbf16, #tpu.memory_space<vmem>>, vector<64x128xbf16>
    tpu.vector_store %arg15[%c0_218, %c640_219], %218 {strides = array<i32>} : memref<128x1536xbf16, #tpu.memory_space<vmem>>, vector<64x128xbf16>,
    %c0_220 = arith.constant 0 : index
    %c6_221 = arith.constant 6 : index
    %c0_222 = arith.constant 0 : index
    %220 = vector.load %arg14[%c0_220, %c6_221, %c0_222] : memref<2x74x128xf32, #tpu.memory_space<vmem>>, vector<1x64x128xf32>
    %221 = vector.shape_cast %220 : vector<1x64x128xf32> to vector<64x128xf32>
    %222 = arith.truncf %221 : vector<64x128xf32> to vector<64x128xbf16>
    %c0_223 = arith.constant 0 : index
    %c768_224 = arith.constant 768 : index
    %223 = vector.load %arg15[%c0_223, %c768_224] : memref<128x1536xbf16, #tpu.memory_space<vmem>>, vector<64x128xbf16>
    tpu.vector_store %arg15[%c0_223, %c768_224], %222 {strides = array<i32>} : memref<128x1536xbf16, #tpu.memory_space<vmem>>, vector<64x128xbf16>,
    %224 = arith.truncf %85 : vector<64x128xf32> to vector<64x128xbf16>
    %c0_225 = arith.constant 0 : index
    %c896 = arith.constant 896 : index
    %225 = vector.load %arg15[%c0_225, %c896] : memref<128x1536xbf16, #tpu.memory_space<vmem>>, vector<64x128xbf16>
    tpu.vector_store %arg15[%c0_225, %c896], %224 {strides = array<i32>} : memref<128x1536xbf16, #tpu.memory_space<vmem>>, vector<64x128xbf16>,
    %c1_226 = arith.constant 1 : index
    %c0_227 = arith.constant 0 : index
    %c0_228 = arith.constant 0 : index
    %226 = vector.load %arg14[%c1_226, %c0_227, %c0_228] : memref<2x74x128xf32, #tpu.memory_space<vmem>>, vector<1x64x128xf32>
    %227 = vector.shape_cast %226 : vector<1x64x128xf32> to vector<64x128xf32>
    %228 = arith.truncf %227 : vector<64x128xf32> to vector<64x128xbf16>
    %c64_229 = arith.constant 64 : index
    %c0_230 = arith.constant 0 : index
    %229 = vector.load %arg15[%c64_229, %c0_230] : memref<128x1536xbf16, #tpu.memory_space<vmem>>, vector<64x128xbf16>
    tpu.vector_store %arg15[%c64_229, %c0_230], %228 {strides = array<i32>} : memref<128x1536xbf16, #tpu.memory_space<vmem>>, vector<64x128xbf16>,
    %c1_231 = arith.constant 1 : index
    %c1_232 = arith.constant 1 : index
    %c0_233 = arith.constant 0 : index
    %230 = vector.load %arg14[%c1_231, %c1_232, %c0_233] : memref<2x74x128xf32, #tpu.memory_space<vmem>>, vector<1x64x128xf32>
    %231 = vector.shape_cast %230 : vector<1x64x128xf32> to vector<64x128xf32>
    %232 = arith.truncf %231 : vector<64x128xf32> to vector<64x128xbf16>
    %c64_234 = arith.constant 64 : index
    %c128_235 = arith.constant 128 : index
    %233 = vector.load %arg15[%c64_234, %c128_235] : memref<128x1536xbf16, #tpu.memory_space<vmem>>, vector<64x128xbf16>
    tpu.vector_store %arg15[%c64_234, %c128_235], %232 {strides = array<i32>} : memref<128x1536xbf16, #tpu.memory_space<vmem>>, vector<64x128xbf16>,
    %c1_236 = arith.constant 1 : index
    %c2_237 = arith.constant 2 : index
    %c0_238 = arith.constant 0 : index
    %234 = vector.load %arg14[%c1_236, %c2_237, %c0_238] : memref<2x74x128xf32, #tpu.memory_space<vmem>>, vector<1x64x128xf32>
    %235 = vector.shape_cast %234 : vector<1x64x128xf32> to vector<64x128xf32>
    %236 = arith.truncf %235 : vector<64x128xf32> to vector<64x128xbf16>
    %c64_239 = arith.constant 64 : index
    %c256_240 = arith.constant 256 : index
    %237 = vector.load %arg15[%c64_239, %c256_240] : memref<128x1536xbf16, #tpu.memory_space<vmem>>, vector<64x128xbf16>
    tpu.vector_store %arg15[%c64_239, %c256_240], %236 {strides = array<i32>} : memref<128x1536xbf16, #tpu.memory_space<vmem>>, vector<64x128xbf16>,
    %c1_241 = arith.constant 1 : index
    %c3_242 = arith.constant 3 : index
    %c0_243 = arith.constant 0 : index
    %238 = vector.load %arg14[%c1_241, %c3_242, %c0_243] : memref<2x74x128xf32, #tpu.memory_space<vmem>>, vector<1x64x128xf32>
    %239 = vector.shape_cast %238 : vector<1x64x128xf32> to vector<64x128xf32>
    %240 = arith.truncf %239 : vector<64x128xf32> to vector<64x128xbf16>
    %c64_244 = arith.constant 64 : index
    %c384_245 = arith.constant 384 : index
    %241 = vector.load %arg15[%c64_244, %c384_245] : memref<128x1536xbf16, #tpu.memory_space<vmem>>, vector<64x128xbf16>
    tpu.vector_store %arg15[%c64_244, %c384_245], %240 {strides = array<i32>} : memref<128x1536xbf16, #tpu.memory_space<vmem>>, vector<64x128xbf16>,
    %c1_246 = arith.constant 1 : index
    %c4_247 = arith.constant 4 : index
    %c0_248 = arith.constant 0 : index
    %242 = vector.load %arg14[%c1_246, %c4_247, %c0_248] : memref<2x74x128xf32, #tpu.memory_space<vmem>>, vector<1x64x128xf32>
    %243 = vector.shape_cast %242 : vector<1x64x128xf32> to vector<64x128xf32>
    %244 = arith.truncf %243 : vector<64x128xf32> to vector<64x128xbf16>
    %c64_249 = arith.constant 64 : index
    %c512_250 = arith.constant 512 : index
    %245 = vector.load %arg15[%c64_249, %c512_250] : memref<128x1536xbf16, #tpu.memory_space<vmem>>, vector<64x128xbf16>
    tpu.vector_store %arg15[%c64_249, %c512_250], %244 {strides = array<i32>} : memref<128x1536xbf16, #tpu.memory_space<vmem>>, vector<64x128xbf16>,
    %c1_251 = arith.constant 1 : index
    %c5_252 = arith.constant 5 : index
    %c0_253 = arith.constant 0 : index
    %246 = vector.load %arg14[%c1_251, %c5_252, %c0_253] : memref<2x74x128xf32, #tpu.memory_space<vmem>>, vector<1x64x128xf32>
    %247 = vector.shape_cast %246 : vector<1x64x128xf32> to vector<64x128xf32>
    %248 = arith.truncf %247 : vector<64x128xf32> to vector<64x128xbf16>
    %c64_254 = arith.constant 64 : index
    %c640_255 = arith.constant 640 : index
    %249 = vector.load %arg15[%c64_254, %c640_255] : memref<128x1536xbf16, #tpu.memory_space<vmem>>, vector<64x128xbf16>
    tpu.vector_store %arg15[%c64_254, %c640_255], %248 {strides = array<i32>} : memref<128x1536xbf16, #tpu.memory_space<vmem>>, vector<64x128xbf16>,
    %c1_256 = arith.constant 1 : index
    %c6_257 = arith.constant 6 : index
    %c0_258 = arith.constant 0 : index
    %250 = vector.load %arg14[%c1_256, %c6_257, %c0_258] : memref<2x74x128xf32, #tpu.memory_space<vmem>>, vector<1x64x128xf32>
    %251 = vector.shape_cast %250 : vector<1x64x128xf32> to vector<64x128xf32>
    %252 = arith.truncf %251 : vector<64x128xf32> to vector<64x128xbf16>
    %c64_259 = arith.constant 64 : index
    %c768_260 = arith.constant 768 : index
    %253 = vector.load %arg15[%c64_259, %c768_260] : memref<128x1536xbf16, #tpu.memory_space<vmem>>, vector<64x128xbf16>
    tpu.vector_store %arg15[%c64_259, %c768_260], %252 {strides = array<i32>} : memref<128x1536xbf16, #tpu.memory_space<vmem>>, vector<64x128xbf16>,
    %254 = arith.truncf %97 : vector<64x128xf32> to vector<64x128xbf16>
    %c64_261 = arith.constant 64 : index
    %c896_262 = arith.constant 896 : index
    %255 = vector.load %arg15[%c64_261, %c896_262] : memref<128x1536xbf16, #tpu.memory_space<vmem>>, vector<64x128xbf16>
    tpu.vector_store %arg15[%c64_261, %c896_262], %254 {strides = array<i32>} : memref<128x1536xbf16, #tpu.memory_space<vmem>>, vector<64x128xbf16>,
    %c0_263 = arith.constant 0 : index
    %c0_264 = arith.constant 0 : index
    %256 = vector.load %arg15[%c0_263, %c0_264] : memref<128x1536xbf16, #tpu.memory_space<vmem>>, vector<128x1024xbf16>
    %c0_265 = arith.constant 0 : index
    %c0_266 = arith.constant 0 : index
    %257 = vector.load %arg7[%c0_265, %c0_266] : memref<1024x128xbf16, #tpu.memory_space<vmem>>, vector<1024x128xbf16>
    %cst_267 = arith.constant dense<0.000000e+00> : vector<128x128xf32>
    %258 = tpu.matmul %256, %257, %cst_267 {dimension_numbers = #tpu.dot_dimension_numbers<[1], [0], [0], [1], [0, 0, 1, 1], [], []>} : vector<128x1024xbf16>, vector<1024x128xbf16>, vector<128x128xf32> -> vector<128x128xf32>
    %c0_268 = arith.constant 0 : index
    %c0_269 = arith.constant 0 : index
    %259 = vector.load %arg8[%c0_268, %c0_269] : memref<1x128xf32, #tpu.memory_space<vmem>>, vector<1x128xf32>
    %260 = vector.broadcast %259 : vector<1x128xf32> to vector<128x128xf32>
    %261 = arith.addf %258, %260 : vector<128x128xf32>
    %cst_270 = arith.constant 0.000000e+00 : f32
    %262 = vector.broadcast %cst_270 : f32 to vector<128x128xf32>
    %263 = arith.maximumf %261, %262 : vector<128x128xf32>
    %cst_271 = arith.constant 0.000000e+00 : f32
    %264 = vector.broadcast %cst_271 : f32 to vector<5x128xf32>
    %265 = vector.extract_strided_slice %263 {offsets = [0, 0], sizes = [64, 128], strides = [1, 1]} : vector<128x128xf32> to vector<64x128xf32>
    %cst_272 = arith.constant 0.000000e+00 : f32
    %266 = vector.broadcast %cst_272 : f32 to vector<64x128xf32>
    %267 = arith.select %3, %265, %266 : vector<64x128xi1>, vector<64x128xf32>
    %c0_273 = arith.constant 0 : index
    %c0_274 = arith.constant 0 : index
    %c0_275 = arith.constant 0 : index
    %268 = vector.load %arg14[%c0_273, %c0_274, %c0_275] : memref<2x74x128xf32, #tpu.memory_space<vmem>>, vector<1x5x128xf32>
    %269 = vector.shape_cast %268 : vector<1x5x128xf32> to vector<5x128xf32>
    %270 = vector.shape_cast %264 : vector<5x128xf32> to vector<1x5x128xf32>
    tpu.vector_store %arg14[%c0_273, %c0_274, %c0_275], %270 {strides = array<i32>} : memref<2x74x128xf32, #tpu.memory_space<vmem>>, vector<1x5x128xf32>,
    %c0_276 = arith.constant 0 : index
    %c69 = arith.constant 69 : index
    %c0_277 = arith.constant 0 : index
    %271 = vector.load %arg14[%c0_276, %c69, %c0_277] : memref<2x74x128xf32, #tpu.memory_space<vmem>>, vector<1x5x128xf32>
    %272 = vector.shape_cast %271 : vector<1x5x128xf32> to vector<5x128xf32>
    %273 = vector.shape_cast %264 : vector<5x128xf32> to vector<1x5x128xf32>
    tpu.vector_store %arg14[%c0_276, %c69, %c0_277], %273 {strides = array<i32>} : memref<2x74x128xf32, #tpu.memory_space<vmem>>, vector<1x5x128xf32>,
    %c0_278 = arith.constant 0 : index
    %c5_279 = arith.constant 5 : index
    %c0_280 = arith.constant 0 : index
    %274 = vector.load %arg14[%c0_278, %c5_279, %c0_280] : memref<2x74x128xf32, #tpu.memory_space<vmem>>, vector<1x64x128xf32>
    %275 = vector.shape_cast %274 : vector<1x64x128xf32> to vector<64x128xf32>
    %276 = vector.shape_cast %267 : vector<64x128xf32> to vector<1x64x128xf32>
    tpu.vector_store %arg14[%c0_278, %c5_279, %c0_280], %276 {strides = array<i32>} : memref<2x74x128xf32, #tpu.memory_space<vmem>>, vector<1x64x128xf32>,
    %277 = vector.extract_strided_slice %263 {offsets = [64, 0], sizes = [64, 128], strides = [1, 1]} : vector<128x128xf32> to vector<64x128xf32>
    %cst_281 = arith.constant 0.000000e+00 : f32
    %278 = vector.broadcast %cst_281 : f32 to vector<64x128xf32>
    %279 = arith.select %6, %277, %278 : vector<64x128xi1>, vector<64x128xf32>
    %c1_282 = arith.constant 1 : index
    %c0_283 = arith.constant 0 : index
    %c0_284 = arith.constant 0 : index
    %280 = vector.load %arg14[%c1_282, %c0_283, %c0_284] : memref<2x74x128xf32, #tpu.memory_space<vmem>>, vector<1x5x128xf32>
    %281 = vector.shape_cast %280 : vector<1x5x128xf32> to vector<5x128xf32>
    %282 = vector.shape_cast %264 : vector<5x128xf32> to vector<1x5x128xf32>
    tpu.vector_store %arg14[%c1_282, %c0_283, %c0_284], %282 {strides = array<i32>} : memref<2x74x128xf32, #tpu.memory_space<vmem>>, vector<1x5x128xf32>,
    %c1_285 = arith.constant 1 : index
    %c69_286 = arith.constant 69 : index
    %c0_287 = arith.constant 0 : index
    %283 = vector.load %arg14[%c1_285, %c69_286, %c0_287] : memref<2x74x128xf32, #tpu.memory_space<vmem>>, vector<1x5x128xf32>
    %284 = vector.shape_cast %283 : vector<1x5x128xf32> to vector<5x128xf32>
    %285 = vector.shape_cast %264 : vector<5x128xf32> to vector<1x5x128xf32>
    tpu.vector_store %arg14[%c1_285, %c69_286, %c0_287], %285 {strides = array<i32>} : memref<2x74x128xf32, #tpu.memory_space<vmem>>, vector<1x5x128xf32>,
    %c1_288 = arith.constant 1 : index
    %c5_289 = arith.constant 5 : index
    %c0_290 = arith.constant 0 : index
    %286 = vector.load %arg14[%c1_288, %c5_289, %c0_290] : memref<2x74x128xf32, #tpu.memory_space<vmem>>, vector<1x64x128xf32>
    %287 = vector.shape_cast %286 : vector<1x64x128xf32> to vector<64x128xf32>
    %288 = vector.shape_cast %279 : vector<64x128xf32> to vector<1x64x128xf32>
    tpu.vector_store %arg14[%c1_288, %c5_289, %c0_290], %288 {strides = array<i32>} : memref<2x74x128xf32, #tpu.memory_space<vmem>>, vector<1x64x128xf32>,
    %c0_291 = arith.constant 0 : index
    %c0_292 = arith.constant 0 : index
    %c0_293 = arith.constant 0 : index
    %289 = vector.load %arg14[%c0_291, %c0_292, %c0_293] : memref<2x74x128xf32, #tpu.memory_space<vmem>>, vector<1x64x128xf32>
    %290 = vector.shape_cast %289 : vector<1x64x128xf32> to vector<64x128xf32>
    %291 = arith.truncf %290 : vector<64x128xf32> to vector<64x128xbf16>
    %c0_294 = arith.constant 0 : index
    %c0_295 = arith.constant 0 : index
    %292 = vector.load %arg15[%c0_294, %c0_295] : memref<128x1536xbf16, #tpu.memory_space<vmem>>, vector<64x128xbf16>
    tpu.vector_store %arg15[%c0_294, %c0_295], %291 {strides = array<i32>} : memref<128x1536xbf16, #tpu.memory_space<vmem>>, vector<64x128xbf16>,
    %c0_296 = arith.constant 0 : index
    %c1_297 = arith.constant 1 : index
    %c0_298 = arith.constant 0 : index
    %293 = vector.load %arg14[%c0_296, %c1_297, %c0_298] : memref<2x74x128xf32, #tpu.memory_space<vmem>>, vector<1x64x128xf32>
    %294 = vector.shape_cast %293 : vector<1x64x128xf32> to vector<64x128xf32>
    %295 = arith.truncf %294 : vector<64x128xf32> to vector<64x128xbf16>
    %c0_299 = arith.constant 0 : index
    %c128_300 = arith.constant 128 : index
    %296 = vector.load %arg15[%c0_299, %c128_300] : memref<128x1536xbf16, #tpu.memory_space<vmem>>, vector<64x128xbf16>
    tpu.vector_store %arg15[%c0_299, %c128_300], %295 {strides = array<i32>} : memref<128x1536xbf16, #tpu.memory_space<vmem>>, vector<64x128xbf16>,
    %c0_301 = arith.constant 0 : index
    %c2_302 = arith.constant 2 : index
    %c0_303 = arith.constant 0 : index
    %297 = vector.load %arg14[%c0_301, %c2_302, %c0_303] : memref<2x74x128xf32, #tpu.memory_space<vmem>>, vector<1x64x128xf32>
    %298 = vector.shape_cast %297 : vector<1x64x128xf32> to vector<64x128xf32>
    %299 = arith.truncf %298 : vector<64x128xf32> to vector<64x128xbf16>
    %c0_304 = arith.constant 0 : index
    %c256_305 = arith.constant 256 : index
    %300 = vector.load %arg15[%c0_304, %c256_305] : memref<128x1536xbf16, #tpu.memory_space<vmem>>, vector<64x128xbf16>
    tpu.vector_store %arg15[%c0_304, %c256_305], %299 {strides = array<i32>} : memref<128x1536xbf16, #tpu.memory_space<vmem>>, vector<64x128xbf16>,
    %c0_306 = arith.constant 0 : index
    %c3_307 = arith.constant 3 : index
    %c0_308 = arith.constant 0 : index
    %301 = vector.load %arg14[%c0_306, %c3_307, %c0_308] : memref<2x74x128xf32, #tpu.memory_space<vmem>>, vector<1x64x128xf32>
    %302 = vector.shape_cast %301 : vector<1x64x128xf32> to vector<64x128xf32>
    %303 = arith.truncf %302 : vector<64x128xf32> to vector<64x128xbf16>
    %c0_309 = arith.constant 0 : index
    %c384_310 = arith.constant 384 : index
    %304 = vector.load %arg15[%c0_309, %c384_310] : memref<128x1536xbf16, #tpu.memory_space<vmem>>, vector<64x128xbf16>
    tpu.vector_store %arg15[%c0_309, %c384_310], %303 {strides = array<i32>} : memref<128x1536xbf16, #tpu.memory_space<vmem>>, vector<64x128xbf16>,
    %c0_311 = arith.constant 0 : index
    %c4_312 = arith.constant 4 : index
    %c0_313 = arith.constant 0 : index
    %305 = vector.load %arg14[%c0_311, %c4_312, %c0_313] : memref<2x74x128xf32, #tpu.memory_space<vmem>>, vector<1x64x128xf32>
    %306 = vector.shape_cast %305 : vector<1x64x128xf32> to vector<64x128xf32>
    %307 = arith.truncf %306 : vector<64x128xf32> to vector<64x128xbf16>
    %c0_314 = arith.constant 0 : index
    %c512_315 = arith.constant 512 : index
    %308 = vector.load %arg15[%c0_314, %c512_315] : memref<128x1536xbf16, #tpu.memory_space<vmem>>, vector<64x128xbf16>
    tpu.vector_store %arg15[%c0_314, %c512_315], %307 {strides = array<i32>} : memref<128x1536xbf16, #tpu.memory_space<vmem>>, vector<64x128xbf16>,
    %c0_316 = arith.constant 0 : index
    %c5_317 = arith.constant 5 : index
    %c0_318 = arith.constant 0 : index
    %309 = vector.load %arg14[%c0_316, %c5_317, %c0_318] : memref<2x74x128xf32, #tpu.memory_space<vmem>>, vector<1x64x128xf32>
    %310 = vector.shape_cast %309 : vector<1x64x128xf32> to vector<64x128xf32>
    %311 = arith.truncf %310 : vector<64x128xf32> to vector<64x128xbf16>
    %c0_319 = arith.constant 0 : index
    %c640_320 = arith.constant 640 : index
    %312 = vector.load %arg15[%c0_319, %c640_320] : memref<128x1536xbf16, #tpu.memory_space<vmem>>, vector<64x128xbf16>
    tpu.vector_store %arg15[%c0_319, %c640_320], %311 {strides = array<i32>} : memref<128x1536xbf16, #tpu.memory_space<vmem>>, vector<64x128xbf16>,
    %c0_321 = arith.constant 0 : index
    %c6_322 = arith.constant 6 : index
    %c0_323 = arith.constant 0 : index
    %313 = vector.load %arg14[%c0_321, %c6_322, %c0_323] : memref<2x74x128xf32, #tpu.memory_space<vmem>>, vector<1x64x128xf32>
    %314 = vector.shape_cast %313 : vector<1x64x128xf32> to vector<64x128xf32>
    %315 = arith.truncf %314 : vector<64x128xf32> to vector<64x128xbf16>
    %c0_324 = arith.constant 0 : index
    %c768_325 = arith.constant 768 : index
    %316 = vector.load %arg15[%c0_324, %c768_325] : memref<128x1536xbf16, #tpu.memory_space<vmem>>, vector<64x128xbf16>
    tpu.vector_store %arg15[%c0_324, %c768_325], %315 {strides = array<i32>} : memref<128x1536xbf16, #tpu.memory_space<vmem>>, vector<64x128xbf16>,
    %c0_326 = arith.constant 0 : index
    %c7 = arith.constant 7 : index
    %c0_327 = arith.constant 0 : index
    %317 = vector.load %arg14[%c0_326, %c7, %c0_327] : memref<2x74x128xf32, #tpu.memory_space<vmem>>, vector<1x64x128xf32>
    %318 = vector.shape_cast %317 : vector<1x64x128xf32> to vector<64x128xf32>
    %319 = arith.truncf %318 : vector<64x128xf32> to vector<64x128xbf16>
    %c0_328 = arith.constant 0 : index
    %c896_329 = arith.constant 896 : index
    %320 = vector.load %arg15[%c0_328, %c896_329] : memref<128x1536xbf16, #tpu.memory_space<vmem>>, vector<64x128xbf16>
    tpu.vector_store %arg15[%c0_328, %c896_329], %319 {strides = array<i32>} : memref<128x1536xbf16, #tpu.memory_space<vmem>>, vector<64x128xbf16>,
    %c0_330 = arith.constant 0 : index
    %c8 = arith.constant 8 : index
    %c0_331 = arith.constant 0 : index
    %321 = vector.load %arg14[%c0_330, %c8, %c0_331] : memref<2x74x128xf32, #tpu.memory_space<vmem>>, vector<1x64x128xf32>
    %322 = vector.shape_cast %321 : vector<1x64x128xf32> to vector<64x128xf32>
    %323 = arith.truncf %322 : vector<64x128xf32> to vector<64x128xbf16>
    %c0_332 = arith.constant 0 : index
    %c1024 = arith.constant 1024 : index
    %324 = vector.load %arg15[%c0_332, %c1024] : memref<128x1536xbf16, #tpu.memory_space<vmem>>, vector<64x128xbf16>
    tpu.vector_store %arg15[%c0_332, %c1024], %323 {strides = array<i32>} : memref<128x1536xbf16, #tpu.memory_space<vmem>>, vector<64x128xbf16>,
    %c0_333 = arith.constant 0 : index
    %c9 = arith.constant 9 : index
    %c0_334 = arith.constant 0 : index
    %325 = vector.load %arg14[%c0_333, %c9, %c0_334] : memref<2x74x128xf32, #tpu.memory_space<vmem>>, vector<1x64x128xf32>
    %326 = vector.shape_cast %325 : vector<1x64x128xf32> to vector<64x128xf32>
    %327 = arith.truncf %326 : vector<64x128xf32> to vector<64x128xbf16>
    %c0_335 = arith.constant 0 : index
    %c1152 = arith.constant 1152 : index
    %328 = vector.load %arg15[%c0_335, %c1152] : memref<128x1536xbf16, #tpu.memory_space<vmem>>, vector<64x128xbf16>
    tpu.vector_store %arg15[%c0_335, %c1152], %327 {strides = array<i32>} : memref<128x1536xbf16, #tpu.memory_space<vmem>>, vector<64x128xbf16>,
    %c0_336 = arith.constant 0 : index
    %c10 = arith.constant 10 : index
    %c0_337 = arith.constant 0 : index
    %329 = vector.load %arg14[%c0_336, %c10, %c0_337] : memref<2x74x128xf32, #tpu.memory_space<vmem>>, vector<1x64x128xf32>
    %330 = vector.shape_cast %329 : vector<1x64x128xf32> to vector<64x128xf32>
    %331 = arith.truncf %330 : vector<64x128xf32> to vector<64x128xbf16>
    %c0_338 = arith.constant 0 : index
    %c1280 = arith.constant 1280 : index
    %332 = vector.load %arg15[%c0_338, %c1280] : memref<128x1536xbf16, #tpu.memory_space<vmem>>, vector<64x128xbf16>
    tpu.vector_store %arg15[%c0_338, %c1280], %331 {strides = array<i32>} : memref<128x1536xbf16, #tpu.memory_space<vmem>>, vector<64x128xbf16>,
    %c1_339 = arith.constant 1 : index
    %c0_340 = arith.constant 0 : index
    %c0_341 = arith.constant 0 : index
    %333 = vector.load %arg14[%c1_339, %c0_340, %c0_341] : memref<2x74x128xf32, #tpu.memory_space<vmem>>, vector<1x64x128xf32>
    %334 = vector.shape_cast %333 : vector<1x64x128xf32> to vector<64x128xf32>
    %335 = arith.truncf %334 : vector<64x128xf32> to vector<64x128xbf16>
    %c64_342 = arith.constant 64 : index
    %c0_343 = arith.constant 0 : index
    %336 = vector.load %arg15[%c64_342, %c0_343] : memref<128x1536xbf16, #tpu.memory_space<vmem>>, vector<64x128xbf16>
    tpu.vector_store %arg15[%c64_342, %c0_343], %335 {strides = array<i32>} : memref<128x1536xbf16, #tpu.memory_space<vmem>>, vector<64x128xbf16>,
    %c1_344 = arith.constant 1 : index
    %c1_345 = arith.constant 1 : index
    %c0_346 = arith.constant 0 : index
    %337 = vector.load %arg14[%c1_344, %c1_345, %c0_346] : memref<2x74x128xf32, #tpu.memory_space<vmem>>, vector<1x64x128xf32>
    %338 = vector.shape_cast %337 : vector<1x64x128xf32> to vector<64x128xf32>
    %339 = arith.truncf %338 : vector<64x128xf32> to vector<64x128xbf16>
    %c64_347 = arith.constant 64 : index
    %c128_348 = arith.constant 128 : index
    %340 = vector.load %arg15[%c64_347, %c128_348] : memref<128x1536xbf16, #tpu.memory_space<vmem>>, vector<64x128xbf16>
    tpu.vector_store %arg15[%c64_347, %c128_348], %339 {strides = array<i32>} : memref<128x1536xbf16, #tpu.memory_space<vmem>>, vector<64x128xbf16>,
    %c1_349 = arith.constant 1 : index
    %c2_350 = arith.constant 2 : index
    %c0_351 = arith.constant 0 : index
    %341 = vector.load %arg14[%c1_349, %c2_350, %c0_351] : memref<2x74x128xf32, #tpu.memory_space<vmem>>, vector<1x64x128xf32>
    %342 = vector.shape_cast %341 : vector<1x64x128xf32> to vector<64x128xf32>
    %343 = arith.truncf %342 : vector<64x128xf32> to vector<64x128xbf16>
    %c64_352 = arith.constant 64 : index
    %c256_353 = arith.constant 256 : index
    %344 = vector.load %arg15[%c64_352, %c256_353] : memref<128x1536xbf16, #tpu.memory_space<vmem>>, vector<64x128xbf16>
    tpu.vector_store %arg15[%c64_352, %c256_353], %343 {strides = array<i32>} : memref<128x1536xbf16, #tpu.memory_space<vmem>>, vector<64x128xbf16>,
    %c1_354 = arith.constant 1 : index
    %c3_355 = arith.constant 3 : index
    %c0_356 = arith.constant 0 : index
    %345 = vector.load %arg14[%c1_354, %c3_355, %c0_356] : memref<2x74x128xf32, #tpu.memory_space<vmem>>, vector<1x64x128xf32>
    %346 = vector.shape_cast %345 : vector<1x64x128xf32> to vector<64x128xf32>
    %347 = arith.truncf %346 : vector<64x128xf32> to vector<64x128xbf16>
    %c64_357 = arith.constant 64 : index
    %c384_358 = arith.constant 384 : index
    %348 = vector.load %arg15[%c64_357, %c384_358] : memref<128x1536xbf16, #tpu.memory_space<vmem>>, vector<64x128xbf16>
    tpu.vector_store %arg15[%c64_357, %c384_358], %347 {strides = array<i32>} : memref<128x1536xbf16, #tpu.memory_space<vmem>>, vector<64x128xbf16>,
    %c1_359 = arith.constant 1 : index
    %c4_360 = arith.constant 4 : index
    %c0_361 = arith.constant 0 : index
    %349 = vector.load %arg14[%c1_359, %c4_360, %c0_361] : memref<2x74x128xf32, #tpu.memory_space<vmem>>, vector<1x64x128xf32>
    %350 = vector.shape_cast %349 : vector<1x64x128xf32> to vector<64x128xf32>
    %351 = arith.truncf %350 : vector<64x128xf32> to vector<64x128xbf16>
    %c64_362 = arith.constant 64 : index
    %c512_363 = arith.constant 512 : index
    %352 = vector.load %arg15[%c64_362, %c512_363] : memref<128x1536xbf16, #tpu.memory_space<vmem>>, vector<64x128xbf16>
    tpu.vector_store %arg15[%c64_362, %c512_363], %351 {strides = array<i32>} : memref<128x1536xbf16, #tpu.memory_space<vmem>>, vector<64x128xbf16>,
    %c1_364 = arith.constant 1 : index
    %c5_365 = arith.constant 5 : index
    %c0_366 = arith.constant 0 : index
    %353 = vector.load %arg14[%c1_364, %c5_365, %c0_366] : memref<2x74x128xf32, #tpu.memory_space<vmem>>, vector<1x64x128xf32>
    %354 = vector.shape_cast %353 : vector<1x64x128xf32> to vector<64x128xf32>
    %355 = arith.truncf %354 : vector<64x128xf32> to vector<64x128xbf16>
    %c64_367 = arith.constant 64 : index
    %c640_368 = arith.constant 640 : index
    %356 = vector.load %arg15[%c64_367, %c640_368] : memref<128x1536xbf16, #tpu.memory_space<vmem>>, vector<64x128xbf16>
    tpu.vector_store %arg15[%c64_367, %c640_368], %355 {strides = array<i32>} : memref<128x1536xbf16, #tpu.memory_space<vmem>>, vector<64x128xbf16>,
    %c1_369 = arith.constant 1 : index
    %c6_370 = arith.constant 6 : index
    %c0_371 = arith.constant 0 : index
    %357 = vector.load %arg14[%c1_369, %c6_370, %c0_371] : memref<2x74x128xf32, #tpu.memory_space<vmem>>, vector<1x64x128xf32>
    %358 = vector.shape_cast %357 : vector<1x64x128xf32> to vector<64x128xf32>
    %359 = arith.truncf %358 : vector<64x128xf32> to vector<64x128xbf16>
    %c64_372 = arith.constant 64 : index
    %c768_373 = arith.constant 768 : index
    %360 = vector.load %arg15[%c64_372, %c768_373] : memref<128x1536xbf16, #tpu.memory_space<vmem>>, vector<64x128xbf16>
    tpu.vector_store %arg15[%c64_372, %c768_373], %359 {strides = array<i32>} : memref<128x1536xbf16, #tpu.memory_space<vmem>>, vector<64x128xbf16>,
    %c1_374 = arith.constant 1 : index
    %c7_375 = arith.constant 7 : index
    %c0_376 = arith.constant 0 : index
    %361 = vector.load %arg14[%c1_374, %c7_375, %c0_376] : memref<2x74x128xf32, #tpu.memory_space<vmem>>, vector<1x64x128xf32>
    %362 = vector.shape_cast %361 : vector<1x64x128xf32> to vector<64x128xf32>
    %363 = arith.truncf %362 : vector<64x128xf32> to vector<64x128xbf16>
    %c64_377 = arith.constant 64 : index
    %c896_378 = arith.constant 896 : index
    %364 = vector.load %arg15[%c64_377, %c896_378] : memref<128x1536xbf16, #tpu.memory_space<vmem>>, vector<64x128xbf16>
    tpu.vector_store %arg15[%c64_377, %c896_378], %363 {strides = array<i32>} : memref<128x1536xbf16, #tpu.memory_space<vmem>>, vector<64x128xbf16>,
    %c1_379 = arith.constant 1 : index
    %c8_380 = arith.constant 8 : index
    %c0_381 = arith.constant 0 : index
    %365 = vector.load %arg14[%c1_379, %c8_380, %c0_381] : memref<2x74x128xf32, #tpu.memory_space<vmem>>, vector<1x64x128xf32>
    %366 = vector.shape_cast %365 : vector<1x64x128xf32> to vector<64x128xf32>
    %367 = arith.truncf %366 : vector<64x128xf32> to vector<64x128xbf16>
    %c64_382 = arith.constant 64 : index
    %c1024_383 = arith.constant 1024 : index
    %368 = vector.load %arg15[%c64_382, %c1024_383] : memref<128x1536xbf16, #tpu.memory_space<vmem>>, vector<64x128xbf16>
    tpu.vector_store %arg15[%c64_382, %c1024_383], %367 {strides = array<i32>} : memref<128x1536xbf16, #tpu.memory_space<vmem>>, vector<64x128xbf16>,
    %c1_384 = arith.constant 1 : index
    %c9_385 = arith.constant 9 : index
    %c0_386 = arith.constant 0 : index
    %369 = vector.load %arg14[%c1_384, %c9_385, %c0_386] : memref<2x74x128xf32, #tpu.memory_space<vmem>>, vector<1x64x128xf32>
    %370 = vector.shape_cast %369 : vector<1x64x128xf32> to vector<64x128xf32>
    %371 = arith.truncf %370 : vector<64x128xf32> to vector<64x128xbf16>
    %c64_387 = arith.constant 64 : index
    %c1152_388 = arith.constant 1152 : index
    %372 = vector.load %arg15[%c64_387, %c1152_388] : memref<128x1536xbf16, #tpu.memory_space<vmem>>, vector<64x128xbf16>
    tpu.vector_store %arg15[%c64_387, %c1152_388], %371 {strides = array<i32>} : memref<128x1536xbf16, #tpu.memory_space<vmem>>, vector<64x128xbf16>,
    %c1_389 = arith.constant 1 : index
    %c10_390 = arith.constant 10 : index
    %c0_391 = arith.constant 0 : index
    %373 = vector.load %arg14[%c1_389, %c10_390, %c0_391] : memref<2x74x128xf32, #tpu.memory_space<vmem>>, vector<1x64x128xf32>
    %374 = vector.shape_cast %373 : vector<1x64x128xf32> to vector<64x128xf32>
    %375 = arith.truncf %374 : vector<64x128xf32> to vector<64x128xbf16>
    %c64_392 = arith.constant 64 : index
    %c1280_393 = arith.constant 1280 : index
    %376 = vector.load %arg15[%c64_392, %c1280_393] : memref<128x1536xbf16, #tpu.memory_space<vmem>>, vector<64x128xbf16>
    tpu.vector_store %arg15[%c64_392, %c1280_393], %375 {strides = array<i32>} : memref<128x1536xbf16, #tpu.memory_space<vmem>>, vector<64x128xbf16>,
    %c0_394 = arith.constant 0 : index
    %c0_395 = arith.constant 0 : index
    %377 = vector.load %arg15[%c0_394, %c0_395] : memref<128x1536xbf16, #tpu.memory_space<vmem>>, vector<128x1408xbf16>
    %c0_396 = arith.constant 0 : index
    %c0_397 = arith.constant 0 : index
    %378 = vector.load %arg9[%c0_396, %c0_397] : memref<1408x128xbf16, #tpu.memory_space<vmem>>, vector<1408x128xbf16>
    %cst_398 = arith.constant dense<0.000000e+00> : vector<128x128xf32>
    %379 = tpu.matmul %377, %378, %cst_398 {dimension_numbers = #tpu.dot_dimension_numbers<[1], [0], [0], [1], [0, 0, 1, 1], [], []>} : vector<128x1408xbf16>, vector<1408x128xbf16>, vector<128x128xf32> -> vector<128x128xf32>
    %c0_399 = arith.constant 0 : index
    %c0_400 = arith.constant 0 : index
    %380 = vector.load %arg10[%c0_399, %c0_400] : memref<1x128xf32, #tpu.memory_space<vmem>>, vector<1x128xf32>
    %381 = vector.broadcast %380 : vector<1x128xf32> to vector<128x128xf32>
    %382 = arith.addf %379, %381 : vector<128x128xf32>
    %cst_401 = arith.constant 0.000000e+00 : f32
    %383 = vector.broadcast %cst_401 : f32 to vector<128x128xf32>
    %384 = arith.maximumf %382, %383 : vector<128x128xf32>
    %cst_402 = arith.constant 0.000000e+00 : f32
    %385 = vector.broadcast %cst_402 : f32 to vector<5x128xf32>
    %386 = vector.extract_strided_slice %384 {offsets = [0, 0], sizes = [64, 128], strides = [1, 1]} : vector<128x128xf32> to vector<64x128xf32>
    %cst_403 = arith.constant 0.000000e+00 : f32
    %387 = vector.broadcast %cst_403 : f32 to vector<64x128xf32>
    %388 = arith.select %3, %386, %387 : vector<64x128xi1>, vector<64x128xf32>
    %c0_404 = arith.constant 0 : index
    %c0_405 = arith.constant 0 : index
    %c0_406 = arith.constant 0 : index
    %389 = vector.load %arg14[%c0_404, %c0_405, %c0_406] : memref<2x74x128xf32, #tpu.memory_space<vmem>>, vector<1x5x128xf32>
    %390 = vector.shape_cast %389 : vector<1x5x128xf32> to vector<5x128xf32>
    %391 = vector.shape_cast %385 : vector<5x128xf32> to vector<1x5x128xf32>
    tpu.vector_store %arg14[%c0_404, %c0_405, %c0_406], %391 {strides = array<i32>} : memref<2x74x128xf32, #tpu.memory_space<vmem>>, vector<1x5x128xf32>,
    %c0_407 = arith.constant 0 : index
    %c69_408 = arith.constant 69 : index
    %c0_409 = arith.constant 0 : index
    %392 = vector.load %arg14[%c0_407, %c69_408, %c0_409] : memref<2x74x128xf32, #tpu.memory_space<vmem>>, vector<1x5x128xf32>
    %393 = vector.shape_cast %392 : vector<1x5x128xf32> to vector<5x128xf32>
    %394 = vector.shape_cast %385 : vector<5x128xf32> to vector<1x5x128xf32>
    tpu.vector_store %arg14[%c0_407, %c69_408, %c0_409], %394 {strides = array<i32>} : memref<2x74x128xf32, #tpu.memory_space<vmem>>, vector<1x5x128xf32>,
    %c0_410 = arith.constant 0 : index
    %c5_411 = arith.constant 5 : index
    %c0_412 = arith.constant 0 : index
    %395 = vector.load %arg14[%c0_410, %c5_411, %c0_412] : memref<2x74x128xf32, #tpu.memory_space<vmem>>, vector<1x64x128xf32>
    %396 = vector.shape_cast %395 : vector<1x64x128xf32> to vector<64x128xf32>
    %397 = vector.shape_cast %388 : vector<64x128xf32> to vector<1x64x128xf32>
    tpu.vector_store %arg14[%c0_410, %c5_411, %c0_412], %397 {strides = array<i32>} : memref<2x74x128xf32, #tpu.memory_space<vmem>>, vector<1x64x128xf32>,
    %398 = vector.extract_strided_slice %384 {offsets = [64, 0], sizes = [64, 128], strides = [1, 1]} : vector<128x128xf32> to vector<64x128xf32>
    %cst_413 = arith.constant 0.000000e+00 : f32
    %399 = vector.broadcast %cst_413 : f32 to vector<64x128xf32>
    %400 = arith.select %6, %398, %399 : vector<64x128xi1>, vector<64x128xf32>
    %c1_414 = arith.constant 1 : index
    %c0_415 = arith.constant 0 : index
    %c0_416 = arith.constant 0 : index
    %401 = vector.load %arg14[%c1_414, %c0_415, %c0_416] : memref<2x74x128xf32, #tpu.memory_space<vmem>>, vector<1x5x128xf32>
    %402 = vector.shape_cast %401 : vector<1x5x128xf32> to vector<5x128xf32>
    %403 = vector.shape_cast %385 : vector<5x128xf32> to vector<1x5x128xf32>
    tpu.vector_store %arg14[%c1_414, %c0_415, %c0_416], %403 {strides = array<i32>} : memref<2x74x128xf32, #tpu.memory_space<vmem>>, vector<1x5x128xf32>,
    %c1_417 = arith.constant 1 : index
    %c69_418 = arith.constant 69 : index
    %c0_419 = arith.constant 0 : index
    %404 = vector.load %arg14[%c1_417, %c69_418, %c0_419] : memref<2x74x128xf32, #tpu.memory_space<vmem>>, vector<1x5x128xf32>
    %405 = vector.shape_cast %404 : vector<1x5x128xf32> to vector<5x128xf32>
    %406 = vector.shape_cast %385 : vector<5x128xf32> to vector<1x5x128xf32>
    tpu.vector_store %arg14[%c1_417, %c69_418, %c0_419], %406 {strides = array<i32>} : memref<2x74x128xf32, #tpu.memory_space<vmem>>, vector<1x5x128xf32>,
    %c1_420 = arith.constant 1 : index
    %c5_421 = arith.constant 5 : index
    %c0_422 = arith.constant 0 : index
    %407 = vector.load %arg14[%c1_420, %c5_421, %c0_422] : memref<2x74x128xf32, #tpu.memory_space<vmem>>, vector<1x64x128xf32>
    %408 = vector.shape_cast %407 : vector<1x64x128xf32> to vector<64x128xf32>
    %409 = vector.shape_cast %400 : vector<64x128xf32> to vector<1x64x128xf32>
    tpu.vector_store %arg14[%c1_420, %c5_421, %c0_422], %409 {strides = array<i32>} : memref<2x74x128xf32, #tpu.memory_space<vmem>>, vector<1x64x128xf32>,
    %c0_423 = arith.constant 0 : index
    %c0_424 = arith.constant 0 : index
    %c0_425 = arith.constant 0 : index
    %410 = vector.load %arg14[%c0_423, %c0_424, %c0_425] : memref<2x74x128xf32, #tpu.memory_space<vmem>>, vector<1x64x128xf32>
    %411 = vector.shape_cast %410 : vector<1x64x128xf32> to vector<64x128xf32>
    %412 = arith.truncf %411 : vector<64x128xf32> to vector<64x128xbf16>
    %c0_426 = arith.constant 0 : index
    %c0_427 = arith.constant 0 : index
    %413 = vector.load %arg15[%c0_426, %c0_427] : memref<128x1536xbf16, #tpu.memory_space<vmem>>, vector<64x128xbf16>
    tpu.vector_store %arg15[%c0_426, %c0_427], %412 {strides = array<i32>} : memref<128x1536xbf16, #tpu.memory_space<vmem>>, vector<64x128xbf16>,
    %c0_428 = arith.constant 0 : index
    %c1_429 = arith.constant 1 : index
    %c0_430 = arith.constant 0 : index
    %414 = vector.load %arg14[%c0_428, %c1_429, %c0_430] : memref<2x74x128xf32, #tpu.memory_space<vmem>>, vector<1x64x128xf32>
    %415 = vector.shape_cast %414 : vector<1x64x128xf32> to vector<64x128xf32>
    %416 = arith.truncf %415 : vector<64x128xf32> to vector<64x128xbf16>
    %c0_431 = arith.constant 0 : index
    %c128_432 = arith.constant 128 : index
    %417 = vector.load %arg15[%c0_431, %c128_432] : memref<128x1536xbf16, #tpu.memory_space<vmem>>, vector<64x128xbf16>
    tpu.vector_store %arg15[%c0_431, %c128_432], %416 {strides = array<i32>} : memref<128x1536xbf16, #tpu.memory_space<vmem>>, vector<64x128xbf16>,
    %c0_433 = arith.constant 0 : index
    %c2_434 = arith.constant 2 : index
    %c0_435 = arith.constant 0 : index
    %418 = vector.load %arg14[%c0_433, %c2_434, %c0_435] : memref<2x74x128xf32, #tpu.memory_space<vmem>>, vector<1x64x128xf32>
    %419 = vector.shape_cast %418 : vector<1x64x128xf32> to vector<64x128xf32>
    %420 = arith.truncf %419 : vector<64x128xf32> to vector<64x128xbf16>
    %c0_436 = arith.constant 0 : index
    %c256_437 = arith.constant 256 : index
    %421 = vector.load %arg15[%c0_436, %c256_437] : memref<128x1536xbf16, #tpu.memory_space<vmem>>, vector<64x128xbf16>
    tpu.vector_store %arg15[%c0_436, %c256_437], %420 {strides = array<i32>} : memref<128x1536xbf16, #tpu.memory_space<vmem>>, vector<64x128xbf16>,
    %c0_438 = arith.constant 0 : index
    %c3_439 = arith.constant 3 : index
    %c0_440 = arith.constant 0 : index
    %422 = vector.load %arg14[%c0_438, %c3_439, %c0_440] : memref<2x74x128xf32, #tpu.memory_space<vmem>>, vector<1x64x128xf32>
    %423 = vector.shape_cast %422 : vector<1x64x128xf32> to vector<64x128xf32>
    %424 = arith.truncf %423 : vector<64x128xf32> to vector<64x128xbf16>
    %c0_441 = arith.constant 0 : index
    %c384_442 = arith.constant 384 : index
    %425 = vector.load %arg15[%c0_441, %c384_442] : memref<128x1536xbf16, #tpu.memory_space<vmem>>, vector<64x128xbf16>
    tpu.vector_store %arg15[%c0_441, %c384_442], %424 {strides = array<i32>} : memref<128x1536xbf16, #tpu.memory_space<vmem>>, vector<64x128xbf16>,
    %c0_443 = arith.constant 0 : index
    %c4_444 = arith.constant 4 : index
    %c0_445 = arith.constant 0 : index
    %426 = vector.load %arg14[%c0_443, %c4_444, %c0_445] : memref<2x74x128xf32, #tpu.memory_space<vmem>>, vector<1x64x128xf32>
    %427 = vector.shape_cast %426 : vector<1x64x128xf32> to vector<64x128xf32>
    %428 = arith.truncf %427 : vector<64x128xf32> to vector<64x128xbf16>
    %c0_446 = arith.constant 0 : index
    %c512_447 = arith.constant 512 : index
    %429 = vector.load %arg15[%c0_446, %c512_447] : memref<128x1536xbf16, #tpu.memory_space<vmem>>, vector<64x128xbf16>
    tpu.vector_store %arg15[%c0_446, %c512_447], %428 {strides = array<i32>} : memref<128x1536xbf16, #tpu.memory_space<vmem>>, vector<64x128xbf16>,
    %c0_448 = arith.constant 0 : index
    %c5_449 = arith.constant 5 : index
    %c0_450 = arith.constant 0 : index
    %430 = vector.load %arg14[%c0_448, %c5_449, %c0_450] : memref<2x74x128xf32, #tpu.memory_space<vmem>>, vector<1x64x128xf32>
    %431 = vector.shape_cast %430 : vector<1x64x128xf32> to vector<64x128xf32>
    %432 = arith.truncf %431 : vector<64x128xf32> to vector<64x128xbf16>
    %c0_451 = arith.constant 0 : index
    %c640_452 = arith.constant 640 : index
    %433 = vector.load %arg15[%c0_451, %c640_452] : memref<128x1536xbf16, #tpu.memory_space<vmem>>, vector<64x128xbf16>
    tpu.vector_store %arg15[%c0_451, %c640_452], %432 {strides = array<i32>} : memref<128x1536xbf16, #tpu.memory_space<vmem>>, vector<64x128xbf16>,
    %c0_453 = arith.constant 0 : index
    %c6_454 = arith.constant 6 : index
    %c0_455 = arith.constant 0 : index
    %434 = vector.load %arg14[%c0_453, %c6_454, %c0_455] : memref<2x74x128xf32, #tpu.memory_space<vmem>>, vector<1x64x128xf32>
    %435 = vector.shape_cast %434 : vector<1x64x128xf32> to vector<64x128xf32>
    %436 = arith.truncf %435 : vector<64x128xf32> to vector<64x128xbf16>
    %c0_456 = arith.constant 0 : index
    %c768_457 = arith.constant 768 : index
    %437 = vector.load %arg15[%c0_456, %c768_457] : memref<128x1536xbf16, #tpu.memory_space<vmem>>, vector<64x128xbf16>
    tpu.vector_store %arg15[%c0_456, %c768_457], %436 {strides = array<i32>} : memref<128x1536xbf16, #tpu.memory_space<vmem>>, vector<64x128xbf16>,
    %c0_458 = arith.constant 0 : index
    %c7_459 = arith.constant 7 : index
    %c0_460 = arith.constant 0 : index
    %438 = vector.load %arg14[%c0_458, %c7_459, %c0_460] : memref<2x74x128xf32, #tpu.memory_space<vmem>>, vector<1x64x128xf32>
    %439 = vector.shape_cast %438 : vector<1x64x128xf32> to vector<64x128xf32>
    %440 = arith.truncf %439 : vector<64x128xf32> to vector<64x128xbf16>
    %c0_461 = arith.constant 0 : index
    %c896_462 = arith.constant 896 : index
    %441 = vector.load %arg15[%c0_461, %c896_462] : memref<128x1536xbf16, #tpu.memory_space<vmem>>, vector<64x128xbf16>
    tpu.vector_store %arg15[%c0_461, %c896_462], %440 {strides = array<i32>} : memref<128x1536xbf16, #tpu.memory_space<vmem>>, vector<64x128xbf16>,
    %c0_463 = arith.constant 0 : index
    %c8_464 = arith.constant 8 : index
    %c0_465 = arith.constant 0 : index
    %442 = vector.load %arg14[%c0_463, %c8_464, %c0_465] : memref<2x74x128xf32, #tpu.memory_space<vmem>>, vector<1x64x128xf32>
    %443 = vector.shape_cast %442 : vector<1x64x128xf32> to vector<64x128xf32>
    %444 = arith.truncf %443 : vector<64x128xf32> to vector<64x128xbf16>
    %c0_466 = arith.constant 0 : index
    %c1024_467 = arith.constant 1024 : index
    %445 = vector.load %arg15[%c0_466, %c1024_467] : memref<128x1536xbf16, #tpu.memory_space<vmem>>, vector<64x128xbf16>
    tpu.vector_store %arg15[%c0_466, %c1024_467], %444 {strides = array<i32>} : memref<128x1536xbf16, #tpu.memory_space<vmem>>, vector<64x128xbf16>,
    %c0_468 = arith.constant 0 : index
    %c9_469 = arith.constant 9 : index
    %c0_470 = arith.constant 0 : index
    %446 = vector.load %arg14[%c0_468, %c9_469, %c0_470] : memref<2x74x128xf32, #tpu.memory_space<vmem>>, vector<1x64x128xf32>
    %447 = vector.shape_cast %446 : vector<1x64x128xf32> to vector<64x128xf32>
    %448 = arith.truncf %447 : vector<64x128xf32> to vector<64x128xbf16>
    %c0_471 = arith.constant 0 : index
    %c1152_472 = arith.constant 1152 : index
    %449 = vector.load %arg15[%c0_471, %c1152_472] : memref<128x1536xbf16, #tpu.memory_space<vmem>>, vector<64x128xbf16>
    tpu.vector_store %arg15[%c0_471, %c1152_472], %448 {strides = array<i32>} : memref<128x1536xbf16, #tpu.memory_space<vmem>>, vector<64x128xbf16>,
    %c0_473 = arith.constant 0 : index
    %c10_474 = arith.constant 10 : index
    %c0_475 = arith.constant 0 : index
    %450 = vector.load %arg14[%c0_473, %c10_474, %c0_475] : memref<2x74x128xf32, #tpu.memory_space<vmem>>, vector<1x64x128xf32>
    %451 = vector.shape_cast %450 : vector<1x64x128xf32> to vector<64x128xf32>
    %452 = arith.truncf %451 : vector<64x128xf32> to vector<64x128xbf16>
    %c0_476 = arith.constant 0 : index
    %c1280_477 = arith.constant 1280 : index
    %453 = vector.load %arg15[%c0_476, %c1280_477] : memref<128x1536xbf16, #tpu.memory_space<vmem>>, vector<64x128xbf16>
    tpu.vector_store %arg15[%c0_476, %c1280_477], %452 {strides = array<i32>} : memref<128x1536xbf16, #tpu.memory_space<vmem>>, vector<64x128xbf16>,
    %454 = arith.truncf %267 : vector<64x128xf32> to vector<64x128xbf16>
    %c0_478 = arith.constant 0 : index
    %c1408 = arith.constant 1408 : index
    %455 = vector.load %arg15[%c0_478, %c1408] : memref<128x1536xbf16, #tpu.memory_space<vmem>>, vector<64x128xbf16>
    tpu.vector_store %arg15[%c0_478, %c1408], %454 {strides = array<i32>} : memref<128x1536xbf16, #tpu.memory_space<vmem>>, vector<64x128xbf16>,
    %c1_479 = arith.constant 1 : index
    %c0_480 = arith.constant 0 : index
    %c0_481 = arith.constant 0 : index
    %456 = vector.load %arg14[%c1_479, %c0_480, %c0_481] : memref<2x74x128xf32, #tpu.memory_space<vmem>>, vector<1x64x128xf32>
    %457 = vector.shape_cast %456 : vector<1x64x128xf32> to vector<64x128xf32>
    %458 = arith.truncf %457 : vector<64x128xf32> to vector<64x128xbf16>
    %c64_482 = arith.constant 64 : index
    %c0_483 = arith.constant 0 : index
    %459 = vector.load %arg15[%c64_482, %c0_483] : memref<128x1536xbf16, #tpu.memory_space<vmem>>, vector<64x128xbf16>
    tpu.vector_store %arg15[%c64_482, %c0_483], %458 {strides = array<i32>} : memref<128x1536xbf16, #tpu.memory_space<vmem>>, vector<64x128xbf16>,
    %c1_484 = arith.constant 1 : index
    %c1_485 = arith.constant 1 : index
    %c0_486 = arith.constant 0 : index
    %460 = vector.load %arg14[%c1_484, %c1_485, %c0_486] : memref<2x74x128xf32, #tpu.memory_space<vmem>>, vector<1x64x128xf32>
    %461 = vector.shape_cast %460 : vector<1x64x128xf32> to vector<64x128xf32>
    %462 = arith.truncf %461 : vector<64x128xf32> to vector<64x128xbf16>
    %c64_487 = arith.constant 64 : index
    %c128_488 = arith.constant 128 : index
    %463 = vector.load %arg15[%c64_487, %c128_488] : memref<128x1536xbf16, #tpu.memory_space<vmem>>, vector<64x128xbf16>
    tpu.vector_store %arg15[%c64_487, %c128_488], %462 {strides = array<i32>} : memref<128x1536xbf16, #tpu.memory_space<vmem>>, vector<64x128xbf16>,
    %c1_489 = arith.constant 1 : index
    %c2_490 = arith.constant 2 : index
    %c0_491 = arith.constant 0 : index
    %464 = vector.load %arg14[%c1_489, %c2_490, %c0_491] : memref<2x74x128xf32, #tpu.memory_space<vmem>>, vector<1x64x128xf32>
    %465 = vector.shape_cast %464 : vector<1x64x128xf32> to vector<64x128xf32>
    %466 = arith.truncf %465 : vector<64x128xf32> to vector<64x128xbf16>
    %c64_492 = arith.constant 64 : index
    %c256_493 = arith.constant 256 : index
    %467 = vector.load %arg15[%c64_492, %c256_493] : memref<128x1536xbf16, #tpu.memory_space<vmem>>, vector<64x128xbf16>
    tpu.vector_store %arg15[%c64_492, %c256_493], %466 {strides = array<i32>} : memref<128x1536xbf16, #tpu.memory_space<vmem>>, vector<64x128xbf16>,
    %c1_494 = arith.constant 1 : index
    %c3_495 = arith.constant 3 : index
    %c0_496 = arith.constant 0 : index
    %468 = vector.load %arg14[%c1_494, %c3_495, %c0_496] : memref<2x74x128xf32, #tpu.memory_space<vmem>>, vector<1x64x128xf32>
    %469 = vector.shape_cast %468 : vector<1x64x128xf32> to vector<64x128xf32>
    %470 = arith.truncf %469 : vector<64x128xf32> to vector<64x128xbf16>
    %c64_497 = arith.constant 64 : index
    %c384_498 = arith.constant 384 : index
    %471 = vector.load %arg15[%c64_497, %c384_498] : memref<128x1536xbf16, #tpu.memory_space<vmem>>, vector<64x128xbf16>
    tpu.vector_store %arg15[%c64_497, %c384_498], %470 {strides = array<i32>} : memref<128x1536xbf16, #tpu.memory_space<vmem>>, vector<64x128xbf16>,
    %c1_499 = arith.constant 1 : index
    %c4_500 = arith.constant 4 : index
    %c0_501 = arith.constant 0 : index
    %472 = vector.load %arg14[%c1_499, %c4_500, %c0_501] : memref<2x74x128xf32, #tpu.memory_space<vmem>>, vector<1x64x128xf32>
    %473 = vector.shape_cast %472 : vector<1x64x128xf32> to vector<64x128xf32>
    %474 = arith.truncf %473 : vector<64x128xf32> to vector<64x128xbf16>
    %c64_502 = arith.constant 64 : index
    %c512_503 = arith.constant 512 : index
    %475 = vector.load %arg15[%c64_502, %c512_503] : memref<128x1536xbf16, #tpu.memory_space<vmem>>, vector<64x128xbf16>
    tpu.vector_store %arg15[%c64_502, %c512_503], %474 {strides = array<i32>} : memref<128x1536xbf16, #tpu.memory_space<vmem>>, vector<64x128xbf16>,
    %c1_504 = arith.constant 1 : index
    %c5_505 = arith.constant 5 : index
    %c0_506 = arith.constant 0 : index
    %476 = vector.load %arg14[%c1_504, %c5_505, %c0_506] : memref<2x74x128xf32, #tpu.memory_space<vmem>>, vector<1x64x128xf32>
    %477 = vector.shape_cast %476 : vector<1x64x128xf32> to vector<64x128xf32>
    %478 = arith.truncf %477 : vector<64x128xf32> to vector<64x128xbf16>
    %c64_507 = arith.constant 64 : index
    %c640_508 = arith.constant 640 : index
    %479 = vector.load %arg15[%c64_507, %c640_508] : memref<128x1536xbf16, #tpu.memory_space<vmem>>, vector<64x128xbf16>
    tpu.vector_store %arg15[%c64_507, %c640_508], %478 {strides = array<i32>} : memref<128x1536xbf16, #tpu.memory_space<vmem>>, vector<64x128xbf16>,
    %c1_509 = arith.constant 1 : index
    %c6_510 = arith.constant 6 : index
    %c0_511 = arith.constant 0 : index
    %480 = vector.load %arg14[%c1_509, %c6_510, %c0_511] : memref<2x74x128xf32, #tpu.memory_space<vmem>>, vector<1x64x128xf32>
    %481 = vector.shape_cast %480 : vector<1x64x128xf32> to vector<64x128xf32>
    %482 = arith.truncf %481 : vector<64x128xf32> to vector<64x128xbf16>
    %c64_512 = arith.constant 64 : index
    %c768_513 = arith.constant 768 : index
    %483 = vector.load %arg15[%c64_512, %c768_513] : memref<128x1536xbf16, #tpu.memory_space<vmem>>, vector<64x128xbf16>
    tpu.vector_store %arg15[%c64_512, %c768_513], %482 {strides = array<i32>} : memref<128x1536xbf16, #tpu.memory_space<vmem>>, vector<64x128xbf16>,
    %c1_514 = arith.constant 1 : index
    %c7_515 = arith.constant 7 : index
    %c0_516 = arith.constant 0 : index
    %484 = vector.load %arg14[%c1_514, %c7_515, %c0_516] : memref<2x74x128xf32, #tpu.memory_space<vmem>>, vector<1x64x128xf32>
    %485 = vector.shape_cast %484 : vector<1x64x128xf32> to vector<64x128xf32>
    %486 = arith.truncf %485 : vector<64x128xf32> to vector<64x128xbf16>
    %c64_517 = arith.constant 64 : index
    %c896_518 = arith.constant 896 : index
    %487 = vector.load %arg15[%c64_517, %c896_518] : memref<128x1536xbf16, #tpu.memory_space<vmem>>, vector<64x128xbf16>
    tpu.vector_store %arg15[%c64_517, %c896_518], %486 {strides = array<i32>} : memref<128x1536xbf16, #tpu.memory_space<vmem>>, vector<64x128xbf16>,
    %c1_519 = arith.constant 1 : index
    %c8_520 = arith.constant 8 : index
    %c0_521 = arith.constant 0 : index
    %488 = vector.load %arg14[%c1_519, %c8_520, %c0_521] : memref<2x74x128xf32, #tpu.memory_space<vmem>>, vector<1x64x128xf32>
    %489 = vector.shape_cast %488 : vector<1x64x128xf32> to vector<64x128xf32>
    %490 = arith.truncf %489 : vector<64x128xf32> to vector<64x128xbf16>
    %c64_522 = arith.constant 64 : index
    %c1024_523 = arith.constant 1024 : index
    %491 = vector.load %arg15[%c64_522, %c1024_523] : memref<128x1536xbf16, #tpu.memory_space<vmem>>, vector<64x128xbf16>
    tpu.vector_store %arg15[%c64_522, %c1024_523], %490 {strides = array<i32>} : memref<128x1536xbf16, #tpu.memory_space<vmem>>, vector<64x128xbf16>,
    %c1_524 = arith.constant 1 : index
    %c9_525 = arith.constant 9 : index
    %c0_526 = arith.constant 0 : index
    %492 = vector.load %arg14[%c1_524, %c9_525, %c0_526] : memref<2x74x128xf32, #tpu.memory_space<vmem>>, vector<1x64x128xf32>
    %493 = vector.shape_cast %492 : vector<1x64x128xf32> to vector<64x128xf32>
    %494 = arith.truncf %493 : vector<64x128xf32> to vector<64x128xbf16>
    %c64_527 = arith.constant 64 : index
    %c1152_528 = arith.constant 1152 : index
    %495 = vector.load %arg15[%c64_527, %c1152_528] : memref<128x1536xbf16, #tpu.memory_space<vmem>>, vector<64x128xbf16>
    tpu.vector_store %arg15[%c64_527, %c1152_528], %494 {strides = array<i32>} : memref<128x1536xbf16, #tpu.memory_space<vmem>>, vector<64x128xbf16>,
    %c1_529 = arith.constant 1 : index
    %c10_530 = arith.constant 10 : index
    %c0_531 = arith.constant 0 : index
    %496 = vector.load %arg14[%c1_529, %c10_530, %c0_531] : memref<2x74x128xf32, #tpu.memory_space<vmem>>, vector<1x64x128xf32>
    %497 = vector.shape_cast %496 : vector<1x64x128xf32> to vector<64x128xf32>
    %498 = arith.truncf %497 : vector<64x128xf32> to vector<64x128xbf16>
    %c64_532 = arith.constant 64 : index
    %c1280_533 = arith.constant 1280 : index
    %499 = vector.load %arg15[%c64_532, %c1280_533] : memref<128x1536xbf16, #tpu.memory_space<vmem>>, vector<64x128xbf16>
    tpu.vector_store %arg15[%c64_532, %c1280_533], %498 {strides = array<i32>} : memref<128x1536xbf16, #tpu.memory_space<vmem>>, vector<64x128xbf16>,
    %500 = arith.truncf %279 : vector<64x128xf32> to vector<64x128xbf16>
    %c64_534 = arith.constant 64 : index
    %c1408_535 = arith.constant 1408 : index
    %501 = vector.load %arg15[%c64_534, %c1408_535] : memref<128x1536xbf16, #tpu.memory_space<vmem>>, vector<64x128xbf16>
    tpu.vector_store %arg15[%c64_534, %c1408_535], %500 {strides = array<i32>} : memref<128x1536xbf16, #tpu.memory_space<vmem>>, vector<64x128xbf16>,
    %c0_536 = arith.constant 0 : index
    %c0_537 = arith.constant 0 : index
    %502 = vector.load %arg15[%c0_536, %c0_537] : memref<128x1536xbf16, #tpu.memory_space<vmem>>, vector<128x1536xbf16>
    %c0_538 = arith.constant 0 : index
    %c0_539 = arith.constant 0 : index
    %503 = vector.load %arg11[%c0_538, %c0_539] : memref<1536x128xbf16, #tpu.memory_space<vmem>>, vector<1536x128xbf16>
    %cst_540 = arith.constant dense<0.000000e+00> : vector<128x128xf32>
    %504 = tpu.matmul %502, %503, %cst_540 {dimension_numbers = #tpu.dot_dimension_numbers<[1], [0], [0], [1], [0, 0, 1, 1], [], []>} : vector<128x1536xbf16>, vector<1536x128xbf16>, vector<128x128xf32> -> vector<128x128xf32>
    %c0_541 = arith.constant 0 : index
    %c0_542 = arith.constant 0 : index
    %505 = vector.load %arg12[%c0_541, %c0_542] : memref<1x128xf32, #tpu.memory_space<vmem>>, vector<1x128xf32>
    %506 = vector.broadcast %505 : vector<1x128xf32> to vector<128x128xf32>
    %507 = arith.addf %504, %506 : vector<128x128xf32>
    %cst_543 = arith.constant 0.000000e+00 : f32
    %508 = vector.broadcast %cst_543 : f32 to vector<128x128xf32>
    %509 = arith.maximumf %507, %508 : vector<128x128xf32>
    %510 = vector.extract_strided_slice %509 {offsets = [0, 0], sizes = [64, 128], strides = [1, 1]} : vector<128x128xf32> to vector<64x128xf32>
    %c0_544 = arith.constant 0 : index
    %c0_545 = arith.constant 0 : index
    %c0_546 = arith.constant 0 : index
    %511 = vector.load %arg13[%c0_544, %c0_545, %c0_546] : memref<2x64x128xf32, #tpu.memory_space<vmem>>, vector<1x64x128xf32>
    %512 = vector.shape_cast %511 : vector<1x64x128xf32> to vector<64x128xf32>
    %513 = vector.shape_cast %510 : vector<64x128xf32> to vector<1x64x128xf32>
    tpu.vector_store %arg13[%c0_544, %c0_545, %c0_546], %513 {strides = array<i32>} : memref<2x64x128xf32, #tpu.memory_space<vmem>>, vector<1x64x128xf32>,
    %514 = vector.extract_strided_slice %509 {offsets = [64, 0], sizes = [64, 128], strides = [1, 1]} : vector<128x128xf32> to vector<64x128xf32>
    %c1_547 = arith.constant 1 : index
    %c0_548 = arith.constant 0 : index
    %c0_549 = arith.constant 0 : index
    %515 = vector.load %arg13[%c1_547, %c0_548, %c0_549] : memref<2x64x128xf32, #tpu.memory_space<vmem>>, vector<1x64x128xf32>
    %516 = vector.shape_cast %515 : vector<1x64x128xf32> to vector<64x128xf32>
    %517 = vector.shape_cast %514 : vector<64x128xf32> to vector<1x64x128xf32>
    tpu.vector_store %arg13[%c1_547, %c0_548, %c0_549], %517 {strides = array<i32>} : memref<2x64x128xf32, #tpu.memory_space<vmem>>, vector<1x64x128xf32>,
    return
  }
  func.func @transform_0(%arg0: i32, %arg1: memref<2xi32, #tpu.memory_space<smem>>) -> (i32, i32, i32) {
    %c0_i32 = arith.constant 0 : i32
    %c0_i32_0 = arith.constant 0 : i32
    %c0_i32_1 = arith.constant 0 : i32
    %c0_i32_2 = arith.constant 0 : i32
    return %c0_i32, %c0_i32_0, %c0_i32_1 : i32, i32, i32
  }
  func.func @transform_1(%arg0: i32, %arg1: memref<2xi32, #tpu.memory_space<smem>>) -> (i32, i32) {
    %c0_i32 = arith.constant 0 : i32
    %c0_i32_0 = arith.constant 0 : i32
    %c0_i32_1 = arith.constant 0 : i32
    return %c0_i32, %c0_i32_0 : i32, i32
  }
  func.func @transform_2(%arg0: i32, %arg1: memref<2xi32, #tpu.memory_space<smem>>) -> (i32, i32) {
    %c0_i32 = arith.constant 0 : i32
    %c0_i32_0 = arith.constant 0 : i32
    %c0_i32_1 = arith.constant 0 : i32
    return %c0_i32, %c0_i32_0 : i32, i32
  }
  func.func @transform_3(%arg0: i32, %arg1: memref<2xi32, #tpu.memory_space<smem>>) -> (i32, i32) {
    %c0_i32 = arith.constant 0 : i32
    %c0_i32_0 = arith.constant 0 : i32
    %c0_i32_1 = arith.constant 0 : i32
    return %c0_i32, %c0_i32_0 : i32, i32
  }
  func.func @transform_4(%arg0: i32, %arg1: memref<2xi32, #tpu.memory_space<smem>>) -> (i32, i32) {
    %c0_i32 = arith.constant 0 : i32
    %c0_i32_0 = arith.constant 0 : i32
    %c0_i32_1 = arith.constant 0 : i32
    return %c0_i32, %c0_i32_0 : i32, i32
  }
  func.func @transform_5(%arg0: i32, %arg1: memref<2xi32, #tpu.memory_space<smem>>) -> (i32, i32) {
    %c0_i32 = arith.constant 0 : i32
    %c0_i32_0 = arith.constant 0 : i32
    %c0_i32_1 = arith.constant 0 : i32
    return %c0_i32, %c0_i32_0 : i32, i32
  }
  func.func @transform_6(%arg0: i32, %arg1: memref<2xi32, #tpu.memory_space<smem>>) -> (i32, i32) {
    %c0_i32 = arith.constant 0 : i32
    %c0_i32_0 = arith.constant 0 : i32
    %c0_i32_1 = arith.constant 0 : i32
    return %c0_i32, %c0_i32_0 : i32, i32
  }
  func.func @transform_7(%arg0: i32, %arg1: memref<2xi32, #tpu.memory_space<smem>>) -> (i32, i32) {
    %c0_i32 = arith.constant 0 : i32
    %c0_i32_0 = arith.constant 0 : i32
    %c0_i32_1 = arith.constant 0 : i32
    return %c0_i32, %c0_i32_0 : i32, i32
  }
  func.func @transform_8(%arg0: i32, %arg1: memref<2xi32, #tpu.memory_space<smem>>) -> (i32, i32) {
    %c0_i32 = arith.constant 0 : i32
    %c0_i32_0 = arith.constant 0 : i32
    %c0_i32_1 = arith.constant 0 : i32
    return %c0_i32, %c0_i32_0 : i32, i32
  }
  func.func @transform_9(%arg0: i32, %arg1: memref<2xi32, #tpu.memory_space<smem>>) -> (i32, i32) {
    %c0_i32 = arith.constant 0 : i32
    %c0_i32_0 = arith.constant 0 : i32
    %c0_i32_1 = arith.constant 0 : i32
    return %c0_i32, %c0_i32_0 : i32, i32
  }
  func.func @transform_10(%arg0: i32, %arg1: memref<2xi32, #tpu.memory_space<smem>>) -> (i32, i32) {
    %c0_i32 = arith.constant 0 : i32
    %c0_i32_0 = arith.constant 0 : i32
    %c0_i32_1 = arith.constant 0 : i32
    return %c0_i32, %c0_i32_0 : i32, i32
  }
  func.func @transform_11(%arg0: i32, %arg1: memref<2xi32, #tpu.memory_space<smem>>) -> (i32, i32, i32) {
    %c0_i32 = arith.constant 0 : i32
    %c0_i32_0 = arith.constant 0 : i32
    %c0_i32_1 = arith.constant 0 : i32
    %c0_i32_2 = arith.constant 0 : i32
    return %c0_i32, %c0_i32_0, %c0_i32_1 : i32, i32, i32
  }
}

</mosaic_0001>

<bundles_post_ra>
// kernel: _lambda_.1
= control target key start
LH: loop header
LB: loop body
LE: loop exit
PB: predicated region body
PF: predicated region fallthrough
CT: control target
= control target key end

     0   :  { %s18169_s0 = inlined_call_operand.vmem [shape: s32[2], index: 0, kind: input, shape index: {}]   ;;  %s18170_s1 = inlined_call_operand.vmem [shape: f32[2,64,128], index: 1, kind: input, shape index: {}]   ;;  %s18171_s2 = inlined_call_operand.hbm [shape: bf16[640,128], index: 2, kind: input, shape index: {}]   ;;  %s18172_s3 = inlined_call_operand.vmem [shape: f32[1,128], index: 3, kind: input, shape index: {}]   ;;  %s18173_s4 = inlined_call_operand.vmem [shape: bf16[896,128], index: 4, kind: input, shape index: {}]   ;;  %s18174_s5 = inlined_call_operand.vmem [shape: f32[1,128], index: 5, kind: input, shape index: {}]   ;;  %s18175_s6 = inlined_call_operand.hbm [shape: bf16[1024,128], index: 6, kind: input, shape index: {}]   ;;  %s18176_s7 = inlined_call_operand.vmem [shape: f32[1,128], index: 7, kind: input, shape index: {}]   ;;  %s18177_s8 = inlined_call_operand.hbm [shape: bf16[1408,128], index: 8, kind: input, shape index: {}]   ;;  %s18178_s9 = inlined_call_operand.vmem [shape: f32[1,128], index: 9, kind: input, shape index: {}]   ;;  %s18179_s10 = inlined_call_operand.hbm [shape: bf16[1536,128], index: 10, kind: input, shape index: {}]   ;;  %s18180_s11 = inlined_call_operand.vmem [shape: f32[1,128], index: 11, kind: input, shape index: {}]   ;;  %s18181_s12 = inlined_call_operand.vmem [shape: f32[2,64,128], index: 12, kind: output, shape index: {}]  }
   0x1   :  { %s17_s23 = sshll.u32 %s18169_s0, 4  ;;  %s18_s23 = int_to_ptr.vmem [resolvable:$true] %s17_s23 }
   0x2   :  { %s16041_s24 = scalar_lea.vmem %s18_s23, 16  ;;  %p16046_p1 = scmp.lt.s32.totalorder %s18_s23, %s18_s23 }
   0x3   :  { %p16042_p0 = scmp.ne.s32.totalorder %s18_s23, %s16041_s24  ;;  %p16047_p2 = scmp.lt.s32.totalorder %s16041_s24, %s16041_s24 }
   0x5   :  { %p16048_p3 = por %p16047_p2, %p16046_p1 }
   0x7   :  { %p16049_p4 = pnand %p16048_p3, %p16042_p0 }
   0x9   :  { %16052 = shalt.err (!%p16049_p4)  }
   0xa   :  { %s16141_s25 = smov [#allocation5]  }
   0xb   :  { %20 = dma.vmem_to_smem %s18_s23, 16, %s16141_s25, [#allocation4] }
   0xc   :  { %16133 = dma.done.wait [#allocation4], 16 }
   0xd   :  { %16134 = vsyncadd [#allocation4], 4294967280 }
   0xe   :  { %22 = sfence }
   0xf   :  { %23 = vsyncpa [#allocation7], 0 }
  0x10   :  { %24 = vsyncpa [#allocation9], 0 }
  0x11   :  { %25 = vsyncpa [#allocation12], 0  ;;  %s16142_s26 = smov [#allocation8]   ;;  %s16143_s28 = smov [#allocation6]  }
  0x12   :  { %s51_s27 = sshll.u32 %s16142_s26, 4  ;;  %s33_s0 = sshll.u32 %s16143_s28, 4  ;;  %s52_s27 = int_to_ptr.vmem [resolvable:$true] %s51_s27  ;;  %s34_s0 = int_to_ptr.vmem [resolvable:$true] %s33_s0 }
  0x13   :  { %s16061_s29 = scalar_lea.vmem %s52_s27, 8192  ;;  %p16066_p6 = scmp.lt.s32.totalorder %s52_s27, %s52_s27 }
  0x14   :  { %p16062_p5 = scmp.ne.s32.totalorder %s52_s27, %s16061_s29  ;;  %p16067_p7 = scmp.lt.s32.totalorder %s16061_s29, %s16061_s29 }
  0x16   :  { %p16068_p8 = por %p16067_p7, %p16066_p6 }
  0x18   :  { %p16069_p9 = pnand %p16068_p8, %p16062_p5 }
  0x1a   :  { %16072 = shalt.err (!%p16069_p9)
}
  0x1b   :  { %s16144_s30 = smov 64   ;;  %s16145_s13 = smov 4  }
  0x1c   :  { %57 = dma.hbm_to_vmem [thread:$0]  %s18175_s6, 8192, %s52_s27, [#allocation9], %s16144_s30, %s16144_s30, %s16145_s13  }
  0x1d   :  { %s16081_s16 = scalar_lea.vmem %s34_s0, 5120  ;;  %p16086_p11 = scmp.lt.s32.totalorder %s34_s0, %s34_s0 }
  0x1e   :  { %p16082_p10 = scmp.ne.s32.totalorder %s34_s0, %s16081_s16  ;;  %p16087_p12 = scmp.lt.s32.totalorder %s16081_s16, %s16081_s16 }
  0x20   :  { %p16088_p13 = por %p16087_p12, %p16086_p11 }
  0x22   :  { %p16089_p0 = pnand %p16088_p13, %p16082_p10 }
  0x24   :  { %16092 = shalt.err (!%p16089_p0)
}
  0x25   :  { %39 = dma.hbm_to_vmem [thread:$0]  %s18171_s2, 5120, %s34_s0, [#allocation7], %s16144_s30, %s16144_s30, %s16145_s13  }
  0x26   :  { %s16146_s19 = smov [#allocation10]   ;;  %s16147_s21 = smov [#allocation11]  }
  0x27   :  { %s65_s20 = sshll.u32 %s16146_s19, 4  ;;  %s79_s22 = sshll.u32 %s16147_s21, 4  ;;  %s66_s20 = int_to_ptr.vmem [resolvable:$true] %s65_s20  ;;  %s80_s22 = int_to_ptr.vmem [resolvable:$true] %s79_s22 }
  0x28   :  { %s16101_s6 = scalar_lea.vmem %s66_s20, 11264  ;;  %p16106_p2 = scmp.lt.s32.totalorder %s66_s20, %s66_s20 }
  0x29   :  { %p16102_p1 = scmp.ne.s32.totalorder %s66_s20, %s16101_s6  ;;  %p16107_p3 = scmp.lt.s32.totalorder %s16101_s6, %s16101_s6 }
  0x2b   :  { %p16108_p4 = por %p16107_p3, %p16106_p2 }
  0x2d   :  { %p16109_p5 = pnand %p16108_p4, %p16102_p1 }
  0x2f   :  { %16112 = shalt.err (!%p16109_p5)
}
  0x30   :  { %71 = dma.hbm_to_vmem [thread:$0]  %s18177_s8, 11264, %s66_s20, [#allocation9], %s16144_s30, %s16144_s30, %s16145_s13  }
  0x31   :  { %s16121_s2 = scalar_lea.vmem %s80_s22, 12288  ;;  %p16126_p7 = scmp.lt.s32.totalorder %s80_s22, %s80_s22 }
  0x32   :  { %p16122_p6 = scmp.ne.s32.totalorder %s80_s22, %s16121_s2  ;;  %p16127_p8 = scmp.lt.s32.totalorder %s16121_s2, %s16121_s2 }
  0x34   :  { %p16128_p9 = por %p16127_p8, %p16126_p7 }
  0x36   :  { %p16129_p10 = pnand %p16128_p9, %p16122_p6 }
  0x38   :  { %16132 = shalt.err (!%p16129_p10)
}
  0x39   :  { %85 = dma.hbm_to_vmem [thread:$0]  %s18179_s10, 12288, %s80_s22, [#allocation12], %s16144_s30, %s16144_s30, %s16145_s13  }
  0x3a   :  { %16135 = dma.done.wait [#allocation7], 5120  }
  0x3b   :  { %16136 = vsyncadd [#allocation7], 4294962176 }
  0x3c   :  { %16137 = dma.done.wait [#allocation9], 19456  }
  0x3d   :  { %16138 = vsyncadd [#allocation9], 4294947840 }
  0x3e   :  { %16139 = dma.done.wait [#allocation12], 12288  }
  0x3f   :  { %16140 = vsyncadd [#allocation12], 4294955008  ;;  %v18182_v0 = vmov 0.0   ;;  %s16245_s8 = sld [smem:[#allocation5]]  ;;  %v15192_v1 = vld [vmem:[#allocation6 + $0x78] sm:$0xff]   ;;  %v15196_v5 = vld [vmem:[#allocation6 + $0x70] sm:$0xff]   ;;  %v101_v19 = vlaneseq }
  0x40   :  { %146 = vst [vmem:[#allocation2] sm:$0x3] %v18182_v0  ;;  %147 = vst [vmem:[#allocation2 + $0x42] sm:$0x3] %v18182_v0  ;;  %s16247_s27 = sld [smem:[#allocation5 + $0x1]]  ;;  %v15193_v2 = vld [vmem:[#allocation6 + $0x38] sm:$0xff]   ;;  %13744 = vmatprep.subr.bf16.mxu0 %v15192_v1 }
  0x41   :  { %174 = vst [vmem:[#allocation2 + $0x50] sm:$0x3] %v18182_v0  ;;  %175 = vst [vmem:[#allocation2 + $0x92] sm:$0x3] %v18182_v0  ;;  %v15194_v3 = vld [vmem:[#allocation6 + $0xf8] sm:$0xff]   ;;  %13745 = vmatpush3.bf16.msra.mxu0 %v15193_v2  ;;  %v15197_v6 = vld [vmem:[#allocation6 + $0x30] sm:$0xff]  }
  0x42   :  { %v15195_v4 = vld [vmem:[#allocation6 + $0xb8] sm:$0xff]   ;;  %13808 = vmatprep.subr.bf16.mxu1 %v15194_v3  ;;  %13746 = vmatprep.subr.bf16.mxu0 %v15196_v5  ;;  %v15198_v7 = vld [vmem:[#allocation6 + $0xf0] sm:$0xff]   ;;  %v15200_v9 = vld [vmem:[#allocation6 + $0x68] sm:$0xff]   ;;  %v16249_v24 = vshrl.u32 %v101_v19, 7  ;;  %v18220_v38 = vmov 0  ;;  %v18223_v39 = vmov 0 }
  0x43   :  { %13809 = vmatpush3.bf16.msra.mxu1 %v15195_v4  ;;  %v15199_v8 = vld [vmem:[#allocation6 + $0xb0] sm:$0xff]   ;;  %v15201_v10 = vld [vmem:[#allocation6 + $0x28] sm:$0xff]   ;;  %v15204_v13 = vld [vmem:[#allocation6 + $0x60] sm:$0xff]   ;;  %v18226_v44 = vmov 0  ;;  %v18229_v51 = vmov 0  ;;  %v18232_v55 = vmov 0 }
  0x44   :  { %13810 = vmatprep.subr.bf16.mxu1 %v15198_v7  ;;  %v15202_v11 = vld [vmem:[#allocation6 + $0xe8] sm:$0xff]   ;;  %v15205_v14 = vld [vmem:[#allocation6 + $0x20] sm:$0xff]   ;;  %v15208_v17 = vld [vmem:[#allocation6 + $0x58] sm:$0xff]   ;;  %v16252_v29 = vadd.s32 8, %v16249_v24  ;;  %v16256_v32 = vadd.s32 16, %v16249_v24  ;;  %v16259_v34 = vadd.s32 24, %v16249_v24 }
  0x45   :  { %13747 = vmatpush3.bf16.msra.mxu0 %v15197_v6  ;;  %v15203_v12 = vld [vmem:[#allocation6 + $0xa8] sm:$0xff]   ;;  %v15206_v15 = vld [vmem:[#allocation6 + $0xe0] sm:$0xff]   ;;  %v15209_v18 = vld [vmem:[#allocation6 + $0x18] sm:$0xff]   ;;  %v111_v31 = vstv %s16245_s8  ;;  %v16262_v36 = vadd.s32 32, %v16249_v24  ;;  %v16275_v40 = vadd.s32 40, %v16249_v24  ;;  %v16289_v45 = vadd.s32 48, %v16249_v24 }
  0x46   :  { %13748 = vmatprep.subr.bf16.mxu0 %v15200_v9  ;;  %v15207_v16 = vld [vmem:[#allocation6 + $0xa0] sm:$0xff]   ;;  %v15210_v20 = vld [vmem:[#allocation6 + $0xd8] sm:$0xff]   ;;  %v15212_v22 = vld [vmem:[#allocation6 + $0x50] sm:$0xff]   ;;  %vm16265_vm0 = vcmp.lt.s32.totalorder %v16249_v24, %v111_v31  ;;  %vm16270_vm1 = vcmp.lt.s32.totalorder %v16252_v29, %v111_v31  ;;  %vm16284_vm2 = vcmp.lt.s32.totalorder %v16256_v32, %v111_v31  ;;  %v16292_v46 = vadd.s32 56, %v16249_v24 }
  0x47   :  { %13811 = vmatpush3.bf16.msra.mxu1 %v15199_v8  ;;  %v15211_v21 = vld [vmem:[#allocation6 + $0x98] sm:$0xff]   ;;  %v15213_v23 = vld [vmem:[#allocation6 + $0x10] sm:$0xff]   ;;  %v15216_v27 = vld [vmem:[#allocation6 + $0x48] sm:$0xff]   ;;  %v18221_v38 = vsel %vm16265_vm0, 4294967295, %v18220_v38  ;;  %v18224_v39 = vsel %vm16270_vm1, 4294967295, %v18223_v39  ;;  %v18227_v44 = vsel %vm16284_vm2, 4294967295, %v18226_v44  ;;  %vm16301_vm3 = vcmp.lt.s32.totalorder %v16259_v34, %v111_v31 }
  0x48   :  { %13812 = vmatprep.subr.bf16.mxu1 %v15202_v11  ;;  %v15214_v25 = vld [vmem:[#allocation6 + $0xd0] sm:$0xff]   ;;  %v15217_v28 = vld [vmem:[#allocation6 + $0x8] sm:$0xff]   ;;  %v15220_v35 = vld [vmem:[#allocation6 + $0x40] sm:$0xff]   ;;  %18222 = vst [vmem:[#allocation17_spill] sm:$0xff] %v18221_v38  ;;  %v18230_v51 = vsel %vm16301_vm3, 4294967295, %v18229_v51  ;;  %vm16309_vm4 = vcmp.lt.s32.totalorder %v16262_v36, %v111_v31  ;;  %vm16314_vm5 = vcmp.lt.s32.totalorder %v16275_v40, %v111_v31  ;;  %v18235_v56 = vmov 0 }
  0x49   :  { %13749 = vmatpush3.bf16.msra.mxu0 %v15201_v10  ;;  %v15215_v26 = vld [vmem:[#allocation6 + $0x90] sm:$0xff]   ;;  %v15218_v30 = vld [vmem:[#allocation6 + $0xc8] sm:$0xff]   ;;  %v15221_v37 = vld [vmem:[#allocation6] sm:$0xff]   ;;  %18225 = vst [vmem:[#allocation18_spill] sm:$0xff] %v18224_v39  ;;  %v18233_v55 = vsel %vm16309_vm4, 4294967295, %v18232_v55  ;;  %v18236_v56 = vsel %vm16314_vm5, 4294967295, %v18235_v56  ;;  %v16325_v59 = vstv %s16247_s27  ;;  %vm16336_vm6 = vcmp.lt.s32.totalorder %v16289_v45, %v111_v31 }
  0x4a   :  { %13750 = vmatprep.subr.bf16.mxu0 %v15204_v13  ;;  %v15219_v33 = vld [vmem:[#allocation6 + $0x88] sm:$0xff]   ;;  %v15222_v41 = vld [vmem:[#allocation6 + $0xc0] sm:$0xff]   ;;  %18228 = vst [vmem:[#allocation19_spill] sm:$0xff] %v18227_v44  ;;  %v16298_v50 = vld [vmem:[#allocation6 + $0x138] sm:$0xff]   ;;  %v18238_v1 = vmov 0  ;;  %vm16341_vm7 = vcmp.lt.s32.totalorder %v16292_v46, %v111_v31  ;;  %v18241_v2 = vmov 0  ;;  %vm16357_vm8 = vcmp.lt.s32.totalorder %v16249_v24, %v16325_v59 }
  0x4b   :  { %13813 = vmatpush3.bf16.msra.mxu1 %v15203_v12  ;;  %v130_v42 = vld [vmem:[%s18170_s1] sm:$0xff]  ;;  %v131_v43 = vld [vmem:[%s18170_s1 + $0x8] sm:$0xff]  ;;  %18231 = vst [vmem:[#allocation20_spill] sm:$0xff] %v18230_v51  ;;  %v132_v52 = vld [vmem:[%s18170_s1 + $0x10] sm:$0xff]  ;;  %v18239_v1 = vsel %vm16336_vm6, 4294967295, %v18238_v1  ;;  %v18242_v2 = vsel %vm16341_vm7, 4294967295, %v18241_v2  ;;  %vm16363_vm9 = vcmp.lt.s32.totalorder %v16252_v29, %v16325_v59  ;;  %vm16384_vm10 = vcmp.lt.s32.totalorder %v16256_v32, %v16325_v59 }
  0x4c   :  { %13814 = vmatprep.subr.bf16.mxu1 %v15206_v15  ;;  %v138_v47 = vsel %vm16265_vm0, %v130_v42, 0.0  ;;  %v139_v48 = vsel %vm16270_vm1, %v131_v43, 0.0  ;;  %v15225_v49 = vld [vmem:[#allocation6 + $0x80] sm:$0xff]   ;;  %18234 = vst [vmem:[#allocation21_spill] sm:$0xff] %v18233_v55  ;;  %18237 = vst [vmem:[#allocation22_spill] sm:$0xff] %v18236_v56  ;;  %v140_v57 = vsel %vm16284_vm2, %v132_v52, 0.0  ;;  %vm16397_vm11 = vcmp.lt.s32.totalorder %v16259_v34, %v16325_v59 }
  0x4d   :  { %13751 = vmatpush3.bf16.msra.mxu0 %v15205_v14  ;;  %148 = vst [vmem:[#allocation2 + $0x2] sm:$0xff] %v138_v47  ;;  %149 = vst [vmem:[#allocation2 + $0xa] sm:$0xff] %v139_v48  ;;  %v13072_v53 = vpack.c.bf16 %v138_v47, %v138_v47  ;;  %v13073_v54 = vpack.c.bf16 %v139_v48, %v139_v48  ;;  %v133_v58 = vld [vmem:[%s18170_s1 + $0x18] sm:$0xff]  ;;  %v134_v61 = vld [vmem:[%s18170_s1 + $0x20] sm:$0xff]  ;;  %v13074_v62 = vpack.c.bf16 %v140_v57, %v140_v57  ;;  %v18244_v10 = vmov 0 }
  0x4e   :  { %13752 = vmatprep.subr.bf16.mxu0 %v15208_v17  ;;  %150 = vst [vmem:[#allocation2 + $0x12] sm:$0xff] %v140_v57  ;;  %v141_v60 = vsel %vm16301_vm3, %v133_v58, 0.0  ;;  %v135_v63 = vld [vmem:[%s18170_s1 + $0x28] sm:$0xff]  ;;  %18240 = vst [vmem:[#allocation23_spill] sm:$0xff] %v18239_v1  ;;  %v142_v3 = vsel %vm16309_vm4, %v134_v61, 0.0  ;;  %v136_v6 = vld [vmem:[%s18170_s1 + $0x30] sm:$0xff]  ;;  %vm16408_vm12 = vcmp.lt.s32.totalorder %v16262_v36, %v16325_v59  ;;  %vm16414_vm13 = vcmp.lt.s32.totalorder %v16275_v40, %v16325_v59 }
  0x4f   :  { %13815 = vmatpush3.bf16.msra.mxu1 %v15207_v16  ;;  %320 = vst [vmem:[#allocation3 + $0x8] sm:$0xf] %v13072_v53  ;;  %321 = vst [vmem:[#allocation3 + $0x38] sm:$0xf] %v13073_v54  ;;  %v13075_v4 = vpack.c.bf16 %v141_v60, %v141_v60  ;;  %v143_v5 = vsel %vm16314_vm5, %v135_v63, 0.0  ;;  %v13076_v7 = vpack.c.bf16 %v142_v3, %v142_v3  ;;  %v137_v9 = vld [vmem:[%s18170_s1 + $0x38] sm:$0xff] }
  0x50   :  { %13816 = vmatprep.subr.bf16.mxu1 %v15210_v20  ;;  %18243 = vst [vmem:[#allocation24_spill] sm:$0xff] %v18242_v2  ;;  %151 = vst [vmem:[#allocation2 + $0x1a] sm:$0xff] %v141_v60  ;;  %v13077_v8 = vpack.c.bf16 %v143_v5, %v143_v5  ;;  %v18245_v10 = vsel %vm16357_vm8, 4294967295, %v18244_v10  ;;  %v18247_v11 = vmov 0  ;;  %v144_v12 = vsel %vm16336_vm6, %v136_v6, 0.0  ;;  %v11659_v16 = vld [vmem:[%s18170_s1 + $0x40] sm:$0xff] }
  0x51   :  { %13753 = vmatpush3.bf16.msra.mxu0 %v15209_v18  ;;  %152 = vst [vmem:[#allocation2 + $0x22] sm:$0xff] %v142_v3  ;;  %322 = vst [vmem:[#allocation3 + $0x68] sm:$0xf] %v13074_v62  ;;  %v18248_v11 = vsel %vm16363_vm9, 4294967295, %v18247_v11  ;;  %v145_v13 = vsel %vm16341_vm7, %v137_v9, 0.0  ;;  %v13078_v14 = vpack.c.bf16 %v144_v12, %v144_v12  ;;  %v11660_v17 = vld [vmem:[%s18170_s1 + $0x48] sm:$0xff]  ;;  %vm16428_vm14 = vcmp.lt.s32.totalorder %v16289_v45, %v16325_v59 }
  0x52   :  { %13754 = vmatprep.subr.bf16.mxu0 %v15212_v22  ;;  %153 = vst [vmem:[#allocation2 + $0x2a] sm:$0xff] %v143_v5  ;;  %18246 = vst [vmem:[#allocation25_spill] sm:$0xff] %v18245_v10  ;;  %v13079_v15 = vpack.c.bf16 %v145_v13, %v145_v13  ;;  %v166_v22 = vsel %vm16363_vm9, %v11660_v17, 0.0  ;;  %v11661_v32 = vld [vmem:[%s18170_s1 + $0x50] sm:$0xff]  ;;  %v18256_v34 = vmov 0  ;;  %v11663_v40 = vld [vmem:[%s18170_s1 + $0x60] sm:$0xff]  ;;  %vm16434_vm15 = vcmp.lt.s32.totalorder %v16292_v46, %v16325_v59 }
  0x53   :  { %13817 = vmatpush3.bf16.msra.mxu1 %v15211_v21  ;;  %18249 = vst [vmem:[#allocation26_spill] sm:$0xff] %v18248_v11  ;;  %323 = vst [vmem:[#allocation3 + $0x98] sm:$0xf] %v13075_v4  ;;  %v165_v21 = vsel %vm16357_vm8, %v11659_v16, 0.0  ;;  %v18257_v34 = vsel %vm16408_vm12, 4294967295, %v18256_v34  ;;  %v11665_v45 = vld [vmem:[%s18170_s1 + $0x70] sm:$0xff] }
  0x54   :  { %13818 = vmatprep.subr.bf16.mxu1 %v15214_v25  ;;  %154 = vst [vmem:[#allocation2 + $0x32] sm:$0xff] %v144_v12  ;;  %324 = vst [vmem:[#allocation3 + $0xc8] sm:$0xf] %v13076_v7  ;;  %v184_v18 = vld [vmem:[#allocation2] sm:$0xff]  ;;  %v185_v19 = vld [vmem:[#allocation2 + $0x8] sm:$0xff] }
  0x55   :  { %13755 = vmatpush3.bf16.msra.mxu0 %v15213_v23  ;;  %325 = vst [vmem:[#allocation3 + $0xf8] sm:$0xf] %v13077_v8  ;;  %155 = vst [vmem:[#allocation2 + $0x3a] sm:$0xff] %v145_v13  ;;  %v232_v20 = vld [vmem:[#allocation2 + $0x1] sm:$0xff]  ;;  %v13056_v23 = vpack.c.bf16 %v184_v18, %v184_v18  ;;  %v13057_v24 = vpack.c.bf16 %v185_v19, %v185_v19  ;;  %v233_v25 = vld [vmem:[#allocation2 + $0x9] sm:$0xff] }
  0x56   :  { %13756 = vmatprep.subr.bf16.mxu0 %v15216_v27  ;;  %v328_v27 = vld [vmem:[#allocation2 + $0x3] sm:$0xff]  ;;  %1562 = vst [vmem:[#allocation2] sm:$0x7] %v18182_v0  ;;  %326 = vst [vmem:[#allocation3 + $0x128] sm:$0xf] %v13078_v14  ;;  %v13065_v29 = vpack.c.bf16 %v233_v25, %v233_v25 }
  0x57   :  { %13819 = vmatpush3.bf16.msra.mxu1 %v15215_v26  ;;  %v13064_v26 = vpack.c.bf16 %v232_v20, %v232_v20  ;;  %327 = vst [vmem:[#allocation3 + $0x158] sm:$0xf] %v13079_v15  ;;  %176 = vst [vmem:[#allocation2 + $0x52] sm:$0xff] %v165_v21  ;;  %v13080_v31 = vpack.c.bf16 %v328_v27, %v328_v27  ;;  %v187_v42 = vld [vmem:[#allocation2 + $0x18] sm:$0xff]  ;;  %v16591_v10 = vld [vmem:[%s18172_s3] ss:$0 sm:$0xff] }
  0x58   :  { %13820 = vmatprep.subr.bf16.mxu1 %v15218_v30  ;;  %177 = vst [vmem:[#allocation2 + $0x5a] sm:$0xff] %v166_v22  ;;  %v329_v30 = vld [vmem:[#allocation2 + $0xb] sm:$0xff]  ;;  %224 = vst [vmem:[#allocation3] sm:$0xf] %v13056_v23  ;;  %v235_v47 = vld [vmem:[#allocation2 + $0x19] sm:$0xff]  ;;  %v13059_v52 = vpack.c.bf16 %v187_v42, %v187_v42 }
  0x59   :  { %13757 = vmatpush3.bf16.msra.mxu0 %v15217_v28  ;;  %v13112_v28 = vpack.c.bf16 %v165_v21, %v165_v21  ;;  %225 = vst [vmem:[#allocation3 + $0x30] sm:$0xf] %v13057_v24  ;;  %272 = vst [vmem:[#allocation3 + $0x4] sm:$0xf] %v13064_v26  ;;  %v13067_v53 = vpack.c.bf16 %v235_v47, %v235_v47  ;;  %v331_v54 = vld [vmem:[#allocation2 + $0x1b] sm:$0xff]  ;;  %v189_v60 = vld [vmem:[#allocation2 + $0x28] sm:$0xff] }
  0x5a   :  { %13758 = vmatprep.subr.bf16.mxu0 %v15220_v35  ;;  %v234_v35 = vld [vmem:[#allocation2 + $0x11] sm:$0xff]  ;;  %273 = vst [vmem:[#allocation3 + $0x34] sm:$0xf] %v13065_v29  ;;  %368 = vst [vmem:[#allocation3 + $0xc] sm:$0xf] %v13080_v31  ;;  %v188_v58 = vld [vmem:[#allocation2 + $0x20] sm:$0xff]  ;;  %v13083_v61 = vpack.c.bf16 %v331_v54, %v331_v54  ;;  %v13061_v63 = vpack.c.bf16 %v189_v60, %v189_v60 }
  0x5b   :  { %13821 = vmatpush3.bf16.msra.mxu1 %v15219_v33  ;;  %v186_v33 = vld [vmem:[#allocation2 + $0x10] sm:$0xff]  ;;  %v13066_v48 = vpack.c.bf16 %v234_v35, %v234_v35  ;;  %560 = vst [vmem:[#allocation3 + $0x188] sm:$0xf] %v13112_v28  ;;  %v13060_v62 = vpack.c.bf16 %v188_v58, %v188_v58  ;;  %v236_v3 = vld [vmem:[#allocation2 + $0x21] sm:$0xff]  ;;  %227 = vst [vmem:[#allocation3 + $0x90] sm:$0xf] %v13059_v52 }
  0x5c   :  { %13822 = vmatprep.subr.bf16.mxu1 %v15222_v41  ;;  %v13081_v41 = vpack.c.bf16 %v329_v30, %v329_v30  ;;  %v13058_v43 = vpack.c.bf16 %v186_v33, %v186_v33  ;;  %v237_v4 = vld [vmem:[#allocation2 + $0x29] sm:$0xff]  ;;  %275 = vst [vmem:[#allocation3 + $0x94] sm:$0xf] %v13067_v53  ;;  %v13068_v6 = vpack.c.bf16 %v236_v3, %v236_v3  ;;  %v191_v13 = vld [vmem:[#allocation2 + $0x38] sm:$0xff]  ;;  %371 = vst [vmem:[#allocation3 + $0x9c] sm:$0xf] %v13083_v61 }
  0x5d   :  { %13759 = vmatpush3.bf16.msra.mxu0 %v15221_v37  ;;  %v13113_v37 = vpack.c.bf16 %v166_v22, %v166_v22  ;;  %274 = vst [vmem:[#allocation3 + $0x64] sm:$0xf] %v13066_v48  ;;  %v332_v5 = vld [vmem:[#allocation2 + $0x23] sm:$0xff]  ;;  %v13069_v7 = vpack.c.bf16 %v237_v4, %v237_v4  ;;  %v333_v8 = vld [vmem:[#allocation2 + $0x2b] sm:$0xff]  ;;  %228 = vst [vmem:[#allocation3 + $0xc0] sm:$0xf] %v13060_v62  ;;  %v13063_v16 = vpack.c.bf16 %v191_v13, %v191_v13 }
  0x5e   :  { %15072 = vmatprep.subr.bf16.mxu0 %v16298_v50  ;;  %369 = vst [vmem:[#allocation3 + $0x3c] sm:$0xf] %v13081_v41  ;;  %226 = vst [vmem:[#allocation3 + $0x60] sm:$0xf] %v13058_v43  ;;  %v13084_v9 = vpack.c.bf16 %v332_v5, %v332_v5  ;;  %v190_v12 = vld [vmem:[#allocation2 + $0x30] sm:$0xff]  ;;  %v13085_v14 = vpack.c.bf16 %v333_v8, %v333_v8  ;;  %v239_v18 = vld [vmem:[#allocation2 + $0x39] sm:$0xff] }
  0x5f   :  { %13823 = vmatpush3.bf16.msra.mxu1 %v15225_v49  ;;  %v330_v49 = vld [vmem:[#allocation2 + $0x13] sm:$0xff]  ;;  %561 = vst [vmem:[#allocation3 + $0x1b8] sm:$0xf] %v13113_v37  ;;  %229 = vst [vmem:[#allocation3 + $0xf0] sm:$0xf] %v13061_v63  ;;  %v13062_v15 = vpack.c.bf16 %v190_v12, %v190_v12  ;;  %v13071_v21 = vpack.c.bf16 %v239_v18, %v239_v18  ;;  %v335_v22 = vld [vmem:[#allocation2 + $0x3b] sm:$0xff] }
  0x60   :  { %v13082_v57 = vpack.c.bf16 %v330_v49, %v330_v49  ;;  %v238_v17 = vld [vmem:[#allocation2 + $0x31] sm:$0xff]  ;;  %276 = vst [vmem:[#allocation3 + $0xc4] sm:$0xf] %v13068_v6  ;;  %277 = vst [vmem:[#allocation3 + $0xf4] sm:$0xf] %v13069_v7  ;;  %v18250_v26 = vmov 0  ;;  %v13087_v27 = vpack.c.bf16 %v335_v22, %v335_v22 }
  0x61   :  { %v334_v19 = vld [vmem:[#allocation2 + $0x33] sm:$0xff]  ;;  %372 = vst [vmem:[#allocation3 + $0xcc] sm:$0xf] %v13084_v9  ;;  %v13070_v20 = vpack.c.bf16 %v238_v17, %v238_v17  ;;  %v18251_v26 = vsel %vm16384_vm10, 4294967295, %v18250_v26  ;;  %373 = vst [vmem:[#allocation3 + $0xfc] sm:$0xf] %v13085_v14 }
  0x62   :  { %370 = vst [vmem:[#allocation3 + $0x6c] sm:$0xf] %v13082_v57  ;;  %v13086_v23 = vpack.c.bf16 %v334_v19, %v334_v19  ;;  %v424_v24 = vld [vmem:[#allocation2 + $0x50] sm:$0xff]  ;;  %v425_v25 = vld [vmem:[#allocation2 + $0x58] sm:$0xff]  ;;  %18252 = vst [vmem:[#allocation27_spill] sm:$0xff] %v18251_v26  ;;  %v167_v43 = vsel %vm16384_vm10, %v11661_v32, 0.0 }
  0x63   :  { %230 = vst [vmem:[#allocation3 + $0x120] sm:$0xf] %v13062_v15  ;;  %231 = vst [vmem:[#allocation3 + $0x150] sm:$0xf] %v13063_v16  ;;  %v13096_v28 = vpack.c.bf16 %v424_v24, %v424_v24  ;;  %v13097_v29 = vpack.c.bf16 %v425_v25, %v425_v25  ;;  %v472_v30 = vld [vmem:[#allocation2 + $0x51] sm:$0xff]  ;;  %v473_v31 = vld [vmem:[#allocation2 + $0x59] sm:$0xff]  ;;  %v13114_v48 = vpack.c.bf16 %v167_v43, %v167_v43 }
  0x64   :  { %v15234_v33 = vld [vmem:[#allocation6 + $0x130] sm:$0xff]   ;;  %278 = vst [vmem:[#allocation3 + $0x124] sm:$0xf] %v13070_v20  ;;  %279 = vst [vmem:[#allocation3 + $0x154] sm:$0xf] %v13071_v21  ;;  %v13104_v35 = vpack.c.bf16 %v472_v30, %v472_v30  ;;  %v13105_v37 = vpack.c.bf16 %v473_v31, %v473_v31  ;;  %v15241_v54 = vld [vmem:[#allocation6 + $0x128] sm:$0xff]  }
  0x65   :  { %374 = vst [vmem:[#allocation3 + $0x12c] sm:$0xf] %v13086_v23  ;;  %1580 = vst [vmem:[#allocation2 + $0x50] sm:$0x7] %v18182_v0  ;;  %v15223_v41 = vld [vmem:[#allocation3 + $0x4] ss:$48 sps:$4 sm:$0xff]  }
  0x66   :  { %v15226_v42 = vld [vmem:[#allocation3] ss:$48 sps:$4 sm:$0xff]   ;;  %375 = vst [vmem:[#allocation3 + $0x15c] sm:$0xf] %v13087_v27  ;;  %464 = vst [vmem:[#allocation3 + $0x180] sm:$0xf] %v13096_v28  ;;  %1279 = vmatprep.mubr.bf16.mxu0 %v15223_v41 }
  0x67   :  { %465 = vst [vmem:[#allocation3 + $0x1b0] sm:$0xf] %v13097_v29  ;;  %v15228_v47 = vld [vmem:[#allocation3 + $0xc] ss:$48 sps:$4 sm:$0xff]   ;;  %512 = vst [vmem:[#allocation3 + $0x184] sm:$0xf] %v13104_v35  ;;  %1280 = vmatmul.mubr.bf16.vlgmr.msra.gmra.mxu0 %v15226_v42 }
  0x68   :  { %513 = vst [vmem:[#allocation3 + $0x1b4] sm:$0xf] %v13105_v37  ;;  %178 = vst [vmem:[#allocation2 + $0x62] sm:$0xff] %v167_v43  ;;  %v15230_v49 = vld [vmem:[#allocation3 + $0x8] ss:$48 sps:$4 sm:$0xff]   ;;  %1376 = vmatprep.mubr.bf16.mxu1 %v15228_v47  ;;  %15073 = vmatpush3.bf16.msra.mxu0 %v16298_v50  ;;  %v15248_v62 = vld [vmem:[#allocation6 + $0x120] sm:$0xff]  }
  0x69   :  { %v15231_v52 = vld [vmem:[#allocation3 + $0x64] ss:$48 sps:$4 sm:$0xff]   ;;  %562 = vst [vmem:[#allocation3 + $0x1e8] sm:$0xf] %v13114_v48  ;;  %1377 = vmatmul.mubr.bf16.vlgmr.msra.gmra.mxu1 %v15230_v49  ;;  %v15235_v53 = vld [vmem:[#allocation3 + $0x6c] ss:$48 sps:$4 sm:$0xff]   ;;  %15074 = vmatprep.subr.bf16.mxu0 %v15234_v33 }
  0x6a   :  { %1287 = vmatprep.mubr.bf16.mxu0 %v15231_v52  ;;  %1384 = vmatprep.mubr.bf16.mxu1 %v15235_v53  ;;  %v15233_v57 = vld [vmem:[#allocation3 + $0x60] ss:$48 sps:$4 sm:$0xff]   ;;  %v15237_v58 = vld [vmem:[#allocation3 + $0x68] ss:$48 sps:$4 sm:$0xff]   ;;  %v15238_v60 = vld [vmem:[#allocation3 + $0xc4] ss:$48 sps:$4 sm:$0xff]  }
  0x6b   :  { %v15242_v61 = vld [vmem:[#allocation3 + $0xcc] ss:$48 sps:$4 sm:$0xff]   ;;  %v18253_v63 = vmov 0  ;;  %v568_v50 = vld [vmem:[#allocation2 + $0x53] sm:$0xff]  ;;  %18258 = vst [vmem:[#allocation29_spill] sm:$0xff] %v18257_v34  ;;  %v18259_v8 = vmov 0 }
  0x6c   :  { %15075 = vmatpush3.bf16.msra.mxu0 %v15234_v33  ;;  %v18254_v63 = vsel %vm16397_vm11, 4294967295, %v18253_v63  ;;  %v16401_v3 = vld [vmem:[#allocation6 + $0x118] sm:$0xff]   ;;  %v13120_v5 = vpack.c.bf16 %v568_v50, %v568_v50  ;;  %v18260_v8 = vsel %vm16414_vm13, 4294967295, %v18259_v8  ;;  %v15240_v9 = vld [vmem:[#allocation3 + $0xc0] ss:$48 sps:$4 sm:$0xff]   ;;  %v11664_v19 = vld [vmem:[%s18170_s1 + $0x68] sm:$0xff] }
  0x6d   :  { %15076 = vmatprep.subr.bf16.mxu0 %v15241_v54  ;;  %18255 = vst [vmem:[#allocation28_spill] sm:$0xff] %v18254_v63  ;;  %v11662_v6 = vld [vmem:[%s18170_s1 + $0x58] sm:$0xff]  ;;  %18261 = vst [vmem:[#allocation30_spill] sm:$0xff] %v18260_v8  ;;  %v15245_v36 = vld [vmem:[#allocation3 + $0x124] ss:$48 sps:$4 sm:$0xff]   ;;  %v18262_v20 = vmov 0 }
  0x6e   :  { %v168_v13 = vsel %vm16397_vm11, %v11662_v6, 0.0  ;;  %v15244_v16 = vld [vmem:[#allocation3 + $0xc8] ss:$48 sps:$4 sm:$0xff]   ;;  %608 = vst [vmem:[#allocation3 + $0x18c] sm:$0xf] %v13120_v5  ;;  %v18263_v20 = vsel %vm16428_vm14, 4294967295, %v18262_v20 }
  0x6f   :  { %1288 = vmatmul.mubr.bf16.gmra.mxu0 %v15233_v57  ;;  %v569_v4 = vld [vmem:[#allocation2 + $0x5b] sm:$0xff]  ;;  %179 = vst [vmem:[#allocation2 + $0x6a] sm:$0xff] %v168_v13  ;;  %v13115_v18 = vpack.c.bf16 %v168_v13, %v168_v13  ;;  %18264 = vst [vmem:[#allocation31_spill] sm:$0xff] %v18263_v20  ;;  %v18265_v21 = vmov 0  ;;  %v169_v22 = vsel %vm16408_vm12, %v11663_v40, 0.0  ;;  %v170_v23 = vsel %vm16414_vm13, %v11664_v19, 0.0 }
  0x70   :  { %1295 = vmatprep.mubr.bf16.mxu0 %v15238_v60  ;;  %v426_v7 = vld [vmem:[#allocation2 + $0x60] sm:$0xff]  ;;  %15077 = vmatpush3.bf16.msra.mxu0 %v15241_v54  ;;  %v13121_v12 = vpack.c.bf16 %v569_v4, %v569_v4  ;;  %v18266_v21 = vsel %vm16434_vm15, 4294967295, %v18265_v21  ;;  %v15249_v24 = vld [vmem:[#allocation3 + $0x12c] ss:$48 sps:$4 sm:$0xff]   ;;  %180 = vst [vmem:[#allocation2 + $0x72] sm:$0xff] %v169_v22  ;;  %181 = vst [vmem:[#allocation2 + $0x7a] sm:$0xff] %v170_v23  ;;  %v13116_v46 = vpack.c.bf16 %v169_v22, %v169_v22 }
  0x71   :  { %1385 = vmatmul.mubr.bf16.gmra.mxu1 %v15237_v58  ;;  %v13098_v14 = vpack.c.bf16 %v426_v7, %v426_v7  ;;  %v474_v15 = vld [vmem:[#allocation2 + $0x61] sm:$0xff]  ;;  %15078 = vmatprep.subr.bf16.mxu0 %v15248_v62  ;;  %18267 = vst [vmem:[#allocation32_spill] sm:$0xff] %v18266_v21  ;;  %563 = vst [vmem:[#allocation3 + $0x218] sm:$0xf] %v13115_v18  ;;  %v13117_v59 = vpack.c.bf16 %v170_v23, %v170_v23  ;;  %v11666_v25 = vld [vmem:[%s18170_s1 + $0x78] sm:$0xff]  ;;  %v171_v27 = vsel %vm16428_vm14, %v11665_v45, 0.0 }
  0x72   :  { %1392 = vmatprep.mubr.bf16.mxu1 %v15242_v61  ;;  %v13106_v17 = vpack.c.bf16 %v474_v15, %v474_v15  ;;  %609 = vst [vmem:[#allocation3 + $0x1bc] sm:$0xf] %v13121_v12  ;;  %v172_v28 = vsel %vm16434_vm15, %v11666_v25, 0.0  ;;  %v15262_v29 = vld [vmem:[#allocation6 + $0x110] sm:$0xff]   ;;  %182 = vst [vmem:[#allocation2 + $0x82] sm:$0xff] %v171_v27  ;;  %v13118_v30 = vpack.c.bf16 %v171_v27, %v171_v27  ;;  %v376_v33 = vld [vmem:[#allocation2 + $0x4] sm:$0xff] }
  0x73   :  { %466 = vst [vmem:[#allocation3 + $0x1e0] sm:$0xf] %v13098_v14  ;;  %564 = vst [vmem:[#allocation3 + $0x248] sm:$0xf] %v13116_v46  ;;  %v13119_v31 = vpack.c.bf16 %v172_v28, %v172_v28  ;;  %v377_v35 = vld [vmem:[#allocation2 + $0xc] sm:$0xff]  ;;  %v13088_v37 = vpack.c.bf16 %v376_v33, %v376_v33  ;;  %v378_v41 = vld [vmem:[#allocation2 + $0x14] sm:$0xff] }
  0x74   :  { %514 = vst [vmem:[#allocation3 + $0x1e4] sm:$0xf] %v13106_v17  ;;  %15079 = vmatpush3.bf16.msra.mxu0 %v15248_v62  ;;  %565 = vst [vmem:[#allocation3 + $0x278] sm:$0xf] %v13117_v59  ;;  %v13089_v32 = vpack.c.bf16 %v377_v35, %v377_v35  ;;  %v379_v42 = vld [vmem:[#allocation2 + $0x1c] sm:$0xff]  ;;  %v380_v43 = vld [vmem:[#allocation2 + $0x24] sm:$0xff]  ;;  %v13090_v47 = vpack.c.bf16 %v378_v41, %v378_v41 }
  0x75   :  { %15080 = vmatprep.subr.bf16.mxu0 %v16401_v3  ;;  %183 = vst [vmem:[#allocation2 + $0x8a] sm:$0xff] %v172_v28  ;;  %566 = vst [vmem:[#allocation3 + $0x2a8] sm:$0xf] %v13118_v30  ;;  %v13091_v48 = vpack.c.bf16 %v379_v42, %v379_v42  ;;  %v381_v49 = vld [vmem:[#allocation2 + $0x2c] sm:$0xff]  ;;  %v13092_v52 = vpack.c.bf16 %v380_v43, %v380_v43  ;;  %v382_v53 = vld [vmem:[#allocation2 + $0x34] sm:$0xff] }
  0x76   :  { %567 = vst [vmem:[#allocation3 + $0x2d8] sm:$0xf] %v13119_v31  ;;  %v383_v54 = vld [vmem:[#allocation2 + $0x3c] sm:$0xff]  ;;  %v427_v58 = vld [vmem:[#allocation2 + $0x68] sm:$0xff]  ;;  %416 = vst [vmem:[#allocation3 + $0x10] sm:$0xf] %v13088_v37  ;;  %v13093_v61 = vpack.c.bf16 %v381_v49, %v381_v49  ;;  %v13094_v62 = vpack.c.bf16 %v382_v53, %v382_v53 }
  0x77   :  { %1296 = vmatmul.mubr.bf16.gmra.mxu0 %v15240_v9  ;;  %v15247_v57 = vld [vmem:[#allocation3 + $0x120] ss:$48 sps:$4 sm:$0xff]   ;;  %417 = vst [vmem:[#allocation3 + $0x40] sm:$0xf] %v13089_v32  ;;  %v13095_v50 = vpack.c.bf16 %v383_v54, %v383_v54  ;;  %1563 = vst [vmem:[#allocation2 + $0x43] sm:$0x7] %v18182_v0  ;;  %v13099_v6 = vpack.c.bf16 %v427_v58, %v427_v58 }
  0x78   :  { %1303 = vmatprep.mubr.bf16.mxu0 %v15245_v36  ;;  %15081 = vmatpush3.bf16.msra.mxu0 %v16401_v3  ;;  %v475_v60 = vld [vmem:[#allocation2 + $0x69] sm:$0xff]  ;;  %v15252_v5 = vld [vmem:[#allocation3 + $0x184] ss:$48 sps:$4 sm:$0xff]   ;;  %418 = vst [vmem:[#allocation3 + $0x70] sm:$0xf] %v13090_v47  ;;  %v429_v36 = vld [vmem:[#allocation2 + $0x78] sm:$0xff] }
  0x79   :  { %1393 = vmatmul.mubr.bf16.gmra.mxu1 %v15244_v16  ;;  %v15251_v4 = vld [vmem:[#allocation3 + $0x128] ss:$48 sps:$4 sm:$0xff]   ;;  %v13107_v7 = vpack.c.bf16 %v475_v60, %v475_v60  ;;  %15082 = vmatprep.subr.bf16.mxu0 %v15262_v29  ;;  %419 = vst [vmem:[#allocation3 + $0xa0] sm:$0xf] %v13091_v48  ;;  %420 = vst [vmem:[#allocation3 + $0xd0] sm:$0xf] %v13092_v52  ;;  %v13101_v19 = vpack.c.bf16 %v429_v36, %v429_v36 }
  0x7a   :  { %1400 = vmatprep.mubr.bf16.mxu1 %v15249_v24  ;;  %v15269_v9 = vld [vmem:[#allocation6 + $0x108] sm:$0xff]   ;;  %421 = vst [vmem:[#allocation3 + $0x100] sm:$0xf] %v13093_v61  ;;  %422 = vst [vmem:[#allocation3 + $0x130] sm:$0xf] %v13094_v62  ;;  %v428_v16 = vld [vmem:[#allocation2 + $0x70] sm:$0xff] }
  0x7b   :  { %v15256_v12 = vld [vmem:[#allocation3 + $0x18c] ss:$48 sps:$4 sm:$0xff]   ;;  %v570_v3 = vld [vmem:[#allocation2 + $0x63] sm:$0xff]  ;;  %423 = vst [vmem:[#allocation3 + $0x160] sm:$0xf] %v13095_v50  ;;  %v476_v17 = vld [vmem:[#allocation2 + $0x71] sm:$0xff]  ;;  %v13100_v18 = vpack.c.bf16 %v428_v16, %v428_v16 }
  0x7c   :  { %v571_v13 = vld [vmem:[#allocation2 + $0x6b] sm:$0xff]  ;;  %467 = vst [vmem:[#allocation3 + $0x210] sm:$0xf] %v13099_v6  ;;  %515 = vst [vmem:[#allocation3 + $0x214] sm:$0xf] %v13107_v7  ;;  %v13122_v14 = vpack.c.bf16 %v570_v3, %v570_v3  ;;  %v15276_v40 = vld [vmem:[#allocation6 + $0x100] sm:$0xff]   ;;  %15083 = vmatpush3.bf16.msra.mxu0 %v15262_v29  ;;  %v13108_v23 = vpack.c.bf16 %v476_v17, %v476_v17 }
  0x7d   :  { %v13123_v15 = vpack.c.bf16 %v571_v13, %v571_v13  ;;  %v477_v22 = vld [vmem:[#allocation2 + $0x79] sm:$0xff]  ;;  %15084 = vmatprep.subr.bf16.mxu0 %v15269_v9  ;;  %v431_v28 = vld [vmem:[#allocation2 + $0x88] sm:$0xff]  ;;  %468 = vst [vmem:[#allocation3 + $0x240] sm:$0xf] %v13100_v18  ;;  %469 = vst [vmem:[#allocation3 + $0x270] sm:$0xf] %v13101_v19 }
  0x7e   :  { %v572_v24 = vld [vmem:[#allocation2 + $0x73] sm:$0xff]  ;;  %v573_v45 = vld [vmem:[#allocation2 + $0x7b] sm:$0xff]  ;;  %610 = vst [vmem:[#allocation3 + $0x1ec] sm:$0xf] %v13122_v14  ;;  %v13109_v46 = vpack.c.bf16 %v477_v22, %v477_v22  ;;  %516 = vst [vmem:[#allocation3 + $0x244] sm:$0xf] %v13108_v23  ;;  %v13103_v31 = vpack.c.bf16 %v431_v28, %v431_v28 }
  0x7f   :  { %611 = vst [vmem:[#allocation3 + $0x21c] sm:$0xf] %v13123_v15  ;;  %v13124_v59 = vpack.c.bf16 %v572_v24, %v572_v24  ;;  %v13125_v25 = vpack.c.bf16 %v573_v45, %v573_v45  ;;  %v430_v27 = vld [vmem:[#allocation2 + $0x80] sm:$0xff]  ;;  %1304 = vmatmul.mubr.bf16.gmra.mxu0 %v15247_v57  ;;  %v479_v33 = vld [vmem:[#allocation2 + $0x89] sm:$0xff]  ;;  %v616_v53 = vld [vmem:[#allocation2 + $0x54] sm:$0xff] }
  0x80   :  { %v478_v30 = vld [vmem:[#allocation2 + $0x81] sm:$0xff]  ;;  %v13102_v29 = vpack.c.bf16 %v430_v27, %v430_v27  ;;  %v575_v32 = vld [vmem:[#allocation2 + $0x8b] sm:$0xff]  ;;  %1311 = vmatprep.mubr.bf16.mxu0 %v15252_v5  ;;  %517 = vst [vmem:[#allocation3 + $0x274] sm:$0xf] %v13109_v46  ;;  %v13111_v41 = vpack.c.bf16 %v479_v33, %v479_v33  ;;  %15085 = vmatpush3.bf16.msra.mxu0 %v15269_v9  ;;  %471 = vst [vmem:[#allocation3 + $0x2d0] sm:$0xf] %v13103_v31 }
  0x81   :  { %v13110_v35 = vpack.c.bf16 %v478_v30, %v478_v30  ;;  %v574_v37 = vld [vmem:[#allocation2 + $0x83] sm:$0xff]  ;;  %1401 = vmatmul.mubr.bf16.gmra.mxu1 %v15251_v4  ;;  %612 = vst [vmem:[#allocation3 + $0x24c] sm:$0xf] %v13124_v59  ;;  %613 = vst [vmem:[#allocation3 + $0x27c] sm:$0xf] %v13125_v25  ;;  %v13127_v43 = vpack.c.bf16 %v575_v32, %v575_v32  ;;  %15086 = vmatprep.subr.bf16.mxu0 %v15276_v40  ;;  %v619_v4 = vld [vmem:[#allocation2 + $0x6c] sm:$0xff] }
  0x82   :  { %v13126_v42 = vpack.c.bf16 %v574_v37, %v574_v37  ;;  %1408 = vmatprep.mubr.bf16.mxu1 %v15256_v12  ;;  %470 = vst [vmem:[#allocation3 + $0x2a0] sm:$0xf] %v13102_v29  ;;  %519 = vst [vmem:[#allocation3 + $0x2d4] sm:$0xf] %v13111_v41  ;;  %v15254_v47 = vld [vmem:[#allocation3 + $0x180] ss:$48 sps:$4 sm:$0xff]   ;;  %v13128_v54 = vpack.c.bf16 %v616_v53, %v616_v53  ;;  %v13131_v7 = vpack.c.bf16 %v619_v4, %v619_v4 }
  0x83   :  { %518 = vst [vmem:[#allocation3 + $0x2a4] sm:$0xf] %v13110_v35  ;;  %615 = vst [vmem:[#allocation3 + $0x2dc] sm:$0xf] %v13127_v43  ;;  %v15258_v48 = vld [vmem:[#allocation3 + $0x188] ss:$48 sps:$4 sm:$0xff]  }
  0x84   :  { %614 = vst [vmem:[#allocation3 + $0x2ac] sm:$0xf] %v13126_v42  ;;  %v15259_v49 = vld [vmem:[#allocation3 + $0x1e4] ss:$48 sps:$4 sm:$0xff]   ;;  %15087 = vmatpush3.bf16.msra.mxu0 %v15276_v40  ;;  %656 = vst [vmem:[#allocation3 + $0x190] sm:$0xf] %v13128_v54 }
  0x85   :  { %v15261_v57 = vld [vmem:[#allocation3 + $0x1e0] ss:$48 sps:$4 sm:$0xff]   ;;  %v15265_v58 = vld [vmem:[#allocation3 + $0x1e8] ss:$48 sps:$4 sm:$0xff]   ;;  %659 = vst [vmem:[#allocation3 + $0x220] sm:$0xf] %v13131_v7 }
  0x86   :  { %v15263_v52 = vld [vmem:[#allocation3 + $0x1ec] ss:$48 sps:$4 sm:$0xff]   ;;  %v618_v50 = vld [vmem:[#allocation2 + $0x64] sm:$0xff]  ;;  %v620_v9 = vld [vmem:[#allocation2 + $0x74] sm:$0xff] }
  0x87   :  { %1312 = vmatmul.mubr.bf16.gmra.mxu0 %v15254_v47  ;;  %v15266_v60 = vld [vmem:[#allocation3 + $0x244] ss:$48 sps:$4 sm:$0xff]   ;;  %v617_v62 = vld [vmem:[#allocation2 + $0x5c] sm:$0xff]  ;;  %v13130_v6 = vpack.c.bf16 %v618_v50, %v618_v50  ;;  %v13132_v13 = vpack.c.bf16 %v620_v9, %v620_v9  ;;  %v623_v15 = vld [vmem:[#allocation2 + $0x8c] sm:$0xff] }
  0x88   :  { %1319 = vmatprep.mubr.bf16.mxu0 %v15259_v49  ;;  %v15270_v61 = vld [vmem:[#allocation3 + $0x24c] ss:$48 sps:$4 sm:$0xff]   ;;  %v13129_v5 = vpack.c.bf16 %v617_v62, %v617_v62  ;;  %v622_v3 = vld [vmem:[#allocation2 + $0x84] sm:$0xff]  ;;  %v13135_v36 = vpack.c.bf16 %v623_v15, %v623_v15  ;;  %1581 = vst [vmem:[#allocation2 + $0x93] sm:$0x7] %v18182_v0  ;;  %v15290_v33 = vld [vmem:[%s18173_s4 + $0x70] sm:$0xff]  }
  0x89   :  { %1409 = vmatmul.mubr.bf16.gmra.mxu1 %v15258_v48  ;;  %v621_v12 = vld [vmem:[#allocation2 + $0x7c] sm:$0xff]  ;;  %v13134_v16 = vpack.c.bf16 %v622_v3, %v622_v3  ;;  %658 = vst [vmem:[#allocation3 + $0x1f0] sm:$0xf] %v13130_v6  ;;  %660 = vst [vmem:[#allocation3 + $0x250] sm:$0xf] %v13132_v13  ;;  %v15291_v35 = vld [vmem:[%s18173_s4 + $0x30] sm:$0xff]  }
  0x8a   :  { %1416 = vmatprep.mubr.bf16.mxu1 %v15263_v52  ;;  %v13133_v14 = vpack.c.bf16 %v621_v12, %v621_v12  ;;  %657 = vst [vmem:[#allocation3 + $0x1c0] sm:$0xf] %v13129_v5  ;;  %v15268_v17 = vld [vmem:[#allocation3 + $0x240] ss:$48 sps:$4 sm:$0xff]   ;;  %663 = vst [vmem:[#allocation3 + $0x2e0] sm:$0xf] %v13135_v36 }
  0x8b   :  { %662 = vst [vmem:[#allocation3 + $0x2b0] sm:$0xf] %v13134_v16  ;;  %v15272_v40 = vld [vmem:[#allocation3 + $0x248] ss:$48 sps:$4 sm:$0xff]   ;;  %v15273_v18 = vld [vmem:[#allocation3 + $0x2a4] ss:$48 sps:$4 sm:$0xff]  }
  0x8c   :  { %661 = vst [vmem:[#allocation3 + $0x280] sm:$0xf] %v13133_v14  ;;  %v15277_v19 = vld [vmem:[#allocation3 + $0x2ac] ss:$48 sps:$4 sm:$0xff]   ;;  %v15275_v22 = vld [vmem:[#allocation3 + $0x2a0] ss:$48 sps:$4 sm:$0xff]  }
  0x8d   :  { %v15279_v23 = vld [vmem:[#allocation3 + $0x2a8] ss:$48 sps:$4 sm:$0xff]   ;;  %v15280_v24 = vld [vmem:[#allocation3 + $0x10] ss:$48 sps:$4 sm:$0xff]  }
  0x8e   :  { %v15281_v45 = vld [vmem:[#allocation3 + $0x70] ss:$48 sps:$4 sm:$0xff]   ;;  %v15288_v29 = vld [vmem:[%s18173_s4 + $0x78] sm:$0xff]   ;;  %v15292_v37 = vld [vmem:[%s18173_s4 + $0x68] sm:$0xff]  }
  0x8f   :  { %1320 = vmatmul.mubr.bf16.gmra.mxu0 %v15261_v57  ;;  %v15282_v46 = vld [vmem:[#allocation3 + $0xd0] ss:$48 sps:$4 sm:$0xff]   ;;  %13888 = vmatprep.subr.bf16.mxu1 %v15288_v29  ;;  %v15289_v31 = vld [vmem:[%s18173_s4 + $0x38] sm:$0xff]   ;;  %v15293_v32 = vld [vmem:[%s18173_s4 + $0x28] sm:$0xff]  }
  0x90   :  { %1327 = vmatprep.mubr.bf16.mxu0 %v15266_v60  ;;  %v15283_v59 = vld [vmem:[#allocation3 + $0x130] ss:$48 sps:$4 sm:$0xff]   ;;  %13889 = vmatpush3.bf16.msra.mxu1 %v15289_v31  ;;  %v15297_v43 = vld [vmem:[%s18173_s4 + $0xf8] sm:$0xff]   ;;  %v15303_v52 = vld [vmem:[%s18173_s4 + $0xe8] sm:$0xff]  }
  0x91   :  { %1417 = vmatmul.mubr.bf16.gmra.mxu1 %v15265_v58  ;;  %v15284_v25 = vld [vmem:[#allocation3 + $0x190] ss:$48 sps:$4 sm:$0xff]   ;;  %13890 = vmatprep.subr.bf16.mxu1 %v15290_v33  ;;  %v15299_v47 = vld [vmem:[%s18173_s4 + $0xb8] sm:$0xff]   ;;  %v15305_v53 = vld [vmem:[%s18173_s4 + $0xa8] sm:$0xff]  }
  0x92   :  { %1424 = vmatprep.mubr.bf16.mxu1 %v15270_v61  ;;  %v15285_v27 = vld [vmem:[#allocation3 + $0x1f0] ss:$48 sps:$4 sm:$0xff]   ;;  %13952 = vmatprep.subr.bf16.mxu0 %v15297_v43  ;;  %v15296_v54 = vld [vmem:[%s18173_s4 + $0x58] sm:$0xff]   ;;  %v15308_v7 = vld [vmem:[%s18173_s4 + $0x48] sm:$0xff]  }
  0x93   :  { %v15286_v28 = vld [vmem:[#allocation3 + $0x250] ss:$48 sps:$4 sm:$0xff]   ;;  %v15298_v60 = vld [vmem:[%s18173_s4 + $0x18] sm:$0xff]   ;;  %v15315_v9 = vld [vmem:[%s18173_s4 + $0xc8] sm:$0xff]  }
  0x94   :  { %v15287_v30 = vld [vmem:[#allocation3 + $0x2b0] ss:$48 sps:$4 sm:$0xff]   ;;  %13891 = vmatpush3.bf16.msra.mxu1 %v15291_v35  ;;  %v15309_v61 = vld [vmem:[%s18173_s4 + $0xd8] sm:$0xff]   ;;  %v15310_v12 = vld [vmem:[%s18173_s4 + $0x8] sm:$0xff]  }
  0x95   :  { %13892 = vmatprep.subr.bf16.mxu1 %v15292_v37  ;;  %v15294_v41 = vld [vmem:[%s18173_s4 + $0x60] sm:$0xff]   ;;  %v15300_v48 = vld [vmem:[%s18173_s4 + $0xf0] sm:$0xff]   ;;  %v15311_v50 = vld [vmem:[%s18173_s4 + $0x98] sm:$0xff]  }
  0x96   :  { %v15295_v42 = vld [vmem:[%s18173_s4 + $0x20] sm:$0xff]   ;;  %v15301_v49 = vld [vmem:[%s18173_s4 + $0xb0] sm:$0xff]   ;;  %v15317_v3 = vld [vmem:[%s18173_s4 + $0x88] sm:$0xff]  }
  0x97   :  { %1328 = vmatmul.mubr.bf16.gmra.mxu0 %v15268_v17  ;;  %v15306_v57 = vld [vmem:[%s18173_s4 + $0xe0] sm:$0xff]   ;;  %v15302_v62 = vld [vmem:[%s18173_s4 + $0x50] sm:$0xff]   ;;  %v15326_v36 = vld [vmem:[%s18173_s4 + $0x178] sm:$0xff]  }
  0x98   :  { %1335 = vmatprep.mubr.bf16.mxu0 %v15273_v18  ;;  %13893 = vmatpush3.bf16.msra.mxu1 %v15293_v32  ;;  %v15307_v58 = vld [vmem:[%s18173_s4 + $0xa0] sm:$0xff]   ;;  %v15304_v4 = vld [vmem:[%s18173_s4 + $0x10] sm:$0xff]   ;;  %v15332_v17 = vld [vmem:[%s18173_s4 + $0x1b8] sm:$0xff]  }
  0x99   :  { %1425 = vmatmul.mubr.bf16.gmra.mxu1 %v15272_v40  ;;  %13894 = vmatprep.subr.bf16.mxu1 %v15294_v41  ;;  %v15312_v5 = vld [vmem:[%s18173_s4 + $0xd0] sm:$0xff]   ;;  %v15314_v13 = vld [vmem:[%s18173_s4 + $0x40] sm:$0xff]  }
  0x9a   :  { %1432 = vmatprep.mubr.bf16.mxu1 %v15277_v19  ;;  %v15313_v6 = vld [vmem:[%s18173_s4 + $0x90] sm:$0xff]   ;;  %v15318_v14 = vld [vmem:[%s18173_s4 + $0xc0] sm:$0xff]  }
  0x9b   :  { %v15316_v15 = vld [vmem:[%s18173_s4] sm:$0xff]  }
  0x9c   :  { %13895 = vmatpush3.bf16.msra.mxu1 %v15295_v42  ;;  %v15319_v16 = vld [vmem:[%s18173_s4 + $0x80] sm:$0xff]  }
  0x9d   :  { %13896 = vmatprep.subr.bf16.mxu1 %v15296_v54 }
  0x9f   :  { %1336 = vmatmul.mubr.bf16.gmra.mxu0 %v15275_v22 }
  0xa0   :  { %15088 = vmatprep.mubr.bf16.mxu0 %v15280_v24  ;;  %13897 = vmatpush3.bf16.msra.mxu1 %v15298_v60 }
  0xa1   :  { %1433 = vmatmul.mubr.bf16.gmra.mxu1 %v15279_v23  ;;  %13898 = vmatprep.subr.bf16.mxu1 %v15302_v62 }
  0xa4   :  { %13899 = vmatpush3.bf16.msra.mxu1 %v15304_v4 }
  0xa5   :  { %13900 = vmatprep.subr.bf16.mxu1 %v15308_v7 }
  0xa7   :  { %15089 = vmatmul.mubr.bf16.vlgmr.msra.gmra.mxu0 %v15281_v45 }
  0xa8   :  { %15092 = vmatprep.mubr.bf16.mxu0 %v15282_v46  ;;  %13953 = vmatpush3.bf16.msra.mxu0 %v15299_v47 }
  0xa9   :  { %13954 = vmatprep.subr.bf16.mxu0 %v15300_v48  ;;  %13901 = vmatpush3.bf16.msra.mxu1 %v15310_v12 }
  0xaa   :  { %13902 = vmatprep.subr.bf16.mxu1 %v15314_v13 }
  0xac   :  { %13955 = vmatpush3.bf16.msra.mxu0 %v15301_v49 }
  0xad   :  { %13956 = vmatprep.subr.bf16.mxu0 %v15303_v52  ;;  %13903 = vmatpush3.bf16.msra.mxu1 %v15316_v15 }
  0xae   :  { %14016 = vmatprep.subr.bf16.mxu1 %v15326_v36 }
  0xaf   :  { %15093 = vmatmul.mubr.bf16.gmra.mxu0 %v15283_v59 }
  0xb0   :  { %15096 = vmatprep.mubr.bf16.mxu0 %v15284_v25  ;;  %13957 = vmatpush3.bf16.msra.mxu0 %v15305_v53 }
  0xb1   :  { %13958 = vmatprep.subr.bf16.mxu0 %v15306_v57 }
  0xb4   :  { %13959 = vmatpush3.bf16.msra.mxu0 %v15307_v58 }
  0xb5   :  { %13960 = vmatprep.subr.bf16.mxu0 %v15309_v61 }
  0xb7   :  { %15097 = vmatmul.mubr.bf16.gmra.mxu0 %v15285_v27 }
  0xb8   :  { %15100 = vmatprep.mubr.bf16.mxu0 %v15286_v28  ;;  %13961 = vmatpush3.bf16.msra.mxu0 %v15311_v50 }
  0xb9   :  { %13962 = vmatprep.subr.bf16.mxu0 %v15312_v5 }
  0xbc   :  { %13963 = vmatpush3.bf16.msra.mxu0 %v15313_v6 }
  0xbd   :  { %13964 = vmatprep.subr.bf16.mxu0 %v15315_v9 }
  0xbf   :  { %15101 = vmatmul.mubr.bf16.gmra.mxu0 %v15287_v30 }
  0xc0   :  { %13965 = vmatpush3.bf16.msra.mxu0 %v15317_v3 }
  0xc1   :  { %13966 = vmatprep.subr.bf16.mxu0 %v15318_v14 }
  0xc4   :  { %13967 = vmatpush3.bf16.msra.mxu0 %v15319_v16 }
  0xc5   :  { %15104 = vmatprep.subr.bf16.mxu0 %v15332_v17 }
 0x127   :  { %v13760_v40 = vpop.f32.mrf.mxu0 }
 0x129   :  { %v16558_v18 = vpop.f32.mrf.mxu1  ;;  %v13761_v19 = vpop.f32.mrf.mxu0 }
 0x12a   :  { %v13762_v2 = vadd.f32 %v13761_v19, %v13760_v40 }
 0x12b   :  { %v16560_v22 = vpop.f32.mrf.mxu1  ;;  %v13763_v23 = vpop.f32.mrf.mxu0 }
 0x12d   :  { %v16562_v24 = vpop.f32.mrf.mxu1  ;;  %v13764_v45 = vpop.f32.mrf.mxu0 }
 0x12e   :  { %v13765_v55 = vadd.f32 %v13764_v45, %v13763_v23 }
 0x12f   :  { %v16564_v46 = vpop.f32.mrf.mxu1  ;;  %v13766_v59 = vpop.f32.mrf.mxu0 }
 0x130   :  { %v1285_v40 = vadd.f32 %v13765_v55, %v16591_v10 }
 0x131   :  { %v13830_v25 = vpop.f32.mrf.mxu1  ;;  %v13767_v27 = vpop.f32.mrf.mxu0 }
 0x132   :  { %v13768_v11 = vadd.f32 %v13767_v27, %v13766_v59 }
 0x133   :  { %v13831_v28 = vpop.f32.mrf.mxu1  ;;  %v13769_v30 = vpop.f32.mrf.mxu0 }
 0x134   :  { %v1290_v1 = vadd.f32 %v13768_v11, %v16591_v10  ;;  %v13832_v39 = vadd.f32 %v13831_v28, %v13830_v25  ;;  %v13829_v11 = vadd.f32 %v16564_v46, %v16562_v24 }
 0x135   :  { %v16566_v29 = vpop.f32.mrf.mxu1  ;;  %v13770_v31 = vpop.f32.mrf.mxu0 }
 0x136   :  { %v1387_v23 = vadd.f32 %v13832_v39, %v1290_v1 }
 0x137   :  { %v13834_v33 = vpop.f32.mrf.mxu1  ;;  %v13772_v35 = vpop.f32.mrf.mxu0 }
 0x138   :  { %v13835_v25 = vadd.f32 %v13834_v33, %v16566_v29 }
 0x139   :  { %v13836_v37 = vpop.f32.mrf.mxu1  ;;  %v13773_v32 = vpop.f32.mrf.mxu0 }
 0x13a   :  { %v13774_v38 = vadd.f32 %v13773_v32, %v13772_v35 }
 0x13b   :  { %v13837_v41 = vpop.f32.mrf.mxu1  ;;  %v13775_v42 = vpop.f32.mrf.mxu0 }
 0x13c   :  { %v1298_v28 = vadd.f32 %v13774_v38, %v16591_v10 }
 0x13d   :  { %v13839_v43 = vpop.f32.mrf.mxu1  ;;  %v13776_v47 = vpop.f32.mrf.mxu0 }
 0x13e   :  { %v13777_v59 = vadd.f32 %v13776_v47, %v13775_v42 }
 0x13f   :  { %v13840_v48 = vpop.f32.mrf.mxu1  ;;  %v13778_v49 = vpop.f32.mrf.mxu0 }
 0x141   :  { %v13842_v52 = vpop.f32.mrf.mxu1  ;;  %v13779_v53 = vpop.f32.mrf.mxu0 }
 0x142   :  { %v13780_v27 = vadd.f32 %v13779_v53, %v13778_v49 }
 0x143   :  { %v13843_v54 = vpop.f32.mrf.mxu1  ;;  %v13781_v57 = vpop.f32.mrf.mxu0 }
 0x144   :  { %v13844_v35 = vadd.f32 %v13843_v54, %v13842_v52 }
 0x145   :  { %v13845_v58 = vpop.f32.mrf.mxu1  ;;  %v13782_v60 = vpop.f32.mrf.mxu0 }
 0x147   :  { %v13846_v61 = vpop.f32.mrf.mxu1  ;;  %v13784_v62 = vpop.f32.mrf.mxu0 }
 0x148   :  { %v13847_v24 = vadd.f32 %v13846_v61, %v13845_v58 }
 0x149   :  { %v13848_v50 = vpop.f32.mrf.mxu1  ;;  %v13785_v4 = vpop.f32.mrf.mxu0 }
 0x14a   :  { %v13786_v44 = vadd.f32 %v13785_v4, %v13784_v62 }
 0x14b   :  { %v13849_v5 = vpop.f32.mrf.mxu1  ;;  %v13787_v6 = vpop.f32.mrf.mxu0 }
 0x14c   :  { %v1314_v39 = vadd.f32 %v13786_v44, %v16591_v10  ;;  %v13850_v1 = vadd.f32 %v13849_v5, %v13848_v50 }
 0x14d   :  { %v16568_v7 = vpop.f32.mrf.mxu1  ;;  %v13788_v9 = vpop.f32.mrf.mxu0 }
 0x14f   :  { %v16570_v12 = vpop.f32.mrf.mxu1  ;;  %v13790_v3 = vpop.f32.mrf.mxu0 }
 0x150   :  { %v13853_v58 = vadd.f32 %v16570_v12, %v16568_v7 }
 0x151   :  { %v16572_v13 = vpop.f32.mrf.mxu1  ;;  %v13791_v14 = vpop.f32.mrf.mxu0 }
 0x152   :  { %v13792_v42 = vadd.f32 %v13791_v14, %v13790_v3 }
 0x153   :  { %v16574_v15 = vpop.f32.mrf.mxu1  ;;  %v16576_v16 = vpop.f32.mrf.mxu0 }
 0x154   :  { %v13856_v61 = vadd.f32 %v16574_v15, %v16572_v13 }
 0x155   :  { %v16578_v36 = vpop.f32.mrf.mxu1  ;;  %v13794_v17 = vpop.f32.mrf.mxu0 }
 0x156   :  { %18268 = vst [vmem:[#allocation33_spill] sm:$0xff] %v16578_v36  ;;  %v13783_v36 = vadd.f32 %v13782_v60, %v13781_v57  ;;  %v16613_v57 = vadd.f32 %v13850_v1, %v1314_v39 }
 0x157   :  { %v16580_v0 = vpop.f32.mrf.mxu1  ;;  %v13796_v8 = vpop.f32.mrf.mxu0 }
 0x158   :  { %18269 = vst [vmem:[#allocation34_spill] sm:$0xff] %v16580_v0  ;;  %v13826_v0 = vadd.f32 %v16560_v22, %v16558_v18  ;;  %v1301_v18 = vadd.f32 %v13777_v59, %v16591_v10  ;;  %v13841_v22 = vadd.f32 %v13840_v48, %v13839_v43  ;;  %v1309_v32 = vadd.f32 %v13783_v36, %v16591_v10 }
 0x159   :  { %v16582_v21 = vpop.f32.mrf.mxu1  ;;  %v13797_v34 = vpop.f32.mrf.mxu0 }
 0x15a   :  { %18270 = vst [vmem:[#allocation35_spill] sm:$0xff] %v16582_v21  ;;  %v13771_v21 = vadd.f32 %v13770_v31, %v13769_v30  ;;  %v13838_v30 = vadd.f32 %v13837_v41, %v13836_v37  ;;  %v1382_v41 = vadd.f32 %v13829_v11, %v1285_v40  ;;  %v16611_v49 = vadd.f32 %v13841_v22, %v1301_v18 }
 0x15b   :  { %v16584_v20 = vpop.f32.mrf.mxu1  ;;  %v16586_v63 = vpop.f32.mrf.mxu0  ;;  %v1406_v54 = vadd.f32 %v13847_v24, %v1309_v32 }
 0x15c   :  { %18271 = vst [vmem:[#allocation36_spill] sm:$0xff] %v16584_v20  ;;  %18272 = vst [vmem:[#allocation37_spill] sm:$0xff] %v16586_v63  ;;  %v1293_v45 = vadd.f32 %v13771_v21, %v16591_v10  ;;  %v13789_v21 = vadd.f32 %v13788_v9, %v13787_v6  ;;  %v1395_v48 = vadd.f32 %v13838_v30, %v1298_v28 }
 0x15d   :  { %v16593_v26 = vpop.f32.mrf.mxu1  ;;  %v13800_v56 = vpop.f32.mrf.mxu0  ;;  %v1322_v9 = vadd.f32 %v13792_v42, %v16591_v10  ;;  %v18275_v3 = vld [vmem:[#allocation33_spill] sm:$0xff] }
 0x15e   :  { %18273 = vst [vmem:[#allocation38_spill] sm:$0xff] %v16593_v26  ;;  %v1282_v26 = vadd.f32 %v13762_v2, %v16591_v10  ;;  %v1306_v2 = vadd.f32 %v13780_v27, %v16591_v10  ;;  %v1390_v37 = vadd.f32 %v13835_v25, %v1293_v45  ;;  %v1317_v44 = vadd.f32 %v13789_v21, %v16591_v10 }
 0x15f   :  { %v13802_v51 = vpop.f32.mrf.mxu0  ;;  %v16596_v20 = vpop.f32.mrf.mxu1  ;;  %v18276_v14 = vld [vmem:[#allocation34_spill] sm:$0xff]  ;;  %v1419_v42 = vadd.f32 %v13856_v61, %v1322_v9 }
 0x160   :  { %v1379_v38 = vadd.f32 %v13826_v0, %v1282_v26  ;;  %v1403_v43 = vadd.f32 %v13844_v35, %v1306_v2  ;;  %v13795_v0 = vadd.f32 %v13794_v17, %v16576_v16  ;;  %v13798_v26 = vadd.f32 %v13797_v34, %v13796_v8 }
 0x161   :  { %v13803_v63 = vpop.f32.mrf.mxu0  ;;  %v13866_v31 = vpop.f32.mrf.mxu1  ;;  %v13859_v36 = vadd.f32 %v18276_v14, %v18275_v3  ;;  %v18279_v11 = vld [vmem:[#allocation35_spill] sm:$0xff] }
 0x162   :  { %v13804_v8 = vadd.f32 %v13803_v63, %v13802_v51  ;;  %v1325_v27 = vadd.f32 %v13795_v0, %v16591_v10  ;;  %v1330_v40 = vadd.f32 %v13798_v26, %v16591_v10 }
 0x163   :  { %v13805_v19 = vpop.f32.mrf.mxu0  ;;  %v13867_v29 = vpop.f32.mrf.mxu1  ;;  %v18277_v59 = vld [vmem:[#allocation37_spill] sm:$0xff] }
 0x164   :  { %v13801_v7 = vadd.f32 %v13800_v56, %v18277_v59  ;;  %v13868_v24 = vadd.f32 %v13867_v29, %v13866_v31  ;;  %v1338_v21 = vadd.f32 %v13804_v8, %v16591_v10  ;;  %v1422_v0 = vadd.f32 %v13859_v36, %v1325_v27 }
 0x165   :  { %v13806_v55 = vpop.f32.mrf.mxu0  ;;  %v13869_v62 = vpop.f32.mrf.mxu1  ;;  %v18282_v35 = vld [vmem:[#allocation38_spill] sm:$0xff] }
 0x166   :  { %v13807_v28 = vadd.f32 %v13806_v55, %v13805_v19  ;;  %v1333_v2 = vadd.f32 %v13801_v7, %v16591_v10  ;;  %v13865_v32 = vadd.f32 %v16596_v20, %v18282_v35  ;;  %v16641_v20 = vadd.f32 %v13853_v58, %v1317_v44 }
 0x167   :  { %v15090_v46 = vpop.f32.mrf.mxu0  ;;  %v13870_v30 = vpop.f32.mrf.mxu1 }
 0x168   :  { %v1484_v33 = vadd.f32 %v15090_v46, %v1387_v23  ;;  %v18280_v23 = vld [vmem:[#allocation36_spill] sm:$0xff]  ;;  %v1341_v31 = vadd.f32 %v13807_v28, %v16591_v10 }
 0x169   :  { %v1475_v47 = vpop.f32.mrf.mxu0  ;;  %v13862_v45 = vadd.f32 %v18280_v23, %v18279_v11 }
 0x16a   :  { %v1540_v52 = vmax.f32 %v1484_v33, 0.0  ;;  %v1476_v53 = vadd.f32 %v1475_v47, %v1379_v38  ;;  %v13871_v38 = vadd.f32 %v13870_v30, %v13869_v62 }
 0x16b   :  { %v15091_v60 = vpop.f32.mrf.mxu0  ;;  %v16646_v26 = vadd.f32 %v13862_v45, %v1330_v40 }
 0x16c   :  { %v1556_v4 = vsel %vm16284_vm2, %v1540_v52, 0.0  ;;  %v1538_v5 = vmax.f32 %v1476_v53, 0.0  ;;  %v1487_v6 = vadd.f32 %v15091_v60, %v1390_v37  ;;  %v16648_v60 = vadd.f32 %v13865_v32, %v1333_v2 }
 0x16d   :  { %1566 = vst [vmem:[#allocation2 + $0x13] sm:$0xff] %v1556_v4  ;;  %v13306_v12 = vpack.c.bf16 %v1556_v4, %v1556_v4  ;;  %v1478_v34 = vpop.f32.mrf.mxu0 }
 0x16e   :  { %v1554_v13 = vsel %vm16265_vm0, %v1538_v5, 0.0  ;;  %v1541_v15 = vmax.f32 %v1487_v6, 0.0  ;;  %v1479_v17 = vadd.f32 %v1478_v34, %v1382_v41  ;;  %v18286_v6 = vmov 0.0  }
 0x16f   :  { %3879 = vst [vmem:[#allocation3 + $0x7c] sm:$0xf] %v13306_v12  ;;  %1564 = vst [vmem:[#allocation2 + $0x3] sm:$0xff] %v1554_v13  ;;  %v13304_v25 = vpack.c.bf16 %v1554_v13, %v1554_v13  ;;  %v15094_v56 = vpop.f32.mrf.mxu0  ;;  %v16658_v13 = vadd.f32 %v13871_v38, %v1341_v31 }
 0x170   :  { %1776 = vst [vmem:[#allocation3 + $0x6c] sm:$0xf] %v13306_v12  ;;  %v1557_v63 = vsel %vm16301_vm3, %v1541_v15, 0.0  ;;  %v1539_v18 = vmax.f32 %v1479_v17, 0.0  ;;  %v1500_v22 = vadd.f32 %v15094_v56, %v1403_v43 }
 0x171   :  { %3877 = vst [vmem:[#allocation3 + $0x1c] sm:$0xf] %v13304_v25  ;;  %1567 = vst [vmem:[#allocation2 + $0x1b] sm:$0xff] %v1557_v63  ;;  %v13307_v39 = vpack.c.bf16 %v1557_v63, %v1557_v63  ;;  %v1491_v1 = vpop.f32.mrf.mxu0 }
 0x172   :  { %1774 = vst [vmem:[#allocation3 + $0xc] sm:$0xf] %v13304_v25  ;;  %v1555_v55 = vsel %vm16270_vm1, %v1539_v18, 0.0  ;;  %v1544_v46 = vmax.f32 %v1500_v22, 0.0  ;;  %v1492_v33 = vadd.f32 %v1491_v1, %v1395_v48 }
 0x173   :  { %3880 = vst [vmem:[#allocation3 + $0xac] sm:$0xf] %v13307_v39  ;;  %1565 = vst [vmem:[#allocation2 + $0xb] sm:$0xff] %v1555_v55  ;;  %v13305_v37 = vpack.c.bf16 %v1555_v55, %v1555_v55  ;;  %v15095_v41 = vpop.f32.mrf.mxu0 }
 0x174   :  { %1777 = vst [vmem:[#allocation3 + $0x9c] sm:$0xf] %v13307_v39  ;;  %v1560_v47 = vsel %vm16336_vm6, %v1544_v46, 0.0  ;;  %v1542_v43 = vmax.f32 %v1492_v33, 0.0  ;;  %v1503_v52 = vadd.f32 %v15095_v41, %v1406_v54  ;;  %v16653_v54 = vadd.f32 %v13868_v24, %v1338_v21 }
 0x175   :  { %3878 = vst [vmem:[#allocation3 + $0x4c] sm:$0xf] %v13305_v37  ;;  %1570 = vst [vmem:[#allocation2 + $0x33] sm:$0xff] %v1560_v47  ;;  %v13310_v53 = vpack.c.bf16 %v1560_v47, %v1560_v47  ;;  %v1494_v48 = vpop.f32.mrf.mxu0 }
 0x176   :  { %1775 = vst [vmem:[#allocation3 + $0x3c] sm:$0xf] %v13305_v37  ;;  %v1590_v44 = vld [vmem:[#allocation2] sm:$0xff]  ;;  %v1558_v10 = vsel %vm16309_vm4, %v1542_v43, 0.0  ;;  %v1545_v4 = vmax.f32 %v1503_v52, 0.0  ;;  %v1495_v5 = vadd.f32 %v1494_v48, %v16611_v49 }
 0x177   :  { %v1638_v58 = vld [vmem:[#allocation2 + $0x1] sm:$0xff]  ;;  %3883 = vst [vmem:[#allocation3 + $0x13c] sm:$0xf] %v13310_v53  ;;  %1568 = vst [vmem:[#allocation2 + $0x23] sm:$0xff] %v1558_v10  ;;  %v13308_v9 = vpack.c.bf16 %v1558_v10, %v1558_v10  ;;  %v15098_v3 = vpop.f32.mrf.mxu0  ;;  %v13136_v14 = vpack.c.bf16 %v1590_v44, %v1590_v44 }
 0x178   :  { %v1686_v61 = vld [vmem:[#allocation2 + $0x2] sm:$0xff]  ;;  %v13144_v36 = vpack.c.bf16 %v1638_v58, %v1638_v58  ;;  %1780 = vst [vmem:[#allocation3 + $0x12c] sm:$0xf] %v13310_v53  ;;  %v1561_v12 = vsel %vm16341_vm7, %v1545_v4, 0.0  ;;  %v1543_v34 = vmax.f32 %v1495_v5, 0.0  ;;  %v1516_v8 = vadd.f32 %v15098_v3, %v1419_v42  ;;  %v1593_v49 = vld [vmem:[#allocation2 + $0x18] sm:$0xff] }
 0x179   :  { %3481 = vst [vmem:[#allocation2] sm:$0x7] %v18286_v6  ;;  %v13152_v59 = vpack.c.bf16 %v1686_v61, %v1686_v61  ;;  %v1641_v15 = vld [vmem:[#allocation2 + $0x19] sm:$0xff]  ;;  %3881 = vst [vmem:[#allocation3 + $0xdc] sm:$0xf] %v13308_v9  ;;  %v13311_v27 = vpack.c.bf16 %v1561_v12, %v1561_v12  ;;  %v1507_v40 = vpop.f32.mrf.mxu0  ;;  %v13139_v11 = vpack.c.bf16 %v1593_v49, %v1593_v49 }
 0x17a   :  { %v1689_v17 = vld [vmem:[#allocation2 + $0x1a] sm:$0xff]  ;;  %1571 = vst [vmem:[#allocation2 + $0x3b] sm:$0xff] %v1561_v12  ;;  %1630 = vst [vmem:[#allocation3] sm:$0xf] %v13136_v14  ;;  %v13147_v23 = vpack.c.bf16 %v1641_v15, %v1641_v15  ;;  %v1559_v28 = vsel %vm16314_vm5, %v1543_v34, 0.0  ;;  %v1548_v30 = vmax.f32 %v1516_v8, 0.0  ;;  %v1508_v63 = vadd.f32 %v1507_v40, %v16613_v57 }
 0x17b   :  { %1678 = vst [vmem:[#allocation3 + $0x4] sm:$0xf] %v13144_v36  ;;  %1726 = vst [vmem:[#allocation3 + $0x8] sm:$0xf] %v13152_v59  ;;  %v13155_v45 = vpack.c.bf16 %v1689_v17, %v1689_v17  ;;  %v1880_v25 = vld [vmem:[#allocation2 + $0x16] sm:$0xff]  ;;  %v1591_v18 = vld [vmem:[#allocation2 + $0x8] sm:$0xff]  ;;  %v13309_v32 = vpack.c.bf16 %v1559_v28, %v1559_v28  ;;  %v15099_v24 = vpop.f32.mrf.mxu0 }
 0x17c   :  { %1778 = vst [vmem:[#allocation3 + $0xcc] sm:$0xf] %v13308_v9  ;;  %v1639_v22 = vld [vmem:[#allocation2 + $0x9] sm:$0xff]  ;;  %v13186_v35 = vpack.c.bf16 %v1880_v25, %v1880_v25  ;;  %3884 = vst [vmem:[#allocation3 + $0x16c] sm:$0xf] %v13311_v27  ;;  %v13137_v39 = vpack.c.bf16 %v1591_v18, %v1591_v18  ;;  %v1640_v46 = vld [vmem:[#allocation2 + $0x11] sm:$0xff]  ;;  %v1519_v41 = vadd.f32 %v15099_v24, %v1422_v0 }
 0x17d   :  { %v1687_v2 = vld [vmem:[#allocation2 + $0xa] sm:$0xff]  ;;  %1569 = vst [vmem:[#allocation2 + $0x2b] sm:$0xff] %v1559_v28  ;;  %v13145_v1 = vpack.c.bf16 %v1639_v22, %v1639_v22  ;;  %1633 = vst [vmem:[#allocation3 + $0x90] sm:$0xf] %v13139_v11  ;;  %v1688_v33 = vld [vmem:[#allocation2 + $0x12] sm:$0xff]  ;;  %v1574_v57 = vsel %vm16384_vm10, %v1548_v30, 0.0  ;;  %v1510_v52 = vpop.f32.mrf.mxu0  ;;  %v13146_v53 = vpack.c.bf16 %v1640_v46, %v1640_v46 }
 0x17e   :  { %v13153_v21 = vpack.c.bf16 %v1687_v2, %v1687_v2  ;;  %v1592_v55 = vld [vmem:[#allocation2 + $0x10] sm:$0xff]  ;;  %1681 = vst [vmem:[#allocation3 + $0x94] sm:$0xf] %v13147_v23  ;;  %1729 = vst [vmem:[#allocation3 + $0x98] sm:$0xf] %v13155_v45  ;;  %v1546_v37 = vmax.f32 %v1508_v63, 0.0  ;;  %v13370_v43 = vpack.c.bf16 %v1574_v57, %v1574_v57  ;;  %v13154_v48 = vpack.c.bf16 %v1688_v33, %v1688_v33 }
 0x17f   :  { %1781 = vst [vmem:[#allocation3 + $0x15c] sm:$0xf] %v13311_v27  ;;  %v13138_v42 = vpack.c.bf16 %v1592_v55, %v1592_v55  ;;  %v1782_v31 = vld [vmem:[#allocation2 + $0x4] sm:$0xff]  ;;  %v1783_v47 = vld [vmem:[#allocation2 + $0xc] sm:$0xff]  ;;  %1920 = vst [vmem:[#allocation3 + $0x78] sm:$0xf] %v13186_v35  ;;  %v1511_v5 = vadd.f32 %v1510_v52, %v16641_v20  ;;  %v15102_v12 = vpop.f32.mrf.mxu0 }
 0x180   :  { %3882 = vst [vmem:[#allocation3 + $0x10c] sm:$0xf] %v13309_v32  ;;  %1584 = vst [vmem:[#allocation2 + $0x63] sm:$0xff] %v1574_v57  ;;  %v13168_v44 = vpack.c.bf16 %v1782_v31, %v1782_v31  ;;  %v1830_v58 = vld [vmem:[#allocation2 + $0x5] sm:$0xff]  ;;  %v16665_v61 = vld [vmem:[#allocation2 + $0xd] sm:$0xff]  ;;  %v1572_v0 = vsel %vm16357_vm8, %v1546_v37, 0.0  ;;  %v13169_v36 = vpack.c.bf16 %v1783_v47, %v1783_v47  ;;  %v1532_v28 = vadd.f32 %v15102_v12, %v16653_v54 }
 0x181   :  { %1631 = vst [vmem:[#allocation3 + $0x30] sm:$0xf] %v13137_v39  ;;  %1679 = vst [vmem:[#allocation3 + $0x34] sm:$0xf] %v13145_v1  ;;  %v1549_v4 = vmax.f32 %v1519_v41, 0.0  ;;  %v1594_v9 = vld [vmem:[#allocation2 + $0x20] sm:$0xff]  ;;  %v13368_v59 = vpack.c.bf16 %v1572_v0, %v1572_v0  ;;  %v13176_v30 = vpack.c.bf16 %v1830_v58, %v1830_v58  ;;  %v1523_v18 = vpop.f32.mrf.mxu0  ;;  %v13177_v46 = vpack.c.bf16 %v16665_v61, %v16665_v61 }
 0x182   :  { %1727 = vst [vmem:[#allocation3 + $0x38] sm:$0xf] %v13153_v21  ;;  %1779 = vst [vmem:[#allocation3 + $0xfc] sm:$0xf] %v13309_v32  ;;  %v1642_v3 = vld [vmem:[#allocation2 + $0x21] sm:$0xff]  ;;  %v13140_v34 = vpack.c.bf16 %v1594_v9, %v1594_v9  ;;  %v16672_v17 = vld [vmem:[#allocation2 + $0xe] sm:$0xff]  ;;  %v1524_v21 = vadd.f32 %v1523_v18, %v16646_v26 }
 0x183   :  { %1632 = vst [vmem:[#allocation3 + $0x60] sm:$0xf] %v13138_v42  ;;  %v1690_v14 = vld [vmem:[#allocation2 + $0x22] sm:$0xff]  ;;  %4255 = vst [vmem:[#allocation3 + $0x1fc] sm:$0xf] %v13370_v43  ;;  %v13148_v8 = vpack.c.bf16 %v1642_v3, %v1642_v3  ;;  %v1597_v27 = vld [vmem:[#allocation2 + $0x38] sm:$0xff]  ;;  %v15103_v57 = vpop.f32.mrf.mxu0  ;;  %v13185_v31 = vpack.c.bf16 %v16672_v17, %v16672_v17 }
 0x184   :  { %1582 = vst [vmem:[#allocation2 + $0x53] sm:$0xff] %v1572_v0  ;;  %1680 = vst [vmem:[#allocation3 + $0x64] sm:$0xf] %v13146_v53  ;;  %v13156_v49 = vpack.c.bf16 %v1690_v14, %v1690_v14  ;;  %v16670_v15 = vld [vmem:[#allocation2 + $0x6] sm:$0xff]  ;;  %v16674_v20 = vld [vmem:[#allocation2 + $0x1e] sm:$0xff]  ;;  %v1575_v45 = vsel %vm16397_vm11, %v1549_v4, 0.0  ;;  %v13143_v22 = vpack.c.bf16 %v1597_v27, %v1597_v27  ;;  %v1535_v58 = vadd.f32 %v15103_v57, %v16658_v13 }
 0x185   :  { %1728 = vst [vmem:[#allocation3 + $0x68] sm:$0xf] %v13154_v48  ;;  %2112 = vst [vmem:[#allocation3 + $0x1ec] sm:$0xf] %v13370_v43  ;;  %v1645_v40 = vld [vmem:[#allocation2 + $0x39] sm:$0xff]  ;;  %v1547_v25 = vmax.f32 %v1511_v5, 0.0  ;;  %v13371_v63 = vpack.c.bf16 %v1575_v45, %v1575_v45  ;;  %v13184_v26 = vpack.c.bf16 %v16670_v15, %v16670_v15  ;;  %v13187_v47 = vpack.c.bf16 %v16674_v20, %v16674_v20  ;;  %v1526_v14 = vpop.f32.mrf.mxu0 }
 0x186   :  { %1822 = vst [vmem:[#allocation3 + $0x10] sm:$0xf] %v13168_v44  ;;  %v1693_v11 = vld [vmem:[#allocation2 + $0x3a] sm:$0xff]  ;;  %1823 = vst [vmem:[#allocation3 + $0x40] sm:$0xf] %v13169_v36  ;;  %v13151_v2 = vpack.c.bf16 %v1645_v40, %v1645_v40  ;;  %v1552_v1 = vmax.f32 %v1532_v28, 0.0 }
 0x187   :  { %4253 = vst [vmem:[#allocation3 + $0x19c] sm:$0xf] %v13368_v59  ;;  %1585 = vst [vmem:[#allocation2 + $0x6b] sm:$0xff] %v1575_v45  ;;  %v13159_v35 = vpack.c.bf16 %v1693_v11, %v1693_v11  ;;  %v16679_v32 = vld [vmem:[#allocation2 + $0x14] sm:$0xff]  ;;  %v16681_v24 = vld [vmem:[#allocation2 + $0x1c] sm:$0xff]  ;;  %v1573_v54 = vsel %vm16363_vm9, %v1547_v25, 0.0  ;;  %v1527_v45 = vadd.f32 %v1526_v14, %v16648_v60 }
 0x188   :  { %1634 = vst [vmem:[#allocation3 + $0xc0] sm:$0xf] %v13140_v34  ;;  %1682 = vst [vmem:[#allocation3 + $0xc4] sm:$0xf] %v13148_v8  ;;  %v16689_v55 = vld [vmem:[%s18173_s4 + $0x138] sm:$0xff]   ;;  %v13369_v33 = vpack.c.bf16 %v1573_v54, %v1573_v54  ;;  %v1595_v37 = vld [vmem:[#allocation2 + $0x28] sm:$0xff]  ;;  %v13171_v25 = vpack.c.bf16 %v16681_v24, %v16681_v24 }
 0x189   :  { %1730 = vst [vmem:[#allocation3 + $0xc8] sm:$0xf] %v13156_v49  ;;  %2110 = vst [vmem:[#allocation3 + $0x18c] sm:$0xf] %v13368_v59  ;;  %v1643_v41 = vld [vmem:[#allocation2 + $0x29] sm:$0xff]  ;;  %v16699_v43 = vld [vmem:[#allocation2 + $0x15] sm:$0xff]  ;;  %v13141_v4 = vpack.c.bf16 %v1595_v37, %v1595_v37  ;;  %v13170_v49 = vpack.c.bf16 %v16679_v32, %v16679_v32 }
 0x18a   :  { %1870 = vst [vmem:[#allocation3 + $0x14] sm:$0xf] %v13176_v30  ;;  %4256 = vst [vmem:[#allocation3 + $0x22c] sm:$0xf] %v13371_v63  ;;  %v1691_v42 = vld [vmem:[#allocation2 + $0x2a] sm:$0xff]  ;;  %v16701_v52 = vld [vmem:[#allocation2 + $0x34] sm:$0xff]  ;;  %v13149_v13 = vpack.c.bf16 %v1643_v41, %v1643_v41 }
 0x18b   :  { %1583 = vst [vmem:[#allocation2 + $0x5b] sm:$0xff] %v1573_v54  ;;  %1637 = vst [vmem:[#allocation3 + $0x150] sm:$0xf] %v13143_v22  ;;  %v1578_v48 = vsel %vm16428_vm14, %v1552_v1, 0.0  ;;  %v1550_v44 = vmax.f32 %v1524_v21, 0.0  ;;  %v16709_v0 = vld [vmem:[%s18173_s4 + $0x170] sm:$0xff]   ;;  %v13157_v34 = vpack.c.bf16 %v1691_v42, %v1691_v42  ;;  %v13178_v1 = vpack.c.bf16 %v16699_v43, %v16699_v43 }
 0x18c   :  { %1685 = vst [vmem:[#allocation3 + $0x154] sm:$0xf] %v13151_v2  ;;  %1733 = vst [vmem:[#allocation3 + $0x158] sm:$0xf] %v13159_v35  ;;  %v15320_v61 = vld [vmem:[#allocation3 + $0x4] ss:$48 sps:$4 sm:$0xff]   ;;  %v13374_v3 = vpack.c.bf16 %v1578_v48, %v1578_v48  ;;  %v13174_v57 = vpack.c.bf16 %v16701_v52, %v16701_v52 }
 0x18d   :  { %2113 = vst [vmem:[#allocation3 + $0x21c] sm:$0xf] %v13371_v63  ;;  %1871 = vst [vmem:[#allocation3 + $0x44] sm:$0xf] %v13177_v46  ;;  %v16711_v5 = vld [vmem:[#allocation2 + $0x1d] sm:$0xff]  ;;  %v16718_v8 = vld [vmem:[%s18173_s4 + $0x1b0] sm:$0xff]   ;;  %3101 = vmatprep.mubr.bf16.mxu1 %v15320_v61 }
 0x18e   :  { %v16713_v9 = vld [vmem:[#allocation2 + $0x3c] sm:$0xff]  ;;  %4254 = vst [vmem:[#allocation3 + $0x1cc] sm:$0xf] %v13369_v33  ;;  %1588 = vst [vmem:[#allocation2 + $0x83] sm:$0xff] %v1578_v48  ;;  %v15325_v12 = vld [vmem:[#allocation3 + $0x8] ss:$48 sps:$4 sm:$0xff]  }
 0x18f   :  { %v15322_v36 = vld [vmem:[#allocation3 + $0xc] ss:$48 sps:$4 sm:$0xff]   ;;  %v15324_v59 = vld [vmem:[#allocation3] ss:$48 sps:$4 sm:$0xff]   ;;  %2111 = vst [vmem:[#allocation3 + $0x1bc] sm:$0xf] %v13369_v33  ;;  %v13179_v33 = vpack.c.bf16 %v16711_v5, %v16711_v5 }
 0x190   :  { %1918 = vst [vmem:[#allocation3 + $0x18] sm:$0xf] %v13184_v26  ;;  %1919 = vst [vmem:[#allocation3 + $0x48] sm:$0xf] %v13185_v31  ;;  %v1926_v15 = vld [vmem:[#allocation2 + $0x50] sm:$0xff]  ;;  %v1576_v40 = vsel %vm16408_vm12, %v1550_v44, 0.0  ;;  %3198 = vmatprep.mubr.bf16.mxu0 %v15322_v36  ;;  %3102 = vmatmul.mubr.bf16.vlgmr.msra.gmra.mxu1 %v15324_v59  ;;  %v13175_v31 = vpack.c.bf16 %v16713_v9, %v16713_v9 }
 0x191   :  { %1921 = vst [vmem:[#allocation3 + $0xa8] sm:$0xf] %v13187_v47  ;;  %v1974_v17 = vld [vmem:[#allocation2 + $0x51] sm:$0xff]  ;;  %v1553_v11 = vmax.f32 %v1535_v58, 0.0  ;;  %1635 = vst [vmem:[#allocation3 + $0xf0] sm:$0xf] %v13141_v4  ;;  %v13372_v28 = vpack.c.bf16 %v1576_v40, %v1576_v40  ;;  %v13192_v63 = vpack.c.bf16 %v1926_v15, %v1926_v15  ;;  %3199 = vmatmul.mubr.bf16.vlgmr.msra.gmra.mxu0 %v15325_v12  ;;  %14017 = vmatpush3.bf16.msra.mxu1 %v16689_v55 }
 0x192   :  { %v2022_v20 = vld [vmem:[#allocation2 + $0x52] sm:$0xff]  ;;  %4259 = vst [vmem:[#allocation3 + $0x2bc] sm:$0xf] %v13374_v3  ;;  %1586 = vst [vmem:[#allocation2 + $0x73] sm:$0xff] %v1576_v40  ;;  %v13200_v18 = vpack.c.bf16 %v1974_v17, %v1974_v17  ;;  %v1551_v2 = vmax.f32 %v1527_v45, 0.0  ;;  %v15344_v24 = vld [vmem:[%s18173_s4 + $0x168] sm:$0xff]   ;;  %14018 = vmatprep.subr.bf16.mxu1 %v16709_v0 }
 0x193   :  { %3499 = vst [vmem:[#allocation2 + $0x50] sm:$0x7] %v18286_v6  ;;  %v15327_v30 = vld [vmem:[#allocation3 + $0x64] ss:$48 sps:$4 sm:$0xff]   ;;  %1683 = vst [vmem:[#allocation3 + $0xf4] sm:$0xf] %v13149_v13  ;;  %v13208_v54 = vpack.c.bf16 %v2022_v20, %v2022_v20 }
 0x194   :  { %1731 = vst [vmem:[#allocation3 + $0xf8] sm:$0xf] %v13157_v34  ;;  %2116 = vst [vmem:[#allocation3 + $0x2ac] sm:$0xf] %v13374_v3  ;;  %v1579_v22 = vsel %vm16434_vm15, %v1553_v11, 0.0  ;;  %v15340_v32 = vld [vmem:[%s18173_s4 + $0x130] sm:$0xff]   ;;  %3109 = vmatprep.mubr.bf16.mxu1 %v15327_v30 }
 0x195   :  { %1824 = vst [vmem:[#allocation3 + $0x70] sm:$0xf] %v13170_v49  ;;  %v15329_v35 = vld [vmem:[#allocation3 + $0x6c] ss:$48 sps:$4 sm:$0xff]   ;;  %1825 = vst [vmem:[#allocation3 + $0xa0] sm:$0xf] %v13171_v25  ;;  %v13375_v21 = vpack.c.bf16 %v1579_v22, %v1579_v22  ;;  %14019 = vmatpush3.bf16.msra.mxu1 %v15340_v32 }
 0x196   :  { %4257 = vst [vmem:[#allocation3 + $0x25c] sm:$0xf] %v13372_v28  ;;  %1589 = vst [vmem:[#allocation2 + $0x8b] sm:$0xff] %v1579_v22  ;;  %v16040_v55 = vld [vmem:[%s18173_s4 + $0x1b8] sm:$0xff]   ;;  %v16745_v46 = vld [vmem:[%s18173_s4 + $0x1a8] sm:$0xff]   ;;  %v1577_v41 = vsel %vm16414_vm13, %v1551_v2, 0.0  ;;  %3206 = vmatprep.mubr.bf16.mxu0 %v15329_v35  ;;  %14020 = vmatprep.subr.bf16.mxu1 %v15344_v24 }
 0x197   :  { %15105 = vmatpush3.bf16.msra.mxu0 %v16040_v55  ;;  %1966 = vst [vmem:[#allocation3 + $0x180] sm:$0xf] %v13192_v63  ;;  %2014 = vst [vmem:[#allocation3 + $0x184] sm:$0xf] %v13200_v18  ;;  %v1596_v42 = vld [vmem:[#allocation2 + $0x30] sm:$0xff]  ;;  %v13373_v47 = vpack.c.bf16 %v1577_v41, %v1577_v41  ;;  %v15349_v58 = vld [vmem:[%s18173_s4 + $0x128] sm:$0xff]  }
 0x198   :  { %2114 = vst [vmem:[#allocation3 + $0x24c] sm:$0xf] %v13372_v28  ;;  %v1644_v26 = vld [vmem:[#allocation2 + $0x31] sm:$0xff]  ;;  %2062 = vst [vmem:[#allocation3 + $0x188] sm:$0xf] %v13208_v54  ;;  %15106 = vmatprep.subr.bf16.mxu0 %v16718_v8  ;;  %v13142_v52 = vpack.c.bf16 %v1596_v42, %v1596_v42  ;;  %v15353_v5 = vld [vmem:[%s18173_s4 + $0x160] sm:$0xff]  }
 0x199   :  { %1872 = vst [vmem:[#allocation3 + $0x74] sm:$0xf] %v13178_v1  ;;  %4260 = vst [vmem:[#allocation3 + $0x2ec] sm:$0xf] %v13375_v21  ;;  %v15333_v43 = vld [vmem:[#allocation3 + $0x60] ss:$48 sps:$4 sm:$0xff]   ;;  %v13150_v48 = vpack.c.bf16 %v1644_v26, %v1644_v26  ;;  %14021 = vmatpush3.bf16.msra.mxu1 %v15349_v58 }
 0x19a   :  { %1587 = vst [vmem:[#allocation2 + $0x7b] sm:$0xff] %v1577_v41  ;;  %v1692_v44 = vld [vmem:[#allocation2 + $0x32] sm:$0xff]  ;;  %2117 = vst [vmem:[#allocation3 + $0x2dc] sm:$0xf] %v13375_v21  ;;  %v2023_v14 = vld [vmem:[#allocation2 + $0x5a] sm:$0xff]  ;;  %3110 = vmatmul.mubr.bf16.gmra.mxu1 %v15333_v43  ;;  %14022 = vmatprep.subr.bf16.mxu1 %v15353_v5 }
 0x19b   :  { %v1927_v61 = vld [vmem:[#allocation2 + $0x58] sm:$0xff]  ;;  %1873 = vst [vmem:[#allocation3 + $0xa4] sm:$0xf] %v13179_v33  ;;  %1828 = vst [vmem:[#allocation3 + $0x130] sm:$0xf] %v13174_v57  ;;  %v13158_v4 = vpack.c.bf16 %v1692_v44, %v1692_v44  ;;  %v1928_v36 = vld [vmem:[#allocation2 + $0x60] sm:$0xff]  ;;  %15107 = vmatpush3.bf16.msra.mxu0 %v16718_v8  ;;  %v13209_v12 = vpack.c.bf16 %v2023_v14, %v2023_v14 }
 0x19c   :  { %v15334_v0 = vld [vmem:[#allocation3 + $0x68] ss:$48 sps:$4 sm:$0xff]   ;;  %v13193_v9 = vpack.c.bf16 %v1927_v61, %v1927_v61  ;;  %1829 = vst [vmem:[#allocation3 + $0x160] sm:$0xf] %v13175_v31  ;;  %4258 = vst [vmem:[#allocation3 + $0x28c] sm:$0xf] %v13373_v47  ;;  %v13194_v34 = vpack.c.bf16 %v1928_v36, %v1928_v36  ;;  %15108 = vmatprep.subr.bf16.mxu0 %v16745_v46 }
 0x19d   :  { %v1975_v3 = vld [vmem:[#allocation2 + $0x59] sm:$0xff]  ;;  %1636 = vst [vmem:[#allocation3 + $0x120] sm:$0xf] %v13142_v52  ;;  %1684 = vst [vmem:[#allocation3 + $0x124] sm:$0xf] %v13150_v48  ;;  %v1929_v13 = vld [vmem:[#allocation2 + $0x68] sm:$0xff]  ;;  %3207 = vmatmul.mubr.bf16.gmra.mxu0 %v15334_v0 }
 0x19e   :  { %v13201_v59 = vpack.c.bf16 %v1975_v3, %v1975_v3  ;;  %v1976_v49 = vld [vmem:[#allocation2 + $0x61] sm:$0xff]  ;;  %v1977_v15 = vld [vmem:[#allocation2 + $0x69] sm:$0xff]  ;;  %2115 = vst [vmem:[#allocation3 + $0x27c] sm:$0xf] %v13373_v47  ;;  %1732 = vst [vmem:[#allocation3 + $0x128] sm:$0xf] %v13158_v4  ;;  %v13195_v20 = vpack.c.bf16 %v1929_v13, %v1929_v13 }
 0x19f   :  { %v15336_v17 = vld [vmem:[#allocation3 + $0xc4] ss:$48 sps:$4 sm:$0xff]   ;;  %1967 = vst [vmem:[#allocation3 + $0x1b0] sm:$0xf] %v13193_v9  ;;  %v13202_v40 = vpack.c.bf16 %v1976_v49, %v1976_v49  ;;  %v13203_v11 = vpack.c.bf16 %v1977_v15, %v1977_v15  ;;  %v15338_v8 = vld [vmem:[#allocation3 + $0xcc] ss:$48 sps:$4 sm:$0xff]   ;;  %15109 = vmatpush3.bf16.msra.mxu0 %v16745_v46 }
 0x1a0   :  { %2015 = vst [vmem:[#allocation3 + $0x1b4] sm:$0xf] %v13201_v59  ;;  %2063 = vst [vmem:[#allocation3 + $0x1b8] sm:$0xf] %v13209_v12  ;;  %v15358_v45 = vld [vmem:[%s18173_s4 + $0x120] sm:$0xff]   ;;  %v1933_v28 = vld [vmem:[#allocation2 + $0x88] sm:$0xff]  ;;  %3117 = vmatprep.mubr.bf16.mxu1 %v15336_v17  ;;  %3214 = vmatprep.mubr.bf16.mxu0 %v15338_v8 }
 0x1a1   :  { %v15359_v25 = vld [vmem:[%s18173_s4 + $0x1a0] sm:$0xff]   ;;  %1968 = vst [vmem:[#allocation3 + $0x1e0] sm:$0xf] %v13194_v34  ;;  %v1981_v30 = vld [vmem:[#allocation2 + $0x89] sm:$0xff]  ;;  %v15362_v18 = vld [vmem:[%s18173_s4 + $0x158] sm:$0xff]   ;;  %v13199_v32 = vpack.c.bf16 %v1933_v28, %v1933_v28  ;;  %14023 = vmatpush3.bf16.msra.mxu1 %v15358_v45 }
 0x1a2   :  { %v2029_v63 = vld [vmem:[#allocation2 + $0x8a] sm:$0xff]  ;;  %1969 = vst [vmem:[#allocation3 + $0x210] sm:$0xf] %v13195_v20  ;;  %2016 = vst [vmem:[#allocation3 + $0x1e4] sm:$0xf] %v13202_v40  ;;  %v15368_v35 = vld [vmem:[%s18173_s4 + $0x198] sm:$0xff]   ;;  %v13207_v24 = vpack.c.bf16 %v1981_v30, %v1981_v30  ;;  %15110 = vmatprep.subr.bf16.mxu0 %v15359_v25  ;;  %14024 = vmatprep.subr.bf16.mxu1 %v15362_v18 }
 0x1a3   :  { %2017 = vst [vmem:[#allocation3 + $0x214] sm:$0xf] %v13203_v11  ;;  %v2124_v22 = vld [vmem:[#allocation2 + $0x84] sm:$0xff]  ;;  %v2125_v2 = vld [vmem:[#allocation2 + $0x8c] sm:$0xff]  ;;  %v13215_v54 = vpack.c.bf16 %v2029_v63, %v2029_v63  ;;  %v1931_v26 = vld [vmem:[#allocation2 + $0x78] sm:$0xff]  ;;  %15111 = vmatpush3.bf16.msra.mxu0 %v15359_v25 }
 0x1a4   :  { %v2024_v1 = vld [vmem:[#allocation2 + $0x62] sm:$0xff]  ;;  %v2025_v21 = vld [vmem:[#allocation2 + $0x6a] sm:$0xff]  ;;  %v13230_v55 = vpack.c.bf16 %v2124_v22, %v2124_v22  ;;  %v13231_v33 = vpack.c.bf16 %v2125_v2, %v2125_v2  ;;  %1973 = vst [vmem:[#allocation3 + $0x2d0] sm:$0xf] %v13199_v32  ;;  %2021 = vst [vmem:[#allocation3 + $0x2d4] sm:$0xf] %v13207_v24  ;;  %v13197_v52 = vpack.c.bf16 %v1931_v26, %v1931_v26  ;;  %15112 = vmatprep.subr.bf16.mxu0 %v15368_v35 }
 0x1a5   :  { %v13210_v57 = vpack.c.bf16 %v2024_v1, %v2024_v1  ;;  %v13211_v41 = vpack.c.bf16 %v2025_v21, %v2025_v21  ;;  %v1930_v42 = vld [vmem:[#allocation2 + $0x70] sm:$0xff]  ;;  %2069 = vst [vmem:[#allocation3 + $0x2d8] sm:$0xf] %v13215_v54  ;;  %v15367_v47 = vld [vmem:[%s18173_s4 + $0x118] sm:$0xff]   ;;  %v15380_v9 = vld [vmem:[%s18173_s4 + $0x148] sm:$0xff]  }
 0x1a6   :  { %v1978_v31 = vld [vmem:[#allocation2 + $0x71] sm:$0xff]  ;;  %v13196_v43 = vpack.c.bf16 %v1930_v42, %v1930_v42  ;;  %2164 = vst [vmem:[#allocation3 + $0x2b0] sm:$0xf] %v13230_v55  ;;  %2165 = vst [vmem:[#allocation3 + $0x2e0] sm:$0xf] %v13231_v33  ;;  %14025 = vmatpush3.bf16.msra.mxu1 %v15367_v47  ;;  %v1979_v3 = vld [vmem:[#allocation2 + $0x79] sm:$0xff] }
 0x1a7   :  { %v15371_v46 = vld [vmem:[%s18173_s4 + $0x150] sm:$0xff]   ;;  %v13204_v48 = vpack.c.bf16 %v1978_v31, %v1978_v31  ;;  %v15343_v58 = vld [vmem:[#allocation3 + $0xc8] ss:$48 sps:$4 sm:$0xff]   ;;  %2064 = vst [vmem:[#allocation3 + $0x1e8] sm:$0xf] %v13210_v57  ;;  %15113 = vmatpush3.bf16.msra.mxu0 %v15368_v35  ;;  %v13205_v59 = vpack.c.bf16 %v1979_v3, %v1979_v3  ;;  %v1932_v34 = vld [vmem:[#allocation2 + $0x80] sm:$0xff] }
 0x1a8   :  { %v15342_v44 = vld [vmem:[#allocation3 + $0xc0] ss:$48 sps:$4 sm:$0xff]   ;;  %2065 = vst [vmem:[#allocation3 + $0x218] sm:$0xf] %v13211_v41  ;;  %v15345_v61 = vld [vmem:[#allocation3 + $0x124] ss:$48 sps:$4 sm:$0xff]   ;;  %3215 = vmatmul.mubr.bf16.gmra.mxu0 %v15343_v58  ;;  %14026 = vmatprep.subr.bf16.mxu1 %v15371_v46  ;;  %v13198_v17 = vpack.c.bf16 %v1932_v34, %v1932_v34 }
 0x1a9   :  { %1970 = vst [vmem:[#allocation3 + $0x240] sm:$0xf] %v13196_v43  ;;  %1971 = vst [vmem:[#allocation3 + $0x270] sm:$0xf] %v13197_v52  ;;  %3118 = vmatmul.mubr.bf16.gmra.mxu1 %v15342_v44  ;;  %v15347_v0 = vld [vmem:[#allocation3 + $0x12c] ss:$48 sps:$4 sm:$0xff]  }
 0x1aa   :  { %2018 = vst [vmem:[#allocation3 + $0x244] sm:$0xf] %v13204_v48  ;;  %v15376_v4 = vld [vmem:[%s18173_s4 + $0x110] sm:$0xff]   ;;  %3125 = vmatprep.mubr.bf16.mxu1 %v15345_v61  ;;  %3222 = vmatprep.mubr.bf16.mxu0 %v15347_v0  ;;  %v15386_v36 = vld [vmem:[%s18173_s4 + $0x188] sm:$0xff]   ;;  %v2027_v12 = vld [vmem:[#allocation2 + $0x7a] sm:$0xff] }
 0x1ab   :  { %v15377_v5 = vld [vmem:[%s18173_s4 + $0x190] sm:$0xff]   ;;  %v1980_v49 = vld [vmem:[#allocation2 + $0x81] sm:$0xff]  ;;  %v13213_v15 = vpack.c.bf16 %v2027_v12, %v2027_v12  ;;  %2019 = vst [vmem:[#allocation3 + $0x274] sm:$0xf] %v13205_v59  ;;  %14027 = vmatpush3.bf16.msra.mxu1 %v15376_v4  ;;  %1972 = vst [vmem:[#allocation3 + $0x2a0] sm:$0xf] %v13198_v17 }
 0x1ac   :  { %v2026_v14 = vld [vmem:[#allocation2 + $0x72] sm:$0xff]  ;;  %15114 = vmatprep.subr.bf16.mxu0 %v15377_v5  ;;  %v13206_v20 = vpack.c.bf16 %v1980_v49, %v1980_v49  ;;  %v2028_v40 = vld [vmem:[#allocation2 + $0x82] sm:$0xff]  ;;  %14028 = vmatprep.subr.bf16.mxu1 %v15380_v9  ;;  %v15356_v63 = vld [vmem:[#allocation3 + $0x18c] ss:$48 sps:$4 sm:$0xff]  }
 0x1ad   :  { %v13212_v13 = vpack.c.bf16 %v2026_v14, %v2026_v14  ;;  %v15385_v11 = vld [vmem:[%s18173_s4 + $0x108] sm:$0xff]   ;;  %v15351_v8 = vld [vmem:[#allocation3 + $0x120] ss:$48 sps:$4 sm:$0xff]   ;;  %v13214_v45 = vpack.c.bf16 %v2028_v40, %v2028_v40  ;;  %2067 = vst [vmem:[#allocation3 + $0x278] sm:$0xf] %v13213_v15  ;;  %15115 = vmatpush3.bf16.msra.mxu0 %v15377_v5  ;;  %v1884_v33 = vld [vmem:[#allocation2 + $0x36] sm:$0xff] }
 0x1ae   :  { %v15389_v25 = vld [vmem:[%s18173_s4 + $0x140] sm:$0xff]   ;;  %v15352_v28 = vld [vmem:[#allocation3 + $0x128] ss:$48 sps:$4 sm:$0xff]   ;;  %2020 = vst [vmem:[#allocation3 + $0x2a4] sm:$0xf] %v13206_v20  ;;  %15116 = vmatprep.subr.bf16.mxu0 %v15386_v36  ;;  %v1883_v35 = vld [vmem:[#allocation2 + $0x2e] sm:$0xff]  ;;  %v13190_v41 = vpack.c.bf16 %v1884_v33, %v1884_v33 }
 0x1af   :  { %2066 = vst [vmem:[#allocation3 + $0x248] sm:$0xf] %v13212_v13  ;;  %v15354_v30 = vld [vmem:[#allocation3 + $0x184] ss:$48 sps:$4 sm:$0xff]   ;;  %2068 = vst [vmem:[#allocation3 + $0x2a8] sm:$0xf] %v13214_v45  ;;  %14029 = vmatpush3.bf16.msra.mxu1 %v15385_v11  ;;  %v13189_v24 = vpack.c.bf16 %v1883_v35, %v1883_v35 }
 0x1b0   :  { %v15394_v18 = vld [vmem:[%s18173_s4 + $0x180] sm:$0xff]   ;;  %3223 = vmatmul.mubr.bf16.gmra.mxu0 %v15352_v28  ;;  %14030 = vmatprep.subr.bf16.mxu1 %v15389_v25  ;;  %v15361_v1 = vld [vmem:[#allocation3 + $0x188] ss:$48 sps:$4 sm:$0xff]   ;;  %v15365_v55 = vld [vmem:[#allocation3 + $0x1ec] ss:$48 sps:$4 sm:$0xff]  }
 0x1b1   :  { %3126 = vmatmul.mubr.bf16.gmra.mxu1 %v15351_v8  ;;  %3230 = vmatprep.mubr.bf16.mxu0 %v15356_v63  ;;  %v15390_v22 = vld [vmem:[%s18173_s4 + $0x100] sm:$0xff]   ;;  %1923 = vst [vmem:[#allocation3 + $0x108] sm:$0xf] %v13189_v24  ;;  %v1787_v31 = vld [vmem:[#allocation2 + $0x2c] sm:$0xff]  ;;  %v2214_v44 = vld [vmem:[#allocation2 + $0x56] sm:$0xff] }
 0x1b2   :  { %3133 = vmatprep.mubr.bf16.mxu1 %v15354_v30  ;;  %15117 = vmatpush3.bf16.msra.mxu0 %v15386_v36  ;;  %v1882_v2 = vld [vmem:[#allocation2 + $0x26] sm:$0xff]  ;;  %v15360_v54 = vld [vmem:[#allocation3 + $0x180] ss:$48 sps:$4 sm:$0xff]   ;;  %v13173_v43 = vpack.c.bf16 %v1787_v31, %v1787_v31  ;;  %1924 = vst [vmem:[#allocation3 + $0x138] sm:$0xf] %v13190_v41  ;;  %v13240_v0 = vpack.c.bf16 %v2214_v44, %v2214_v44  ;;  %v1836_v3 = vld [vmem:[#allocation2 + $0x35] sm:$0xff] }
 0x1b3   :  { %15118 = vmatprep.subr.bf16.mxu0 %v15394_v18  ;;  %v13188_v32 = vpack.c.bf16 %v1882_v2, %v1882_v2  ;;  %14031 = vmatpush3.bf16.msra.mxu1 %v15390_v22  ;;  %v15363_v21 = vld [vmem:[#allocation3 + $0x1e4] ss:$48 sps:$4 sm:$0xff]   ;;  %v15369_v14 = vld [vmem:[#allocation3 + $0x1e0] ss:$48 sps:$4 sm:$0xff]   ;;  %v13182_v13 = vpack.c.bf16 %v1836_v3, %v1836_v3  ;;  %v15370_v15 = vld [vmem:[#allocation3 + $0x1e8] ss:$48 sps:$4 sm:$0xff]  }
 0x1b4   :  { %v1885_v57 = vld [vmem:[#allocation2 + $0x3e] sm:$0xff]  ;;  %v1835_v52 = vld [vmem:[#allocation2 + $0x2d] sm:$0xff]  ;;  %1827 = vst [vmem:[#allocation3 + $0x100] sm:$0xf] %v13173_v43  ;;  %v2218_v34 = vld [vmem:[#allocation2 + $0x76] sm:$0xff] }
 0x1b5   :  { %1922 = vst [vmem:[#allocation3 + $0xd8] sm:$0xf] %v13188_v32  ;;  %v13191_v42 = vpack.c.bf16 %v1885_v57, %v1885_v57  ;;  %v1786_v26 = vld [vmem:[#allocation2 + $0x24] sm:$0xff]  ;;  %v13181_v61 = vpack.c.bf16 %v1835_v52, %v1835_v52  ;;  %v2217_v9 = vld [vmem:[#allocation2 + $0x6e] sm:$0xff]  ;;  %2254 = vst [vmem:[#allocation3 + $0x198] sm:$0xf] %v13240_v0  ;;  %v13244_v40 = vpack.c.bf16 %v2218_v34, %v2218_v34 }
 0x1b6   :  { %15119 = vmatpush3.bf16.msra.mxu0 %v15394_v18  ;;  %v1834_v47 = vld [vmem:[#allocation2 + $0x25] sm:$0xff]  ;;  %v13172_v46 = vpack.c.bf16 %v1786_v26, %v1786_v26  ;;  %v13243_v59 = vpack.c.bf16 %v2217_v9, %v2217_v9  ;;  %v1837_v12 = vld [vmem:[#allocation2 + $0x3d] sm:$0xff]  ;;  %1876 = vst [vmem:[#allocation3 + $0x134] sm:$0xf] %v13182_v13  ;;  %v2221_v25 = vld [vmem:[#allocation2 + $0x8e] sm:$0xff] }
 0x1b7   :  { %v13180_v48 = vpack.c.bf16 %v1834_v47, %v1834_v47  ;;  %v2215_v58 = vld [vmem:[#allocation2 + $0x5e] sm:$0xff]  ;;  %1925 = vst [vmem:[#allocation3 + $0x168] sm:$0xf] %v13191_v42  ;;  %v2216_v5 = vld [vmem:[#allocation2 + $0x66] sm:$0xff]  ;;  %1875 = vst [vmem:[#allocation3 + $0x104] sm:$0xf] %v13181_v61  ;;  %v13183_v20 = vpack.c.bf16 %v1837_v12, %v1837_v12  ;;  %v13247_v63 = vpack.c.bf16 %v2221_v25, %v2221_v25 }
 0x1b8   :  { %3231 = vmatmul.mubr.bf16.gmra.mxu0 %v15361_v1  ;;  %v13241_v4 = vpack.c.bf16 %v2215_v58, %v2215_v58  ;;  %1826 = vst [vmem:[#allocation3 + $0xd0] sm:$0xf] %v13172_v46  ;;  %v13242_v36 = vpack.c.bf16 %v2216_v5, %v2216_v5  ;;  %v2219_v49 = vld [vmem:[#allocation2 + $0x7e] sm:$0xff]  ;;  %3482 = vst [vmem:[#allocation2 + $0x43] sm:$0x7] %v18286_v6  ;;  %v2220_v45 = vld [vmem:[#allocation2 + $0x86] sm:$0xff] }
 0x1b9   :  { %3134 = vmatmul.mubr.bf16.gmra.mxu1 %v15360_v54  ;;  %3238 = vmatprep.mubr.bf16.mxu0 %v15365_v55  ;;  %1874 = vst [vmem:[#allocation3 + $0xd4] sm:$0xf] %v13180_v48  ;;  %v15372_v17 = vld [vmem:[#allocation3 + $0x244] ss:$48 sps:$4 sm:$0xff]   ;;  %v13245_v11 = vpack.c.bf16 %v2219_v49, %v2219_v49  ;;  %v15374_v8 = vld [vmem:[#allocation3 + $0x24c] ss:$48 sps:$4 sm:$0xff]   ;;  %v13246_v30 = vpack.c.bf16 %v2220_v45, %v2220_v45 }
 0x1ba   :  { %3141 = vmatprep.mubr.bf16.mxu1 %v15363_v21  ;;  %2255 = vst [vmem:[#allocation3 + $0x1c8] sm:$0xf] %v13241_v4  ;;  %2256 = vst [vmem:[#allocation3 + $0x1f8] sm:$0xf] %v13242_v36  ;;  %v2118_v28 = vld [vmem:[#allocation2 + $0x54] sm:$0xff]  ;;  %v2119_v18 = vld [vmem:[#allocation2 + $0x5c] sm:$0xff] }
 0x1bb   :  { %2257 = vst [vmem:[#allocation3 + $0x228] sm:$0xf] %v13243_v59  ;;  %1877 = vst [vmem:[#allocation3 + $0x164] sm:$0xf] %v13183_v20  ;;  %v13224_v22 = vpack.c.bf16 %v2118_v28, %v2118_v28  ;;  %v2166_v2 = vld [vmem:[#allocation2 + $0x55] sm:$0xff]  ;;  %v2167_v35 = vld [vmem:[#allocation2 + $0x5d] sm:$0xff]  ;;  %v13225_v32 = vpack.c.bf16 %v2119_v18, %v2119_v18 }
 0x1bc   :  { %2258 = vst [vmem:[#allocation3 + $0x258] sm:$0xf] %v13244_v40  ;;  %2259 = vst [vmem:[#allocation3 + $0x288] sm:$0xf] %v13245_v11  ;;  %v13232_v24 = vpack.c.bf16 %v2166_v2, %v2166_v2  ;;  %v13233_v54 = vpack.c.bf16 %v2167_v35, %v2167_v35  ;;  %v2120_v1 = vld [vmem:[#allocation2 + $0x64] sm:$0xff]  ;;  %v2121_v21 = vld [vmem:[#allocation2 + $0x6c] sm:$0xff] }
 0x1bd   :  { %v2168_v55 = vld [vmem:[#allocation2 + $0x65] sm:$0xff]  ;;  %2260 = vst [vmem:[#allocation3 + $0x2b8] sm:$0xf] %v13246_v30  ;;  %2261 = vst [vmem:[#allocation3 + $0x2e8] sm:$0xf] %v13247_v63  ;;  %v13226_v33 = vpack.c.bf16 %v2120_v1, %v2120_v1  ;;  %v13227_v57 = vpack.c.bf16 %v2121_v21, %v2121_v21  ;;  %v2169_v41 = vld [vmem:[#allocation2 + $0x6d] sm:$0xff] }
 0x1be   :  { %2158 = vst [vmem:[#allocation3 + $0x190] sm:$0xf] %v13224_v22  ;;  %v13234_v42 = vpack.c.bf16 %v2168_v55, %v2168_v55  ;;  %v2122_v26 = vld [vmem:[#allocation2 + $0x74] sm:$0xff]  ;;  %v2123_v31 = vld [vmem:[#allocation2 + $0x7c] sm:$0xff]  ;;  %2159 = vst [vmem:[#allocation3 + $0x1c0] sm:$0xf] %v13225_v32  ;;  %v13235_v47 = vpack.c.bf16 %v2169_v41, %v2169_v41 }
 0x1bf   :  { %2206 = vst [vmem:[#allocation3 + $0x194] sm:$0xf] %v13232_v24  ;;  %2207 = vst [vmem:[#allocation3 + $0x1c4] sm:$0xf] %v13233_v54  ;;  %v13228_v46 = vpack.c.bf16 %v2122_v26, %v2122_v26  ;;  %v13229_v43 = vpack.c.bf16 %v2123_v31, %v2123_v31  ;;  %v2170_v52 = vld [vmem:[#allocation2 + $0x75] sm:$0xff]  ;;  %v2171_v48 = vld [vmem:[#allocation2 + $0x7d] sm:$0xff] }
 0x1c0   :  { %3239 = vmatmul.mubr.bf16.gmra.mxu0 %v15370_v15  ;;  %2160 = vst [vmem:[#allocation3 + $0x1f0] sm:$0xf] %v13226_v33  ;;  %2161 = vst [vmem:[#allocation3 + $0x220] sm:$0xf] %v13227_v57  ;;  %v13236_v44 = vpack.c.bf16 %v2170_v52, %v2170_v52  ;;  %v13237_v58 = vpack.c.bf16 %v2171_v48, %v2171_v48  ;;  %v15378_v61 = vld [vmem:[#allocation3 + $0x240] ss:$48 sps:$4 sm:$0xff]  }
 0x1c1   :  { %3142 = vmatmul.mubr.bf16.gmra.mxu1 %v15369_v14  ;;  %3246 = vmatprep.mubr.bf16.mxu0 %v15374_v8  ;;  %2208 = vst [vmem:[#allocation3 + $0x1f4] sm:$0xf] %v13234_v42  ;;  %2209 = vst [vmem:[#allocation3 + $0x224] sm:$0xf] %v13235_v47  ;;  %v15379_v0 = vld [vmem:[#allocation3 + $0x248] ss:$48 sps:$4 sm:$0xff]  }
 0x1c2   :  { %3149 = vmatprep.mubr.bf16.mxu1 %v15372_v17  ;;  %2162 = vst [vmem:[#allocation3 + $0x250] sm:$0xf] %v13228_v46  ;;  %2163 = vst [vmem:[#allocation3 + $0x280] sm:$0xf] %v13229_v43  ;;  %v15381_v4 = vld [vmem:[#allocation3 + $0x2a4] ss:$48 sps:$4 sm:$0xff]  }
 0x1c3   :  { %2210 = vst [vmem:[#allocation3 + $0x254] sm:$0xf] %v13236_v44  ;;  %2211 = vst [vmem:[#allocation3 + $0x284] sm:$0xf] %v13237_v58  ;;  %v15383_v5 = vld [vmem:[#allocation3 + $0x2ac] ss:$48 sps:$4 sm:$0xff]  }
 0x1c4   :  { %v15387_v9 = vld [vmem:[#allocation3 + $0x2a0] ss:$48 sps:$4 sm:$0xff]   ;;  %v2172_v3 = vld [vmem:[#allocation2 + $0x85] sm:$0xff]  ;;  %v15424_v1 = vld [vmem:[#allocation8 + $0xf8] sm:$0xff]  }
 0x1c5   :  { %v2173_v14 = vld [vmem:[#allocation2 + $0x8d] sm:$0xff]  ;;  %v15388_v36 = vld [vmem:[#allocation3 + $0x2a8] ss:$48 sps:$4 sm:$0xff]   ;;  %v13238_v12 = vpack.c.bf16 %v2172_v3, %v2172_v3  ;;  %14160 = vmatprep.subr.bf16.mxu1 %v15424_v1  ;;  %v15430_v47 = vld [vmem:[#allocation8 + $0xe0] sm:$0xff]  }
 0x1c6   :  { %v15391_v59 = vld [vmem:[#allocation3 + $0x14] ss:$48 sps:$4 sm:$0xff]   ;;  %v13239_v13 = vpack.c.bf16 %v2173_v14, %v2173_v14  ;;  %3500 = vst [vmem:[#allocation2 + $0x93] sm:$0x7] %v18286_v6  ;;  %v15393_v34 = vld [vmem:[#allocation3 + $0x18] ss:$48 sps:$4 sm:$0xff]  }
 0x1c7   :  { %2212 = vst [vmem:[#allocation3 + $0x2b4] sm:$0xf] %v13238_v12  ;;  %v15395_v49 = vld [vmem:[#allocation3 + $0x10] ss:$48 sps:$4 sm:$0xff]   ;;  %v15396_v15 = vld [vmem:[#allocation3 + $0x78] ss:$48 sps:$4 sm:$0xff]  }
 0x1c8   :  { %3247 = vmatmul.mubr.bf16.gmra.mxu0 %v15379_v0  ;;  %2213 = vst [vmem:[#allocation3 + $0x2e4] sm:$0xf] %v13239_v13  ;;  %v15397_v17 = vld [vmem:[#allocation3 + $0x74] ss:$48 sps:$4 sm:$0xff]   ;;  %v15399_v20 = vld [vmem:[#allocation3 + $0xd8] ss:$48 sps:$4 sm:$0xff]  }
 0x1c9   :  { %3150 = vmatmul.mubr.bf16.gmra.mxu1 %v15378_v61  ;;  %3254 = vmatprep.mubr.bf16.mxu0 %v15383_v5  ;;  %v15400_v40 = vld [vmem:[#allocation3 + $0x70] ss:$48 sps:$4 sm:$0xff]   ;;  %v15401_v11 = vld [vmem:[#allocation3 + $0x138] ss:$48 sps:$4 sm:$0xff]   ;;  %v15402_v8 = vld [vmem:[#allocation3 + $0xd4] ss:$48 sps:$4 sm:$0xff]  }
 0x1ca   :  { %3157 = vmatprep.mubr.bf16.mxu1 %v15381_v4  ;;  %v15404_v45 = vld [vmem:[#allocation3 + $0x198] ss:$48 sps:$4 sm:$0xff]   ;;  %v15405_v25 = vld [vmem:[#allocation3 + $0xd0] ss:$48 sps:$4 sm:$0xff]   ;;  %v15407_v30 = vld [vmem:[#allocation3 + $0x134] ss:$48 sps:$4 sm:$0xff]  }
 0x1cb   :  { %v15406_v28 = vld [vmem:[#allocation3 + $0x1f8] ss:$48 sps:$4 sm:$0xff]   ;;  %v15410_v18 = vld [vmem:[#allocation3 + $0x130] ss:$48 sps:$4 sm:$0xff]   ;;  %v15412_v2 = vld [vmem:[#allocation3 + $0x194] ss:$48 sps:$4 sm:$0xff]  }
 0x1cc   :  { %v15409_v63 = vld [vmem:[#allocation3 + $0x258] ss:$48 sps:$4 sm:$0xff]   ;;  %v15414_v35 = vld [vmem:[#allocation3 + $0x190] ss:$48 sps:$4 sm:$0xff]   ;;  %v15415_v32 = vld [vmem:[#allocation3 + $0x1f4] ss:$48 sps:$4 sm:$0xff]  }
 0x1cd   :  { %v15411_v22 = vld [vmem:[#allocation3 + $0x2b8] ss:$48 sps:$4 sm:$0xff]   ;;  %v15417_v24 = vld [vmem:[#allocation3 + $0x1f0] ss:$48 sps:$4 sm:$0xff]   ;;  %v15418_v54 = vld [vmem:[#allocation3 + $0x254] ss:$48 sps:$4 sm:$0xff]  }
 0x1ce   :  { %v15425_v21 = vld [vmem:[#allocation8 + $0xb8] sm:$0xff]   ;;  %v15420_v55 = vld [vmem:[#allocation3 + $0x250] ss:$48 sps:$4 sm:$0xff]   ;;  %v15428_v26 = vld [vmem:[#allocation8 + $0xe8] sm:$0xff]  }
 0x1cf   :  { %v15421_v33 = vld [vmem:[#allocation3 + $0x2b4] ss:$48 sps:$4 sm:$0xff]   ;;  %v15423_v42 = vld [vmem:[#allocation3 + $0x2b0] ss:$48 sps:$4 sm:$0xff]   ;;  %v15429_v31 = vld [vmem:[#allocation8 + $0xa8] sm:$0xff]  }
 0x1d0   :  { %3255 = vmatmul.mubr.bf16.gmra.mxu0 %v15388_v36  ;;  %v15426_v57 = vld [vmem:[#allocation8 + $0xf0] sm:$0xff]   ;;  %v15431_v46 = vld [vmem:[#allocation8 + $0xa0] sm:$0xff]   ;;  %v15432_v43 = vld [vmem:[#allocation8 + $0x78] sm:$0xff]  }
 0x1d1   :  { %3158 = vmatmul.mubr.bf16.gmra.mxu1 %v15387_v9  ;;  %15120 = vmatprep.mubr.bf16.mxu0 %v15393_v34  ;;  %v15427_v41 = vld [vmem:[#allocation8 + $0xb0] sm:$0xff]   ;;  %v15433_v52 = vld [vmem:[#allocation8 + $0x38] sm:$0xff]   ;;  %v15438_v0 = vld [vmem:[#allocation8 + $0x68] sm:$0xff]  }
 0x1d2   :  { %3295 = vmatprep.mubr.bf16.mxu1 %v15391_v59  ;;  %14096 = vmatprep.subr.bf16.mxu0 %v15432_v43  ;;  %v15434_v48 = vld [vmem:[#allocation8 + $0xd8] sm:$0xff]   ;;  %v15436_v58 = vld [vmem:[#allocation8 + $0x70] sm:$0xff]   ;;  %v15439_v4 = vld [vmem:[#allocation8 + $0x28] sm:$0xff]  }
 0x1d3   :  { %v15435_v44 = vld [vmem:[#allocation8 + $0x98] sm:$0xff]   ;;  %v15437_v61 = vld [vmem:[#allocation8 + $0x30] sm:$0xff]   ;;  %v15442_v3 = vld [vmem:[#allocation8 + $0x60] sm:$0xff]  }
 0x1d4   :  { %v15440_v5 = vld [vmem:[#allocation8 + $0xd0] sm:$0xff]   ;;  %v15443_v14 = vld [vmem:[#allocation8 + $0x20] sm:$0xff]   ;;  %v15444_v36 = vld [vmem:[#allocation8 + $0x58] sm:$0xff]  }
 0x1d5   :  { %v15441_v9 = vld [vmem:[#allocation8 + $0x90] sm:$0xff]   ;;  %v15445_v59 = vld [vmem:[#allocation8 + $0x18] sm:$0xff]   ;;  %v15446_v12 = vld [vmem:[#allocation8 + $0xc8] sm:$0xff]  }
 0x1d6   :  { %v15447_v13 = vld [vmem:[#allocation8 + $0x88] sm:$0xff]   ;;  %v15448_v34 = vld [vmem:[#allocation8 + $0x50] sm:$0xff]  }
 0x1d8   :  { %15121 = vmatmul.mubr.bf16.vlgmr.msra.gmra.mxu0 %v15396_v15  ;;  %v15450_v15 = vld [vmem:[#allocation8 + $0x48] sm:$0xff]  }
 0x1d9   :  { %3296 = vmatmul.mubr.bf16.vlgmr.msra.gmra.mxu1 %v15395_v49  ;;  %15124 = vmatprep.mubr.bf16.mxu0 %v15399_v20  ;;  %v15449_v49 = vld [vmem:[#allocation8 + $0x10] sm:$0xff]   ;;  %v15452_v20 = vld [vmem:[#allocation8 + $0xc0] sm:$0xff]  }
 0x1da   :  { %3303 = vmatprep.mubr.bf16.mxu1 %v15397_v17  ;;  %14161 = vmatpush3.bf16.msra.mxu1 %v15425_v21  ;;  %v15451_v17 = vld [vmem:[#allocation8 + $0x8] sm:$0xff]  }
 0x1db   :  { %14162 = vmatprep.subr.bf16.mxu1 %v15426_v57  ;;  %14097 = vmatpush3.bf16.msra.mxu0 %v15433_v52 }
 0x1dc   :  { %14098 = vmatprep.subr.bf16.mxu0 %v15436_v58 }
 0x1de   :  { %14163 = vmatpush3.bf16.msra.mxu1 %v15427_v41 }
 0x1df   :  { %14164 = vmatprep.subr.bf16.mxu1 %v15428_v26  ;;  %14099 = vmatpush3.bf16.msra.mxu0 %v15437_v61 }
 0x1e0   :  { %15125 = vmatmul.mubr.bf16.gmra.mxu0 %v15401_v11  ;;  %14100 = vmatprep.subr.bf16.mxu0 %v15438_v0  ;;  %v15454_v11 = vld [vmem:[#allocation8 + $0x40] sm:$0xff]  }
 0x1e1   :  { %3304 = vmatmul.mubr.bf16.gmra.mxu1 %v15400_v40  ;;  %15128 = vmatprep.mubr.bf16.mxu0 %v15404_v45  ;;  %v15453_v40 = vld [vmem:[#allocation8 + $0x80] sm:$0xff]   ;;  %v15462_v45 = vld [vmem:[#allocation8 + $0x178] sm:$0xff]  }
 0x1e2   :  { %3311 = vmatprep.mubr.bf16.mxu1 %v15402_v8  ;;  %14165 = vmatpush3.bf16.msra.mxu1 %v15429_v31  ;;  %v15455_v8 = vld [vmem:[#allocation8] sm:$0xff]  }
 0x1e3   :  { %14166 = vmatprep.subr.bf16.mxu1 %v15430_v47  ;;  %14101 = vmatpush3.bf16.msra.mxu0 %v15439_v4 }
 0x1e4   :  { %14102 = vmatprep.subr.bf16.mxu0 %v15442_v3 }
 0x1e6   :  { %14167 = vmatpush3.bf16.msra.mxu1 %v15431_v46 }
 0x1e7   :  { %14168 = vmatprep.subr.bf16.mxu1 %v15434_v48  ;;  %14103 = vmatpush3.bf16.msra.mxu0 %v15443_v14 }
 0x1e8   :  { %15129 = vmatmul.mubr.bf16.gmra.mxu0 %v15406_v28  ;;  %14104 = vmatprep.subr.bf16.mxu0 %v15444_v36 }
 0x1e9   :  { %3312 = vmatmul.mubr.bf16.gmra.mxu1 %v15405_v25  ;;  %15132 = vmatprep.mubr.bf16.mxu0 %v15409_v63  ;;  %v15464_v25 = vld [vmem:[#allocation8 + $0x1f8] sm:$0xff]  }
 0x1ea   :  { %3319 = vmatprep.mubr.bf16.mxu1 %v15407_v30  ;;  %14169 = vmatpush3.bf16.msra.mxu1 %v15435_v44 }
 0x1eb   :  { %14170 = vmatprep.subr.bf16.mxu1 %v15440_v5  ;;  %14105 = vmatpush3.bf16.msra.mxu0 %v15445_v59 }
 0x1ec   :  { %14106 = vmatprep.subr.bf16.mxu0 %v15448_v34 }
 0x1ee   :  { %14171 = vmatpush3.bf16.msra.mxu1 %v15441_v9 }
 0x1ef   :  { %14172 = vmatprep.subr.bf16.mxu1 %v15446_v12  ;;  %14107 = vmatpush3.bf16.msra.mxu0 %v15449_v49 }
 0x1f0   :  { %15133 = vmatmul.mubr.bf16.gmra.mxu0 %v15411_v22  ;;  %14108 = vmatprep.subr.bf16.mxu0 %v15450_v15 }
 0x1f1   :  { %3320 = vmatmul.mubr.bf16.gmra.mxu1 %v15410_v18 }
 0x1f2   :  { %3327 = vmatprep.mubr.bf16.mxu1 %v15412_v2  ;;  %14173 = vmatpush3.bf16.msra.mxu1 %v15447_v13 }
 0x1f3   :  { %14109 = vmatpush3.bf16.msra.mxu0 %v15451_v17  ;;  %14174 = vmatprep.subr.bf16.mxu1 %v15452_v20 }
 0x1f4   :  { %14110 = vmatprep.subr.bf16.mxu0 %v15454_v11 }
 0x1f6   :  { %14175 = vmatpush3.bf16.msra.mxu1 %v15453_v40 }
 0x1f7   :  { %14111 = vmatpush3.bf16.msra.mxu0 %v15455_v8  ;;  %14288 = vmatprep.subr.bf16.mxu1 %v15464_v25 }
 0x1f8   :  { %14224 = vmatprep.subr.bf16.mxu0 %v15462_v45 }
 0x1f9   :  { %3328 = vmatmul.mubr.bf16.gmra.mxu1 %v15414_v35 }
 0x1fa   :  { %3335 = vmatprep.mubr.bf16.mxu1 %v15415_v32 }
 0x201   :  { %3336 = vmatmul.mubr.bf16.gmra.mxu1 %v15417_v24 }
 0x202   :  { %3343 = vmatprep.mubr.bf16.mxu1 %v15418_v54 }
 0x209   :  { %3344 = vmatmul.mubr.bf16.gmra.mxu1 %v15420_v55 }
 0x20a   :  { %3351 = vmatprep.mubr.bf16.mxu1 %v15421_v33 }
 0x211   :  { %3352 = vmatmul.mubr.bf16.gmra.mxu1 %v15423_v42 }
 0x250   :  { %v13904_v28 = vpop.f32.mrf.mxu1 }
 0x251   :  { %v16810_v30 = vpop.f32.mrf.mxu0 }
 0x252   :  { %v13905_v63 = vpop.f32.mrf.mxu1 }
 0x253   :  { %v16812_v18 = vpop.f32.mrf.mxu0 }
 0x254   :  { %v13907_v22 = vpop.f32.mrf.mxu1 }
 0x255   :  { %v16814_v2 = vpop.f32.mrf.mxu0 }
 0x256   :  { %v13908_v35 = vpop.f32.mrf.mxu1 }
 0x257   :  { %v16816_v32 = vpop.f32.mrf.mxu0 }
 0x25a   :  { %v16818_v24 = vpop.f32.mrf.mxu1 }
 0x25c   :  { %v16822_v1 = vpop.f32.mrf.mxu1 }
 0x25d   :  { %v16820_v54 = vpop.f32.mrf.mxu0 }
 0x25e   :  { %v16826_v55 = vpop.f32.mrf.mxu1 }
 0x25f   :  { %v16824_v21 = vpop.f32.mrf.mxu0 }
 0x260   :  { %v16830_v57 = vpop.f32.mrf.mxu1 }
 0x261   :  { %v16828_v33 = vpop.f32.mrf.mxu0 }
 0x263   :  { %v16832_v41 = vpop.f32.mrf.mxu0 }
 0x268   :  { %v16836_v26 = vpop.f32.mrf.mxu0 }
 0x269   :  { %v16834_v42 = vpop.f32.mrf.mxu1 }
 0x26a   :  { %v16840_v47 = vpop.f32.mrf.mxu0 }
 0x26b   :  { %v16838_v31 = vpop.f32.mrf.mxu1 }
 0x26c   :  { %v16844_v43 = vpop.f32.mrf.mxu0 }
 0x26d   :  { %v16842_v46 = vpop.f32.mrf.mxu1 }
 0x26e   :  { %v16848_v48 = vpop.f32.mrf.mxu0 }
 0x26f   :  { %v16846_v52 = vpop.f32.mrf.mxu1 }
 0x270   :  { %v16852_v58 = vpop.f32.mrf.mxu0 }
 0x271   :  { %v16850_v44 = vpop.f32.mrf.mxu1 }
 0x272   :  { %v16856_v0 = vpop.f32.mrf.mxu0 }
 0x273   :  { %v16854_v61 = vpop.f32.mrf.mxu1 }
 0x274   :  { %v16860_v5 = vpop.f32.mrf.mxu0 }
 0x275   :  { %v16858_v4 = vpop.f32.mrf.mxu1 }
 0x276   :  { %v16864_v3 = vpop.f32.mrf.mxu0 }
 0x277   :  { %v16862_v9 = vpop.f32.mrf.mxu1 }
 0x278   :  { %v16868_v36 = vpop.f32.mrf.mxu0 }
 0x279   :  { %v16866_v14 = vpop.f32.mrf.mxu1 }
 0x27a   :  { %v16872_v12 = vpop.f32.mrf.mxu0 }
 0x27b   :  { %v16870_v59 = vpop.f32.mrf.mxu1 }
 0x27c   :  { %v16876_v34 = vpop.f32.mrf.mxu0 }
 0x27d   :  { %v16874_v13 = vpop.f32.mrf.mxu1 }
 0x27e   :  { %v16880_v15 = vpop.f32.mrf.mxu0 }
 0x27f   :  { %v16878_v49 = vpop.f32.mrf.mxu1 }
 0x280   :  { %v16884_v20 = vpop.f32.mrf.mxu0 }
 0x281   :  { %v16882_v17 = vpop.f32.mrf.mxu1  ;;  %18297 = vst [vmem:[#allocation33_spill] sm:$0xff] %v16884_v20 }
 0x282   :  { %v16888_v11 = vpop.f32.mrf.mxu0 }
 0x283   :  { %v16886_v40 = vpop.f32.mrf.mxu1  ;;  %18298 = vst [vmem:[#allocation34_spill] sm:$0xff] %v16888_v11 }
 0x284   :  { %v16892_v45 = vpop.f32.mrf.mxu0 }
 0x285   :  { %v16890_v8 = vpop.f32.mrf.mxu1  ;;  %18299 = vst [vmem:[#allocation37_spill] sm:$0xff] %v16892_v45 }
 0x286   :  { %v16896_v60 = vpop.f32.mrf.mxu0 }
 0x287   :  { %v16894_v25 = vpop.f32.mrf.mxu1  ;;  %18300 = vst [vmem:[#allocation17_spill] sm:$0xff] %v16896_v60 }
 0x288   :  { %v16900_v37 = vpop.f32.mrf.mxu0 }
 0x289   :  { %v16898_v53 = vpop.f32.mrf.mxu1  ;;  %18302 = vst [vmem:[#allocation36_spill] sm:$0xff] %v16900_v37 }
 0x28a   :  { %18301 = vst [vmem:[#allocation35_spill] sm:$0xff] %v16898_v53  ;;  %v16904_v23 = vpop.f32.mrf.mxu0  ;;  %v13906_v53 = vadd.f32 %v13905_v63, %v13904_v28  ;;  %v13970_v28 = vadd.f32 %v16812_v18, %v16810_v30 }
 0x28b   :  { %v16902_v27 = vpop.f32.mrf.mxu1  ;;  %18304 = vst [vmem:[#allocation18_spill] sm:$0xff] %v16904_v23  ;;  %v16925_v23 = vld [vmem:[%s18174_s5] ss:$0 sm:$0xff] }
 0x28c   :  { %18303 = vst [vmem:[#allocation38_spill] sm:$0xff] %v16902_v27  ;;  %v16908_v39 = vpop.f32.mrf.mxu0 }
 0x28d   :  { %v16906_v38 = vpop.f32.mrf.mxu1  ;;  %18306 = vst [vmem:[#allocation40_spill] sm:$0xff] %v16908_v39 }
 0x28e   :  { %18305 = vst [vmem:[#allocation39_spill] sm:$0xff] %v16906_v38  ;;  %v16912_v7 = vpop.f32.mrf.mxu0 }
 0x28f   :  { %v16910_v10 = vpop.f32.mrf.mxu1  ;;  %18308 = vst [vmem:[#allocation42_spill] sm:$0xff] %v16912_v7  ;;  %v13909_v7 = vadd.f32 %v13908_v35, %v13907_v22  ;;  %v13915_v35 = vadd.f32 %v16830_v57, %v16826_v55 }
 0x290   :  { %18307 = vst [vmem:[#allocation41_spill] sm:$0xff] %v16910_v10  ;;  %v16916_v11 = vpop.f32.mrf.mxu0 }
 0x291   :  { %v16914_v45 = vpop.f32.mrf.mxu1  ;;  %18310 = vst [vmem:[#allocation44_spill] sm:$0xff] %v16916_v11  ;;  %v3107_v20 = vadd.f32 %v13909_v7, %v16925_v23 }
 0x292   :  { %18309 = vst [vmem:[#allocation43_spill] sm:$0xff] %v16914_v45  ;;  %v16920_v37 = vpop.f32.mrf.mxu0  ;;  %v3104_v45 = vadd.f32 %v13906_v53, %v16925_v23  ;;  %v13973_v53 = vadd.f32 %v16816_v32, %v16814_v2 }
 0x293   :  { %v16918_v60 = vpop.f32.mrf.mxu1  ;;  %18312 = vst [vmem:[#allocation46_spill] sm:$0xff] %v16920_v37 }
 0x294   :  { %18311 = vst [vmem:[#allocation45_spill] sm:$0xff] %v16918_v60  ;;  %v16929_v39 = vpop.f32.mrf.mxu0  ;;  %v3201_v27 = vadd.f32 %v13970_v28, %v3104_v45  ;;  %v3204_v18 = vadd.f32 %v13973_v53, %v3107_v20  ;;  %v13921_v53 = vadd.f32 %v16846_v52, %v16842_v46 }
 0x295   :  { %v16927_v38 = vpop.f32.mrf.mxu1  ;;  %18314 = vst [vmem:[#allocation48_spill] sm:$0xff] %v16929_v39 }
 0x296   :  { %18313 = vst [vmem:[#allocation47_spill] sm:$0xff] %v16927_v38  ;;  %v16934_v11 = vpop.f32.mrf.mxu0  ;;  %v13912_v38 = vadd.f32 %v16822_v1, %v16818_v24 }
 0x297   :  { %v16931_v10 = vpop.f32.mrf.mxu1  ;;  %18316 = vst [vmem:[#allocation50_spill] sm:$0xff] %v16934_v11 }
 0x298   :  { %18315 = vst [vmem:[#allocation49_spill] sm:$0xff] %v16931_v10  ;;  %v15122_v63 = vpop.f32.mrf.mxu0  ;;  %v3112_v45 = vadd.f32 %v13912_v38, %v16925_v23 }
 0x299   :  { %v14032_v60 = vpop.f32.mrf.mxu1 }
 0x29a   :  { %v3394_v29 = vpop.f32.mrf.mxu0 }
 0x29b   :  { %v14033_v37 = vpop.f32.mrf.mxu1 }
 0x29c   :  { %v14034_v39 = vadd.f32 %v14033_v37, %v14032_v60  ;;  %v15123_v11 = vpop.f32.mrf.mxu0  ;;  %v13976_v60 = vadd.f32 %v16824_v21, %v16820_v54  ;;  %v13918_v37 = vadd.f32 %v16838_v31, %v16834_v42 }
 0x29d   :  { %v14035_v10 = vpop.f32.mrf.mxu1 }
 0x29e   :  { %v3298_v22 = vadd.f32 %v14034_v39, %v3201_v27  ;;  %v3115_v39 = vadd.f32 %v13915_v35, %v16925_v23  ;;  %v3397_v27 = vpop.f32.mrf.mxu0  ;;  %v3209_v1 = vadd.f32 %v13976_v60, %v3112_v45  ;;  %v3120_v57 = vadd.f32 %v13918_v37, %v16925_v23 }
 0x29f   :  { %v14036_v30 = vpop.f32.mrf.mxu1 }
 0x2a0   :  { %v3395_v28 = vadd.f32 %v3394_v29, %v3298_v22  ;;  %v14037_v7 = vadd.f32 %v14036_v30, %v14035_v10  ;;  %v13979_v10 = vadd.f32 %v16832_v41, %v16828_v33  ;;  %v13924_v22 = vadd.f32 %v16854_v61, %v16850_v44  ;;  %v16960_v35 = vpop.f32.mrf.mxu0 }
 0x2a1   :  { %v14038_v56 = vpop.f32.mrf.mxu1  ;;  %v13982_v33 = vadd.f32 %v16840_v47, %v16836_v26  ;;  %v3123_v44 = vadd.f32 %v13921_v53, %v16925_v23  ;;  %v13985_v61 = vadd.f32 %v16848_v48, %v16844_v43  ;;  %v13927_v26 = vadd.f32 %v16862_v9, %v16858_v4 }
 0x2a2   :  { %v3457_v24 = vmax.f32 %v3395_v28, 0.0  ;;  %v3301_v2 = vadd.f32 %v14037_v7, %v3204_v18  ;;  %v3212_v20 = vadd.f32 %v13979_v10, %v3115_v39  ;;  %v3128_v60 = vadd.f32 %v13924_v22, %v16925_v23  ;;  %v3410_v47 = vpop.f32.mrf.mxu0 }
 0x2a3   :  { %v14039_v32 = vpop.f32.mrf.mxu1  ;;  %v3217_v7 = vadd.f32 %v13982_v33, %v3120_v57  ;;  %v3220_v10 = vadd.f32 %v13985_v61, %v3123_v44  ;;  %v13930_v57 = vadd.f32 %v16870_v59, %v16866_v14  ;;  %v16990_v44 = vadd.f32 %v16872_v12, %v16868_v36 }
 0x2a4   :  { %v3473_v55 = vsel %vm16265_vm0, %v3457_v24, 0.0  ;;  %v3398_v38 = vadd.f32 %v3397_v27, %v3301_v2  ;;  %v14040_v29 = vadd.f32 %v14039_v32, %v14038_v56  ;;  %v13933_v61 = vadd.f32 %v16878_v49, %v16874_v13 }
 0x2a5   :  { %3483 = vst [vmem:[#allocation2 + $0x3] sm:$0xff] %v3473_v55  ;;  %v14041_v54 = vpop.f32.mrf.mxu1  ;;  %v13272_v21 = vpack.c.bf16 %v3473_v55, %v3473_v55 }
 0x2a6   :  { %v3458_v42 = vmax.f32 %v3398_v38, 0.0  ;;  %v3306_v31 = vadd.f32 %v14040_v29, %v3209_v1 }
 0x2a7   :  { %v14042_v56 = vpop.f32.mrf.mxu1  ;;  %3693 = vst [vmem:[#allocation3 + $0xc] sm:$0xf] %v13272_v21 }
 0x2a8   :  { %v3474_v41 = vsel %vm16270_vm1, %v3458_v42, 0.0  ;;  %v3403_v30 = vadd.f32 %v15122_v63, %v3306_v31  ;;  %v14043_v18 = vadd.f32 %v14042_v56, %v14041_v54  ;;  %v13988_v63 = vadd.f32 %v16856_v0, %v16852_v58 }
 0x2a9   :  { %3484 = vst [vmem:[#allocation2 + $0xb] sm:$0xff] %v3474_v41  ;;  %v14044_v45 = vpop.f32.mrf.mxu1  ;;  %v13273_v28 = vpack.c.bf16 %v3474_v41, %v3474_v41  ;;  %v3131_v58 = vadd.f32 %v13927_v26, %v16925_v23  ;;  %v13991_v0 = vadd.f32 %v16864_v3, %v16860_v5 }
 0x2aa   :  { %v3459_v46 = vmax.f32 %v3403_v30, 0.0  ;;  %v3309_v52 = vadd.f32 %v14043_v18, %v3212_v20  ;;  %v3225_v54 = vadd.f32 %v13988_v63, %v3128_v60 }
 0x2ab   :  { %v14045_v37 = vpop.f32.mrf.mxu1  ;;  %3694 = vst [vmem:[#allocation3 + $0x3c] sm:$0xf] %v13273_v28 }
 0x2ac   :  { %v3475_v24 = vsel %vm16284_vm2, %v3459_v46, 0.0  ;;  %v3406_v2 = vadd.f32 %v15123_v11, %v3309_v52  ;;  %v14046_v39 = vadd.f32 %v14045_v37, %v14044_v45  ;;  %v3509_v27 = vld [vmem:[#allocation2] sm:$0xff]  ;;  %v16979_v11 = vpop.f32.mrf.mxu0  ;;  %v16986_v52 = vadd.f32 %v13991_v0, %v3131_v58 }
 0x2ad   :  { %v3557_v32 = vld [vmem:[#allocation2 + $0x1] sm:$0xff]  ;;  %3485 = vst [vmem:[#allocation2 + $0x13] sm:$0xff] %v3475_v24  ;;  %v14047_v43 = vpop.f32.mrf.mxu1  ;;  %v13248_v48 = vpack.c.bf16 %v3509_v27, %v3509_v27  ;;  %v13274_v4 = vpack.c.bf16 %v3475_v24, %v3475_v24  ;;  %v3136_v37 = vadd.f32 %v13930_v57, %v16925_v23  ;;  %v13997_v58 = vadd.f32 %v16880_v15, %v16876_v34  ;;  %v15463_v15 = vld [vmem:[#allocation8 + $0x138] sm:$0xff]  }
 0x2ae   :  { %v3605_v1 = vld [vmem:[#allocation2 + $0x2] sm:$0xff]  ;;  %v13256_v55 = vpack.c.bf16 %v3557_v32, %v3557_v32  ;;  %v3460_v9 = vmax.f32 %v3406_v2, 0.0  ;;  %v3314_v29 = vadd.f32 %v14046_v39, %v3217_v7  ;;  %v3413_v60 = vpop.f32.mrf.mxu0  ;;  %v13936_v0 = vadd.f32 %v16886_v40, %v16882_v17 }
 0x2af   :  { %v13264_v38 = vpack.c.bf16 %v3605_v1, %v3605_v1  ;;  %v14048_v21 = vpop.f32.mrf.mxu1  ;;  %3549 = vst [vmem:[#allocation3] sm:$0xf] %v13248_v48  ;;  %3695 = vst [vmem:[#allocation3 + $0x6c] sm:$0xf] %v13274_v4 }
 0x2b0   :  { %3597 = vst [vmem:[#allocation3 + $0x4] sm:$0xf] %v13256_v55  ;;  %v3476_v42 = vsel %vm16301_vm3, %v3460_v9, 0.0  ;;  %v3411_v31 = vadd.f32 %v3410_v47, %v3314_v29  ;;  %v14049_v20 = vadd.f32 %v14048_v21, %v14047_v43  ;;  %v3510_v53 = vld [vmem:[#allocation2 + $0x8] sm:$0xff]  ;;  %v17002_v21 = vpop.f32.mrf.mxu0 }
 0x2b1   :  { %3645 = vst [vmem:[#allocation3 + $0x8] sm:$0xf] %v13264_v38  ;;  %v3558_v22 = vld [vmem:[#allocation2 + $0x9] sm:$0xff]  ;;  %3486 = vst [vmem:[#allocation2 + $0x1b] sm:$0xff] %v3476_v42  ;;  %v14050_v5 = vpop.f32.mrf.mxu1  ;;  %v13249_v3 = vpack.c.bf16 %v3510_v53, %v3510_v53  ;;  %v13275_v30 = vpack.c.bf16 %v3476_v42, %v3476_v42 }
 0x2b2   :  { %v3606_v56 = vld [vmem:[#allocation2 + $0xa] sm:$0xff]  ;;  %v13257_v33 = vpack.c.bf16 %v3558_v22, %v3558_v22  ;;  %v3461_v7 = vmax.f32 %v3411_v31, 0.0  ;;  %v3317_v46 = vadd.f32 %v14049_v20, %v3220_v10  ;;  %v3139_v10 = vadd.f32 %v13933_v61, %v16925_v23 }
 0x2b3   :  { %v13265_v41 = vpack.c.bf16 %v3606_v56, %v3606_v56  ;;  %v3701_v18 = vld [vmem:[#allocation2 + $0x4] sm:$0xff]  ;;  %v14051_v26 = vpop.f32.mrf.mxu1  ;;  %3550 = vst [vmem:[#allocation3 + $0x30] sm:$0xf] %v13249_v3  ;;  %3696 = vst [vmem:[#allocation3 + $0x9c] sm:$0xf] %v13275_v30  ;;  %v15472_v30 = vld [vmem:[#allocation8 + $0x170] sm:$0xff]   ;;  %v3233_v61 = vadd.f32 %v16990_v44, %v3136_v37 }
 0x2b4   :  { %v3749_v45 = vld [vmem:[#allocation2 + $0x5] sm:$0xff]  ;;  %v13280_v14 = vpack.c.bf16 %v3701_v18, %v3701_v18  ;;  %5576 = vst [vmem:[#allocation2] sm:$0x1f] %v18286_v6  ;;  %3598 = vst [vmem:[#allocation3 + $0x34] sm:$0xf] %v13257_v33  ;;  %v3477_v63 = vsel %vm16309_vm4, %v3461_v7, 0.0  ;;  %v3414_v24 = vadd.f32 %v3413_v60, %v3317_v46  ;;  %v14052_v2 = vadd.f32 %v14051_v26, %v14050_v5 }
 0x2b5   :  { %v3797_v28 = vld [vmem:[#allocation2 + $0x6] sm:$0xff]  ;;  %v13288_v59 = vpack.c.bf16 %v3749_v45, %v3749_v45  ;;  %3646 = vst [vmem:[#allocation3 + $0x38] sm:$0xf] %v13265_v41  ;;  %v3511_v39 = vld [vmem:[#allocation2 + $0x10] sm:$0xff]  ;;  %3487 = vst [vmem:[#allocation2 + $0x23] sm:$0xff] %v3477_v63  ;;  %v14053_v13 = vpop.f32.mrf.mxu1  ;;  %v13276_v1 = vpack.c.bf16 %v3477_v63, %v3477_v63  ;;  %v17011_v60 = vadd.f32 %v13997_v58, %v3139_v10 }
 0x2b6   :  { %v13296_v47 = vpack.c.bf16 %v3797_v28, %v3797_v28  ;;  %v3559_v36 = vld [vmem:[#allocation2 + $0x11] sm:$0xff]  ;;  %3741 = vst [vmem:[#allocation3 + $0x10] sm:$0xf] %v13280_v14  ;;  %v13250_v49 = vpack.c.bf16 %v3511_v39, %v3511_v39  ;;  %v3462_v38 = vmax.f32 %v3414_v24, 0.0  ;;  %v3322_v4 = vadd.f32 %v14052_v2, %v3225_v54  ;;  %v15458_v24 = vld [vmem:[#allocation3 + $0xc] ss:$48 sps:$4 sm:$0xff]  }
 0x2b7   :  { %v3607_v12 = vld [vmem:[#allocation2 + $0x12] sm:$0xff]  ;;  %3789 = vst [vmem:[#allocation3 + $0x14] sm:$0xf] %v13288_v59  ;;  %v13258_v27 = vpack.c.bf16 %v3559_v36, %v3559_v36  ;;  %v14054_v57 = vpop.f32.mrf.mxu1  ;;  %3697 = vst [vmem:[#allocation3 + $0xcc] sm:$0xf] %v13276_v1  ;;  %v13939_v54 = vadd.f32 %v16894_v25, %v16890_v8  ;;  %v17014_v26 = vadd.f32 %v13936_v0, %v16925_v23  ;;  %5293 = vmatprep.mubr.bf16.mxu1 %v15458_v24 }
 0x2b8   :  { %v13266_v32 = vpack.c.bf16 %v3607_v12, %v3607_v12  ;;  %v3702_v43 = vld [vmem:[#allocation2 + $0xc] sm:$0xff]  ;;  %3837 = vst [vmem:[#allocation3 + $0x18] sm:$0xf] %v13296_v47  ;;  %3551 = vst [vmem:[#allocation3 + $0x60] sm:$0xf] %v13250_v49  ;;  %v3478_v20 = vsel %vm16314_vm5, %v3462_v38, 0.0  ;;  %v3419_v53 = vadd.f32 %v16960_v35, %v3322_v4  ;;  %v14055_v34 = vadd.f32 %v14054_v57, %v14053_v13  ;;  %v3426_v47 = vpop.f32.mrf.mxu0 }
 0x2b9   :  { %v3750_v48 = vld [vmem:[#allocation2 + $0xd] sm:$0xff]  ;;  %v13281_v9 = vpack.c.bf16 %v3702_v43, %v3702_v43  ;;  %3599 = vst [vmem:[#allocation3 + $0x64] sm:$0xf] %v13258_v27  ;;  %v3512_v22 = vld [vmem:[#allocation2 + $0x18] sm:$0xff]  ;;  %3488 = vst [vmem:[#allocation2 + $0x2b] sm:$0xff] %v3478_v20  ;;  %v14056_v56 = vpop.f32.mrf.mxu1  ;;  %v13277_v8 = vpack.c.bf16 %v3478_v20, %v3478_v20  ;;  %v3147_v36 = vadd.f32 %v13939_v54, %v16925_v23 }
 0x2ba   :  { %v3798_v55 = vld [vmem:[#allocation2 + $0xe] sm:$0xff]  ;;  %v13289_v29 = vpack.c.bf16 %v3750_v48, %v3750_v48  ;;  %3647 = vst [vmem:[#allocation3 + $0x68] sm:$0xf] %v13266_v32  ;;  %v3560_v17 = vld [vmem:[#allocation2 + $0x19] sm:$0xff]  ;;  %v13251_v3 = vpack.c.bf16 %v3512_v22, %v3512_v22  ;;  %v3463_v35 = vmax.f32 %v3419_v53, 0.0  ;;  %v3325_v28 = vadd.f32 %v14055_v34, %v16986_v52  ;;  %v17024_v22 = vpop.f32.mrf.mxu0 }
 0x2bb   :  { %v13297_v42 = vpack.c.bf16 %v3798_v55, %v3798_v55  ;;  %v3608_v40 = vld [vmem:[#allocation2 + $0x1a] sm:$0xff]  ;;  %3742 = vst [vmem:[#allocation3 + $0x40] sm:$0xf] %v13281_v9  ;;  %v13259_v33 = vpack.c.bf16 %v3560_v17, %v3560_v17  ;;  %v15456_v7 = vld [vmem:[#allocation3 + $0x4] ss:$48 sps:$4 sm:$0xff]   ;;  %v14057_v63 = vpop.f32.mrf.mxu1  ;;  %v18322_v53 = vld [vmem:[#allocation38_spill] sm:$0xff] }
 0x2bc   :  { %3790 = vst [vmem:[#allocation3 + $0x44] sm:$0xf] %v13289_v29  ;;  %v15465_v5 = vld [vmem:[#allocation8 + $0x1b8] sm:$0xff]   ;;  %v13267_v41 = vpack.c.bf16 %v3608_v40, %v3608_v40  ;;  %v15474_v46 = vld [vmem:[#allocation8 + $0x1f0] sm:$0xff]   ;;  %3552 = vst [vmem:[#allocation3 + $0x90] sm:$0xf] %v13251_v3  ;;  %v3422_v37 = vadd.f32 %v16979_v11, %v3325_v28  ;;  %v14058_v13 = vadd.f32 %v14057_v63, %v14056_v56  ;;  %5196 = vmatprep.mubr.bf16.mxu0 %v15456_v7 }
 0x2bd   :  { %3838 = vst [vmem:[#allocation3 + $0x48] sm:$0xf] %v13297_v42  ;;  %v3703_v25 = vld [vmem:[#allocation2 + $0x14] sm:$0xff]  ;;  %v15460_v2 = vld [vmem:[#allocation3] ss:$48 sps:$4 sm:$0xff]   ;;  %v3479_v44 = vsel %vm16336_vm6, %v3463_v35, 0.0  ;;  %v14059_v43 = vpop.f32.mrf.mxu1 }
 0x2be   :  { %v3751_v18 = vld [vmem:[#allocation2 + $0x15] sm:$0xff]  ;;  %v13282_v14 = vpack.c.bf16 %v3703_v25, %v3703_v25  ;;  %3600 = vst [vmem:[#allocation3 + $0x94] sm:$0xf] %v13259_v33  ;;  %3648 = vst [vmem:[#allocation3 + $0x98] sm:$0xf] %v13267_v41  ;;  %v3513_v27 = vld [vmem:[#allocation2 + $0x20] sm:$0xff]  ;;  %5197 = vmatmul.mubr.bf16.vlgmr.msra.gmra.mxu0 %v15460_v2  ;;  %v3330_v11 = vadd.f32 %v14058_v13, %v3233_v61  ;;  %v13278_v10 = vpack.c.bf16 %v3479_v44, %v3479_v44 }
 0x2bf   :  { %v3799_v45 = vld [vmem:[#allocation2 + $0x16] sm:$0xff]  ;;  %v13290_v59 = vpack.c.bf16 %v3751_v18, %v3751_v18  ;;  %3698 = vst [vmem:[#allocation3 + $0xfc] sm:$0xf] %v13277_v8  ;;  %v3561_v32 = vld [vmem:[#allocation2 + $0x21] sm:$0xff]  ;;  %3489 = vst [vmem:[#allocation2 + $0x33] sm:$0xff] %v3479_v44  ;;  %v13252_v55 = vpack.c.bf16 %v3513_v27, %v3513_v27  ;;  %v3464_v29 = vmax.f32 %v3422_v37, 0.0  ;;  %14225 = vmatpush3.bf16.msra.mxu0 %v15463_v15  ;;  %v14060_v17 = vpop.f32.mrf.mxu1 }
 0x2c0   :  { %v15461_v39 = vld [vmem:[#allocation3 + $0x8] ss:$48 sps:$4 sm:$0xff]   ;;  %v13298_v52 = vpack.c.bf16 %v3799_v45, %v3799_v45  ;;  %v15473_v49 = vld [vmem:[#allocation8 + $0x130] sm:$0xff]   ;;  %3743 = vst [vmem:[#allocation3 + $0x70] sm:$0xf] %v13282_v14  ;;  %v13260_v38 = vpack.c.bf16 %v3561_v32, %v3561_v32  ;;  %v3704_v9 = vld [vmem:[#allocation2 + $0x1c] sm:$0xff]  ;;  %14226 = vmatprep.subr.bf16.mxu0 %v15472_v30  ;;  %v3427_v18 = vadd.f32 %v3426_v47, %v3330_v11 }
 0x2c1   :  { %v3609_v1 = vld [vmem:[#allocation2 + $0x22] sm:$0xff]  ;;  %3791 = vst [vmem:[#allocation3 + $0x74] sm:$0xf] %v13290_v59  ;;  %v15475_v48 = vld [vmem:[#allocation8 + $0x1b0] sm:$0xff]   ;;  %5294 = vmatmul.mubr.bf16.vlgmr.msra.gmra.mxu1 %v15461_v39  ;;  %v13283_v58 = vpack.c.bf16 %v3704_v9, %v3704_v9  ;;  %3553 = vst [vmem:[#allocation3 + $0xc0] sm:$0xf] %v13252_v55  ;;  %v14061_v45 = vadd.f32 %v14060_v17, %v14059_v43  ;;  %v14062_v30 = vpop.f32.mrf.mxu1 }
 0x2c2   :  { %v13268_v4 = vpack.c.bf16 %v3609_v1, %v3609_v1  ;;  %3839 = vst [vmem:[#allocation3 + $0x78] sm:$0xf] %v13298_v52  ;;  %v3752_v0 = vld [vmem:[#allocation2 + $0x1d] sm:$0xff]  ;;  %v18320_v42 = vld [vmem:[#allocation34_spill] sm:$0xff]  ;;  %v18321_v20 = vld [vmem:[#allocation35_spill] sm:$0xff]  ;;  %14289 = vmatpush3.bf16.msra.mxu1 %v15465_v5  ;;  %v3480_v25 = vsel %vm16341_vm7, %v3464_v29, 0.0 }
 0x2c3   :  { %v18319_v57 = vld [vmem:[#allocation33_spill] sm:$0xff]  ;;  %v13942_v34 = vadd.f32 %v18322_v53, %v18321_v20  ;;  %3601 = vst [vmem:[#allocation3 + $0xc4] sm:$0xf] %v13260_v38  ;;  %v15482_v40 = vld [vmem:[#allocation8 + $0x168] sm:$0xff]   ;;  %v13291_v15 = vpack.c.bf16 %v3752_v0, %v3752_v0  ;;  %14290 = vmatprep.subr.bf16.mxu1 %v15474_v46  ;;  %3699 = vst [vmem:[#allocation3 + $0x12c] sm:$0xf] %v13278_v10  ;;  %v13279_v24 = vpack.c.bf16 %v3480_v25, %v3480_v25 }
 0x2c4   :  { %v14000_v54 = vadd.f32 %v18320_v42, %v18319_v57  ;;  %3649 = vst [vmem:[#allocation3 + $0xc8] sm:$0xf] %v13268_v4  ;;  %v15484_v56 = vld [vmem:[#allocation8 + $0x1e8] sm:$0xff]   ;;  %v18323_v3 = vld [vmem:[#allocation37_spill] sm:$0xff]  ;;  %3744 = vst [vmem:[#allocation3 + $0xa0] sm:$0xf] %v13283_v58  ;;  %v3333_v52 = vadd.f32 %v14061_v45, %v17011_v60  ;;  %14227 = vmatpush3.bf16.msra.mxu0 %v15473_v49  ;;  %v3429_v4 = vpop.f32.mrf.mxu0 }
 0x2c5   :  { %v18324_v33 = vld [vmem:[#allocation17_spill] sm:$0xff]  ;;  %v3514_v35 = vld [vmem:[#allocation2 + $0x28] sm:$0xff]  ;;  %3490 = vst [vmem:[#allocation2 + $0x3b] sm:$0xff] %v3480_v25  ;;  %3792 = vst [vmem:[#allocation3 + $0xa4] sm:$0xf] %v13291_v15  ;;  %v3465_v46 = vmax.f32 %v3427_v18, 0.0  ;;  %v17035_v13 = vadd.f32 %v13942_v34, %v16925_v23  ;;  %14228 = vmatprep.subr.bf16.mxu0 %v15482_v40 }
 0x2c6   :  { %v14003_v41 = vadd.f32 %v18324_v33, %v18323_v3  ;;  %v3562_v28 = vld [vmem:[#allocation2 + $0x29] sm:$0xff]  ;;  %v13253_v14 = vpack.c.bf16 %v3514_v35, %v3514_v35  ;;  %v15492_v2 = vld [vmem:[#allocation8 + $0x160] sm:$0xff]   ;;  %v3241_v39 = vadd.f32 %v14000_v54, %v17014_v26  ;;  %v18326_v27 = vld [vmem:[#allocation36_spill] sm:$0xff]  ;;  %v14063_v26 = vpop.f32.mrf.mxu1  ;;  %14291 = vmatpush3.bf16.msra.mxu1 %v15475_v48  ;;  %3700 = vst [vmem:[#allocation3 + $0x15c] sm:$0xf] %v13279_v24 }
 0x2c7   :  { %v3610_v7 = vld [vmem:[#allocation2 + $0x2a] sm:$0xff]  ;;  %v13261_v59 = vpack.c.bf16 %v3562_v28, %v3562_v28  ;;  %v15466_v44 = vld [vmem:[#allocation3 + $0x64] ss:$48 sps:$4 sm:$0xff]   ;;  %v18330_v60 = vld [vmem:[#allocation40_spill] sm:$0xff]  ;;  %v3491_v58 = vsel %vm16357_vm8, %v3465_v46, 0.0  ;;  %v3430_v0 = vadd.f32 %v3429_v4, %v3333_v52  ;;  %v14064_v57 = vadd.f32 %v14063_v26, %v14062_v30  ;;  %14292 = vmatprep.subr.bf16.mxu1 %v15484_v56 }
 0x2c8   :  { %v15483_v5 = vld [vmem:[#allocation8 + $0x128] sm:$0xff]   ;;  %v13269_v61 = vpack.c.bf16 %v3610_v7, %v3610_v7  ;;  %v17031_v47 = vadd.f32 %v14003_v41, %v3147_v36  ;;  %v15494_v37 = vld [vmem:[#allocation8 + $0x1e0] sm:$0xff]   ;;  %v18328_v43 = vld [vmem:[#allocation39_spill] sm:$0xff]  ;;  %3554 = vst [vmem:[#allocation3 + $0xf0] sm:$0xf] %v13253_v14  ;;  %5204 = vmatprep.mubr.bf16.mxu0 %v15466_v44  ;;  %v14065_v53 = vpop.f32.mrf.mxu1  ;;  %v13336_v56 = vpack.c.bf16 %v3491_v58, %v3491_v58 }
 0x2c9   :  { %v15485_v63 = vld [vmem:[#allocation8 + $0x1a8] sm:$0xff]   ;;  %v18329_v55 = vld [vmem:[#allocation41_spill] sm:$0xff]  ;;  %3602 = vst [vmem:[#allocation3 + $0xf4] sm:$0xf] %v13261_v59  ;;  %v3515_v42 = vld [vmem:[#allocation2 + $0x30] sm:$0xff]  ;;  %v3466_v41 = vmax.f32 %v3430_v0, 0.0  ;;  %v3338_v25 = vadd.f32 %v14064_v57, %v3241_v39  ;;  %14229 = vmatpush3.bf16.msra.mxu0 %v15483_v5  ;;  %v17056_v59 = vpop.f32.mrf.mxu0 }
 0x2ca   :  { %v18327_v32 = vld [vmem:[#allocation18_spill] sm:$0xff]  ;;  %v13945_v38 = vadd.f32 %v18329_v55, %v18328_v43  ;;  %v15470_v9 = vld [vmem:[#allocation3 + $0x60] ss:$48 sps:$4 sm:$0xff]   ;;  %3650 = vst [vmem:[#allocation3 + $0xf8] sm:$0xf] %v13269_v61  ;;  %3501 = vst [vmem:[#allocation2 + $0x53] sm:$0xff] %v3491_v58  ;;  %v13254_v34 = vpack.c.bf16 %v3515_v42, %v3515_v42  ;;  %v14066_v61 = vpop.f32.mrf.mxu1  ;;  %14293 = vmatpush3.bf16.msra.mxu1 %v15485_v63  ;;  %14230 = vmatprep.subr.bf16.mxu0 %v15492_v2 }
 0x2cb   :  { %v17039_v1 = vadd.f32 %v18327_v32, %v18326_v27  ;;  %v15468_v36 = vld [vmem:[#allocation3 + $0x6c] ss:$48 sps:$4 sm:$0xff]   ;;  %v15471_v29 = vld [vmem:[#allocation3 + $0x68] ss:$48 sps:$4 sm:$0xff]   ;;  %v15493_v48 = vld [vmem:[#allocation8 + $0x120] sm:$0xff]   ;;  %5205 = vmatmul.mubr.bf16.gmra.mxu0 %v15470_v9  ;;  %v3492_v44 = vsel %vm16363_vm9, %v3466_v41, 0.0  ;;  %v3435_v27 = vadd.f32 %v17002_v21, %v3338_v25  ;;  %v14067_v32 = vadd.f32 %v14066_v61, %v14065_v53  ;;  %14294 = vmatprep.subr.bf16.mxu1 %v15494_v37 }
 0x2cc   :  { %v18331_v49 = vld [vmem:[#allocation42_spill] sm:$0xff]  ;;  %v3563_v54 = vld [vmem:[#allocation2 + $0x31] sm:$0xff]  ;;  %5301 = vmatprep.mubr.bf16.mxu1 %v15468_v36  ;;  %v15495_v15 = vld [vmem:[#allocation8 + $0x1a0] sm:$0xff]   ;;  %v3155_v28 = vadd.f32 %v13945_v38, %v16925_v23  ;;  %3555 = vst [vmem:[#allocation3 + $0x120] sm:$0xf] %v13254_v34  ;;  %v14068_v2 = vpop.f32.mrf.mxu1  ;;  %v3442_v34 = vpop.f32.mrf.mxu0 }
 0x2cd   :  { %v17045_v11 = vadd.f32 %v18331_v49, %v18330_v60  ;;  %v3611_v20 = vld [vmem:[#allocation2 + $0x32] sm:$0xff]  ;;  %v13262_v17 = vpack.c.bf16 %v3563_v54, %v3563_v54  ;;  %v3800_v33 = vld [vmem:[#allocation2 + $0x1e] sm:$0xff]  ;;  %5302 = vmatmul.mubr.bf16.gmra.mxu1 %v15471_v29  ;;  %4069 = vst [vmem:[#allocation3 + $0x18c] sm:$0xf] %v13336_v56  ;;  %3502 = vst [vmem:[#allocation2 + $0x5b] sm:$0xff] %v3492_v44  ;;  %v13337_v29 = vpack.c.bf16 %v3492_v44, %v3492_v44 }
 0x2ce   :  { %v13270_v40 = vpack.c.bf16 %v3611_v20, %v3611_v20  ;;  %v17049_v3 = vld [vmem:[#allocation8 + $0x158] sm:$0xff]   ;;  %v13299_v45 = vpack.c.bf16 %v3800_v33, %v3800_v33  ;;  %v3705_v35 = vld [vmem:[#allocation2 + $0x24] sm:$0xff]  ;;  %v18333_v7 = vld [vmem:[#allocation43_spill] sm:$0xff]  ;;  %v3467_v58 = vmax.f32 %v3435_v27, 0.0  ;;  %v3341_v21 = vadd.f32 %v14067_v32, %v17031_v47  ;;  %14231 = vmatpush3.bf16.msra.mxu0 %v15493_v48  ;;  %14295 = vmatpush3.bf16.msra.mxu1 %v15495_v15  ;;  %v17083_v32 = vpop.f32.mrf.mxu0 }
 0x2cf   :  { %v17051_v18 = vld [vmem:[#allocation8 + $0x1d8] sm:$0xff]   ;;  %v18334_v30 = vld [vmem:[#allocation45_spill] sm:$0xff]  ;;  %3603 = vst [vmem:[#allocation3 + $0x124] sm:$0xf] %v13262_v17  ;;  %v3706_v24 = vld [vmem:[#allocation2 + $0x2c] sm:$0xff]  ;;  %v13284_v5 = vpack.c.bf16 %v3705_v35, %v3705_v35  ;;  %v3249_v54 = vadd.f32 %v17039_v1, %v17035_v13  ;;  %v17067_v20 = vadd.f32 %v17045_v11, %v3155_v28  ;;  %v14069_v17 = vpop.f32.mrf.mxu1  ;;  %14232 = vmatprep.subr.bf16.mxu0 %v17049_v3 }
 0x2d0   :  { %v13948_v14 = vadd.f32 %v18334_v30, %v18333_v7  ;;  %3651 = vst [vmem:[#allocation3 + $0x128] sm:$0xf] %v13270_v40  ;;  %v3753_v39 = vld [vmem:[#allocation2 + $0x25] sm:$0xff]  ;;  %v3754_v46 = vld [vmem:[#allocation2 + $0x2d] sm:$0xff]  ;;  %v3516_v43 = vld [vmem:[#allocation2 + $0x38] sm:$0xff]  ;;  %v13285_v4 = vpack.c.bf16 %v3706_v24, %v3706_v24  ;;  %v3493_v41 = vsel %vm16384_vm10, %v3467_v58, 0.0  ;;  %v3438_v25 = vadd.f32 %v17024_v22, %v3341_v21  ;;  %14296 = vmatprep.subr.bf16.mxu1 %v17051_v18 }
 0x2d1   :  { %v3564_v55 = vld [vmem:[#allocation2 + $0x39] sm:$0xff]  ;;  %3840 = vst [vmem:[#allocation3 + $0xa8] sm:$0xf] %v13299_v45  ;;  %v13255_v26 = vpack.c.bf16 %v3516_v43, %v3516_v43  ;;  %v15512_v49 = vld [vmem:[#allocation8 + $0x150] sm:$0xff]   ;;  %3745 = vst [vmem:[#allocation3 + $0xd0] sm:$0xf] %v13284_v5  ;;  %v13292_v37 = vpack.c.bf16 %v3753_v39, %v3753_v39  ;;  %v13293_v42 = vpack.c.bf16 %v3754_v46, %v3754_v46  ;;  %v14071_v3 = vpop.f32.mrf.mxu1 }
 0x2d2   :  { %v3612_v38 = vld [vmem:[#allocation2 + $0x3a] sm:$0xff]  ;;  %v13263_v36 = vpack.c.bf16 %v3564_v55, %v3564_v55  ;;  %v15476_v0 = vld [vmem:[#allocation3 + $0xc4] ss:$48 sps:$4 sm:$0xff]   ;;  %3746 = vst [vmem:[#allocation3 + $0x100] sm:$0xf] %v13285_v4  ;;  %v17070_v53 = vadd.f32 %v13948_v14, %v16925_v23  ;;  %v14070_v56 = vadd.f32 %v14069_v17, %v14068_v2  ;;  %3503 = vst [vmem:[#allocation2 + $0x63] sm:$0xff] %v3493_v41 }
 0x2d3   :  { %v15503_v63 = vld [vmem:[#allocation8 + $0x118] sm:$0xff]   ;;  %v13271_v9 = vpack.c.bf16 %v3612_v38, %v3612_v38  ;;  %v17062_v57 = vld [vmem:[#allocation8 + $0x1d0] sm:$0xff]   ;;  %3556 = vst [vmem:[#allocation3 + $0x150] sm:$0xf] %v13255_v26  ;;  %4070 = vst [vmem:[#allocation3 + $0x1bc] sm:$0xf] %v13337_v29  ;;  %5212 = vmatprep.mubr.bf16.mxu0 %v15476_v0  ;;  %v13338_v18 = vpack.c.bf16 %v3493_v41, %v3493_v41  ;;  %v14072_v43 = vpop.f32.mrf.mxu1 }
 0x2d4   :  { %v15505_v60 = vld [vmem:[#allocation8 + $0x198] sm:$0xff]   ;;  %v15480_v47 = vld [vmem:[#allocation3 + $0xc0] ss:$48 sps:$4 sm:$0xff]   ;;  %3604 = vst [vmem:[#allocation3 + $0x154] sm:$0xf] %v13263_v36  ;;  %v3801_v22 = vld [vmem:[#allocation2 + $0x26] sm:$0xff]  ;;  %v3346_v46 = vadd.f32 %v14070_v56, %v3249_v54  ;;  %14233 = vmatpush3.bf16.msra.mxu0 %v15503_v63  ;;  %v14073_v0 = vadd.f32 %v14072_v43, %v14071_v3 }
 0x2d5   :  { %v15478_v40 = vld [vmem:[#allocation3 + $0xcc] ss:$48 sps:$4 sm:$0xff]   ;;  %v15481_v33 = vld [vmem:[#allocation3 + $0xc8] ss:$48 sps:$4 sm:$0xff]   ;;  %3652 = vst [vmem:[#allocation3 + $0x158] sm:$0xf] %v13271_v9  ;;  %5213 = vmatmul.mubr.bf16.gmra.mxu0 %v15480_v47  ;;  %v13300_v44 = vpack.c.bf16 %v3801_v22, %v3801_v22  ;;  %14297 = vmatpush3.bf16.msra.mxu1 %v15505_v60 }
 0x2d6   :  { %v18336_v48 = vld [vmem:[#allocation47_spill] sm:$0xff]  ;;  %v18337_v13 = vld [vmem:[#allocation49_spill] sm:$0xff]  ;;  %3793 = vst [vmem:[#allocation3 + $0xd4] sm:$0xf] %v13292_v37  ;;  %3794 = vst [vmem:[#allocation3 + $0x104] sm:$0xf] %v13293_v42  ;;  %5309 = vmatprep.mubr.bf16.mxu1 %v15478_v40  ;;  %14234 = vmatprep.subr.bf16.mxu0 %v15512_v49  ;;  %v3443_v21 = vadd.f32 %v3442_v34, %v3346_v46  ;;  %v14074_v49 = vpop.f32.mrf.mxu1 }
 0x2d7   :  { %v17075_v1 = vadd.f32 %v18337_v13, %v18336_v48  ;;  %v3885_v45 = vld [vmem:[#allocation2 + $0x50] sm:$0xff]  ;;  %v3468_v39 = vmax.f32 %v3438_v25, 0.0  ;;  %5310 = vmatmul.mubr.bf16.gmra.mxu1 %v15481_v33  ;;  %v3708_v27 = vld [vmem:[#allocation2 + $0x3c] sm:$0xff]  ;;  %v15522_v55 = vld [vmem:[#allocation8 + $0x148] sm:$0xff]   ;;  %4071 = vst [vmem:[#allocation3 + $0x1ec] sm:$0xf] %v13338_v18  ;;  %14298 = vmatprep.subr.bf16.mxu1 %v17062_v57 }
 0x2d8   :  { %v3933_v35 = vld [vmem:[#allocation2 + $0x51] sm:$0xff]  ;;  %v13312_v7 = vpack.c.bf16 %v3885_v45, %v3885_v45  ;;  %v15524_v38 = vld [vmem:[#allocation8 + $0x1c8] sm:$0xff]   ;;  %v13287_v26 = vpack.c.bf16 %v3708_v27, %v3708_v27  ;;  %v3934_v42 = vld [vmem:[#allocation2 + $0x59] sm:$0xff]  ;;  %3841 = vst [vmem:[#allocation3 + $0xd8] sm:$0xf] %v13300_v44  ;;  %v3469_v56 = vmax.f32 %v3443_v21, 0.0  ;;  %v3349_v45 = vadd.f32 %v14073_v0, %v17067_v20  ;;  %v14075_v22 = vpop.f32.mrf.mxu1 }
 0x2d9   :  { %v3981_v28 = vld [vmem:[#allocation2 + $0x52] sm:$0xff]  ;;  %v13320_v30 = vpack.c.bf16 %v3933_v35, %v3933_v35  ;;  %v18340_v9 = vld [vmem:[#allocation46_spill] sm:$0xff]  ;;  %v3494_v58 = vsel %vm16397_vm11, %v3468_v39, 0.0  ;;  %v3982_v54 = vld [vmem:[#allocation2 + $0x5a] sm:$0xff]  ;;  %v13321_v40 = vpack.c.bf16 %v3934_v42, %v3934_v42 }
 0x2da   :  { %v15513_v15 = vld [vmem:[#allocation8 + $0x110] sm:$0xff]   ;;  %v13328_v14 = vpack.c.bf16 %v3981_v28, %v3981_v28  ;;  %3925 = vst [vmem:[#allocation3 + $0x180] sm:$0xf] %v13312_v7  ;;  %v18339_v36 = vld [vmem:[#allocation44_spill] sm:$0xff]  ;;  %v15523_v60 = vld [vmem:[#allocation8 + $0x108] sm:$0xff]   ;;  %v13329_v47 = vpack.c.bf16 %v3982_v54, %v3982_v54  ;;  %v13339_v33 = vpack.c.bf16 %v3494_v58, %v3494_v58  ;;  %v3495_v44 = vsel %vm16408_vm12, %v3469_v56, 0.0 }
 0x2db   :  { %v17081_v61 = vld [vmem:[#allocation8 + $0x190] sm:$0xff]   ;;  %3973 = vst [vmem:[#allocation3 + $0x184] sm:$0xf] %v13320_v30  ;;  %v14012_v29 = vadd.f32 %v18340_v9, %v18339_v36  ;;  %v3886_v37 = vld [vmem:[#allocation2 + $0x58] sm:$0xff]  ;;  %3504 = vst [vmem:[#allocation2 + $0x6b] sm:$0xff] %v3494_v58  ;;  %14235 = vmatpush3.bf16.msra.mxu0 %v15513_v15  ;;  %v3163_v30 = vadd.f32 %v17075_v1, %v16925_v23  ;;  %v14076_v1 = vadd.f32 %v14075_v22, %v14074_v49 }
 0x2dc   :  { %v3802_v24 = vld [vmem:[#allocation2 + $0x2e] sm:$0xff]  ;;  %4021 = vst [vmem:[#allocation3 + $0x188] sm:$0xf] %v13328_v14  ;;  %v13313_v17 = vpack.c.bf16 %v3886_v37, %v3886_v37  ;;  %v15532_v13 = vld [vmem:[#allocation8 + $0x140] sm:$0xff]   ;;  %3748 = vst [vmem:[#allocation3 + $0x160] sm:$0xf] %v13287_v26  ;;  %v3445_v14 = vpop.f32.mrf.mxu0  ;;  %14299 = vmatpush3.bf16.msra.mxu1 %v17081_v61  ;;  %14236 = vmatprep.subr.bf16.mxu0 %v15522_v55  ;;  %v13340_v58 = vpack.c.bf16 %v3495_v44, %v3495_v44 }
 0x2dd   :  { %v3707_v5 = vld [vmem:[#allocation2 + $0x34] sm:$0xff]  ;;  %v13301_v4 = vpack.c.bf16 %v3802_v24, %v3802_v24  ;;  %v15525_v48 = vld [vmem:[#allocation8 + $0x188] sm:$0xff]   ;;  %v3756_v41 = vld [vmem:[#allocation2 + $0x3d] sm:$0xff]  ;;  %v3257_v7 = vadd.f32 %v14012_v29, %v17070_v53  ;;  %3974 = vst [vmem:[#allocation3 + $0x1b4] sm:$0xf] %v13321_v40  ;;  %v3446_v23 = vadd.f32 %v3445_v14, %v3349_v45  ;;  %14300 = vmatprep.subr.bf16.mxu1 %v15524_v38 }
 0x2de   :  { %v13286_v2 = vpack.c.bf16 %v3707_v5, %v3707_v5  ;;  %v3755_v34 = vld [vmem:[#allocation2 + $0x35] sm:$0xff]  ;;  %v15538_v35 = vld [vmem:[#allocation8 + $0x1c0] sm:$0xff]   ;;  %v13295_v3 = vpack.c.bf16 %v3756_v41, %v3756_v41  ;;  %3926 = vst [vmem:[#allocation3 + $0x1b0] sm:$0xf] %v13313_v17  ;;  %4022 = vst [vmem:[#allocation3 + $0x1b8] sm:$0xf] %v13329_v47 }
 0x2df   :  { %3842 = vst [vmem:[#allocation3 + $0x108] sm:$0xf] %v13301_v4  ;;  %v3803_v25 = vld [vmem:[#allocation2 + $0x36] sm:$0xff]  ;;  %v13294_v28 = vpack.c.bf16 %v3755_v34, %v3755_v34  ;;  %v15490_v5 = vld [vmem:[#allocation3 + $0x120] ss:$48 sps:$4 sm:$0xff]   ;;  %v18343_v46 = vld [vmem:[#allocation50_spill] sm:$0xff]  ;;  %v3354_v29 = vadd.f32 %v14076_v1, %v3257_v7  ;;  %14237 = vmatpush3.bf16.msra.mxu0 %v15523_v60 }
 0x2e0   :  { %3747 = vst [vmem:[#allocation3 + $0x130] sm:$0xf] %v13286_v2  ;;  %v15486_v57 = vld [vmem:[#allocation3 + $0x124] ss:$48 sps:$4 sm:$0xff]   ;;  %v15488_v24 = vld [vmem:[#allocation3 + $0x12c] ss:$48 sps:$4 sm:$0xff]   ;;  %v13302_v20 = vpack.c.bf16 %v3803_v25, %v3803_v25  ;;  %v14077_v2 = vpop.f32.mrf.mxu1  ;;  %14301 = vmatpush3.bf16.msra.mxu1 %v15525_v48  ;;  %14238 = vmatprep.subr.bf16.mxu0 %v15532_v13 }
 0x2e1   :  { %v15491_v39 = vld [vmem:[#allocation3 + $0x128] ss:$48 sps:$4 sm:$0xff]   ;;  %4072 = vst [vmem:[#allocation3 + $0x21c] sm:$0xf] %v13339_v33  ;;  %5220 = vmatprep.mubr.bf16.mxu0 %v15486_v57  ;;  %v3887_v27 = vld [vmem:[#allocation2 + $0x60] sm:$0xff]  ;;  %3505 = vst [vmem:[#allocation2 + $0x73] sm:$0xff] %v3495_v44  ;;  %5317 = vmatprep.mubr.bf16.mxu1 %v15488_v24  ;;  %v3451_v17 = vadd.f32 %v17056_v59, %v3354_v29 }
 0x2e2   :  { %v18342_v15 = vld [vmem:[#allocation48_spill] sm:$0xff]  ;;  %v3935_v43 = vld [vmem:[#allocation2 + $0x61] sm:$0xff]  ;;  %3795 = vst [vmem:[#allocation3 + $0x134] sm:$0xf] %v13294_v28  ;;  %3796 = vst [vmem:[#allocation3 + $0x164] sm:$0xf] %v13295_v3  ;;  %5221 = vmatmul.mubr.bf16.gmra.mxu0 %v15490_v5  ;;  %v13314_v61 = vpack.c.bf16 %v3887_v27, %v3887_v27  ;;  %5318 = vmatmul.mubr.bf16.gmra.mxu1 %v15491_v39  ;;  %v14078_v37 = vpop.f32.mrf.mxu1 }
 0x2e3   :  { %v14015_v18 = vadd.f32 %v18343_v46, %v18342_v15  ;;  %v3983_v4 = vld [vmem:[#allocation2 + $0x62] sm:$0xff]  ;;  %v13322_v55 = vpack.c.bf16 %v3935_v43, %v3935_v43  ;;  %3843 = vst [vmem:[#allocation3 + $0x138] sm:$0xf] %v13302_v20  ;;  %v3470_v9 = vmax.f32 %v3446_v23, 0.0  ;;  %v4077_v42 = vld [vmem:[#allocation2 + $0x54] sm:$0xff]  ;;  %v14079_v40 = vadd.f32 %v14078_v37, %v14077_v2  ;;  %v3984_v34 = vld [vmem:[#allocation2 + $0x6a] sm:$0xff]  ;;  %14302 = vmatprep.subr.bf16.mxu1 %v15538_v35 }
 0x2e4   :  { %v13330_v26 = vpack.c.bf16 %v3983_v4, %v3983_v4  ;;  %v15533_v36 = vld [vmem:[#allocation8 + $0x100] sm:$0xff]   ;;  %3927 = vst [vmem:[#allocation3 + $0x1e0] sm:$0xf] %v13314_v61  ;;  %v3888_v47 = vld [vmem:[#allocation2 + $0x68] sm:$0xff]  ;;  %4073 = vst [vmem:[#allocation3 + $0x24c] sm:$0xf] %v13340_v58  ;;  %v13331_v41 = vpack.c.bf16 %v3984_v34, %v3984_v34  ;;  %v13344_v59 = vpack.c.bf16 %v4077_v42, %v4077_v42 }
 0x2e5   :  { %v15539_v21 = vld [vmem:[#allocation8 + $0x180] sm:$0xff]   ;;  %v3260_v0 = vadd.f32 %v14015_v18, %v3163_v30  ;;  %3975 = vst [vmem:[#allocation3 + $0x1e4] sm:$0xf] %v13322_v55  ;;  %v3496_v49 = vsel %vm16414_vm13, %v3470_v9, 0.0  ;;  %v3936_v33 = vld [vmem:[#allocation2 + $0x69] sm:$0xff]  ;;  %v13315_v48 = vpack.c.bf16 %v3888_v47, %v3888_v47  ;;  %v3471_v56 = vmax.f32 %v3451_v17, 0.0  ;;  %14239 = vmatpush3.bf16.msra.mxu0 %v15533_v36 }
 0x2e6   :  { %4023 = vst [vmem:[#allocation3 + $0x1e8] sm:$0xf] %v13330_v26  ;;  %v3804_v38 = vld [vmem:[#allocation2 + $0x3e] sm:$0xff]  ;;  %5594 = vst [vmem:[#allocation2 + $0x50] sm:$0x1f] %v18286_v6  ;;  %v13323_v13 = vpack.c.bf16 %v3936_v33, %v3936_v33  ;;  %v13341_v25 = vpack.c.bf16 %v3496_v49, %v3496_v49  ;;  %14303 = vmatpush3.bf16.msra.mxu1 %v15539_v21  ;;  %v4125_v23 = vld [vmem:[#allocation2 + $0x55] sm:$0xff] }
 0x2e7   :  { %v13303_v60 = vpack.c.bf16 %v3804_v38, %v3804_v38  ;;  %5577 = vst [vmem:[#allocation2 + $0x45] sm:$0x1f] %v18286_v6  ;;  %3506 = vst [vmem:[#allocation2 + $0x7b] sm:$0xff] %v3496_v49  ;;  %v3357_v45 = vadd.f32 %v14079_v40, %v3260_v0  ;;  %v15496_v57 = vld [vmem:[#allocation3 + $0x184] ss:$48 sps:$4 sm:$0xff]   ;;  %v3497_v30 = vsel %vm16428_vm14, %v3471_v56, 0.0  ;;  %v13352_v61 = vpack.c.bf16 %v4125_v23, %v4125_v23 }
 0x2e8   :  { %v15498_v28 = vld [vmem:[#allocation3 + $0x18c] ss:$48 sps:$4 sm:$0xff]   ;;  %v15500_v3 = vld [vmem:[#allocation3 + $0x180] ss:$48 sps:$4 sm:$0xff]   ;;  %v15501_v7 = vld [vmem:[#allocation3 + $0x188] ss:$48 sps:$4 sm:$0xff]   ;;  %5228 = vmatprep.mubr.bf16.mxu0 %v15496_v57  ;;  %v13342_v18 = vpack.c.bf16 %v3497_v30, %v3497_v30 }
 0x2e9   :  { %3844 = vst [vmem:[#allocation3 + $0x168] sm:$0xf] %v13303_v60  ;;  %3928 = vst [vmem:[#allocation3 + $0x210] sm:$0xf] %v13315_v48  ;;  %v3454_v14 = vadd.f32 %v17083_v32, %v3357_v45  ;;  %v3889_v22 = vld [vmem:[#allocation2 + $0x70] sm:$0xff]  ;;  %5325 = vmatprep.mubr.bf16.mxu1 %v15498_v28  ;;  %v4078_v44 = vld [vmem:[#allocation2 + $0x5c] sm:$0xff] }
 0x2ea   :  { %3976 = vst [vmem:[#allocation3 + $0x214] sm:$0xf] %v13323_v13  ;;  %4024 = vst [vmem:[#allocation3 + $0x218] sm:$0xf] %v13331_v41  ;;  %v3937_v24 = vld [vmem:[#allocation2 + $0x71] sm:$0xff]  ;;  %5229 = vmatmul.mubr.bf16.gmra.mxu0 %v15500_v3  ;;  %v13316_v39 = vpack.c.bf16 %v3889_v22, %v3889_v22  ;;  %5326 = vmatmul.mubr.bf16.gmra.mxu1 %v15501_v7  ;;  %v13345_v2 = vpack.c.bf16 %v4078_v44, %v4078_v44  ;;  %v4126_v47 = vld [vmem:[#allocation2 + $0x5d] sm:$0xff] }
 0x2eb   :  { %4074 = vst [vmem:[#allocation3 + $0x27c] sm:$0xf] %v13341_v25  ;;  %v3985_v5 = vld [vmem:[#allocation2 + $0x72] sm:$0xff]  ;;  %4117 = vst [vmem:[#allocation3 + $0x190] sm:$0xf] %v13344_v59  ;;  %v13324_v20 = vpack.c.bf16 %v3937_v24, %v3937_v24  ;;  %v3472_v46 = vmax.f32 %v3454_v14, 0.0  ;;  %v13353_v60 = vpack.c.bf16 %v4126_v47, %v4126_v47 }
 0x2ec   :  { %3507 = vst [vmem:[#allocation2 + $0x83] sm:$0xff] %v3497_v30  ;;  %v13332_v15 = vpack.c.bf16 %v3985_v5, %v3985_v5  ;;  %3929 = vst [vmem:[#allocation3 + $0x240] sm:$0xf] %v13316_v39  ;;  %v15508_v58 = vld [vmem:[#allocation3 + $0x1ec] ss:$48 sps:$4 sm:$0xff]   ;;  %v4079_v41 = vld [vmem:[#allocation2 + $0x64] sm:$0xff] }
 0x2ed   :  { %3977 = vst [vmem:[#allocation3 + $0x244] sm:$0xf] %v13324_v20  ;;  %v3498_v1 = vsel %vm16434_vm15, %v3472_v46, 0.0  ;;  %4075 = vst [vmem:[#allocation3 + $0x2ac] sm:$0xf] %v13342_v18  ;;  %5333 = vmatprep.mubr.bf16.mxu1 %v15508_v58  ;;  %v4173_v33 = vld [vmem:[#allocation2 + $0x56] sm:$0xff]  ;;  %v13346_v56 = vpack.c.bf16 %v4079_v41, %v4079_v41 }
 0x2ee   :  { %4025 = vst [vmem:[#allocation3 + $0x248] sm:$0xf] %v13332_v15  ;;  %v3890_v27 = vld [vmem:[#allocation2 + $0x78] sm:$0xff]  ;;  %3508 = vst [vmem:[#allocation2 + $0x8b] sm:$0xff] %v3498_v1  ;;  %v13343_v9 = vpack.c.bf16 %v3498_v1, %v3498_v1  ;;  %v13360_v48 = vpack.c.bf16 %v4173_v33, %v4173_v33  ;;  %v4080_v25 = vld [vmem:[#allocation2 + $0x6c] sm:$0xff] }
 0x2ef   :  { %v3938_v43 = vld [vmem:[#allocation2 + $0x79] sm:$0xff]  ;;  %v13317_v55 = vpack.c.bf16 %v3890_v27, %v3890_v27  ;;  %4118 = vst [vmem:[#allocation3 + $0x1c0] sm:$0xf] %v13345_v2  ;;  %4165 = vst [vmem:[#allocation3 + $0x194] sm:$0xf] %v13352_v61  ;;  %v4127_v45 = vld [vmem:[#allocation2 + $0x65] sm:$0xff]  ;;  %v13347_v7 = vpack.c.bf16 %v4080_v25, %v4080_v25 }
 0x2f0   :  { %v3986_v4 = vld [vmem:[#allocation2 + $0x7a] sm:$0xff]  ;;  %v13325_v26 = vpack.c.bf16 %v3938_v43, %v3938_v43  ;;  %4076 = vst [vmem:[#allocation3 + $0x2dc] sm:$0xf] %v13343_v9  ;;  %v4128_v57 = vld [vmem:[#allocation2 + $0x6d] sm:$0xff]  ;;  %4166 = vst [vmem:[#allocation3 + $0x1c4] sm:$0xf] %v13353_v60  ;;  %v13354_v30 = vpack.c.bf16 %v4127_v45, %v4127_v45 }
 0x2f1   :  { %v13333_v36 = vpack.c.bf16 %v3986_v4, %v3986_v4  ;;  %v15506_v29 = vld [vmem:[#allocation3 + $0x1e4] ss:$48 sps:$4 sm:$0xff]   ;;  %v15510_v21 = vld [vmem:[#allocation3 + $0x1e0] ss:$48 sps:$4 sm:$0xff]   ;;  %v15511_v0 = vld [vmem:[#allocation3 + $0x1e8] ss:$48 sps:$4 sm:$0xff]   ;;  %v13355_v14 = vpack.c.bf16 %v4128_v57, %v4128_v57 }
 0x2f2   :  { %3930 = vst [vmem:[#allocation3 + $0x270] sm:$0xf] %v13317_v55  ;;  %3978 = vst [vmem:[#allocation3 + $0x274] sm:$0xf] %v13325_v26  ;;  %5236 = vmatprep.mubr.bf16.mxu0 %v15506_v29  ;;  %v4174_v34 = vld [vmem:[#allocation2 + $0x5e] sm:$0xff]  ;;  %5334 = vmatmul.mubr.bf16.gmra.mxu1 %v15511_v0  ;;  %v4175_v39 = vld [vmem:[#allocation2 + $0x66] sm:$0xff] }
 0x2f3   :  { %4026 = vst [vmem:[#allocation3 + $0x278] sm:$0xf] %v13333_v36  ;;  %v3891_v37 = vld [vmem:[#allocation2 + $0x80] sm:$0xff]  ;;  %5237 = vmatmul.mubr.bf16.gmra.mxu0 %v15510_v21  ;;  %v13361_v13 = vpack.c.bf16 %v4174_v34, %v4174_v34  ;;  %4213 = vst [vmem:[#allocation3 + $0x198] sm:$0xf] %v13360_v48  ;;  %v4176_v20 = vld [vmem:[#allocation2 + $0x6e] sm:$0xff]  ;;  %v13362_v46 = vpack.c.bf16 %v4175_v39, %v4175_v39 }
 0x2f4   :  { %v3939_v38 = vld [vmem:[#allocation2 + $0x81] sm:$0xff]  ;;  %v13318_v49 = vpack.c.bf16 %v3891_v37, %v3891_v37  ;;  %4119 = vst [vmem:[#allocation3 + $0x1f0] sm:$0xf] %v13346_v56  ;;  %4120 = vst [vmem:[#allocation3 + $0x220] sm:$0xf] %v13347_v7  ;;  %v13363_v18 = vpack.c.bf16 %v4176_v20, %v4176_v20  ;;  %v4081_v27 = vld [vmem:[#allocation2 + $0x74] sm:$0xff] }
 0x2f5   :  { %v3987_v42 = vld [vmem:[#allocation2 + $0x82] sm:$0xff]  ;;  %v13326_v17 = vpack.c.bf16 %v3939_v38, %v3939_v38  ;;  %v3988_v3 = vld [vmem:[#allocation2 + $0x8a] sm:$0xff]  ;;  %4214 = vst [vmem:[#allocation3 + $0x1c8] sm:$0xf] %v13361_v13  ;;  %4167 = vst [vmem:[#allocation3 + $0x1f4] sm:$0xf] %v13354_v30  ;;  %v13348_v2 = vpack.c.bf16 %v4081_v27, %v4081_v27 }
 0x2f6   :  { %v13334_v40 = vpack.c.bf16 %v3987_v42, %v3987_v42  ;;  %3931 = vst [vmem:[#allocation3 + $0x2a0] sm:$0xf] %v13318_v49  ;;  %v3892_v59 = vld [vmem:[#allocation2 + $0x88] sm:$0xff]  ;;  %v13335_v5 = vpack.c.bf16 %v3988_v3, %v3988_v3  ;;  %4168 = vst [vmem:[#allocation3 + $0x224] sm:$0xf] %v13355_v14  ;;  %v4082_v43 = vld [vmem:[#allocation2 + $0x7c] sm:$0xff] }
 0x2f7   :  { %3979 = vst [vmem:[#allocation3 + $0x2a4] sm:$0xf] %v13326_v17  ;;  %v3940_v28 = vld [vmem:[#allocation2 + $0x89] sm:$0xff]  ;;  %v13319_v22 = vpack.c.bf16 %v3892_v59, %v3892_v59  ;;  %4215 = vst [vmem:[#allocation3 + $0x1f8] sm:$0xf] %v13362_v46  ;;  %v4129_v4 = vld [vmem:[#allocation2 + $0x75] sm:$0xff]  ;;  %v13349_v61 = vpack.c.bf16 %v4082_v43, %v4082_v43 }
 0x2f8   :  { %4027 = vst [vmem:[#allocation3 + $0x2a8] sm:$0xf] %v13334_v40  ;;  %v13327_v24 = vpack.c.bf16 %v3940_v28, %v3940_v28  ;;  %v15518_v44 = vld [vmem:[#allocation3 + $0x24c] ss:$48 sps:$4 sm:$0xff]   ;;  %4028 = vst [vmem:[#allocation3 + $0x2d8] sm:$0xf] %v13335_v5  ;;  %v13356_v26 = vpack.c.bf16 %v4129_v4, %v4129_v4 }
 0x2f9   :  { %v15516_v15 = vld [vmem:[#allocation3 + $0x244] ss:$48 sps:$4 sm:$0xff]   ;;  %v15520_v23 = vld [vmem:[#allocation3 + $0x240] ss:$48 sps:$4 sm:$0xff]   ;;  %3932 = vst [vmem:[#allocation3 + $0x2d0] sm:$0xf] %v13319_v22  ;;  %5341 = vmatprep.mubr.bf16.mxu1 %v15518_v44 }
 0x2fa   :  { %v15521_v1 = vld [vmem:[#allocation3 + $0x248] ss:$48 sps:$4 sm:$0xff]   ;;  %3980 = vst [vmem:[#allocation3 + $0x2d4] sm:$0xf] %v13327_v24  ;;  %5244 = vmatprep.mubr.bf16.mxu0 %v15516_v15  ;;  %4216 = vst [vmem:[#allocation3 + $0x228] sm:$0xf] %v13363_v18 }
 0x2fb   :  { %5245 = vmatmul.mubr.bf16.gmra.mxu0 %v15520_v23  ;;  %v4130_v55 = vld [vmem:[#allocation2 + $0x7d] sm:$0xff]  ;;  %5342 = vmatmul.mubr.bf16.gmra.mxu1 %v15521_v1  ;;  %4121 = vst [vmem:[#allocation3 + $0x250] sm:$0xf] %v13348_v2  ;;  %4122 = vst [vmem:[#allocation3 + $0x280] sm:$0xf] %v13349_v61  ;;  %v4084_v33 = vld [vmem:[#allocation2 + $0x8c] sm:$0xff] }
 0x2fc   :  { %v4177_v36 = vld [vmem:[#allocation2 + $0x76] sm:$0xff]  ;;  %v4178_v9 = vld [vmem:[#allocation2 + $0x7e] sm:$0xff]  ;;  %v13357_v29 = vpack.c.bf16 %v4130_v55, %v4130_v55  ;;  %4169 = vst [vmem:[#allocation3 + $0x254] sm:$0xf] %v13356_v26  ;;  %v13351_v60 = vpack.c.bf16 %v4084_v33, %v4084_v33  ;;  %v4132_v13 = vld [vmem:[#allocation2 + $0x8d] sm:$0xff] }
 0x2fd   :  { %v13364_v58 = vpack.c.bf16 %v4177_v36, %v4177_v36  ;;  %v13365_v21 = vpack.c.bf16 %v4178_v9, %v4178_v9  ;;  %v4083_v0 = vld [vmem:[#allocation2 + $0x84] sm:$0xff]  ;;  %v15528_v42 = vld [vmem:[#allocation3 + $0x2ac] ss:$48 sps:$4 sm:$0xff]   ;;  %v13359_v25 = vpack.c.bf16 %v4132_v13, %v4132_v13  ;;  %v15540_v57 = vld [vmem:[#allocation3 + $0x10] ss:$48 sps:$4 sm:$0xff]  }
 0x2fe   :  { %v13350_v37 = vpack.c.bf16 %v4083_v0, %v4083_v0  ;;  %4170 = vst [vmem:[#allocation3 + $0x284] sm:$0xf] %v13357_v29  ;;  %v15534_v40 = vld [vmem:[#allocation3 + $0x14] ss:$48 sps:$4 sm:$0xff]   ;;  %5349 = vmatprep.mubr.bf16.mxu1 %v15528_v42  ;;  %v15536_v47 = vld [vmem:[#allocation3 + $0x1c] ss:$48 sps:$4 sm:$0xff]  }
 0x2ff   :  { %4217 = vst [vmem:[#allocation3 + $0x258] sm:$0xf] %v13364_v58  ;;  %4218 = vst [vmem:[#allocation3 + $0x288] sm:$0xf] %v13365_v21  ;;  %v15531_v17 = vld [vmem:[#allocation3 + $0x2a8] ss:$48 sps:$4 sm:$0xff]  }
 0x300   :  { %4123 = vst [vmem:[#allocation3 + $0x2b0] sm:$0xf] %v13350_v37  ;;  %v15530_v49 = vld [vmem:[#allocation3 + $0x2a0] ss:$48 sps:$4 sm:$0xff]   ;;  %v4131_v34 = vld [vmem:[#allocation2 + $0x85] sm:$0xff]  ;;  %v15584_v26 = vld [vmem:[#allocation10 + $0x78] sm:$0xff]  }
 0x301   :  { %v15526_v38 = vld [vmem:[#allocation3 + $0x2a4] ss:$48 sps:$4 sm:$0xff]   ;;  %v13358_v48 = vpack.c.bf16 %v4131_v34, %v4131_v34  ;;  %4124 = vst [vmem:[#allocation3 + $0x2e0] sm:$0xf] %v13351_v60  ;;  %v15541_v28 = vld [vmem:[#allocation3 + $0x18] ss:$48 sps:$4 sm:$0xff]   ;;  %14352 = vmatprep.subr.bf16.mxu0 %v15584_v26 }
 0x302   :  { %5252 = vmatprep.mubr.bf16.mxu0 %v15526_v38  ;;  %v4179_v41 = vld [vmem:[#allocation2 + $0x86] sm:$0xff]  ;;  %v4180_v56 = vld [vmem:[#allocation2 + $0x8e] sm:$0xff]  ;;  %4172 = vst [vmem:[#allocation3 + $0x2e4] sm:$0xf] %v13359_v25  ;;  %v15585_v9 = vld [vmem:[#allocation10 + $0x38] sm:$0xff]  }
 0x303   :  { %5253 = vmatmul.mubr.bf16.gmra.mxu0 %v15530_v49  ;;  %5350 = vmatmul.mubr.bf16.gmra.mxu1 %v15531_v17  ;;  %4171 = vst [vmem:[#allocation3 + $0x2b4] sm:$0xf] %v13358_v48  ;;  %v13366_v45 = vpack.c.bf16 %v4179_v41, %v4179_v41  ;;  %v13367_v59 = vpack.c.bf16 %v4180_v56, %v4180_v56  ;;  %5595 = vst [vmem:[#allocation2 + $0x95] sm:$0x1f] %v18286_v6  ;;  %v15542_v3 = vld [vmem:[#allocation3 + $0x74] ss:$48 sps:$4 sm:$0xff]  }
 0x304   :  { %5390 = vmatprep.mubr.bf16.mxu0 %v15534_v40  ;;  %5487 = vmatprep.mubr.bf16.mxu1 %v15536_v47  ;;  %v15544_v7 = vld [vmem:[#allocation3 + $0x7c] ss:$48 sps:$4 sm:$0xff]   ;;  %v15546_v30 = vld [vmem:[#allocation3 + $0x70] ss:$48 sps:$4 sm:$0xff]   ;;  %v15547_v14 = vld [vmem:[#allocation3 + $0x78] ss:$48 sps:$4 sm:$0xff]  }
 0x305   :  { %4219 = vst [vmem:[#allocation3 + $0x2b8] sm:$0xf] %v13366_v45  ;;  %4220 = vst [vmem:[#allocation3 + $0x2e8] sm:$0xf] %v13367_v59  ;;  %v15548_v22 = vld [vmem:[#allocation3 + $0xd4] ss:$48 sps:$4 sm:$0xff]  }
 0x306   :  { %v15550_v24 = vld [vmem:[#allocation3 + $0xdc] ss:$48 sps:$4 sm:$0xff]   ;;  %v15552_v5 = vld [vmem:[#allocation3 + $0xd0] ss:$48 sps:$4 sm:$0xff]   ;;  %v15553_v39 = vld [vmem:[#allocation3 + $0xd8] ss:$48 sps:$4 sm:$0xff]  }
 0x307   :  { %v15554_v20 = vld [vmem:[#allocation3 + $0x134] ss:$48 sps:$4 sm:$0xff]   ;;  %v15556_v15 = vld [vmem:[#allocation3 + $0x13c] ss:$48 sps:$4 sm:$0xff]   ;;  %v15558_v46 = vld [vmem:[#allocation3 + $0x130] ss:$48 sps:$4 sm:$0xff]  }
 0x308   :  { %v15559_v18 = vld [vmem:[#allocation3 + $0x138] ss:$48 sps:$4 sm:$0xff]   ;;  %v15560_v44 = vld [vmem:[#allocation3 + $0x194] ss:$48 sps:$4 sm:$0xff]   ;;  %v15562_v23 = vld [vmem:[#allocation3 + $0x19c] ss:$48 sps:$4 sm:$0xff]  }
 0x309   :  { %v15564_v1 = vld [vmem:[#allocation3 + $0x190] ss:$48 sps:$4 sm:$0xff]   ;;  %v15565_v27 = vld [vmem:[#allocation3 + $0x198] ss:$48 sps:$4 sm:$0xff]   ;;  %v15566_v43 = vld [vmem:[#allocation3 + $0x1f4] ss:$48 sps:$4 sm:$0xff]  }
 0x30a   :  { %v15568_v4 = vld [vmem:[#allocation3 + $0x1fc] ss:$48 sps:$4 sm:$0xff]   ;;  %v15570_v2 = vld [vmem:[#allocation3 + $0x1f0] ss:$48 sps:$4 sm:$0xff]   ;;  %v15571_v61 = vld [vmem:[#allocation3 + $0x1f8] ss:$48 sps:$4 sm:$0xff]  }
 0x30b   :  { %5391 = vmatmul.mubr.bf16.vlgmr.msra.gmra.mxu0 %v15540_v57  ;;  %5488 = vmatmul.mubr.bf16.vlgmr.msra.gmra.mxu1 %v15541_v28  ;;  %v15572_v55 = vld [vmem:[#allocation3 + $0x254] ss:$48 sps:$4 sm:$0xff]   ;;  %v15574_v36 = vld [vmem:[#allocation3 + $0x25c] ss:$48 sps:$4 sm:$0xff]   ;;  %v15576_v58 = vld [vmem:[#allocation3 + $0x250] ss:$48 sps:$4 sm:$0xff]  }
 0x30c   :  { %5398 = vmatprep.mubr.bf16.mxu0 %v15542_v3  ;;  %5495 = vmatprep.mubr.bf16.mxu1 %v15544_v7  ;;  %v15586_v29 = vld [vmem:[#allocation10 + $0xf8] sm:$0xff]   ;;  %v15578_v0 = vld [vmem:[#allocation3 + $0x2b4] ss:$48 sps:$4 sm:$0xff]   ;;  %v15582_v40 = vld [vmem:[#allocation3 + $0x2b0] ss:$48 sps:$4 sm:$0xff]  }
 0x30d   :  { %14353 = vmatpush3.bf16.msra.mxu0 %v15585_v9  ;;  %14416 = vmatprep.subr.bf16.mxu1 %v15586_v29  ;;  %v15577_v21 = vld [vmem:[#allocation3 + $0x258] ss:$48 sps:$4 sm:$0xff]   ;;  %v15588_v38 = vld [vmem:[#allocation10 + $0x70] sm:$0xff]   ;;  %v15580_v42 = vld [vmem:[#allocation3 + $0x2bc] ss:$48 sps:$4 sm:$0xff]  }
 0x30e   :  { %v15587_v37 = vld [vmem:[#allocation10 + $0xb8] sm:$0xff]   ;;  %14354 = vmatprep.subr.bf16.mxu0 %v15588_v38  ;;  %v15589_v49 = vld [vmem:[#allocation10 + $0x30] sm:$0xff]   ;;  %v15592_v34 = vld [vmem:[#allocation10 + $0x68] sm:$0xff]  }
 0x30f   :  { %14417 = vmatpush3.bf16.msra.mxu1 %v15587_v37  ;;  %v15590_v17 = vld [vmem:[#allocation10 + $0xf0] sm:$0xff]   ;;  %v15583_v47 = vld [vmem:[#allocation3 + $0x2b8] ss:$48 sps:$4 sm:$0xff]   ;;  %v15596_v41 = vld [vmem:[#allocation10 + $0x60] sm:$0xff]  }
 0x310   :  { %14418 = vmatprep.subr.bf16.mxu1 %v15590_v17  ;;  %v15591_v33 = vld [vmem:[#allocation10 + $0xb0] sm:$0xff]   ;;  %v15593_v60 = vld [vmem:[#allocation10 + $0x28] sm:$0xff]   ;;  %v15597_v25 = vld [vmem:[#allocation10 + $0x20] sm:$0xff]  }
 0x311   :  { %14355 = vmatpush3.bf16.msra.mxu0 %v15589_v49  ;;  %v15594_v48 = vld [vmem:[#allocation10 + $0xe8] sm:$0xff]   ;;  %v15598_v56 = vld [vmem:[#allocation10 + $0xe0] sm:$0xff]   ;;  %v15600_v57 = vld [vmem:[#allocation10 + $0x58] sm:$0xff]  }
 0x312   :  { %14356 = vmatprep.subr.bf16.mxu0 %v15592_v34  ;;  %v15595_v13 = vld [vmem:[#allocation10 + $0xa8] sm:$0xff]   ;;  %v15599_v45 = vld [vmem:[#allocation10 + $0xa0] sm:$0xff]   ;;  %v15601_v59 = vld [vmem:[#allocation10 + $0x18] sm:$0xff]  }
 0x313   :  { %5399 = vmatmul.mubr.bf16.gmra.mxu0 %v15546_v30  ;;  %5496 = vmatmul.mubr.bf16.gmra.mxu1 %v15547_v14  ;;  %v15602_v28 = vld [vmem:[#allocation10 + $0xd8] sm:$0xff]   ;;  %v15604_v7 = vld [vmem:[#allocation10 + $0x50] sm:$0xff]  }
 0x314   :  { %5406 = vmatprep.mubr.bf16.mxu0 %v15548_v22  ;;  %5503 = vmatprep.mubr.bf16.mxu1 %v15550_v24  ;;  %v15603_v3 = vld [vmem:[#allocation10 + $0x98] sm:$0xff]   ;;  %v15605_v30 = vld [vmem:[#allocation10 + $0x10] sm:$0xff]   ;;  %v15608_v24 = vld [vmem:[#allocation10 + $0x48] sm:$0xff]  }
 0x315   :  { %14419 = vmatpush3.bf16.msra.mxu1 %v15591_v33  ;;  %14357 = vmatpush3.bf16.msra.mxu0 %v15593_v60  ;;  %v15606_v14 = vld [vmem:[#allocation10 + $0xd0] sm:$0xff]  }
 0x316   :  { %14420 = vmatprep.subr.bf16.mxu1 %v15594_v48  ;;  %14358 = vmatprep.subr.bf16.mxu0 %v15596_v41  ;;  %v15607_v22 = vld [vmem:[#allocation10 + $0x90] sm:$0xff]  }
 0x319   :  { %14421 = vmatpush3.bf16.msra.mxu1 %v15595_v13  ;;  %14359 = vmatpush3.bf16.msra.mxu0 %v15597_v25 }
 0x31a   :  { %14422 = vmatprep.subr.bf16.mxu1 %v15598_v56  ;;  %14360 = vmatprep.subr.bf16.mxu0 %v15600_v57 }
 0x31b   :  { %5407 = vmatmul.mubr.bf16.gmra.mxu0 %v15552_v5  ;;  %5504 = vmatmul.mubr.bf16.gmra.mxu1 %v15553_v39  ;;  %v15609_v5 = vld [vmem:[#allocation10 + $0x8] sm:$0xff]  }
 0x31c   :  { %5414 = vmatprep.mubr.bf16.mxu0 %v15554_v20  ;;  %5511 = vmatprep.mubr.bf16.mxu1 %v15556_v15  ;;  %v15610_v39 = vld [vmem:[#allocation10 + $0xc8] sm:$0xff]   ;;  %v15612_v15 = vld [vmem:[#allocation10 + $0x40] sm:$0xff]  }
 0x31d   :  { %14423 = vmatpush3.bf16.msra.mxu1 %v15599_v45  ;;  %14361 = vmatpush3.bf16.msra.mxu0 %v15601_v59  ;;  %v15611_v20 = vld [vmem:[#allocation10 + $0x88] sm:$0xff]  }
 0x31e   :  { %14424 = vmatprep.subr.bf16.mxu1 %v15602_v28  ;;  %14362 = vmatprep.subr.bf16.mxu0 %v15604_v7 }
 0x321   :  { %14425 = vmatpush3.bf16.msra.mxu1 %v15603_v3  ;;  %14363 = vmatpush3.bf16.msra.mxu0 %v15605_v30 }
 0x322   :  { %14426 = vmatprep.subr.bf16.mxu1 %v15606_v14  ;;  %14364 = vmatprep.subr.bf16.mxu0 %v15608_v24 }
 0x323   :  { %5415 = vmatmul.mubr.bf16.gmra.mxu0 %v15558_v46  ;;  %5512 = vmatmul.mubr.bf16.gmra.mxu1 %v15559_v18  ;;  %v15613_v46 = vld [vmem:[#allocation10] sm:$0xff]  }
 0x324   :  { %5422 = vmatprep.mubr.bf16.mxu0 %v15560_v44  ;;  %5519 = vmatprep.mubr.bf16.mxu1 %v15562_v23  ;;  %v15614_v18 = vld [vmem:[#allocation10 + $0xc0] sm:$0xff]   ;;  %v15622_v23 = vld [vmem:[#allocation10 + $0x178] sm:$0xff]  }
 0x325   :  { %14427 = vmatpush3.bf16.msra.mxu1 %v15607_v22  ;;  %14365 = vmatpush3.bf16.msra.mxu0 %v15609_v5  ;;  %v15615_v44 = vld [vmem:[#allocation10 + $0x80] sm:$0xff]  }
 0x326   :  { %14428 = vmatprep.subr.bf16.mxu1 %v15610_v39  ;;  %14366 = vmatprep.subr.bf16.mxu0 %v15612_v15 }
 0x329   :  { %14429 = vmatpush3.bf16.msra.mxu1 %v15611_v20  ;;  %14367 = vmatpush3.bf16.msra.mxu0 %v15613_v46 }
 0x32a   :  { %14430 = vmatprep.subr.bf16.mxu1 %v15614_v18  ;;  %14480 = vmatprep.subr.bf16.mxu0 %v15622_v23 }
 0x32b   :  { %5423 = vmatmul.mubr.bf16.gmra.mxu0 %v15564_v1  ;;  %5520 = vmatmul.mubr.bf16.gmra.mxu1 %v15565_v27  ;;  %v15624_v1 = vld [vmem:[#allocation10 + $0x1f8] sm:$0xff]  }
 0x32c   :  { %5430 = vmatprep.mubr.bf16.mxu0 %v15566_v43  ;;  %5527 = vmatprep.mubr.bf16.mxu1 %v15568_v4 }
 0x32d   :  { %14431 = vmatpush3.bf16.msra.mxu1 %v15615_v44 }
 0x32e   :  { %14544 = vmatprep.subr.bf16.mxu1 %v15624_v1 }
 0x333   :  { %5431 = vmatmul.mubr.bf16.gmra.mxu0 %v15570_v2  ;;  %5528 = vmatmul.mubr.bf16.gmra.mxu1 %v15571_v61 }
 0x334   :  { %5438 = vmatprep.mubr.bf16.mxu0 %v15572_v55  ;;  %5535 = vmatprep.mubr.bf16.mxu1 %v15574_v36 }
 0x33b   :  { %5439 = vmatmul.mubr.bf16.gmra.mxu0 %v15576_v58  ;;  %5536 = vmatmul.mubr.bf16.gmra.mxu1 %v15577_v21 }
 0x33c   :  { %5446 = vmatprep.mubr.bf16.mxu0 %v15578_v0  ;;  %5543 = vmatprep.mubr.bf16.mxu1 %v15580_v42 }
 0x343   :  { %5447 = vmatmul.mubr.bf16.gmra.mxu0 %v15582_v40  ;;  %5544 = vmatmul.mubr.bf16.gmra.mxu1 %v15583_v47 }
 0x37e   :  { %v14112_v27 = vpop.f32.mrf.mxu0 }
 0x380   :  { %v14113_v4 = vpop.f32.mrf.mxu0 }
 0x381   :  { %v17110_v43 = vpop.f32.mrf.mxu1  ;;  %v14114_v51 = vadd.f32 %v14113_v4, %v14112_v27 }
 0x382   :  { %v14115_v61 = vpop.f32.mrf.mxu0 }
 0x383   :  { %v17112_v2 = vpop.f32.mrf.mxu1 }
 0x384   :  { %v14116_v26 = vpop.f32.mrf.mxu0  ;;  %v14178_v4 = vadd.f32 %v17112_v2, %v17110_v43 }
 0x385   :  { %v17114_v55 = vpop.f32.mrf.mxu1 }
 0x387   :  { %v17116_v36 = vpop.f32.mrf.mxu1 }
 0x38b   :  { %v14118_v9 = vpop.f32.mrf.mxu0 }
 0x38d   :  { %v17118_v29 = vpop.f32.mrf.mxu1  ;;  %v14119_v58 = vpop.f32.mrf.mxu0 }
 0x38f   :  { %v17120_v21 = vpop.f32.mrf.mxu1  ;;  %v14121_v0 = vpop.f32.mrf.mxu0 }
 0x391   :  { %v17122_v37 = vpop.f32.mrf.mxu1  ;;  %v14122_v38 = vpop.f32.mrf.mxu0 }
 0x393   :  { %v17124_v42 = vpop.f32.mrf.mxu1 }
 0x395   :  { %v17126_v49 = vpop.f32.mrf.mxu0 }
 0x397   :  { %v17128_v17 = vpop.f32.mrf.mxu1  ;;  %v17130_v40 = vpop.f32.mrf.mxu0 }
 0x398   :  { %v14126_v43 = vadd.f32 %v17130_v40, %v17126_v49 }
 0x399   :  { %v17132_v47 = vpop.f32.mrf.mxu1  ;;  %v17134_v33 = vpop.f32.mrf.mxu0 }
 0x39b   :  { %v17136_v34 = vpop.f32.mrf.mxu1  ;;  %v14128_v60 = vpop.f32.mrf.mxu0 }
 0x39c   :  { %v14129_v2 = vadd.f32 %v14128_v60, %v17134_v33 }
 0x39d   :  { %v17138_v48 = vpop.f32.mrf.mxu1 }
 0x3a2   :  { %v14130_v13 = vpop.f32.mrf.mxu0  ;;  %v17140_v41 = vpop.f32.mrf.mxu1 }
 0x3a4   :  { %v14131_v25 = vpop.f32.mrf.mxu0  ;;  %v17142_v56 = vpop.f32.mrf.mxu1 }
 0x3a6   :  { %v17144_v45 = vpop.f32.mrf.mxu0  ;;  %v17146_v57 = vpop.f32.mrf.mxu1 }
 0x3a8   :  { %v14134_v59 = vpop.f32.mrf.mxu0  ;;  %v17148_v28 = vpop.f32.mrf.mxu1 }
 0x3aa   :  { %v17150_v3 = vpop.f32.mrf.mxu0  ;;  %v17152_v7 = vpop.f32.mrf.mxu1 }
 0x3ac   :  { %v17154_v30 = vpop.f32.mrf.mxu0  ;;  %v17156_v14 = vpop.f32.mrf.mxu1 }
 0x3ae   :  { %v17158_v22 = vpop.f32.mrf.mxu0  ;;  %v17160_v24 = vpop.f32.mrf.mxu1 }
 0x3b0   :  { %v17162_v5 = vpop.f32.mrf.mxu0  ;;  %v17164_v39 = vpop.f32.mrf.mxu1 }
 0x3b2   :  { %v17168_v15 = vpop.f32.mrf.mxu1 }
 0x3b3   :  { %v17166_v20 = vpop.f32.mrf.mxu0 }
 0x3b4   :  { %v17172_v18 = vpop.f32.mrf.mxu1 }
 0x3b5   :  { %v17170_v46 = vpop.f32.mrf.mxu0 }
 0x3b6   :  { %v17176_v23 = vpop.f32.mrf.mxu1 }
 0x3b7   :  { %v17174_v44 = vpop.f32.mrf.mxu0 }
 0x3b8   :  { %v17180_v32 = vpop.f32.mrf.mxu1 }
 0x3b9   :  { %v17178_v1 = vpop.f32.mrf.mxu0 }
 0x3bb   :  { %v17182_v35 = vpop.f32.mrf.mxu0  ;;  %v17184_v54 = vpop.f32.mrf.mxu1 }
 0x3bc   :  { %18348 = vst [vmem:[#allocation33_spill] sm:$0xff] %v17184_v54 }
 0x3bd   :  { %v17186_v53 = vpop.f32.mrf.mxu0  ;;  %v17188_v63 = vpop.f32.mrf.mxu1 }
 0x3be   :  { %18349 = vst [vmem:[#allocation34_spill] sm:$0xff] %v17186_v53  ;;  %18350 = vst [vmem:[#allocation35_spill] sm:$0xff] %v17188_v63  ;;  %v17209_v63 = vld [vmem:[%s18176_s7] ss:$0 sm:$0xff] }
 0x3bf   :  { %v17190_v11 = vpop.f32.mrf.mxu0  ;;  %v17192_v52 = vpop.f32.mrf.mxu1  ;;  %v5215_v33 = vadd.f32 %v14126_v43, %v17209_v63 }
 0x3c0   :  { %18351 = vst [vmem:[#allocation38_spill] sm:$0xff] %v17190_v11  ;;  %18352 = vst [vmem:[#allocation37_spill] sm:$0xff] %v17192_v52 }
 0x3c1   :  { %v17194_v10 = vpop.f32.mrf.mxu0  ;;  %v17196_v8 = vpop.f32.mrf.mxu1 }
 0x3c2   :  { %18353 = vst [vmem:[#allocation17_spill] sm:$0xff] %v17194_v10  ;;  %18354 = vst [vmem:[#allocation36_spill] sm:$0xff] %v17196_v8  ;;  %v14117_v10 = vadd.f32 %v14116_v26, %v14115_v61  ;;  %v14120_v8 = vadd.f32 %v14119_v58, %v14118_v9  ;;  %v14184_v58 = vadd.f32 %v17120_v21, %v17118_v29 }
 0x3c3   :  { %v17198_v12 = vpop.f32.mrf.mxu0  ;;  %v17200_v31 = vpop.f32.mrf.mxu1  ;;  %v14190_v29 = vadd.f32 %v17132_v47, %v17128_v17 }
 0x3c4   :  { %18355 = vst [vmem:[#allocation18_spill] sm:$0xff] %v17198_v12  ;;  %18356 = vst [vmem:[#allocation39_spill] sm:$0xff] %v17200_v31  ;;  %v5199_v31 = vadd.f32 %v14114_v51, %v17209_v63  ;;  %v14123_v12 = vadd.f32 %v14122_v38, %v14121_v0  ;;  %v5202_v50 = vadd.f32 %v14117_v10, %v17209_v63 }
 0x3c5   :  { %v17202_v62 = vpop.f32.mrf.mxu0  ;;  %v17204_v54 = vpop.f32.mrf.mxu1  ;;  %v14181_v51 = vadd.f32 %v17116_v36, %v17114_v55  ;;  %v14135_v55 = vadd.f32 %v14134_v59, %v17144_v45  ;;  %v14141_v45 = vadd.f32 %v17162_v5, %v17158_v22 }
 0x3c6   :  { %18357 = vst [vmem:[#allocation41_spill] sm:$0xff] %v17202_v62  ;;  %18358 = vst [vmem:[#allocation40_spill] sm:$0xff] %v17204_v54  ;;  %v5210_v61 = vadd.f32 %v14123_v12, %v17209_v63 }
 0x3c7   :  { %v17211_v11 = vpop.f32.mrf.mxu0  ;;  %v17213_v52 = vpop.f32.mrf.mxu1  ;;  %v5299_v38 = vadd.f32 %v14181_v51, %v5202_v50  ;;  %v14196_v50 = vadd.f32 %v17142_v56, %v17140_v41  ;;  %v5226_v47 = vadd.f32 %v14135_v55, %v17209_v63  ;;  %v14147_v41 = vadd.f32 %v17178_v1, %v17174_v44 }
 0x3c8   :  { %18359 = vst [vmem:[#allocation42_spill] sm:$0xff] %v17211_v11  ;;  %18360 = vst [vmem:[#allocation43_spill] sm:$0xff] %v17213_v52  ;;  %v5207_v11 = vadd.f32 %v14120_v8, %v17209_v63  ;;  %v5296_v52 = vadd.f32 %v14178_v4, %v5199_v31  ;;  %v14187_v8 = vadd.f32 %v17124_v42, %v17122_v37 }
 0x3c9   :  { %v17215_v6 = vpop.f32.mrf.mxu0  ;;  %v17218_v62 = vpop.f32.mrf.mxu1  ;;  %v14132_v31 = vadd.f32 %v14131_v25, %v14130_v13  ;;  %v5218_v37 = vadd.f32 %v14129_v2, %v17209_v63  ;;  %v14138_v25 = vadd.f32 %v17154_v30, %v17150_v3  ;;  %v14199_v3 = vadd.f32 %v17148_v28, %v17146_v57 }
 0x3ca   :  { %v5307_v4 = vadd.f32 %v14187_v8, %v5210_v61  ;;  %v5234_v2 = vadd.f32 %v14141_v45, %v17209_v63  ;;  %v5242_v57 = vadd.f32 %v14147_v41, %v17209_v63 }
 0x3cb   :  { %v14240_v27 = vpop.f32.mrf.mxu0  ;;  %v14304_v54 = vpop.f32.mrf.mxu1  ;;  %v5231_v43 = vadd.f32 %v14138_v25, %v17209_v63 }
 0x3cd   :  { %v14241_v53 = vpop.f32.mrf.mxu0  ;;  %v14305_v9 = vpop.f32.mrf.mxu1 }
 0x3ce   :  { %v14242_v26 = vadd.f32 %v14241_v53, %v14240_v27  ;;  %v14306_v12 = vadd.f32 %v14305_v9, %v14304_v54  ;;  %v5304_v27 = vadd.f32 %v14184_v58, %v5207_v11  ;;  %v5223_v54 = vadd.f32 %v14132_v31, %v17209_v63 }
 0x3cf   :  { %v14243_v10 = vpop.f32.mrf.mxu0  ;;  %v14307_v53 = vpop.f32.mrf.mxu1  ;;  %v5312_v9 = vadd.f32 %v14190_v29, %v5215_v33  ;;  %v17261_v58 = vadd.f32 %v14199_v3, %v5226_v47  ;;  %v14211_v29 = vadd.f32 %v17180_v32, %v17176_v23 }
 0x3d0   :  { %v5393_v0 = vadd.f32 %v14242_v26, %v5296_v52  ;;  %v14193_v52 = vadd.f32 %v17138_v48, %v17136_v34  ;;  %v14144_v34 = vadd.f32 %v17170_v46, %v17166_v20  ;;  %v17259_v5 = vadd.f32 %v14196_v50, %v5223_v54 }
 0x3d1   :  { %v14244_v36 = vpop.f32.mrf.mxu0  ;;  %v14308_v40 = vpop.f32.mrf.mxu1 }
 0x3d2   :  { %v5490_v21 = vadd.f32 %v14306_v12, %v5393_v0  ;;  %v14245_v49 = vadd.f32 %v14244_v36, %v14243_v10  ;;  %v14309_v13 = vadd.f32 %v14308_v40, %v14307_v53  ;;  %v17255_v51 = vadd.f32 %v14193_v52, %v5218_v37 }
 0x3d3   :  { %v14246_v11 = vpop.f32.mrf.mxu0  ;;  %v14310_v17 = vpop.f32.mrf.mxu1  ;;  %v5239_v10 = vadd.f32 %v14144_v34, %v17209_v63  ;;  %v14202_v53 = vadd.f32 %v17156_v14, %v17152_v7  ;;  %v18361_v14 = vld [vmem:[#allocation34_spill] sm:$0xff] }
 0x3d4   :  { %v5552_v42 = vmax.f32 %v5490_v21, 0.0  ;;  %v5396_v60 = vadd.f32 %v14245_v49, %v5299_v38  ;;  %v14205_v38 = vadd.f32 %v17164_v39, %v17160_v24  ;;  %v14150_v24 = vadd.f32 %v18361_v14, %v17182_v35 }
 0x3d5   :  { %v14247_v48 = vpop.f32.mrf.mxu0  ;;  %v14311_v26 = vpop.f32.mrf.mxu1  ;;  %v17277_v37 = vadd.f32 %v14202_v53, %v5231_v43  ;;  %v18366_v43 = vld [vmem:[#allocation38_spill] sm:$0xff] }
 0x3d6   :  { %v5568_v56 = vsel %vm16265_vm0, %v5552_v42, 0.0  ;;  %v5493_v59 = vadd.f32 %v14309_v13, %v5396_v60  ;;  %v14248_v61 = vadd.f32 %v14247_v48, %v14246_v11  ;;  %v14312_v44 = vadd.f32 %v14311_v26, %v14310_v17 }
 0x3d7   :  { %v13640_v30 = vpack.c.bf16 %v5568_v56, %v5568_v56  ;;  %5578 = vst [vmem:[#allocation2 + $0x5] sm:$0xff] %v5568_v56  ;;  %v14249_v22 = vpop.f32.mrf.mxu0  ;;  %v14313_v1 = vpop.f32.mrf.mxu1  ;;  %v17279_v52 = vadd.f32 %v14205_v38, %v5234_v2  ;;  %v18363_v26 = vmov 0.0   ;;  %v17291_v3 = vadd.f32 %v14150_v24, %v17209_v63 }
 0x3d8   :  { %v5553_v20 = vmax.f32 %v5493_v59, 0.0  ;;  %v5401_v46 = vadd.f32 %v14248_v61, %v5304_v27  ;;  %v14208_v27 = vadd.f32 %v17172_v18, %v17168_v15  ;;  %v17285_v15 = vadd.f32 %v14211_v29, %v5242_v57 }
 0x3d9   :  { %9109 = vst [vmem:[#allocation3 + $0x2c] sm:$0xf] %v13640_v30  ;;  %v14250_v8 = vpop.f32.mrf.mxu0  ;;  %v14314_v12 = vpop.f32.mrf.mxu1  ;;  %v18364_v30 = vld [vmem:[#allocation33_spill] sm:$0xff] }
 0x3da   :  { %v5569_v28 = vsel %vm16270_vm1, %v5553_v20, 0.0  ;;  %v5498_v31 = vadd.f32 %v14312_v44, %v5401_v46  ;;  %v14251_v0 = vadd.f32 %v14250_v8, %v14249_v22  ;;  %v14315_v40 = vadd.f32 %v14314_v12, %v14313_v1  ;;  %v18365_v22 = vld [vmem:[#allocation35_spill] sm:$0xff] }
 0x3db   :  { %v13641_v55 = vpack.c.bf16 %v5569_v28, %v5569_v28  ;;  %5579 = vst [vmem:[#allocation2 + $0xd] sm:$0xff] %v5569_v28  ;;  %v14252_v36 = vpop.f32.mrf.mxu0  ;;  %v14316_v33 = vpop.f32.mrf.mxu1  ;;  %v17281_v7 = vadd.f32 %v14208_v27, %v5239_v10  ;;  %v17295_v20 = vadd.f32 %v18365_v22, %v18364_v30 }
 0x3dc   :  { %v5554_v21 = vmax.f32 %v5498_v31, 0.0  ;;  %v5404_v49 = vadd.f32 %v14251_v0, %v5307_v4 }
 0x3dd   :  { %9110 = vst [vmem:[#allocation3 + $0x5c] sm:$0xf] %v13641_v55  ;;  %v14253_v39 = vpop.f32.mrf.mxu0  ;;  %v14317_v50 = vpop.f32.mrf.mxu1 }
 0x3de   :  { %v5570_v32 = vsel %vm16284_vm2, %v5554_v21, 0.0  ;;  %v5501_v23 = vadd.f32 %v14315_v40, %v5404_v49  ;;  %v14254_v4 = vadd.f32 %v14253_v39, %v14252_v36  ;;  %v5604_v11 = vld [vmem:[#allocation2] sm:$0xff]  ;;  %v14318_v13 = vadd.f32 %v14317_v50, %v14316_v33 }
 0x3df   :  { %v5652_v54 = vld [vmem:[#allocation2 + $0x1] sm:$0xff]  ;;  %v13642_v60 = vpack.c.bf16 %v5570_v32, %v5570_v32  ;;  %5580 = vst [vmem:[#allocation2 + $0x15] sm:$0xff] %v5570_v32  ;;  %v14255_v17 = vpop.f32.mrf.mxu0  ;;  %v13376_v47 = vpack.c.bf16 %v5604_v11, %v5604_v11  ;;  %v14319_v56 = vpop.f32.mrf.mxu1 }
 0x3e0   :  { %v5700_v42 = vld [vmem:[#allocation2 + $0x2] sm:$0xff]  ;;  %v13384_v25 = vpack.c.bf16 %v5652_v54, %v5652_v54  ;;  %v5555_v48 = vmax.f32 %v5501_v23, 0.0  ;;  %v5409_v41 = vadd.f32 %v14254_v4, %v5312_v9 }
 0x3e1   :  { %v5748_v35 = vld [vmem:[#allocation2 + $0x3] sm:$0xff]  ;;  %v13392_v59 = vpack.c.bf16 %v5700_v42, %v5700_v42  ;;  %9111 = vst [vmem:[#allocation3 + $0x8c] sm:$0xf] %v13642_v60  ;;  %v14256_v46 = vpop.f32.mrf.mxu0  ;;  %5644 = vst [vmem:[#allocation3] sm:$0xf] %v13376_v47  ;;  %v14320_v31 = vpop.f32.mrf.mxu1 }
 0x3e2   :  { %v5796_v45 = vld [vmem:[#allocation2 + $0x4] sm:$0xff]  ;;  %v13400_v61 = vpack.c.bf16 %v5748_v35, %v5748_v35  ;;  %5692 = vst [vmem:[#allocation3 + $0x4] sm:$0xf] %v13384_v25  ;;  %v5571_v8 = vsel %vm16301_vm3, %v5555_v48, 0.0  ;;  %v5506_v57 = vadd.f32 %v14318_v13, %v5409_v41  ;;  %v14257_v28 = vadd.f32 %v14256_v46, %v14255_v17  ;;  %v5797_v49 = vld [vmem:[#allocation2 + $0xc] sm:$0xff] }
 0x3e3   :  { %v5844_v34 = vld [vmem:[#allocation2 + $0x5] sm:$0xff]  ;;  %8521 = vst [vmem:[#allocation2] sm:$0x1f] %v18363_v26  ;;  %v13408_v44 = vpack.c.bf16 %v5796_v45, %v5796_v45  ;;  %5740 = vst [vmem:[#allocation3 + $0x8] sm:$0xf] %v13392_v59  ;;  %v13643_v38 = vpack.c.bf16 %v5571_v8, %v5571_v8  ;;  %v14321_v27 = vadd.f32 %v14320_v31, %v14319_v56  ;;  %v14258_v55 = vpop.f32.mrf.mxu0  ;;  %v5845_v40 = vld [vmem:[#allocation2 + $0xd] sm:$0xff]  ;;  %v14322_v24 = vpop.f32.mrf.mxu1 }
 0x3e4   :  { %v13416_v1 = vpack.c.bf16 %v5844_v34, %v5844_v34  ;;  %v18367_v9 = vld [vmem:[#allocation17_spill] sm:$0xff]  ;;  %v5605_v0 = vld [vmem:[#allocation2 + $0x8] sm:$0xff]  ;;  %5788 = vst [vmem:[#allocation3 + $0xc] sm:$0xf] %v13400_v61  ;;  %5581 = vst [vmem:[#allocation2 + $0x1d] sm:$0xff] %v5571_v8  ;;  %v5556_v33 = vmax.f32 %v5506_v57, 0.0  ;;  %v5412_v14 = vadd.f32 %v14257_v28, %v17255_v51  ;;  %v13409_v54 = vpack.c.bf16 %v5797_v49, %v5797_v49 }
 0x3e5   :  { %v17299_v2 = vadd.f32 %v18367_v9, %v18366_v43  ;;  %v5653_v12 = vld [vmem:[#allocation2 + $0x9] sm:$0xff]  ;;  %v13377_v36 = vpack.c.bf16 %v5605_v0, %v5605_v0  ;;  %5836 = vst [vmem:[#allocation3 + $0x10] sm:$0xf] %v13408_v44  ;;  %9112 = vst [vmem:[#allocation3 + $0xbc] sm:$0xf] %v13643_v38  ;;  %v14259_v11 = vpop.f32.mrf.mxu0  ;;  %v13417_v42 = vpack.c.bf16 %v5845_v40, %v5845_v40  ;;  %v14323_v45 = vpop.f32.mrf.mxu1 }
 0x3e6   :  { %v5701_v53 = vld [vmem:[#allocation2 + $0xa] sm:$0xff]  ;;  %v13385_v29 = vpack.c.bf16 %v5653_v12, %v5653_v12  ;;  %5884 = vst [vmem:[#allocation3 + $0x14] sm:$0xf] %v13416_v1  ;;  %v5572_v25 = vsel %vm16309_vm4, %v5556_v33, 0.0  ;;  %v5509_v51 = vadd.f32 %v14321_v27, %v5412_v14  ;;  %v14260_v35 = vadd.f32 %v14259_v11, %v14258_v55  ;;  %v5702_v41 = vld [vmem:[#allocation2 + $0x12] sm:$0xff] }
 0x3e7   :  { %v5749_v21 = vld [vmem:[#allocation2 + $0xb] sm:$0xff]  ;;  %v13393_v39 = vpack.c.bf16 %v5701_v53, %v5701_v53  ;;  %5645 = vst [vmem:[#allocation3 + $0x30] sm:$0xf] %v13377_v36  ;;  %v13644_v59 = vpack.c.bf16 %v5572_v25, %v5572_v25  ;;  %5582 = vst [vmem:[#allocation2 + $0x25] sm:$0xff] %v5572_v25  ;;  %v14324_v61 = vadd.f32 %v14323_v45, %v14322_v24  ;;  %v14261_v30 = vpop.f32.mrf.mxu0  ;;  %v5750_v44 = vld [vmem:[#allocation2 + $0x13] sm:$0xff]  ;;  %v14325_v57 = vpop.f32.mrf.mxu1 }
 0x3e8   :  { %v13401_v32 = vpack.c.bf16 %v5749_v21, %v5749_v21  ;;  %v5892_v23 = vld [vmem:[#allocation2 + $0x6] sm:$0xff]  ;;  %5693 = vst [vmem:[#allocation3 + $0x34] sm:$0xf] %v13385_v29  ;;  %v5606_v34 = vld [vmem:[#allocation2 + $0x10] sm:$0xff]  ;;  %5837 = vst [vmem:[#allocation3 + $0x40] sm:$0xf] %v13409_v54  ;;  %v5417_v8 = vadd.f32 %v14260_v35, %v17259_v5  ;;  %v13394_v28 = vpack.c.bf16 %v5702_v41, %v5702_v41 }
 0x3e9   :  { %v5940_v4 = vld [vmem:[#allocation2 + $0x7] sm:$0xff]  ;;  %v13424_v60 = vpack.c.bf16 %v5892_v23, %v5892_v23  ;;  %5741 = vst [vmem:[#allocation3 + $0x38] sm:$0xf] %v13393_v39  ;;  %v5654_v48 = vld [vmem:[#allocation2 + $0x11] sm:$0xff]  ;;  %v13378_v22 = vpack.c.bf16 %v5606_v34, %v5606_v34  ;;  %5885 = vst [vmem:[#allocation3 + $0x44] sm:$0xf] %v13417_v42  ;;  %v13402_v31 = vpack.c.bf16 %v5750_v44, %v5750_v44  ;;  %v14262_v53 = vpop.f32.mrf.mxu0  ;;  %v14326_v33 = vpop.f32.mrf.mxu1 }
 0x3ea   :  { %v5988_v50 = vld [vmem:[#allocation2 + $0x8] sm:$0xff]  ;;  %v13432_v13 = vpack.c.bf16 %v5940_v4, %v5940_v4  ;;  %5789 = vst [vmem:[#allocation3 + $0x3c] sm:$0xf] %v13401_v32  ;;  %v13386_v46 = vpack.c.bf16 %v5654_v48, %v5654_v48  ;;  %v5557_v9 = vmax.f32 %v5509_v51, 0.0  ;;  %v5798_v0 = vld [vmem:[#allocation2 + $0x14] sm:$0xff]  ;;  %v5514_v5 = vadd.f32 %v14324_v61, %v5417_v8 }
 0x3eb   :  { %v17304_v17 = vld [vmem:[#allocation2 + $0x9] sm:$0xff]  ;;  %v13440_v56 = vpack.c.bf16 %v5988_v50, %v5988_v50  ;;  %5932 = vst [vmem:[#allocation3 + $0x18] sm:$0xf] %v13424_v60  ;;  %v5846_v12 = vld [vmem:[#allocation2 + $0x15] sm:$0xff]  ;;  %9113 = vst [vmem:[#allocation3 + $0xec] sm:$0xf] %v13644_v59  ;;  %v13410_v55 = vpack.c.bf16 %v5798_v0, %v5798_v0  ;;  %v14263_v40 = vadd.f32 %v14262_v53, %v14261_v30  ;;  %v14264_v11 = vpop.f32.mrf.mxu0  ;;  %v14328_v34 = vpop.f32.mrf.mxu1 }
 0x3ec   :  { %v5893_v1 = vld [vmem:[#allocation2 + $0xe] sm:$0xff]  ;;  %5980 = vst [vmem:[#allocation3 + $0x1c] sm:$0xf] %v13432_v13  ;;  %5646 = vst [vmem:[#allocation3 + $0x60] sm:$0xf] %v13378_v22  ;;  %v13418_v36 = vpack.c.bf16 %v5846_v12, %v5846_v12  ;;  %v5573_v49 = vsel %vm16314_vm5, %v5557_v9, 0.0  ;;  %v13448_v23 = vpack.c.bf16 %v17304_v17, %v17304_v17  ;;  %v14327_v50 = vadd.f32 %v14326_v33, %v14325_v57 }
 0x3ed   :  { %v5941_v43 = vld [vmem:[#allocation2 + $0xf] sm:$0xff]  ;;  %6028 = vst [vmem:[#allocation3 + $0x20] sm:$0xf] %v13440_v56  ;;  %5694 = vst [vmem:[#allocation3 + $0x64] sm:$0xf] %v13386_v46  ;;  %v13425_v38 = vpack.c.bf16 %v5893_v1, %v5893_v1  ;;  %v17313_v14 = vld [vmem:[#allocation10 + $0x138] sm:$0xff]   ;;  %v13645_v4 = vpack.c.bf16 %v5573_v49, %v5573_v49  ;;  %v5420_v45 = vadd.f32 %v14263_v40, %v17261_v58  ;;  %v14265_v22 = vpop.f32.mrf.mxu0 }
 0x3ee   :  { %v13433_v27 = vpack.c.bf16 %v5941_v43, %v5941_v43  ;;  %v17309_v29 = vld [vmem:[#allocation2 + $0xa] sm:$0xff]  ;;  %v5607_v24 = vld [vmem:[#allocation2 + $0x18] sm:$0xff]  ;;  %5742 = vst [vmem:[#allocation3 + $0x68] sm:$0xf] %v13394_v28  ;;  %5790 = vst [vmem:[#allocation3 + $0x6c] sm:$0xf] %v13402_v31  ;;  %v17322_v61 = vadd.f32 %v17295_v20, %v17291_v3  ;;  %v5250_v30 = vadd.f32 %v17299_v2, %v17209_v63  ;;  %v14329_v31 = vpop.f32.mrf.mxu1 }
 0x3ef   :  { %v5655_v39 = vld [vmem:[#allocation2 + $0x19] sm:$0xff]  ;;  %5583 = vst [vmem:[#allocation2 + $0x2d] sm:$0xff] %v5573_v49  ;;  %v13379_v42 = vpack.c.bf16 %v5607_v24, %v5607_v24  ;;  %v15632_v25 = vld [vmem:[#allocation10 + $0x170] sm:$0xff]   ;;  %5933 = vst [vmem:[#allocation3 + $0x48] sm:$0xf] %v13425_v38  ;;  %v5558_v35 = vmax.f32 %v5514_v5, 0.0  ;;  %v13456_v1 = vpack.c.bf16 %v17309_v29, %v17309_v29  ;;  %v5517_v20 = vadd.f32 %v14327_v50, %v5420_v45 }
 0x3f0   :  { %v5703_v32 = vld [vmem:[#allocation2 + $0x1a] sm:$0xff]  ;;  %v13387_v60 = vpack.c.bf16 %v5655_v39, %v5655_v39  ;;  %5981 = vst [vmem:[#allocation3 + $0x4c] sm:$0xf] %v13433_v27  ;;  %5838 = vst [vmem:[#allocation3 + $0x70] sm:$0xf] %v13410_v55  ;;  %v15634_v59 = vld [vmem:[#allocation10 + $0x1f0] sm:$0xff]   ;;  %v14266_v28 = vadd.f32 %v14265_v22, %v14264_v11  ;;  %v14330_v27 = vadd.f32 %v14329_v31, %v14328_v34  ;;  %v14267_v55 = vpop.f32.mrf.mxu0  ;;  %v14331_v24 = vpop.f32.mrf.mxu1 }
 0x3f1   :  { %v17317_v54 = vld [vmem:[#allocation10 + $0x1b8] sm:$0xff]   ;;  %5886 = vst [vmem:[#allocation3 + $0x74] sm:$0xf] %v13418_v36  ;;  %v15616_v17 = vld [vmem:[#allocation3] ss:$48 sps:$4 sm:$0xff]   ;;  %v13395_v41 = vpack.c.bf16 %v5703_v32, %v5703_v32  ;;  %v5574_v3 = vsel %vm16336_vm6, %v5558_v35, 0.0 }
 0x3f2   :  { %v5751_v13 = vld [vmem:[#allocation2 + $0x1b] sm:$0xff]  ;;  %v15618_v48 = vld [vmem:[#allocation3 + $0x4] ss:$48 sps:$4 sm:$0xff]   ;;  %6076 = vst [vmem:[#allocation3 + $0x24] sm:$0xf] %v13448_v23  ;;  %v13646_v38 = vpack.c.bf16 %v5574_v3, %v5574_v3  ;;  %5584 = vst [vmem:[#allocation2 + $0x35] sm:$0xff] %v5574_v3  ;;  %v5425_v33 = vadd.f32 %v14266_v28, %v17277_v37 }
 0x3f3   :  { %v5799_v51 = vld [vmem:[#allocation2 + $0x1c] sm:$0xff]  ;;  %v13403_v56 = vpack.c.bf16 %v5751_v13, %v5751_v13  ;;  %9114 = vst [vmem:[#allocation3 + $0x11c] sm:$0xf] %v13645_v4  ;;  %v15619_v46 = vld [vmem:[#allocation3 + $0x8] ss:$48 sps:$4 sm:$0xff]   ;;  %7947 = vmatprep.mubr.bf16.mxu0 %v15618_v48  ;;  %v15633_v2 = vld [vmem:[#allocation10 + $0x130] sm:$0xff]  }
 0x3f4   :  { %v15621_v44 = vld [vmem:[#allocation3 + $0xc] ss:$48 sps:$4 sm:$0xff]   ;;  %5647 = vst [vmem:[#allocation3 + $0x90] sm:$0xf] %v13379_v42  ;;  %5695 = vst [vmem:[#allocation3 + $0x94] sm:$0xf] %v13387_v60  ;;  %v13411_v58 = vpack.c.bf16 %v5799_v51, %v5799_v51  ;;  %7948 = vmatmul.mubr.bf16.vlgmr.msra.gmra.mxu0 %v15616_v17  ;;  %v14268_v60 = vpop.f32.mrf.mxu0  ;;  %v5522_v45 = vadd.f32 %v14330_v27, %v5425_v33  ;;  %v14332_v17 = vpop.f32.mrf.mxu1 }
 0x3f5   :  { %v18371_v43 = vld [vmem:[#allocation37_spill] sm:$0xff]  ;;  %v18372_v9 = vld [vmem:[#allocation36_spill] sm:$0xff]  ;;  %5743 = vst [vmem:[#allocation3 + $0x98] sm:$0xf] %v13395_v41  ;;  %5791 = vst [vmem:[#allocation3 + $0x9c] sm:$0xf] %v13403_v56  ;;  %8044 = vmatprep.mubr.bf16.mxu1 %v15621_v44  ;;  %14481 = vmatpush3.bf16.msra.mxu0 %v17313_v14  ;;  %v14269_v34 = vadd.f32 %v14268_v60, %v14267_v55  ;;  %v14333_v22 = vadd.f32 %v14332_v17, %v14331_v24 }
 0x3f6   :  { %v14217_v8 = vadd.f32 %v18372_v9, %v18371_v43  ;;  %v5608_v0 = vld [vmem:[#allocation2 + $0x20] sm:$0xff]  ;;  %v15635_v36 = vld [vmem:[#allocation10 + $0x1b0] sm:$0xff]   ;;  %v15642_v5 = vld [vmem:[#allocation10 + $0x168] sm:$0xff]   ;;  %5839 = vst [vmem:[#allocation3 + $0xa0] sm:$0xf] %v13411_v58  ;;  %v5559_v40 = vmax.f32 %v5517_v20, 0.0  ;;  %8045 = vmatmul.mubr.bf16.vlgmr.msra.gmra.mxu1 %v15619_v46  ;;  %14482 = vmatprep.subr.bf16.mxu0 %v15632_v25  ;;  %v14270_v46 = vpop.f32.mrf.mxu0  ;;  %v14334_v3 = vpop.f32.mrf.mxu1 }
 0x3f7   :  { %v5656_v12 = vld [vmem:[#allocation2 + $0x21] sm:$0xff]  ;;  %v13380_v29 = vpack.c.bf16 %v5608_v0, %v5608_v0  ;;  %6124 = vst [vmem:[#allocation3 + $0x28] sm:$0xf] %v13456_v1  ;;  %9115 = vst [vmem:[#allocation3 + $0x14c] sm:$0xf] %v13646_v38  ;;  %14545 = vmatpush3.bf16.msra.mxu1 %v17317_v54  ;;  %v17339_v51 = vld [vmem:[#allocation2 + $0x16] sm:$0xff] }
 0x3f8   :  { %v5704_v53 = vld [vmem:[#allocation2 + $0x22] sm:$0xff]  ;;  %v13388_v39 = vpack.c.bf16 %v5656_v12, %v5656_v12  ;;  %v17334_v4 = vadd.f32 %v14217_v8, %v5250_v30  ;;  %v5575_v14 = vsel %vm16341_vm7, %v5559_v40, 0.0  ;;  %14546 = vmatprep.subr.bf16.mxu1 %v15634_v59  ;;  %v5705_v56 = vld [vmem:[#allocation2 + $0x2a] sm:$0xff]  ;;  %v5560_v8 = vmax.f32 %v5522_v45, 0.0  ;;  %v18378_v27 = vld [vmem:[#allocation40_spill] sm:$0xff] }
 0x3f9   :  { %v5752_v49 = vld [vmem:[#allocation2 + $0x23] sm:$0xff]  ;;  %v13396_v32 = vpack.c.bf16 %v5704_v53, %v5704_v53  ;;  %5648 = vst [vmem:[#allocation3 + $0xc0] sm:$0xf] %v13380_v29  ;;  %v13647_v25 = vpack.c.bf16 %v5575_v14, %v5575_v14  ;;  %5585 = vst [vmem:[#allocation2 + $0x3d] sm:$0xff] %v5575_v14  ;;  %v5753_v1 = vld [vmem:[#allocation2 + $0x2b] sm:$0xff]  ;;  %v5428_v59 = vadd.f32 %v14269_v34, %v17279_v52  ;;  %14483 = vmatpush3.bf16.msra.mxu0 %v15633_v2  ;;  %v14271_v29 = vpop.f32.mrf.mxu0 }
 0x3fa   :  { %v15644_v23 = vld [vmem:[#allocation10 + $0x1e8] sm:$0xff]   ;;  %v18375_v11 = vld [vmem:[#allocation41_spill] sm:$0xff]  ;;  %v13404_v13 = vpack.c.bf16 %v5752_v49, %v5752_v49  ;;  %5696 = vst [vmem:[#allocation3 + $0xc4] sm:$0xf] %v13388_v39  ;;  %v13397_v31 = vpack.c.bf16 %v5705_v56, %v5705_v56  ;;  %v13405_v0 = vpack.c.bf16 %v5753_v1, %v5753_v1  ;;  %v18377_v38 = vld [vmem:[#allocation39_spill] sm:$0xff]  ;;  %14484 = vmatprep.subr.bf16.mxu0 %v15642_v5  ;;  %v5586_v39 = vsel %vm16357_vm8, %v5560_v8, 0.0 }
 0x3fb   :  { %v18374_v50 = vld [vmem:[#allocation18_spill] sm:$0xff]  ;;  %v5847_v37 = vld [vmem:[#allocation2 + $0x1d] sm:$0xff]  ;;  %5744 = vst [vmem:[#allocation3 + $0xc8] sm:$0xf] %v13396_v32  ;;  %v17351_v55 = vadd.f32 %v18378_v27, %v18377_v38  ;;  %9116 = vst [vmem:[#allocation3 + $0x17c] sm:$0xf] %v13647_v25  ;;  %14547 = vmatpush3.bf16.msra.mxu1 %v15635_v36  ;;  %v13426_v2 = vpack.c.bf16 %v17339_v51, %v17339_v51  ;;  %v5525_v32 = vadd.f32 %v14333_v22, %v5428_v59 }
 0x3fc   :  { %v14156_v42 = vadd.f32 %v18375_v11, %v18374_v50  ;;  %v5609_v48 = vld [vmem:[#allocation2 + $0x28] sm:$0xff]  ;;  %v13419_v54 = vpack.c.bf16 %v5847_v37, %v5847_v37  ;;  %5792 = vst [vmem:[#allocation3 + $0xcc] sm:$0xf] %v13404_v13  ;;  %v15652_v9 = vld [vmem:[#allocation10 + $0x160] sm:$0xff]   ;;  %v14272_v50 = vadd.f32 %v14271_v29, %v14270_v46  ;;  %v14335_v11 = vpop.f32.mrf.mxu1  ;;  %5745 = vst [vmem:[#allocation3 + $0xf8] sm:$0xf] %v13397_v31  ;;  %14548 = vmatprep.subr.bf16.mxu1 %v15644_v23 }
 0x3fd   :  { %v5657_v41 = vld [vmem:[#allocation2 + $0x29] sm:$0xff]  ;;  %v13381_v44 = vpack.c.bf16 %v5609_v48, %v5609_v48  ;;  %v15626_v20 = vld [vmem:[#allocation3 + $0x64] ss:$48 sps:$4 sm:$0xff]   ;;  %5793 = vst [vmem:[#allocation3 + $0xfc] sm:$0xf] %v13405_v0  ;;  %v13736_v13 = vpack.c.bf16 %v5586_v39, %v5586_v39  ;;  %5596 = vst [vmem:[#allocation2 + $0x55] sm:$0xff] %v5586_v39  ;;  %v14336_v37 = vadd.f32 %v14335_v11, %v14334_v3 }
 0x3fe   :  { %v15643_v30 = vld [vmem:[#allocation10 + $0x128] sm:$0xff]   ;;  %v13389_v58 = vpack.c.bf16 %v5657_v41, %v5657_v41  ;;  %v15630_v28 = vld [vmem:[#allocation3 + $0x60] ss:$48 sps:$4 sm:$0xff]   ;;  %5887 = vst [vmem:[#allocation3 + $0xa4] sm:$0xf] %v13419_v54  ;;  %v17347_v53 = vadd.f32 %v14156_v42, %v17209_v63  ;;  %7955 = vmatprep.mubr.bf16.mxu0 %v15626_v20  ;;  %v17365_v34 = vld [vmem:[#allocation10 + $0x158] sm:$0xff]   ;;  %v5433_v23 = vadd.f32 %v14272_v50, %v17281_v7  ;;  %v14337_v48 = vpop.f32.mrf.mxu1 }
 0x3ff   :  { %v15645_v43 = vld [vmem:[#allocation10 + $0x1a8] sm:$0xff]   ;;  %v17344_v12 = vld [vmem:[#allocation10 + $0x1e0] sm:$0xff]   ;;  %5649 = vst [vmem:[#allocation3 + $0xf0] sm:$0xf] %v13381_v44  ;;  %v5610_v36 = vld [vmem:[#allocation2 + $0x30] sm:$0xff]  ;;  %7956 = vmatmul.mubr.bf16.gmra.mxu0 %v15630_v28  ;;  %v5561_v17 = vmax.f32 %v5525_v32, 0.0 }
 0x400   :  { %v15628_v49 = vld [vmem:[#allocation3 + $0x6c] ss:$48 sps:$4 sm:$0xff]   ;;  %v15631_v52 = vld [vmem:[#allocation3 + $0x68] ss:$48 sps:$4 sm:$0xff]   ;;  %5697 = vst [vmem:[#allocation3 + $0xf4] sm:$0xf] %v13389_v58  ;;  %v13382_v51 = vpack.c.bf16 %v5610_v36, %v5610_v36  ;;  %14485 = vmatpush3.bf16.msra.mxu0 %v15643_v30  ;;  %14549 = vmatpush3.bf16.msra.mxu1 %v15645_v43  ;;  %v5530_v20 = vadd.f32 %v14336_v37, %v5433_v23  ;;  %v14338_v31 = vpop.f32.mrf.mxu1 }
 0x401   :  { %v18379_v40 = vld [vmem:[#allocation42_spill] sm:$0xff]  ;;  %v5658_v42 = vld [vmem:[#allocation2 + $0x31] sm:$0xff]  ;;  %v17361_v60 = vld [vmem:[#allocation10 + $0x120] sm:$0xff]   ;;  %8052 = vmatprep.mubr.bf16.mxu1 %v15628_v49  ;;  %5934 = vst [vmem:[#allocation3 + $0x78] sm:$0xf] %v13426_v2  ;;  %14486 = vmatprep.subr.bf16.mxu0 %v15652_v9  ;;  %v5587_v3 = vsel %vm16363_vm9, %v5561_v17, 0.0  ;;  %v14339_v29 = vadd.f32 %v14338_v31, %v14337_v48 }
 0x402   :  { %v17357_v33 = vadd.f32 %v17215_v6, %v18379_v40  ;;  %v5706_v5 = vld [vmem:[#allocation2 + $0x32] sm:$0xff]  ;;  %v14273_v6 = vpop.f32.mrf.mxu0  ;;  %v17363_v45 = vld [vmem:[#allocation10 + $0x1a0] sm:$0xff]   ;;  %8053 = vmatmul.mubr.bf16.gmra.mxu1 %v15631_v52  ;;  %v13390_v41 = vpack.c.bf16 %v5658_v42, %v5658_v42  ;;  %9677 = vst [vmem:[#allocation3 + $0x1ac] sm:$0xf] %v13736_v13  ;;  %5650 = vst [vmem:[#allocation3 + $0x120] sm:$0xf] %v13382_v51  ;;  %14550 = vmatprep.subr.bf16.mxu1 %v17344_v12  ;;  %v14340_v36 = vpop.f32.mrf.mxu1 }
 0x403   :  { %v5754_v14 = vld [vmem:[#allocation2 + $0x33] sm:$0xff]  ;;  %v13398_v56 = vpack.c.bf16 %v5706_v5, %v5706_v5  ;;  %v5895_v25 = vld [vmem:[#allocation2 + $0x1e] sm:$0xff]  ;;  %v13737_v27 = vpack.c.bf16 %v5587_v3, %v5587_v3  ;;  %5597 = vst [vmem:[#allocation2 + $0x5d] sm:$0xff] %v5587_v3  ;;  %v5562_v11 = vmax.f32 %v5530_v20, 0.0  ;;  %v17408_v3 = vld [vmem:[#allocation10 + $0x148] sm:$0xff]  }
 0x404   :  { %v17368_v54 = vld [vmem:[#allocation10 + $0x1d8] sm:$0xff]   ;;  %v14274_v44 = vpop.f32.mrf.mxu0  ;;  %v13406_v58 = vpack.c.bf16 %v5754_v14, %v5754_v14  ;;  %v13427_v1 = vpack.c.bf16 %v5895_v25, %v5895_v25  ;;  %v17370_v59 = vld [vmem:[#allocation2 + $0x24] sm:$0xff]  ;;  %v17372_v7 = vld [vmem:[#allocation2 + $0x2c] sm:$0xff]  ;;  %5698 = vst [vmem:[#allocation3 + $0x124] sm:$0xf] %v13390_v41  ;;  %14487 = vmatpush3.bf16.msra.mxu0 %v17361_v60  ;;  %14551 = vmatpush3.bf16.msra.mxu1 %v17363_v45 }
 0x405   :  { %v5942_v22 = vld [vmem:[#allocation2 + $0x17] sm:$0xff]  ;;  %v5943_v46 = vld [vmem:[#allocation2 + $0x1f] sm:$0xff]  ;;  %v14275_v28 = vadd.f32 %v14274_v44, %v14273_v6  ;;  %5746 = vst [vmem:[#allocation3 + $0x128] sm:$0xf] %v13398_v56  ;;  %9678 = vst [vmem:[#allocation3 + $0x1dc] sm:$0xf] %v13737_v27  ;;  %14488 = vmatprep.subr.bf16.mxu0 %v17365_v34  ;;  %v13413_v60 = vpack.c.bf16 %v17372_v7, %v17372_v7  ;;  %14552 = vmatprep.subr.bf16.mxu1 %v17368_v54 }
 0x406   :  { %v13434_v8 = vpack.c.bf16 %v5942_v22, %v5942_v22  ;;  %v5611_v0 = vld [vmem:[#allocation2 + $0x38] sm:$0xff]  ;;  %v13435_v9 = vpack.c.bf16 %v5943_v46, %v5943_v46  ;;  %v14276_v49 = vpop.f32.mrf.mxu0  ;;  %5794 = vst [vmem:[#allocation3 + $0x12c] sm:$0xf] %v13406_v58  ;;  %v17381_v50 = vld [vmem:[#allocation10 + $0x150] sm:$0xff]   ;;  %5935 = vst [vmem:[#allocation3 + $0xa8] sm:$0xf] %v13427_v1  ;;  %v14341_v46 = vpop.f32.mrf.mxu1 }
 0x407   :  { %v5659_v38 = vld [vmem:[#allocation2 + $0x39] sm:$0xff]  ;;  %v13383_v52 = vpack.c.bf16 %v5611_v0, %v5611_v0  ;;  %v5436_v12 = vadd.f32 %v14275_v28, %v17285_v15  ;;  %v15636_v42 = vld [vmem:[#allocation3 + $0xc4] ss:$48 sps:$4 sm:$0xff]   ;;  %v13412_v15 = vpack.c.bf16 %v17370_v59, %v17370_v59  ;;  %v5588_v56 = vsel %vm16384_vm10, %v5562_v11, 0.0  ;;  %5841 = vst [vmem:[#allocation3 + $0x100] sm:$0xf] %v13413_v60 }
 0x408   :  { %v17377_v43 = vld [vmem:[#allocation10 + $0x118] sm:$0xff]   ;;  %v13391_v2 = vpack.c.bf16 %v5659_v38, %v5659_v38  ;;  %5982 = vst [vmem:[#allocation3 + $0x7c] sm:$0xf] %v13434_v8  ;;  %v15640_v5 = vld [vmem:[#allocation3 + $0xc0] ss:$48 sps:$4 sm:$0xff]   ;;  %v14277_v17 = vpop.f32.mrf.mxu0  ;;  %7963 = vmatprep.mubr.bf16.mxu0 %v15636_v42  ;;  %v13738_v1 = vpack.c.bf16 %v5588_v56, %v5588_v56  ;;  %5598 = vst [vmem:[#allocation2 + $0x65] sm:$0xff] %v5588_v56  ;;  %v14343_v54 = vpop.f32.mrf.mxu1 }
 0x409   :  { %v5707_v40 = vld [vmem:[#allocation2 + $0x3a] sm:$0xff]  ;;  %v17385_v6 = vld [vmem:[#allocation10 + $0x1d0] sm:$0xff]   ;;  %5983 = vst [vmem:[#allocation3 + $0xac] sm:$0xf] %v13435_v9  ;;  %5651 = vst [vmem:[#allocation3 + $0x150] sm:$0xf] %v13383_v52  ;;  %v5533_v25 = vadd.f32 %v14339_v29, %v5436_v12  ;;  %v14278_v22 = vadd.f32 %v14277_v17, %v14276_v49  ;;  %7964 = vmatmul.mubr.bf16.gmra.mxu0 %v15640_v5 }
 0x40a   :  { %v5755_v39 = vld [vmem:[#allocation2 + $0x3b] sm:$0xff]  ;;  %v13399_v13 = vpack.c.bf16 %v5707_v40, %v5707_v40  ;;  %v18382_v51 = vld [vmem:[#allocation43_spill] sm:$0xff]  ;;  %5699 = vst [vmem:[#allocation3 + $0x154] sm:$0xf] %v13391_v2  ;;  %5840 = vst [vmem:[#allocation3 + $0xd0] sm:$0xf] %v13412_v15  ;;  %14489 = vmatpush3.bf16.msra.mxu0 %v17377_v43  ;;  %v14344_v42 = vpop.f32.mrf.mxu1 }
 0x40b   :  { %v17379_v32 = vld [vmem:[#allocation10 + $0x198] sm:$0xff]   ;;  %v13407_v37 = vpack.c.bf16 %v5755_v39, %v5755_v39  ;;  %v17389_v14 = vadd.f32 %v17218_v62, %v18382_v51  ;;  %v17399_v62 = vadd.f32 %v17357_v33, %v17209_v63  ;;  %v6132_v45 = vld [vmem:[#allocation2 + $0x50] sm:$0xff]  ;;  %v14342_v63 = vadd.f32 %v14341_v46, %v14340_v36  ;;  %v14279_v33 = vpop.f32.mrf.mxu0  ;;  %v17412_v38 = vld [vmem:[#allocation10 + $0x1c8] sm:$0xff]   ;;  %9679 = vst [vmem:[#allocation3 + $0x20c] sm:$0xf] %v13738_v1 }
 0x40c   :  { %v15638_v23 = vld [vmem:[#allocation3 + $0xcc] ss:$48 sps:$4 sm:$0xff]   ;;  %v15641_v48 = vld [vmem:[#allocation3 + $0xc8] ss:$48 sps:$4 sm:$0xff]   ;;  %5747 = vst [vmem:[#allocation3 + $0x158] sm:$0xf] %v13399_v13  ;;  %v13464_v8 = vpack.c.bf16 %v6132_v45, %v6132_v45  ;;  %v5441_v28 = vadd.f32 %v14278_v22, %v17322_v61  ;;  %14553 = vmatpush3.bf16.msra.mxu1 %v17379_v32  ;;  %14490 = vmatprep.subr.bf16.mxu0 %v17381_v50  ;;  %v14346_v46 = vpop.f32.mrf.mxu1 }
 0x40d   :  { %5795 = vst [vmem:[#allocation3 + $0x15c] sm:$0xf] %v13407_v37  ;;  %v6180_v34 = vld [vmem:[#allocation2 + $0x51] sm:$0xff]  ;;  %8060 = vmatprep.mubr.bf16.mxu1 %v15638_v23  ;;  %v5563_v20 = vmax.f32 %v5533_v25, 0.0  ;;  %v5848_v9 = vld [vmem:[#allocation2 + $0x25] sm:$0xff]  ;;  %v14280_v49 = vpop.f32.mrf.mxu0  ;;  %v6181_v13 = vld [vmem:[#allocation2 + $0x59] sm:$0xff]  ;;  %14554 = vmatprep.subr.bf16.mxu1 %v17385_v6  ;;  %v14345_v51 = vadd.f32 %v14344_v42, %v14343_v54 }
 0x40e   :  { %v6228_v44 = vld [vmem:[#allocation2 + $0x52] sm:$0xff]  ;;  %8061 = vmatmul.mubr.bf16.gmra.mxu1 %v15641_v48  ;;  %v13472_v31 = vpack.c.bf16 %v6180_v34, %v6180_v34  ;;  %v5896_v29 = vld [vmem:[#allocation2 + $0x26] sm:$0xff]  ;;  %6172 = vst [vmem:[#allocation3 + $0x180] sm:$0xf] %v13464_v8  ;;  %v13420_v61 = vpack.c.bf16 %v5848_v9, %v5848_v9  ;;  %v5538_v12 = vadd.f32 %v14342_v63, %v5441_v28  ;;  %v6229_v15 = vld [vmem:[#allocation2 + $0x5a] sm:$0xff] }
 0x40f   :  { %v17404_v58 = vld [vmem:[#allocation10 + $0x110] sm:$0xff]   ;;  %v13480_v0 = vpack.c.bf16 %v6228_v44, %v6228_v44  ;;  %v17418_v39 = vld [vmem:[#allocation2 + $0x27] sm:$0xff]  ;;  %v5589_v11 = vsel %vm16397_vm11, %v5563_v20, 0.0  ;;  %v14281_v36 = vadd.f32 %v14280_v49, %v14279_v33  ;;  %v6133_v5 = vld [vmem:[#allocation2 + $0x58] sm:$0xff]  ;;  %v13428_v50 = vpack.c.bf16 %v5896_v29, %v5896_v29  ;;  %v14282_v17 = vpop.f32.mrf.mxu0 }
 0x410   :  { %v6276_v59 = vld [vmem:[#allocation2 + $0x53] sm:$0xff]  ;;  %6220 = vst [vmem:[#allocation3 + $0x184] sm:$0xf] %v13472_v31  ;;  %v17423_v32 = vld [vmem:[#allocation10 + $0x108] sm:$0xff]   ;;  %v13739_v37 = vpack.c.bf16 %v5589_v11, %v5589_v11  ;;  %5599 = vst [vmem:[#allocation2 + $0x6d] sm:$0xff] %v5589_v11  ;;  %v13465_v23 = vpack.c.bf16 %v6133_v5, %v6133_v5  ;;  %v13473_v48 = vpack.c.bf16 %v6181_v13, %v6181_v13  ;;  %v5564_v22 = vmax.f32 %v5538_v12, 0.0 }
 0x411   :  { %v17406_v7 = vld [vmem:[#allocation10 + $0x190] sm:$0xff]   ;;  %v13488_v52 = vpack.c.bf16 %v6276_v59, %v6276_v59  ;;  %6268 = vst [vmem:[#allocation3 + $0x188] sm:$0xf] %v13480_v0  ;;  %v6277_v60 = vld [vmem:[#allocation2 + $0x5b] sm:$0xff]  ;;  %v17425_v56 = vld [vmem:[#allocation10 + $0x188] sm:$0xff]   ;;  %v5444_v6 = vadd.f32 %v14281_v36, %v17334_v4  ;;  %v13481_v44 = vpack.c.bf16 %v6229_v15, %v6229_v15  ;;  %14491 = vmatpush3.bf16.msra.mxu0 %v17404_v58  ;;  %v14283_v8 = vpop.f32.mrf.mxu0  ;;  %v14347_v0 = vpop.f32.mrf.mxu1 }
 0x412   :  { %v5849_v27 = vld [vmem:[#allocation2 + $0x2d] sm:$0xff]  ;;  %v17427_v25 = vld [vmem:[#allocation10 + $0x140] sm:$0xff]   ;;  %5888 = vst [vmem:[#allocation3 + $0xd4] sm:$0xf] %v13420_v61  ;;  %v13489_v1 = vpack.c.bf16 %v6277_v60, %v6277_v60  ;;  %5936 = vst [vmem:[#allocation3 + $0xd8] sm:$0xf] %v13428_v50  ;;  %v5352_v33 = vadd.f32 %v17351_v55, %v17347_v53  ;;  %14555 = vmatpush3.bf16.msra.mxu1 %v17406_v7  ;;  %14492 = vmatprep.subr.bf16.mxu0 %v17408_v3 }
 0x413   :  { %v13421_v2 = vpack.c.bf16 %v5849_v27, %v5849_v27  ;;  %v17416_v40 = vld [vmem:[#allocation2 + $0x2e] sm:$0xff]  ;;  %6316 = vst [vmem:[#allocation3 + $0x18c] sm:$0xf] %v13488_v52  ;;  %v17431_v63 = vld [vmem:[#allocation10 + $0x1c0] sm:$0xff]   ;;  %9680 = vst [vmem:[#allocation3 + $0x23c] sm:$0xf] %v13739_v37  ;;  %v13436_v58 = vpack.c.bf16 %v17418_v39, %v17418_v39  ;;  %v17443_v28 = vadd.f32 %v17389_v14, %v17399_v62  ;;  %14556 = vmatprep.subr.bf16.mxu1 %v17412_v38  ;;  %v14285_v14 = vpop.f32.mrf.mxu0  ;;  %v14349_v11 = vpop.f32.mrf.mxu1 }
 0x414   :  { %v15646_v45 = vld [vmem:[#allocation3 + $0x124] ss:$48 sps:$4 sm:$0xff]   ;;  %v15650_v34 = vld [vmem:[#allocation3 + $0x120] ss:$48 sps:$4 sm:$0xff]   ;;  %v15648_v59 = vld [vmem:[#allocation3 + $0x12c] ss:$48 sps:$4 sm:$0xff]   ;;  %v13429_v4 = vpack.c.bf16 %v17416_v40, %v17416_v40  ;;  %v5541_v54 = vadd.f32 %v14345_v51, %v5444_v6  ;;  %v14284_v31 = vadd.f32 %v14283_v8, %v14282_v17  ;;  %v14348_v49 = vadd.f32 %v14347_v0, %v14346_v46 }
 0x415   :  { %5889 = vst [vmem:[#allocation3 + $0x104] sm:$0xf] %v13421_v2  ;;  %v15651_v20 = vld [vmem:[#allocation3 + $0x128] ss:$48 sps:$4 sm:$0xff]   ;;  %6173 = vst [vmem:[#allocation3 + $0x1b0] sm:$0xf] %v13465_v23  ;;  %7971 = vmatprep.mubr.bf16.mxu0 %v15646_v45  ;;  %8068 = vmatprep.mubr.bf16.mxu1 %v15648_v59  ;;  %v14286_v13 = vpop.f32.mrf.mxu0 }
 0x416   :  { %6221 = vst [vmem:[#allocation3 + $0x1b4] sm:$0xf] %v13473_v48  ;;  %v5590_v55 = vsel %vm16408_vm12, %v5564_v22, 0.0  ;;  %6269 = vst [vmem:[#allocation3 + $0x1b8] sm:$0xf] %v13481_v44  ;;  %v6134_v7 = vld [vmem:[#allocation2 + $0x60] sm:$0xff]  ;;  %7972 = vmatmul.mubr.bf16.gmra.mxu0 %v15650_v34  ;;  %v5449_v39 = vadd.f32 %v14284_v31, %v5352_v33  ;;  %8069 = vmatmul.mubr.bf16.gmra.mxu1 %v15651_v20  ;;  %v14287_v60 = vadd.f32 %v14286_v13, %v14285_v14  ;;  %v14350_v22 = vpop.f32.mrf.mxu1 }
 0x417   :  { %6317 = vst [vmem:[#allocation3 + $0x1bc] sm:$0xf] %v13489_v1  ;;  %v6182_v3 = vld [vmem:[#allocation2 + $0x61] sm:$0xff]  ;;  %v13740_v29 = vpack.c.bf16 %v5590_v55, %v5590_v55  ;;  %5600 = vst [vmem:[#allocation2 + $0x75] sm:$0xff] %v5590_v55  ;;  %v13466_v62 = vpack.c.bf16 %v6134_v7, %v6134_v7  ;;  %v15702_v2 = vld [vmem:[#allocation10 + $0x278] sm:$0xff]   ;;  %v5565_v40 = vmax.f32 %v5541_v54, 0.0  ;;  %14493 = vmatpush3.bf16.msra.mxu0 %v17423_v32  ;;  %14557 = vmatpush3.bf16.msra.mxu1 %v17425_v56 }
 0x418   :  { %v6230_v9 = vld [vmem:[#allocation2 + $0x62] sm:$0xff]  ;;  %5937 = vst [vmem:[#allocation3 + $0x108] sm:$0xf] %v13429_v4  ;;  %5984 = vst [vmem:[#allocation3 + $0xdc] sm:$0xf] %v13436_v58  ;;  %v13474_v12 = vpack.c.bf16 %v6182_v3, %v6182_v3  ;;  %v17449_v38 = vld [vmem:[#allocation10 + $0x2b8] sm:$0xff]   ;;  %14494 = vmatprep.subr.bf16.mxu0 %v17427_v25  ;;  %v5546_v32 = vadd.f32 %v14348_v49, %v5449_v39  ;;  %14558 = vmatprep.subr.bf16.mxu1 %v17431_v63 }
 0x419   :  { %v15693_v27 = vld [vmem:[#allocation10 + $0x100] sm:$0xff]   ;;  %v13482_v36 = vpack.c.bf16 %v6230_v9, %v6230_v9  ;;  %v5945_v42 = vld [vmem:[#allocation2 + $0x2f] sm:$0xff]  ;;  %9681 = vst [vmem:[#allocation3 + $0x26c] sm:$0xf] %v13740_v29  ;;  %6174 = vst [vmem:[#allocation3 + $0x1e0] sm:$0xf] %v13466_v62  ;;  %v14351_v25 = vadd.f32 %v14350_v22, %v14349_v11  ;;  %v5452_v59 = vadd.f32 %v14287_v60, %v17443_v28 }
 0x41a   :  { %v6278_v52 = vld [vmem:[#allocation2 + $0x63] sm:$0xff]  ;;  %v5802_v5 = vld [vmem:[#allocation2 + $0x34] sm:$0xff]  ;;  %v13437_v37 = vpack.c.bf16 %v5945_v42, %v5945_v42  ;;  %v5591_v15 = vsel %vm16414_vm13, %v5565_v40, 0.0  ;;  %6222 = vst [vmem:[#allocation3 + $0x1e4] sm:$0xf] %v13474_v12  ;;  %v6279_v33 = vld [vmem:[#allocation2 + $0x6b] sm:$0xff] }
 0x41b   :  { %v15701_v61 = vld [vmem:[#allocation10 + $0x180] sm:$0xff]   ;;  %v13490_v50 = vpack.c.bf16 %v6278_v52, %v6278_v52  ;;  %v13414_v17 = vpack.c.bf16 %v5802_v5, %v5802_v5  ;;  %v5850_v23 = vld [vmem:[#allocation2 + $0x35] sm:$0xff]  ;;  %v6135_v6 = vld [vmem:[#allocation2 + $0x68] sm:$0xff]  ;;  %6270 = vst [vmem:[#allocation3 + $0x1e8] sm:$0xf] %v13482_v36  ;;  %v13741_v56 = vpack.c.bf16 %v5591_v15, %v5591_v15  ;;  %v5566_v8 = vmax.f32 %v5546_v32, 0.0  ;;  %14495 = vmatpush3.bf16.msra.mxu0 %v15693_v27 }
 0x41c   :  { %v5803_v51 = vld [vmem:[#allocation2 + $0x3c] sm:$0xff]  ;;  %v6183_v46 = vld [vmem:[#allocation2 + $0x69] sm:$0xff]  ;;  %5601 = vst [vmem:[#allocation2 + $0x7d] sm:$0xff] %v5591_v15  ;;  %v13467_v34 = vpack.c.bf16 %v6135_v6, %v6135_v6  ;;  %5985 = vst [vmem:[#allocation3 + $0x10c] sm:$0xf] %v13437_v37  ;;  %v13491_v55 = vpack.c.bf16 %v6279_v33, %v6279_v33  ;;  %14559 = vmatpush3.bf16.msra.mxu1 %v15701_v61  ;;  %14608 = vmatprep.subr.bf16.mxu0 %v15702_v2 }
 0x41d   :  { %v13415_v45 = vpack.c.bf16 %v5803_v51, %v5803_v51  ;;  %v13475_v44 = vpack.c.bf16 %v6183_v46, %v6183_v46  ;;  %v6231_v1 = vld [vmem:[#allocation2 + $0x6a] sm:$0xff]  ;;  %6318 = vst [vmem:[#allocation3 + $0x1ec] sm:$0xf] %v13490_v50  ;;  %5842 = vst [vmem:[#allocation3 + $0x130] sm:$0xf] %v13414_v17  ;;  %v13422_v31 = vpack.c.bf16 %v5850_v23, %v5850_v23  ;;  %v5592_v7 = vsel %vm16428_vm14, %v5566_v8, 0.0 }
 0x41e   :  { %v15656_v20 = vld [vmem:[#allocation3 + $0x184] ss:$48 sps:$4 sm:$0xff]   ;;  %v15660_v4 = vld [vmem:[#allocation3 + $0x180] ss:$48 sps:$4 sm:$0xff]   ;;  %v13483_v58 = vpack.c.bf16 %v6231_v1, %v6231_v1  ;;  %9682 = vst [vmem:[#allocation3 + $0x29c] sm:$0xf] %v13741_v56  ;;  %v5549_v3 = vadd.f32 %v14351_v25, %v5452_v59  ;;  %15136 = vmatprep.subr.bf16.mxu1 %v17449_v38  ;;  %v13742_v27 = vpack.c.bf16 %v5592_v7, %v5592_v7 }
 0x41f   :  { %5843 = vst [vmem:[#allocation3 + $0x160] sm:$0xf] %v13415_v45  ;;  %v15658_v63 = vld [vmem:[#allocation3 + $0x18c] ss:$48 sps:$4 sm:$0xff]   ;;  %v15661_v54 = vld [vmem:[#allocation3 + $0x188] ss:$48 sps:$4 sm:$0xff]   ;;  %7979 = vmatprep.mubr.bf16.mxu0 %v15656_v20 }
 0x420   :  { %6175 = vst [vmem:[#allocation3 + $0x210] sm:$0xf] %v13467_v34  ;;  %6223 = vst [vmem:[#allocation3 + $0x214] sm:$0xf] %v13475_v44  ;;  %v6136_v28 = vld [vmem:[#allocation2 + $0x70] sm:$0xff]  ;;  %8076 = vmatprep.mubr.bf16.mxu1 %v15658_v63  ;;  %7980 = vmatmul.mubr.bf16.gmra.mxu0 %v15660_v4  ;;  %v5567_v52 = vmax.f32 %v5549_v3, 0.0 }
 0x421   :  { %6271 = vst [vmem:[#allocation3 + $0x218] sm:$0xf] %v13483_v58  ;;  %6319 = vst [vmem:[#allocation3 + $0x21c] sm:$0xf] %v13491_v55  ;;  %v6184_v9 = vld [vmem:[#allocation2 + $0x71] sm:$0xff]  ;;  %v13468_v49 = vpack.c.bf16 %v6136_v28, %v6136_v28  ;;  %8077 = vmatmul.mubr.bf16.gmra.mxu1 %v15661_v54  ;;  %v5851_v40 = vld [vmem:[#allocation2 + $0x3d] sm:$0xff] }
 0x422   :  { %v6232_v29 = vld [vmem:[#allocation2 + $0x72] sm:$0xff]  ;;  %5602 = vst [vmem:[#allocation2 + $0x85] sm:$0xff] %v5592_v7  ;;  %v13476_v14 = vpack.c.bf16 %v6184_v9, %v6184_v9  ;;  %5890 = vst [vmem:[#allocation3 + $0x134] sm:$0xf] %v13422_v31  ;;  %v13423_v39 = vpack.c.bf16 %v5851_v40, %v5851_v40  ;;  %v5899_v12 = vld [vmem:[#allocation2 + $0x3e] sm:$0xff]  ;;  %v5593_v42 = vsel %vm16434_vm15, %v5567_v52, 0.0 }
 0x423   :  { %v6280_v62 = vld [vmem:[#allocation2 + $0x73] sm:$0xff]  ;;  %v13484_v61 = vpack.c.bf16 %v6232_v29, %v6232_v29  ;;  %9683 = vst [vmem:[#allocation3 + $0x2cc] sm:$0xf] %v13742_v27  ;;  %6176 = vst [vmem:[#allocation3 + $0x240] sm:$0xf] %v13468_v49  ;;  %v13431_v37 = vpack.c.bf16 %v5899_v12, %v5899_v12  ;;  %v13743_v51 = vpack.c.bf16 %v5593_v42, %v5593_v42  ;;  %v6281_v32 = vld [vmem:[#allocation2 + $0x7b] sm:$0xff] }
 0x424   :  { %v13492_v2 = vpack.c.bf16 %v6280_v62, %v6280_v62  ;;  %6224 = vst [vmem:[#allocation3 + $0x244] sm:$0xf] %v13476_v14  ;;  %v5898_v11 = vld [vmem:[#allocation2 + $0x36] sm:$0xff]  ;;  %5603 = vst [vmem:[#allocation2 + $0x8d] sm:$0xff] %v5593_v42  ;;  %v13493_v46 = vpack.c.bf16 %v6281_v32, %v6281_v32  ;;  %v5947_v58 = vld [vmem:[#allocation2 + $0x3f] sm:$0xff] }
 0x425   :  { %v6137_v5 = vld [vmem:[#allocation2 + $0x78] sm:$0xff]  ;;  %6272 = vst [vmem:[#allocation3 + $0x248] sm:$0xf] %v13484_v61  ;;  %v13430_v50 = vpack.c.bf16 %v5898_v11, %v5898_v11  ;;  %5891 = vst [vmem:[#allocation3 + $0x164] sm:$0xf] %v13423_v39  ;;  %v13439_v3 = vpack.c.bf16 %v5947_v58, %v5947_v58  ;;  %v6423_v58 = vld [vmem:[#allocation2 + $0x6e] sm:$0xff] }
 0x426   :  { %v6185_v13 = vld [vmem:[#allocation2 + $0x79] sm:$0xff]  ;;  %6320 = vst [vmem:[#allocation3 + $0x24c] sm:$0xf] %v13492_v2  ;;  %v13469_v17 = vpack.c.bf16 %v6137_v5, %v6137_v5  ;;  %5939 = vst [vmem:[#allocation3 + $0x168] sm:$0xf] %v13431_v37 }
 0x427   :  { %v13477_v23 = vpack.c.bf16 %v6185_v13, %v6185_v13  ;;  %v6233_v15 = vld [vmem:[#allocation2 + $0x7a] sm:$0xff]  ;;  %v15666_v60 = vld [vmem:[#allocation3 + $0x1e4] ss:$48 sps:$4 sm:$0xff]   ;;  %5938 = vst [vmem:[#allocation3 + $0x138] sm:$0xf] %v13430_v50 }
 0x428   :  { %v15670_v22 = vld [vmem:[#allocation3 + $0x1e0] ss:$48 sps:$4 sm:$0xff]   ;;  %v13485_v6 = vpack.c.bf16 %v6233_v15, %v6233_v15  ;;  %9684 = vst [vmem:[#allocation3 + $0x2fc] sm:$0xf] %v13743_v51  ;;  %v15668_v45 = vld [vmem:[#allocation3 + $0x1ec] ss:$48 sps:$4 sm:$0xff]   ;;  %7987 = vmatprep.mubr.bf16.mxu0 %v15666_v60 }
 0x429   :  { %v15671_v56 = vld [vmem:[#allocation3 + $0x1e8] ss:$48 sps:$4 sm:$0xff]   ;;  %6177 = vst [vmem:[#allocation3 + $0x270] sm:$0xf] %v13469_v17  ;;  %6225 = vst [vmem:[#allocation3 + $0x274] sm:$0xf] %v13477_v23  ;;  %8084 = vmatprep.mubr.bf16.mxu1 %v15668_v45  ;;  %7988 = vmatmul.mubr.bf16.gmra.mxu0 %v15670_v22 }
 0x42a   :  { %6273 = vst [vmem:[#allocation3 + $0x278] sm:$0xf] %v13485_v6  ;;  %6321 = vst [vmem:[#allocation3 + $0x27c] sm:$0xf] %v13493_v46  ;;  %v6138_v25 = vld [vmem:[#allocation2 + $0x80] sm:$0xff]  ;;  %8085 = vmatmul.mubr.bf16.gmra.mxu1 %v15671_v56  ;;  %v5946_v4 = vld [vmem:[#allocation2 + $0x37] sm:$0xff] }
 0x42b   :  { %v6186_v34 = vld [vmem:[#allocation2 + $0x81] sm:$0xff]  ;;  %v13470_v1 = vpack.c.bf16 %v6138_v25, %v6138_v25  ;;  %v13438_v55 = vpack.c.bf16 %v5946_v4, %v5946_v4  ;;  %v6324_v63 = vld [vmem:[#allocation2 + $0x54] sm:$0xff]  ;;  %v6187_v31 = vld [vmem:[#allocation2 + $0x89] sm:$0xff]  ;;  %5987 = vst [vmem:[#allocation3 + $0x16c] sm:$0xf] %v13439_v3 }
 0x42c   :  { %v6234_v44 = vld [vmem:[#allocation2 + $0x82] sm:$0xff]  ;;  %v13478_v33 = vpack.c.bf16 %v6186_v34, %v6186_v34  ;;  %v6235_v7 = vld [vmem:[#allocation2 + $0x8a] sm:$0xff]  ;;  %v13496_v28 = vpack.c.bf16 %v6324_v63, %v6324_v63  ;;  %8539 = vst [vmem:[#allocation2 + $0x50] sm:$0x1f] %v18363_v26  ;;  %v13479_v29 = vpack.c.bf16 %v6187_v31, %v6187_v31  ;;  %v6372_v39 = vld [vmem:[#allocation2 + $0x55] sm:$0xff] }
 0x42d   :  { %v13486_v8 = vpack.c.bf16 %v6234_v44, %v6234_v44  ;;  %v6282_v59 = vld [vmem:[#allocation2 + $0x83] sm:$0xff]  ;;  %6178 = vst [vmem:[#allocation3 + $0x2a0] sm:$0xf] %v13470_v1  ;;  %v13487_v27 = vpack.c.bf16 %v6235_v7, %v6235_v7  ;;  %v6283_v49 = vld [vmem:[#allocation2 + $0x8b] sm:$0xff]  ;;  %5986 = vst [vmem:[#allocation3 + $0x13c] sm:$0xf] %v13438_v55  ;;  %v13504_v42 = vpack.c.bf16 %v6372_v39, %v6372_v39 }
 0x42e   :  { %v13494_v20 = vpack.c.bf16 %v6282_v59, %v6282_v59  ;;  %6226 = vst [vmem:[#allocation3 + $0x2a4] sm:$0xf] %v13478_v33  ;;  %v6139_v54 = vld [vmem:[#allocation2 + $0x88] sm:$0xff]  ;;  %v13495_v52 = vpack.c.bf16 %v6283_v49, %v6283_v49  ;;  %6364 = vst [vmem:[#allocation3 + $0x190] sm:$0xf] %v13496_v28  ;;  %v6325_v40 = vld [vmem:[#allocation2 + $0x5c] sm:$0xff] }
 0x42f   :  { %6274 = vst [vmem:[#allocation3 + $0x2a8] sm:$0xf] %v13486_v8  ;;  %v13471_v9 = vpack.c.bf16 %v6139_v54, %v6139_v54  ;;  %6227 = vst [vmem:[#allocation3 + $0x2d4] sm:$0xf] %v13479_v29  ;;  %v13497_v11 = vpack.c.bf16 %v6325_v40, %v6325_v40  ;;  %v6373_v12 = vld [vmem:[#allocation2 + $0x5d] sm:$0xff]  ;;  %v6327_v22 = vld [vmem:[#allocation2 + $0x6c] sm:$0xff]  ;;  %v13515_v54 = vpack.c.bf16 %v6423_v58, %v6423_v58 }
 0x430   :  { %6322 = vst [vmem:[#allocation3 + $0x2ac] sm:$0xf] %v13494_v20  ;;  %v15676_v14 = vld [vmem:[#allocation3 + $0x244] ss:$48 sps:$4 sm:$0xff]   ;;  %v15680_v62 = vld [vmem:[#allocation3 + $0x240] ss:$48 sps:$4 sm:$0xff]   ;;  %v13505_v50 = vpack.c.bf16 %v6373_v12, %v6373_v12  ;;  %v13499_v46 = vpack.c.bf16 %v6327_v22, %v6327_v22 }
 0x431   :  { %v15678_v61 = vld [vmem:[#allocation3 + $0x24c] ss:$48 sps:$4 sm:$0xff]   ;;  %v15681_v2 = vld [vmem:[#allocation3 + $0x248] ss:$48 sps:$4 sm:$0xff]   ;;  %6179 = vst [vmem:[#allocation3 + $0x2d0] sm:$0xf] %v13471_v9  ;;  %7995 = vmatprep.mubr.bf16.mxu0 %v15676_v14 }
 0x432   :  { %6275 = vst [vmem:[#allocation3 + $0x2d8] sm:$0xf] %v13487_v27  ;;  %6323 = vst [vmem:[#allocation3 + $0x2dc] sm:$0xf] %v13495_v52  ;;  %8092 = vmatprep.mubr.bf16.mxu1 %v15678_v61  ;;  %7996 = vmatmul.mubr.bf16.gmra.mxu0 %v15680_v62  ;;  %v6420_v5 = vld [vmem:[#allocation2 + $0x56] sm:$0xff]  ;;  %v6421_v13 = vld [vmem:[#allocation2 + $0x5e] sm:$0xff] }
 0x433   :  { %8093 = vmatmul.mubr.bf16.gmra.mxu1 %v15681_v2  ;;  %v13512_v37 = vpack.c.bf16 %v6420_v5, %v6420_v5  ;;  %v13513_v51 = vpack.c.bf16 %v6421_v13, %v6421_v13  ;;  %v6468_v17 = vld [vmem:[#allocation2 + $0x57] sm:$0xff]  ;;  %v6469_v23 = vld [vmem:[#allocation2 + $0x5f] sm:$0xff]  ;;  %6365 = vst [vmem:[#allocation3 + $0x1c0] sm:$0xf] %v13497_v11  ;;  %6412 = vst [vmem:[#allocation3 + $0x194] sm:$0xf] %v13504_v42 }
 0x434   :  { %v13520_v15 = vpack.c.bf16 %v6468_v17, %v6468_v17  ;;  %v13521_v32 = vpack.c.bf16 %v6469_v23, %v6469_v23  ;;  %v6326_v60 = vld [vmem:[#allocation2 + $0x64] sm:$0xff]  ;;  %6413 = vst [vmem:[#allocation3 + $0x1c4] sm:$0xf] %v13505_v50  ;;  %v6375_v56 = vld [vmem:[#allocation2 + $0x6d] sm:$0xff]  ;;  %6367 = vst [vmem:[#allocation3 + $0x220] sm:$0xf] %v13499_v46 }
 0x435   :  { %6460 = vst [vmem:[#allocation3 + $0x198] sm:$0xf] %v13512_v37  ;;  %6461 = vst [vmem:[#allocation3 + $0x1c8] sm:$0xf] %v13513_v51  ;;  %v13498_v6 = vpack.c.bf16 %v6326_v60, %v6326_v60  ;;  %v6374_v45 = vld [vmem:[#allocation2 + $0x65] sm:$0xff]  ;;  %v13507_v34 = vpack.c.bf16 %v6375_v56, %v6375_v56  ;;  %v6471_v31 = vld [vmem:[#allocation2 + $0x6f] sm:$0xff] }
 0x436   :  { %6508 = vst [vmem:[#allocation3 + $0x19c] sm:$0xf] %v13520_v15  ;;  %6509 = vst [vmem:[#allocation3 + $0x1cc] sm:$0xf] %v13521_v32  ;;  %v13506_v25 = vpack.c.bf16 %v6374_v45, %v6374_v45  ;;  %v15686_v44 = vld [vmem:[#allocation3 + $0x2a4] ss:$48 sps:$4 sm:$0xff]   ;;  %v13523_v9 = vpack.c.bf16 %v6471_v31, %v6471_v31 }
 0x437   :  { %v15696_v33 = vld [vmem:[#allocation3 + $0x14] ss:$48 sps:$4 sm:$0xff]   ;;  %6366 = vst [vmem:[#allocation3 + $0x1f0] sm:$0xf] %v13498_v6  ;;  %v15699_v20 = vld [vmem:[#allocation3 + $0x1c] ss:$48 sps:$4 sm:$0xff]   ;;  %8003 = vmatprep.mubr.bf16.mxu0 %v15686_v44 }
 0x438   :  { %v15690_v1 = vld [vmem:[#allocation3 + $0x2a0] ss:$48 sps:$4 sm:$0xff]   ;;  %6414 = vst [vmem:[#allocation3 + $0x1f4] sm:$0xf] %v13506_v25  ;;  %6415 = vst [vmem:[#allocation3 + $0x224] sm:$0xf] %v13507_v34 }
 0x439   :  { %v15688_v8 = vld [vmem:[#allocation3 + $0x2ac] ss:$48 sps:$4 sm:$0xff]   ;;  %v15691_v59 = vld [vmem:[#allocation3 + $0x2a8] ss:$48 sps:$4 sm:$0xff]   ;;  %6463 = vst [vmem:[#allocation3 + $0x228] sm:$0xf] %v13515_v54 }
 0x43a   :  { %v6422_v4 = vld [vmem:[#allocation2 + $0x66] sm:$0xff]  ;;  %8100 = vmatprep.mubr.bf16.mxu1 %v15688_v8  ;;  %8004 = vmatmul.mubr.bf16.gmra.mxu0 %v15690_v1  ;;  %v6328_v3 = vld [vmem:[#allocation2 + $0x74] sm:$0xff]  ;;  %v6329_v28 = vld [vmem:[#allocation2 + $0x7c] sm:$0xff]  ;;  %6511 = vst [vmem:[#allocation3 + $0x22c] sm:$0xf] %v13523_v9 }
 0x43b   :  { %v6470_v55 = vld [vmem:[#allocation2 + $0x67] sm:$0xff]  ;;  %v13514_v63 = vpack.c.bf16 %v6422_v4, %v6422_v4  ;;  %8101 = vmatmul.mubr.bf16.gmra.mxu1 %v15691_v59  ;;  %8141 = vmatprep.mubr.bf16.mxu0 %v15696_v33  ;;  %v13500_v29 = vpack.c.bf16 %v6328_v3, %v6328_v3  ;;  %v13501_v27 = vpack.c.bf16 %v6329_v28, %v6329_v28  ;;  %v6376_v49 = vld [vmem:[#allocation2 + $0x75] sm:$0xff]  ;;  %v6377_v14 = vld [vmem:[#allocation2 + $0x7d] sm:$0xff] }
 0x43c   :  { %v13522_v7 = vpack.c.bf16 %v6470_v55, %v6470_v55  ;;  %8238 = vmatprep.mubr.bf16.mxu1 %v15699_v20  ;;  %v13508_v62 = vpack.c.bf16 %v6376_v49, %v6376_v49  ;;  %v13509_v52 = vpack.c.bf16 %v6377_v14, %v6377_v14  ;;  %v15694_v61 = vld [vmem:[#allocation3 + $0x10] ss:$48 sps:$4 sm:$0xff]   ;;  %v15707_v2 = vld [vmem:[#allocation10 + $0x238] sm:$0xff]   ;;  %v15703_v12 = vld [vmem:[#allocation3 + $0x74] ss:$48 sps:$4 sm:$0xff]  }
 0x43d   :  { %6462 = vst [vmem:[#allocation3 + $0x1f8] sm:$0xf] %v13514_v63  ;;  %6368 = vst [vmem:[#allocation3 + $0x250] sm:$0xf] %v13500_v29  ;;  %v6424_v40 = vld [vmem:[#allocation2 + $0x76] sm:$0xff]  ;;  %v6425_v39 = vld [vmem:[#allocation2 + $0x7e] sm:$0xff] }
 0x43e   :  { %6510 = vst [vmem:[#allocation3 + $0x1fc] sm:$0xf] %v13522_v7  ;;  %6369 = vst [vmem:[#allocation3 + $0x280] sm:$0xf] %v13501_v27  ;;  %v15697_v11 = vld [vmem:[#allocation3 + $0x18] ss:$48 sps:$4 sm:$0xff]   ;;  %v13516_v5 = vpack.c.bf16 %v6424_v40, %v6424_v40  ;;  %v13517_v13 = vpack.c.bf16 %v6425_v39, %v6425_v39 }
 0x43f   :  { %6416 = vst [vmem:[#allocation3 + $0x254] sm:$0xf] %v13508_v62  ;;  %6417 = vst [vmem:[#allocation3 + $0x284] sm:$0xf] %v13509_v52  ;;  %v15711_v42 = vld [vmem:[#allocation10 + $0x270] sm:$0xff]   ;;  %v6473_v17 = vld [vmem:[#allocation2 + $0x7f] sm:$0xff] }
 0x440   :  { %v15705_v50 = vld [vmem:[#allocation3 + $0x7c] ss:$48 sps:$4 sm:$0xff]   ;;  %v15717_v37 = vld [vmem:[#allocation10 + $0x2b0] sm:$0xff]   ;;  %6464 = vst [vmem:[#allocation3 + $0x258] sm:$0xf] %v13516_v5  ;;  %v13525_v15 = vpack.c.bf16 %v6473_v17, %v6473_v17  ;;  %v6330_v32 = vld [vmem:[#allocation2 + $0x84] sm:$0xff] }
 0x441   :  { %v6472_v51 = vld [vmem:[#allocation2 + $0x77] sm:$0xff]  ;;  %6465 = vst [vmem:[#allocation3 + $0x288] sm:$0xf] %v13517_v13  ;;  %v6331_v60 = vld [vmem:[#allocation2 + $0x8c] sm:$0xff]  ;;  %v13502_v6 = vpack.c.bf16 %v6330_v32, %v6330_v32  ;;  %v15729_v9 = vld [vmem:[#allocation10 + $0x260] sm:$0xff]  }
 0x442   :  { %v13524_v23 = vpack.c.bf16 %v6472_v51, %v6472_v51  ;;  %v6378_v22 = vld [vmem:[#allocation2 + $0x85] sm:$0xff]  ;;  %8142 = vmatmul.mubr.bf16.vlgmr.msra.gmra.mxu0 %v15694_v61  ;;  %v13503_v46 = vpack.c.bf16 %v6331_v60, %v6331_v60  ;;  %v6379_v45 = vld [vmem:[#allocation2 + $0x8d] sm:$0xff]  ;;  %6513 = vst [vmem:[#allocation3 + $0x28c] sm:$0xf] %v13525_v15  ;;  %v6086_v52 = vld [vmem:[#allocation2 + $0x1a] sm:$0xff] }
 0x443   :  { %v13510_v56 = vpack.c.bf16 %v6378_v22, %v6378_v22  ;;  %v6426_v25 = vld [vmem:[#allocation2 + $0x86] sm:$0xff]  ;;  %v6427_v34 = vld [vmem:[#allocation2 + $0x8e] sm:$0xff]  ;;  %8239 = vmatmul.mubr.bf16.vlgmr.msra.gmra.mxu1 %v15697_v11  ;;  %8149 = vmatprep.mubr.bf16.mxu0 %v15703_v12  ;;  %v13511_v44 = vpack.c.bf16 %v6379_v45, %v6379_v45  ;;  %6370 = vst [vmem:[#allocation3 + $0x2b0] sm:$0xf] %v13502_v6  ;;  %v5990_v39 = vld [vmem:[#allocation2 + $0x18] sm:$0xff] }
 0x444   :  { %6512 = vst [vmem:[#allocation3 + $0x25c] sm:$0xf] %v13524_v23  ;;  %v13518_v1 = vpack.c.bf16 %v6426_v25, %v6426_v25  ;;  %v13519_v33 = vpack.c.bf16 %v6427_v34, %v6427_v34  ;;  %v6474_v8 = vld [vmem:[#allocation2 + $0x87] sm:$0xff]  ;;  %v6475_v59 = vld [vmem:[#allocation2 + $0x8f] sm:$0xff]  ;;  %8246 = vmatprep.mubr.bf16.mxu1 %v15705_v50  ;;  %14609 = vmatpush3.bf16.msra.mxu0 %v15707_v2  ;;  %6371 = vst [vmem:[#allocation3 + $0x2e0] sm:$0xf] %v13503_v46 }
 0x445   :  { %v15716_v20 = vld [vmem:[#allocation10 + $0x230] sm:$0xff]   ;;  %v15720_v4 = vld [vmem:[#allocation10 + $0x268] sm:$0xff]   ;;  %6418 = vst [vmem:[#allocation3 + $0x2b4] sm:$0xf] %v13510_v56  ;;  %v13526_v58 = vpack.c.bf16 %v6474_v8, %v6474_v8  ;;  %v13527_v55 = vpack.c.bf16 %v6475_v59, %v6475_v59  ;;  %15137 = vmatpush3.bf16.msra.mxu1 %v17449_v38  ;;  %14610 = vmatprep.subr.bf16.mxu0 %v15711_v42  ;;  %6419 = vst [vmem:[#allocation3 + $0x2e4] sm:$0xf] %v13511_v44 }
 0x446   :  { %v15726_v63 = vld [vmem:[#allocation10 + $0x2a8] sm:$0xff]   ;;  %6466 = vst [vmem:[#allocation3 + $0x2b8] sm:$0xf] %v13518_v1  ;;  %6467 = vst [vmem:[#allocation3 + $0x2e8] sm:$0xf] %v13519_v33  ;;  %15138 = vmatprep.subr.bf16.mxu1 %v15717_v37  ;;  %v5989_v7 = vld [vmem:[#allocation2 + $0x10] sm:$0xff]  ;;  %v13458_v2 = vpack.c.bf16 %v6086_v52, %v6086_v52  ;;  %v13442_v5 = vpack.c.bf16 %v5990_v39, %v5990_v39 }
 0x447   :  { %v15709_v54 = vld [vmem:[#allocation3 + $0x70] ss:$48 sps:$4 sm:$0xff]   ;;  %v15725_v31 = vld [vmem:[#allocation10 + $0x228] sm:$0xff]   ;;  %6514 = vst [vmem:[#allocation3 + $0x2bc] sm:$0xf] %v13526_v58  ;;  %v13441_v29 = vpack.c.bf16 %v5989_v7, %v5989_v7  ;;  %v15738_v23 = vld [vmem:[#allocation10 + $0x258] sm:$0xff]  }
 0x448   :  { %6515 = vst [vmem:[#allocation3 + $0x2ec] sm:$0xf] %v13527_v55  ;;  %v6037_v3 = vld [vmem:[#allocation2 + $0x11] sm:$0xff]  ;;  %14611 = vmatpush3.bf16.msra.mxu0 %v15716_v20  ;;  %v15735_v38 = vld [vmem:[#allocation10 + $0x2a0] sm:$0xff]   ;;  %v15714_v42 = vld [vmem:[#allocation3 + $0xdc] ss:$48 sps:$4 sm:$0xff]  }
 0x449   :  { %v15710_v28 = vld [vmem:[#allocation3 + $0x78] ss:$48 sps:$4 sm:$0xff]   ;;  %v13449_v27 = vpack.c.bf16 %v6037_v3, %v6037_v3  ;;  %v15712_v14 = vld [vmem:[#allocation3 + $0xd4] ss:$48 sps:$4 sm:$0xff]   ;;  %15139 = vmatpush3.bf16.msra.mxu1 %v15717_v37  ;;  %14612 = vmatprep.subr.bf16.mxu0 %v15720_v4  ;;  %6029 = vst [vmem:[#allocation3 + $0x50] sm:$0xf] %v13441_v29 }
 0x44a   :  { %v6085_v49 = vld [vmem:[#allocation2 + $0x12] sm:$0xff]  ;;  %v6087_v61 = vld [vmem:[#allocation2 + $0x22] sm:$0xff]  ;;  %8150 = vmatmul.mubr.bf16.gmra.mxu0 %v15709_v54  ;;  %15140 = vmatprep.subr.bf16.mxu1 %v15726_v63  ;;  %6126 = vst [vmem:[#allocation3 + $0x88] sm:$0xf] %v13458_v2  ;;  %6030 = vst [vmem:[#allocation3 + $0x80] sm:$0xf] %v13442_v5 }
 0x44b   :  { %v13457_v62 = vpack.c.bf16 %v6085_v49, %v6085_v49  ;;  %6077 = vst [vmem:[#allocation3 + $0x54] sm:$0xf] %v13449_v27  ;;  %v13459_v40 = vpack.c.bf16 %v6087_v61, %v6087_v61  ;;  %v5991_v11 = vld [vmem:[#allocation2 + $0x20] sm:$0xff]  ;;  %8247 = vmatmul.mubr.bf16.gmra.mxu1 %v15710_v28  ;;  %8157 = vmatprep.mubr.bf16.mxu0 %v15712_v14  ;;  %v15743_v15 = vld [vmem:[#allocation10 + $0x218] sm:$0xff]   ;;  %v6088_v60 = vld [vmem:[#allocation2 + $0x2a] sm:$0xff] }
 0x44c   :  { %v6038_v12 = vld [vmem:[#allocation2 + $0x19] sm:$0xff]  ;;  %v13443_v13 = vpack.c.bf16 %v5991_v11, %v5991_v11  ;;  %v6039_v37 = vld [vmem:[#allocation2 + $0x21] sm:$0xff]  ;;  %8254 = vmatprep.mubr.bf16.mxu1 %v15714_v42  ;;  %14613 = vmatpush3.bf16.msra.mxu0 %v15725_v31  ;;  %v15747_v6 = vld [vmem:[#allocation10 + $0x250] sm:$0xff]   ;;  %v13460_v46 = vpack.c.bf16 %v6088_v60, %v6088_v60 }
 0x44d   :  { %6125 = vst [vmem:[#allocation3 + $0x58] sm:$0xf] %v13457_v62  ;;  %v13450_v50 = vpack.c.bf16 %v6038_v12, %v6038_v12  ;;  %6127 = vst [vmem:[#allocation3 + $0xb8] sm:$0xf] %v13459_v40  ;;  %v15734_v51 = vld [vmem:[#allocation10 + $0x220] sm:$0xff]   ;;  %v13451_v17 = vpack.c.bf16 %v6039_v37, %v6039_v37  ;;  %15141 = vmatpush3.bf16.msra.mxu1 %v15726_v63  ;;  %14614 = vmatprep.subr.bf16.mxu0 %v15729_v9  ;;  %v15744_v32 = vld [vmem:[#allocation10 + $0x298] sm:$0xff]  }
 0x44e   :  { %6031 = vst [vmem:[#allocation3 + $0xb0] sm:$0xf] %v13443_v13  ;;  %15142 = vmatprep.subr.bf16.mxu1 %v15735_v38  ;;  %v6089_v22 = vld [vmem:[#allocation2 + $0x32] sm:$0xff]  ;;  %v6090_v56 = vld [vmem:[#allocation2 + $0x3a] sm:$0xff]  ;;  %v6091_v25 = vld [vmem:[#allocation2 + $0x42] sm:$0xff] }
 0x44f   :  { %6078 = vst [vmem:[#allocation3 + $0x84] sm:$0xf] %v13450_v50  ;;  %6079 = vst [vmem:[#allocation3 + $0xb4] sm:$0xf] %v13451_v17  ;;  %v13461_v45 = vpack.c.bf16 %v6089_v22, %v6089_v22  ;;  %v5992_v34 = vld [vmem:[#allocation2 + $0x28] sm:$0xff]  ;;  %v17464_v33 = vld [vmem:[#allocation10 + $0x290] sm:$0xff]   ;;  %v13462_v8 = vpack.c.bf16 %v6090_v56, %v6090_v56  ;;  %v13463_v59 = vpack.c.bf16 %v6091_v25, %v6091_v25 }
 0x450   :  { %v15718_v44 = vld [vmem:[#allocation3 + $0xd0] ss:$48 sps:$4 sm:$0xff]   ;;  %v15719_v1 = vld [vmem:[#allocation3 + $0xd8] ss:$48 sps:$4 sm:$0xff]   ;;  %14615 = vmatpush3.bf16.msra.mxu0 %v15734_v51  ;;  %v13444_v20 = vpack.c.bf16 %v5992_v34, %v5992_v34  ;;  %v15721_v4 = vld [vmem:[#allocation3 + $0x134] ss:$48 sps:$4 sm:$0xff]  }
 0x451   :  { %15143 = vmatpush3.bf16.msra.mxu1 %v15735_v38  ;;  %14616 = vmatprep.subr.bf16.mxu0 %v15738_v23  ;;  %6128 = vst [vmem:[#allocation3 + $0xe8] sm:$0xf] %v13460_v46  ;;  %6129 = vst [vmem:[#allocation3 + $0x118] sm:$0xf] %v13461_v45  ;;  %v5993_v58 = vld [vmem:[#allocation2 + $0x30] sm:$0xff]  ;;  %v6612_v9 = vld [vmem:[#allocation2 + $0x5a] sm:$0xff] }
 0x452   :  { %8158 = vmatmul.mubr.bf16.gmra.mxu0 %v15718_v44  ;;  %v15723_v55 = vld [vmem:[#allocation3 + $0x13c] ss:$48 sps:$4 sm:$0xff]   ;;  %15144 = vmatprep.subr.bf16.mxu1 %v15744_v32  ;;  %v15752_v63 = vld [vmem:[#allocation10 + $0x210] sm:$0xff]   ;;  %6130 = vst [vmem:[#allocation3 + $0x148] sm:$0xf] %v13462_v8  ;;  %v13445_v54 = vpack.c.bf16 %v5993_v58, %v5993_v58  ;;  %v6613_v29 = vld [vmem:[#allocation2 + $0x62] sm:$0xff]  ;;  %v13544_v38 = vpack.c.bf16 %v6612_v9, %v6612_v9 }
 0x453   :  { %6131 = vst [vmem:[#allocation3 + $0x178] sm:$0xf] %v13463_v59  ;;  %6032 = vst [vmem:[#allocation3 + $0xe0] sm:$0xf] %v13444_v20  ;;  %8255 = vmatmul.mubr.bf16.gmra.mxu1 %v15719_v1  ;;  %8165 = vmatprep.mubr.bf16.mxu0 %v15721_v4  ;;  %v6040_v31 = vld [vmem:[#allocation2 + $0x29] sm:$0xff]  ;;  %v6041_v7 = vld [vmem:[#allocation2 + $0x31] sm:$0xff]  ;;  %v13545_v62 = vpack.c.bf16 %v6613_v29, %v6613_v29 }
 0x454   :  { %8262 = vmatprep.mubr.bf16.mxu1 %v15723_v55  ;;  %14617 = vmatpush3.bf16.msra.mxu0 %v15743_v15  ;;  %6033 = vst [vmem:[#allocation3 + $0x110] sm:$0xf] %v13445_v54  ;;  %v13452_v3 = vpack.c.bf16 %v6040_v31, %v6040_v31  ;;  %v13453_v28 = vpack.c.bf16 %v6041_v7, %v6041_v7  ;;  %v6614_v27 = vld [vmem:[#allocation2 + $0x6a] sm:$0xff]  ;;  %v6615_v40 = vld [vmem:[#allocation2 + $0x72] sm:$0xff]  ;;  %v5995_v11 = vld [vmem:[#allocation2 + $0x40] sm:$0xff] }
 0x455   :  { %15145 = vmatpush3.bf16.msra.mxu1 %v15744_v32  ;;  %14618 = vmatprep.subr.bf16.mxu0 %v15747_v6  ;;  %v15756_v49 = vld [vmem:[#allocation10 + $0x248] sm:$0xff]   ;;  %v13546_v52 = vpack.c.bf16 %v6614_v27, %v6614_v27  ;;  %v15727_v61 = vld [vmem:[#allocation3 + $0x130] ss:$48 sps:$4 sm:$0xff]   ;;  %v5994_v39 = vld [vmem:[#allocation2 + $0x38] sm:$0xff]  ;;  %6652 = vst [vmem:[#allocation3 + $0x1a8] sm:$0xf] %v13544_v38  ;;  %v13547_v13 = vpack.c.bf16 %v6615_v40, %v6615_v40 }
 0x456   :  { %v15762_v14 = vld [vmem:[#allocation10 + $0x288] sm:$0xff]   ;;  %15146 = vmatprep.subr.bf16.mxu1 %v17464_v33  ;;  %6080 = vst [vmem:[#allocation3 + $0xe4] sm:$0xf] %v13452_v3  ;;  %6081 = vst [vmem:[#allocation3 + $0x114] sm:$0xf] %v13453_v28  ;;  %v15765_v5 = vld [vmem:[#allocation10 + $0x240] sm:$0xff]   ;;  %v13446_v50 = vpack.c.bf16 %v5994_v39, %v5994_v39  ;;  %v13447_v37 = vpack.c.bf16 %v5995_v11, %v5995_v11 }
 0x457   :  { %v15761_v2 = vld [vmem:[#allocation10 + $0x208] sm:$0xff]   ;;  %v15730_v42 = vld [vmem:[#allocation3 + $0x194] ss:$48 sps:$4 sm:$0xff]   ;;  %6653 = vst [vmem:[#allocation3 + $0x1d8] sm:$0xf] %v13545_v62  ;;  %v6042_v51 = vld [vmem:[#allocation2 + $0x39] sm:$0xff] }
 0x458   :  { %v15728_v12 = vld [vmem:[#allocation3 + $0x138] ss:$48 sps:$4 sm:$0xff]   ;;  %6654 = vst [vmem:[#allocation3 + $0x208] sm:$0xf] %v13546_v52  ;;  %v15732_v15 = vld [vmem:[#allocation3 + $0x19c] ss:$48 sps:$4 sm:$0xff]   ;;  %14619 = vmatpush3.bf16.msra.mxu0 %v15752_v63  ;;  %v13454_v32 = vpack.c.bf16 %v6042_v51, %v6042_v51 }
 0x459   :  { %v6043_v17 = vld [vmem:[#allocation2 + $0x41] sm:$0xff]  ;;  %15147 = vmatpush3.bf16.msra.mxu1 %v17464_v33  ;;  %14620 = vmatprep.subr.bf16.mxu0 %v15756_v49  ;;  %6655 = vst [vmem:[#allocation3 + $0x238] sm:$0xf] %v13547_v13  ;;  %6034 = vst [vmem:[#allocation3 + $0x140] sm:$0xf] %v13446_v50  ;;  %v6618_v56 = vld [vmem:[#allocation2 + $0x8a] sm:$0xff] }
 0x45a   :  { %v6616_v23 = vld [vmem:[#allocation2 + $0x7a] sm:$0xff]  ;;  %v13455_v60 = vpack.c.bf16 %v6043_v17, %v6043_v17  ;;  %8522 = vst [vmem:[#allocation2 + $0x45] sm:$0x1f] %v18363_v26  ;;  %6035 = vst [vmem:[#allocation3 + $0x170] sm:$0xf] %v13447_v37  ;;  %8166 = vmatmul.mubr.bf16.gmra.mxu0 %v15727_v61  ;;  %15148 = vmatprep.subr.bf16.mxu1 %v15762_v14  ;;  %v6617_v45 = vld [vmem:[#allocation2 + $0x82] sm:$0xff]  ;;  %v13550_v44 = vpack.c.bf16 %v6618_v56, %v6618_v56 }
 0x45b   :  { %v13548_v22 = vpack.c.bf16 %v6616_v23, %v6616_v23  ;;  %v15771_v6 = vld [vmem:[#allocation10 + $0x280] sm:$0xff]   ;;  %6082 = vst [vmem:[#allocation3 + $0x144] sm:$0xf] %v13454_v32  ;;  %v6619_v25 = vld [vmem:[#allocation2 + $0x92] sm:$0xff]  ;;  %8263 = vmatmul.mubr.bf16.gmra.mxu1 %v15728_v12  ;;  %8173 = vmatprep.mubr.bf16.mxu0 %v15730_v42  ;;  %v13549_v34 = vpack.c.bf16 %v6617_v45, %v6617_v45  ;;  %v6518_v63 = vld [vmem:[#allocation2 + $0x68] sm:$0xff] }
 0x45c   :  { %v15766_v46 = vld [vmem:[#allocation10 + $0x200] sm:$0xff]   ;;  %6083 = vst [vmem:[#allocation3 + $0x174] sm:$0xf] %v13455_v60  ;;  %v13551_v1 = vpack.c.bf16 %v6619_v25, %v6619_v25  ;;  %v6516_v33 = vld [vmem:[#allocation2 + $0x58] sm:$0xff]  ;;  %8270 = vmatprep.mubr.bf16.mxu1 %v15732_v15  ;;  %14621 = vmatpush3.bf16.msra.mxu0 %v15761_v2  ;;  %v6519_v54 = vld [vmem:[#allocation2 + $0x70] sm:$0xff]  ;;  %v13530_v7 = vpack.c.bf16 %v6518_v63, %v6518_v63 }
 0x45d   :  { %6656 = vst [vmem:[#allocation3 + $0x268] sm:$0xf] %v13548_v22  ;;  %v6517_v8 = vld [vmem:[#allocation2 + $0x60] sm:$0xff]  ;;  %v13528_v20 = vpack.c.bf16 %v6516_v33, %v6516_v33  ;;  %15149 = vmatpush3.bf16.msra.mxu1 %v15762_v14  ;;  %14622 = vmatprep.subr.bf16.mxu0 %v15765_v5  ;;  %6657 = vst [vmem:[#allocation3 + $0x298] sm:$0xf] %v13549_v34  ;;  %v13531_v3 = vpack.c.bf16 %v6519_v54, %v6519_v54  ;;  %v6566_v9 = vld [vmem:[#allocation2 + $0x69] sm:$0xff] }
 0x45e   :  { %v6564_v59 = vld [vmem:[#allocation2 + $0x59] sm:$0xff]  ;;  %v13529_v4 = vpack.c.bf16 %v6517_v8, %v6517_v8  ;;  %v6565_v58 = vld [vmem:[#allocation2 + $0x61] sm:$0xff]  ;;  %6658 = vst [vmem:[#allocation3 + $0x2c8] sm:$0xf] %v13550_v44  ;;  %6659 = vst [vmem:[#allocation3 + $0x2f8] sm:$0xf] %v13551_v1  ;;  %15150 = vmatprep.subr.bf16.mxu1 %v15771_v6  ;;  %v13538_v49 = vpack.c.bf16 %v6566_v9, %v6566_v9 }
 0x45f   :  { %v13536_v55 = vpack.c.bf16 %v6564_v59, %v6564_v59  ;;  %v13537_v31 = vpack.c.bf16 %v6565_v58, %v6565_v58  ;;  %6556 = vst [vmem:[#allocation3 + $0x1a0] sm:$0xf] %v13528_v20  ;;  %v15736_v28 = vld [vmem:[#allocation3 + $0x190] ss:$48 sps:$4 sm:$0xff]   ;;  %6558 = vst [vmem:[#allocation3 + $0x200] sm:$0xf] %v13530_v7 }
 0x460   :  { %6557 = vst [vmem:[#allocation3 + $0x1d0] sm:$0xf] %v13529_v4  ;;  %6559 = vst [vmem:[#allocation3 + $0x230] sm:$0xf] %v13531_v3  ;;  %v15737_v29 = vld [vmem:[#allocation3 + $0x198] ss:$48 sps:$4 sm:$0xff]   ;;  %14623 = vmatpush3.bf16.msra.mxu0 %v15766_v46 }
 0x461   :  { %6604 = vst [vmem:[#allocation3 + $0x1a4] sm:$0xf] %v13536_v55  ;;  %6605 = vst [vmem:[#allocation3 + $0x1d4] sm:$0xf] %v13537_v31  ;;  %v6567_v27 = vld [vmem:[#allocation2 + $0x71] sm:$0xff]  ;;  %15151 = vmatpush3.bf16.msra.mxu1 %v15771_v6  ;;  %v6521_v61 = vld [vmem:[#allocation2 + $0x80] sm:$0xff] }
 0x462   :  { %v15739_v14 = vld [vmem:[#allocation3 + $0x1f4] ss:$48 sps:$4 sm:$0xff]   ;;  %v13539_v38 = vpack.c.bf16 %v6567_v27, %v6567_v27  ;;  %8174 = vmatmul.mubr.bf16.gmra.mxu0 %v15736_v28  ;;  %v15741_v62 = vld [vmem:[#allocation3 + $0x1fc] ss:$48 sps:$4 sm:$0xff]   ;;  %6606 = vst [vmem:[#allocation3 + $0x204] sm:$0xf] %v13538_v49  ;;  %v13533_v11 = vpack.c.bf16 %v6521_v61, %v6521_v61 }
 0x463   :  { %v6520_v52 = vld [vmem:[#allocation2 + $0x78] sm:$0xff]  ;;  %8271 = vmatmul.mubr.bf16.gmra.mxu1 %v15737_v29  ;;  %8181 = vmatprep.mubr.bf16.mxu0 %v15739_v14  ;;  %v6569_v39 = vld [vmem:[#allocation2 + $0x81] sm:$0xff]  ;;  %v6523_v13 = vld [vmem:[#allocation2 + $0x90] sm:$0xff] }
 0x464   :  { %6607 = vst [vmem:[#allocation3 + $0x234] sm:$0xf] %v13539_v38  ;;  %v13532_v2 = vpack.c.bf16 %v6520_v52, %v6520_v52  ;;  %v6568_v40 = vld [vmem:[#allocation2 + $0x79] sm:$0xff]  ;;  %8278 = vmatprep.mubr.bf16.mxu1 %v15741_v62  ;;  %v13541_v42 = vpack.c.bf16 %v6569_v39, %v6569_v39  ;;  %6561 = vst [vmem:[#allocation3 + $0x290] sm:$0xf] %v13533_v11  ;;  %v6522_v5 = vld [vmem:[#allocation2 + $0x88] sm:$0xff]  ;;  %v13535_v17 = vpack.c.bf16 %v6523_v13, %v6523_v13 }
 0x465   :  { %v13540_v12 = vpack.c.bf16 %v6568_v40, %v6568_v40  ;;  %v6570_v50 = vld [vmem:[#allocation2 + $0x89] sm:$0xff]  ;;  %v13534_v51 = vpack.c.bf16 %v6522_v5, %v6522_v5  ;;  %v6571_v23 = vld [vmem:[#allocation2 + $0x91] sm:$0xff]  ;;  %v17473_v39 = vld [vmem:[%s18178_s9] ss:$0 sm:$0xff] }
 0x466   :  { %6560 = vst [vmem:[#allocation3 + $0x260] sm:$0xf] %v13532_v2  ;;  %6609 = vst [vmem:[#allocation3 + $0x294] sm:$0xf] %v13541_v42  ;;  %v15745_v37 = vld [vmem:[#allocation3 + $0x1f0] ss:$48 sps:$4 sm:$0xff]   ;;  %v13542_v15 = vpack.c.bf16 %v6570_v50, %v6570_v50  ;;  %v13543_v22 = vpack.c.bf16 %v6571_v23, %v6571_v23 }
 0x467   :  { %6608 = vst [vmem:[#allocation3 + $0x264] sm:$0xf] %v13540_v12  ;;  %v15746_v32 = vld [vmem:[#allocation3 + $0x1f8] ss:$48 sps:$4 sm:$0xff]   ;;  %v15748_v60 = vld [vmem:[#allocation3 + $0x254] ss:$48 sps:$4 sm:$0xff]  }
 0x468   :  { %8540 = vst [vmem:[#allocation2 + $0x95] sm:$0x1f] %v18363_v26  ;;  %v15750_v6 = vld [vmem:[#allocation3 + $0x25c] ss:$48 sps:$4 sm:$0xff]   ;;  %6562 = vst [vmem:[#allocation3 + $0x2c0] sm:$0xf] %v13534_v51 }
 0x469   :  { %6563 = vst [vmem:[#allocation3 + $0x2f0] sm:$0xf] %v13535_v17  ;;  %6610 = vst [vmem:[#allocation3 + $0x2c4] sm:$0xf] %v13542_v15  ;;  %v15754_v46 = vld [vmem:[#allocation3 + $0x250] ss:$48 sps:$4 sm:$0xff]  }
 0x46a   :  { %8182 = vmatmul.mubr.bf16.gmra.mxu0 %v15745_v37  ;;  %6611 = vst [vmem:[#allocation3 + $0x2f4] sm:$0xf] %v13543_v22  ;;  %v15755_v45 = vld [vmem:[#allocation3 + $0x258] ss:$48 sps:$4 sm:$0xff]   ;;  %v15757_v56 = vld [vmem:[#allocation3 + $0x2b4] ss:$48 sps:$4 sm:$0xff]  }
 0x46b   :  { %8279 = vmatmul.mubr.bf16.gmra.mxu1 %v15746_v32  ;;  %8189 = vmatprep.mubr.bf16.mxu0 %v15748_v60  ;;  %v15759_v25 = vld [vmem:[#allocation3 + $0x2bc] ss:$48 sps:$4 sm:$0xff]   ;;  %v15763_v34 = vld [vmem:[#allocation3 + $0x2b0] ss:$48 sps:$4 sm:$0xff]   ;;  %v15764_v44 = vld [vmem:[#allocation3 + $0x2b8] ss:$48 sps:$4 sm:$0xff]  }
 0x46c   :  { %8286 = vmatprep.mubr.bf16.mxu1 %v15750_v6  ;;  %v15769_v26 = vld [vmem:[#allocation3 + $0x24] ss:$48 sps:$4 sm:$0xff]   ;;  %v15770_v1 = vld [vmem:[#allocation3 + $0x28] ss:$48 sps:$4 sm:$0xff]   ;;  %v15767_v33 = vld [vmem:[#allocation3 + $0x20] ss:$48 sps:$4 sm:$0xff]  }
 0x46d   :  { %v15772_v8 = vld [vmem:[#allocation3 + $0x88] ss:$48 sps:$4 sm:$0xff]   ;;  %v15773_v59 = vld [vmem:[#allocation3 + $0x84] ss:$48 sps:$4 sm:$0xff]   ;;  %v15776_v4 = vld [vmem:[#allocation3 + $0x80] ss:$48 sps:$4 sm:$0xff]  }
 0x46e   :  { %v15775_v20 = vld [vmem:[#allocation3 + $0xe8] ss:$48 sps:$4 sm:$0xff]   ;;  %v15778_v55 = vld [vmem:[#allocation3 + $0xe4] ss:$48 sps:$4 sm:$0xff]   ;;  %v15781_v54 = vld [vmem:[#allocation3 + $0xe0] ss:$48 sps:$4 sm:$0xff]  }
 0x46f   :  { %v15777_v58 = vld [vmem:[#allocation3 + $0x148] ss:$48 sps:$4 sm:$0xff]   ;;  %v15783_v7 = vld [vmem:[#allocation3 + $0x144] ss:$48 sps:$4 sm:$0xff]   ;;  %v15786_v28 = vld [vmem:[#allocation3 + $0x140] ss:$48 sps:$4 sm:$0xff]  }
 0x470   :  { %v15780_v63 = vld [vmem:[#allocation3 + $0x1a8] ss:$48 sps:$4 sm:$0xff]   ;;  %v15788_v29 = vld [vmem:[#allocation3 + $0x1a4] ss:$48 sps:$4 sm:$0xff]   ;;  %v15790_v27 = vld [vmem:[#allocation3 + $0x1a0] ss:$48 sps:$4 sm:$0xff]  }
 0x471   :  { %v15782_v31 = vld [vmem:[#allocation3 + $0x208] ss:$48 sps:$4 sm:$0xff]   ;;  %v15791_v49 = vld [vmem:[#allocation3 + $0x204] ss:$48 sps:$4 sm:$0xff]   ;;  %v15793_v14 = vld [vmem:[#allocation3 + $0x200] ss:$48 sps:$4 sm:$0xff]  }
 0x472   :  { %8190 = vmatmul.mubr.bf16.gmra.mxu0 %v15754_v46  ;;  %v15785_v3 = vld [vmem:[#allocation3 + $0x268] ss:$48 sps:$4 sm:$0xff]   ;;  %v15794_v38 = vld [vmem:[#allocation3 + $0x264] ss:$48 sps:$4 sm:$0xff]   ;;  %v15796_v62 = vld [vmem:[#allocation3 + $0x260] ss:$48 sps:$4 sm:$0xff]  }
 0x473   :  { %8287 = vmatmul.mubr.bf16.gmra.mxu1 %v15755_v45  ;;  %8197 = vmatprep.mubr.bf16.mxu0 %v15757_v56  ;;  %v15787_v9 = vld [vmem:[#allocation3 + $0x2c8] ss:$48 sps:$4 sm:$0xff]   ;;  %v15797_v52 = vld [vmem:[#allocation3 + $0x2c4] ss:$48 sps:$4 sm:$0xff]   ;;  %v15799_v61 = vld [vmem:[#allocation3 + $0x2c0] ss:$48 sps:$4 sm:$0xff]  }
 0x474   :  { %8294 = vmatprep.mubr.bf16.mxu1 %v15759_v25 }
 0x47a   :  { %8198 = vmatmul.mubr.bf16.gmra.mxu0 %v15763_v34 }
 0x47b   :  { %8295 = vmatmul.mubr.bf16.gmra.mxu1 %v15764_v44  ;;  %8335 = vmatprep.mubr.bf16.mxu0 %v15769_v26  ;;  %v15800_v26 = vld [vmem:[#allocation11 + $0x78] sm:$0xff]  }
 0x47c   :  { %15152 = vmatprep.mubr.bf16.mxu1 %v15770_v1  ;;  %v15801_v1 = vld [vmem:[#allocation11 + $0xf8] sm:$0xff]   ;;  %14688 = vmatprep.subr.bf16.mxu1 %v15800_v26 }
 0x47d   :  { %14752 = vmatprep.subr.bf16.mxu0 %v15801_v1  ;;  %v15814_v1 = vld [vmem:[#allocation11 + $0x20] sm:$0xff]  }
 0x482   :  { %8336 = vmatmul.mubr.bf16.vlgmr.msra.gmra.mxu0 %v15767_v33 }
 0x483   :  { %15153 = vmatmul.mubr.bf16.vlgmr.msra.gmra.mxu1 %v15772_v8  ;;  %8343 = vmatprep.mubr.bf16.mxu0 %v15773_v59 }
 0x484   :  { %15156 = vmatprep.mubr.bf16.mxu1 %v15775_v20 }
 0x48a   :  { %8344 = vmatmul.mubr.bf16.gmra.mxu0 %v15776_v4 }
 0x48b   :  { %15157 = vmatmul.mubr.bf16.gmra.mxu1 %v15777_v58  ;;  %8351 = vmatprep.mubr.bf16.mxu0 %v15778_v55 }
 0x48c   :  { %15160 = vmatprep.mubr.bf16.mxu1 %v15780_v63  ;;  %v15802_v63 = vld [vmem:[#allocation11 + $0x38] sm:$0xff]  }
 0x48d   :  { %14689 = vmatpush3.bf16.msra.mxu1 %v15802_v63 }
 0x492   :  { %8352 = vmatmul.mubr.bf16.gmra.mxu0 %v15781_v54  ;;  %v15803_v54 = vld [vmem:[#allocation11 + $0xb8] sm:$0xff]  }
 0x493   :  { %15161 = vmatmul.mubr.bf16.gmra.mxu1 %v15782_v31  ;;  %8359 = vmatprep.mubr.bf16.mxu0 %v15783_v7  ;;  %v15804_v31 = vld [vmem:[#allocation11 + $0x70] sm:$0xff]  }
 0x494   :  { %15164 = vmatprep.mubr.bf16.mxu1 %v15785_v3  ;;  %14753 = vmatpush3.bf16.msra.mxu0 %v15803_v54 }
 0x495   :  { %14690 = vmatprep.subr.bf16.mxu1 %v15804_v31 }
 0x49a   :  { %8360 = vmatmul.mubr.bf16.gmra.mxu0 %v15786_v28 }
 0x49b   :  { %15165 = vmatmul.mubr.bf16.gmra.mxu1 %v15787_v9  ;;  %8367 = vmatprep.mubr.bf16.mxu0 %v15788_v29  ;;  %v15805_v9 = vld [vmem:[#allocation11 + $0xf0] sm:$0xff]  }
 0x49c   :  { %14754 = vmatprep.subr.bf16.mxu0 %v15805_v9  ;;  %v15820_v9 = vld [vmem:[#allocation11 + $0x50] sm:$0xff]  }
 0x4a2   :  { %8368 = vmatmul.mubr.bf16.gmra.mxu0 %v15790_v27 }
 0x4a3   :  { %8375 = vmatprep.mubr.bf16.mxu0 %v15791_v49 }
 0x4aa   :  { %8376 = vmatmul.mubr.bf16.gmra.mxu0 %v15793_v14 }
 0x4ab   :  { %8383 = vmatprep.mubr.bf16.mxu0 %v15794_v38 }
 0x4b2   :  { %8384 = vmatmul.mubr.bf16.gmra.mxu0 %v15796_v62 }
 0x4b3   :  { %8391 = vmatprep.mubr.bf16.mxu0 %v15797_v52  ;;  %v15806_v52 = vld [vmem:[#allocation11 + $0x30] sm:$0xff]  }
 0x4b4   :  { %v14368_v2 = vpop.f32.mrf.mxu0  ;;  %14691 = vmatpush3.bf16.msra.mxu1 %v15806_v52 }
 0x4b6   :  { %v14432_v40 = vpop.f32.mrf.mxu1  ;;  %v14369_v11 = vpop.f32.mrf.mxu0 }
 0x4b7   :  { %v14370_v12 = vadd.f32 %v14369_v11, %v14368_v2  ;;  %v15808_v2 = vld [vmem:[#allocation11 + $0x68] sm:$0xff]  }
 0x4b8   :  { %v14433_v42 = vpop.f32.mrf.mxu1  ;;  %v14371_v13 = vpop.f32.mrf.mxu0  ;;  %14692 = vmatprep.subr.bf16.mxu1 %v15808_v2 }
 0x4b9   :  { %v14434_v5 = vadd.f32 %v14433_v42, %v14432_v40  ;;  %v7950_v50 = vadd.f32 %v14370_v12, %v17473_v39  ;;  %v15809_v12 = vld [vmem:[#allocation11 + $0xe8] sm:$0xff]  }
 0x4ba   :  { %8392 = vmatmul.mubr.bf16.gmra.mxu0 %v15799_v61  ;;  %v14435_v37 = vpop.f32.mrf.mxu1  ;;  %v14372_v51 = vpop.f32.mrf.mxu0  ;;  %v15807_v61 = vld [vmem:[#allocation11 + $0xb0] sm:$0xff]  }
 0x4bb   :  { %v17476_v17 = vadd.f32 %v14434_v5, %v7950_v50  ;;  %v14373_v23 = vadd.f32 %v14372_v51, %v14371_v13  ;;  %14755 = vmatpush3.bf16.msra.mxu0 %v15807_v61  ;;  %v15810_v51 = vld [vmem:[#allocation11 + $0x28] sm:$0xff]  }
 0x4bc   :  { %v14436_v15 = vpop.f32.mrf.mxu1  ;;  %14756 = vmatprep.subr.bf16.mxu0 %v15809_v12  ;;  %14693 = vmatpush3.bf16.msra.mxu1 %v15810_v51  ;;  %v15822_v12 = vld [vmem:[#allocation11 + $0x10] sm:$0xff]   ;;  %v15825_v51 = vld [vmem:[#allocation11 + $0xc8] sm:$0xff]  }
 0x4bd   :  { %v7953_v60 = vadd.f32 %v14373_v23, %v17473_v39  ;;  %v14437_v22 = vadd.f32 %v14436_v15, %v14435_v37  ;;  %v15811_v23 = vld [vmem:[#allocation11 + $0xa8] sm:$0xff]   ;;  %v15812_v15 = vld [vmem:[#allocation11 + $0x60] sm:$0xff]  }
 0x4be   :  { %14694 = vmatprep.subr.bf16.mxu1 %v15812_v15 }
 0x4bf   :  { %v14374_v32 = vpop.f32.mrf.mxu0  ;;  %v17479_v45 = vadd.f32 %v14437_v22, %v7953_v60  ;;  %14757 = vmatpush3.bf16.msra.mxu0 %v15811_v23 }
 0x4c0   :  { %14695 = vmatpush3.bf16.msra.mxu1 %v15814_v1  ;;  %v15829_v1 = vld [vmem:[#allocation11 + $0xc0] sm:$0xff]  }
 0x4c1   :  { %v14375_v46 = vpop.f32.mrf.mxu0 }
 0x4c2   :  { %v14438_v6 = vpop.f32.mrf.mxu1  ;;  %v14376_v56 = vadd.f32 %v14375_v46, %v14374_v32 }
 0x4c3   :  { %v14377_v44 = vpop.f32.mrf.mxu0 }
 0x4c4   :  { %v14439_v25 = vpop.f32.mrf.mxu1  ;;  %v7958_v33 = vadd.f32 %v14376_v56, %v17473_v39 }
 0x4c5   :  { %v14440_v34 = vadd.f32 %v14439_v25, %v14438_v6  ;;  %v14378_v59 = vpop.f32.mrf.mxu0  ;;  %v15813_v6 = vld [vmem:[#allocation11 + $0xe0] sm:$0xff]  }
 0x4c6   :  { %v14441_v8 = vpop.f32.mrf.mxu1  ;;  %v14379_v4 = vadd.f32 %v14378_v59, %v14377_v44  ;;  %14758 = vmatprep.subr.bf16.mxu0 %v15813_v6  ;;  %v15826_v6 = vld [vmem:[#allocation11 + $0x8] sm:$0xff]  }
 0x4c7   :  { %v17482_v20 = vadd.f32 %v14440_v34, %v7958_v33  ;;  %v15815_v33 = vld [vmem:[#allocation11 + $0xa0] sm:$0xff]  }
 0x4c8   :  { %v14442_v58 = vpop.f32.mrf.mxu1  ;;  %v7961_v7 = vadd.f32 %v14379_v4, %v17473_v39  ;;  %14759 = vmatpush3.bf16.msra.mxu0 %v15815_v33 }
 0x4c9   :  { %v14380_v55 = vpop.f32.mrf.mxu0  ;;  %v14443_v3 = vadd.f32 %v14442_v58, %v14441_v8  ;;  %v15816_v8 = vld [vmem:[#allocation11 + $0x58] sm:$0xff]  }
 0x4ca   :  { %v15817_v58 = vld [vmem:[#allocation11 + $0xd8] sm:$0xff]   ;;  %14696 = vmatprep.subr.bf16.mxu1 %v15816_v8 }
 0x4cb   :  { %v14381_v29 = vpop.f32.mrf.mxu0  ;;  %v17485_v27 = vadd.f32 %v14443_v3, %v7961_v7  ;;  %14760 = vmatprep.subr.bf16.mxu0 %v15817_v58  ;;  %v15818_v3 = vld [vmem:[#allocation11 + $0x18] sm:$0xff]  }
 0x4cc   :  { %v14382_v49 = vadd.f32 %v14381_v29, %v14380_v55  ;;  %14697 = vmatpush3.bf16.msra.mxu1 %v15818_v3 }
 0x4cd   :  { %v14383_v62 = vpop.f32.mrf.mxu0  ;;  %14698 = vmatprep.subr.bf16.mxu1 %v15820_v9 }
 0x4ce   :  { %v14444_v28 = vpop.f32.mrf.mxu1  ;;  %v7966_v40 = vadd.f32 %v14382_v49, %v17473_v39 }
 0x4cf   :  { %v14384_v42 = vpop.f32.mrf.mxu0 }
 0x4d0   :  { %v14445_v14 = vpop.f32.mrf.mxu1  ;;  %v14385_v13 = vadd.f32 %v14384_v42, %v14383_v62  ;;  %v15823_v42 = vld [vmem:[#allocation11 + $0x90] sm:$0xff]   ;;  %14699 = vmatpush3.bf16.msra.mxu1 %v15822_v12 }
 0x4d1   :  { %v14446_v38 = vadd.f32 %v14445_v14, %v14444_v28  ;;  %v15819_v28 = vld [vmem:[#allocation11 + $0x98] sm:$0xff]  }
 0x4d2   :  { %v14447_v11 = vpop.f32.mrf.mxu1  ;;  %v7969_v32 = vadd.f32 %v14385_v13, %v17473_v39  ;;  %14761 = vmatpush3.bf16.msra.mxu0 %v15819_v28  ;;  %v15824_v13 = vld [vmem:[#allocation11 + $0x48] sm:$0xff]  }
 0x4d3   :  { %v17488_v5 = vadd.f32 %v14446_v38, %v7966_v40  ;;  %v15821_v38 = vld [vmem:[#allocation11 + $0xd0] sm:$0xff]   ;;  %14700 = vmatprep.subr.bf16.mxu1 %v15824_v13 }
 0x4d4   :  { %v14448_v50 = vpop.f32.mrf.mxu1  ;;  %14762 = vmatprep.subr.bf16.mxu0 %v15821_v38  ;;  %14701 = vmatpush3.bf16.msra.mxu1 %v15826_v6 }
 0x4d5   :  { %v14449_v60 = vadd.f32 %v14448_v50, %v14447_v11 }
 0x4d6   :  { %v14386_v37 = vpop.f32.mrf.mxu0  ;;  %v14450_v22 = vpop.f32.mrf.mxu1  ;;  %14763 = vmatpush3.bf16.msra.mxu0 %v15823_v42 }
 0x4d7   :  { %v17491_v56 = vadd.f32 %v14449_v60, %v7969_v32  ;;  %14764 = vmatprep.subr.bf16.mxu0 %v15825_v51 }
 0x4d8   :  { %v14387_v46 = vpop.f32.mrf.mxu0  ;;  %v14451_v34 = vpop.f32.mrf.mxu1 }
 0x4d9   :  { %v14388_v25 = vadd.f32 %v14387_v46, %v14386_v37  ;;  %v14452_v44 = vadd.f32 %v14451_v34, %v14450_v22  ;;  %v15827_v46 = vld [vmem:[#allocation11 + $0x88] sm:$0xff]  }
 0x4da   :  { %v14389_v26 = vpop.f32.mrf.mxu0  ;;  %v14453_v4 = vpop.f32.mrf.mxu1  ;;  %14765 = vmatpush3.bf16.msra.mxu0 %v15827_v46 }
 0x4db   :  { %v7974_v59 = vadd.f32 %v14388_v25, %v17473_v39  ;;  %v15828_v25 = vld [vmem:[#allocation11 + $0x40] sm:$0xff]   ;;  %14766 = vmatprep.subr.bf16.mxu0 %v15829_v1 }
 0x4dc   :  { %v14390_v55 = vpop.f32.mrf.mxu0  ;;  %v14454_v31 = vpop.f32.mrf.mxu1  ;;  %14702 = vmatprep.subr.bf16.mxu1 %v15828_v25 }
 0x4dd   :  { %v17494_v63 = vadd.f32 %v14452_v44, %v7974_v59  ;;  %v14391_v54 = vadd.f32 %v14390_v55, %v14389_v26  ;;  %v14455_v49 = vadd.f32 %v14454_v31, %v14453_v4  ;;  %v15831_v31 = vld [vmem:[#allocation11 + $0x80] sm:$0xff]  }
 0x4de   :  { %14767 = vmatpush3.bf16.msra.mxu0 %v15831_v31 }
 0x4df   :  { %v7977_v29 = vadd.f32 %v14391_v54, %v17473_v39  ;;  %v15830_v54 = vld [vmem:[#allocation11] sm:$0xff]  }
 0x4e0   :  { %v14392_v7 = vpop.f32.mrf.mxu0  ;;  %14703 = vmatpush3.bf16.msra.mxu1 %v15830_v54 }
 0x4e1   :  { %v14456_v14 = vpop.f32.mrf.mxu1  ;;  %v17497_v52 = vadd.f32 %v14455_v49, %v7977_v29 }
 0x4e2   :  { %v14393_v62 = vpop.f32.mrf.mxu0 }
 0x4e3   :  { %v14394_v61 = vadd.f32 %v14393_v62, %v14392_v7  ;;  %v14457_v2 = vpop.f32.mrf.mxu1  ;;  %v15838_v7 = vld [vmem:[#allocation11 + $0x178] sm:$0xff]  }
 0x4e4   :  { %v14458_v40 = vadd.f32 %v14457_v2, %v14456_v14  ;;  %v14395_v11 = vpop.f32.mrf.mxu0  ;;  %14816 = vmatprep.subr.bf16.mxu1 %v15838_v7 }
 0x4e5   :  { %v7982_v50 = vadd.f32 %v14394_v61, %v17473_v39  ;;  %v14459_v37 = vpop.f32.mrf.mxu1 }
 0x4e6   :  { %v14396_v23 = vpop.f32.mrf.mxu0 }
 0x4e7   :  { %v17500_v15 = vadd.f32 %v14458_v40, %v7982_v50  ;;  %v14397_v32 = vadd.f32 %v14396_v23, %v14395_v11  ;;  %v14460_v60 = vpop.f32.mrf.mxu1 }
 0x4e8   :  { %v14461_v44 = vadd.f32 %v14460_v60, %v14459_v37 }
 0x4e9   :  { %v14398_v22 = vpop.f32.mrf.mxu0  ;;  %v7985_v34 = vadd.f32 %v14397_v32, %v17473_v39 }
 0x4ea   :  { %v14462_v26 = vpop.f32.mrf.mxu1 }
 0x4eb   :  { %v14399_v33 = vpop.f32.mrf.mxu0  ;;  %v17503_v8 = vadd.f32 %v14461_v44, %v7985_v34 }
 0x4ec   :  { %v14400_v59 = vadd.f32 %v14399_v33, %v14398_v22  ;;  %v14463_v4 = vpop.f32.mrf.mxu1 }
 0x4ed   :  { %v14464_v58 = vadd.f32 %v14463_v4, %v14462_v26  ;;  %v14401_v55 = vpop.f32.mrf.mxu0 }
 0x4ee   :  { %v7990_v3 = vadd.f32 %v14400_v59, %v17473_v39  ;;  %v14465_v28 = vpop.f32.mrf.mxu1 }
 0x4ef   :  { %v14402_v9 = vpop.f32.mrf.mxu0 }
 0x4f0   :  { %v17506_v29 = vadd.f32 %v14464_v58, %v7990_v3  ;;  %v14403_v49 = vadd.f32 %v14402_v9, %v14401_v55  ;;  %v14466_v14 = vpop.f32.mrf.mxu1 }
 0x4f1   :  { %v14467_v61 = vadd.f32 %v14466_v14, %v14465_v28 }
 0x4f2   :  { %18389 = vst [vmem:[#allocation45_spill] sm:$0xff] %v17506_v29  ;;  %v14404_v38 = vpop.f32.mrf.mxu0  ;;  %v7993_v62 = vadd.f32 %v14403_v49, %v17473_v39 }
 0x4f3   :  { %v14468_v2 = vpop.f32.mrf.mxu1 }
 0x4f4   :  { %v14405_v40 = vpop.f32.mrf.mxu0  ;;  %v17509_v11 = vadd.f32 %v14467_v61, %v7993_v62 }
 0x4f5   :  { %v14406_v12 = vadd.f32 %v14405_v40, %v14404_v38  ;;  %v14469_v42 = vpop.f32.mrf.mxu1 }
 0x4f6   :  { %18390 = vst [vmem:[#allocation47_spill] sm:$0xff] %v17509_v11  ;;  %v14470_v13 = vadd.f32 %v14469_v42, %v14468_v2  ;;  %v14407_v50 = vpop.f32.mrf.mxu0 }
 0x4f7   :  { %v7998_v37 = vadd.f32 %v14406_v12, %v17473_v39  ;;  %v14471_v51 = vpop.f32.mrf.mxu1 }
 0x4f8   :  { %v14408_v23 = vpop.f32.mrf.mxu0 }
 0x4f9   :  { %v17512_v32 = vadd.f32 %v14470_v13, %v7998_v37  ;;  %v14409_v60 = vadd.f32 %v14408_v23, %v14407_v50  ;;  %v14472_v22 = vpop.f32.mrf.mxu1  ;;  %v15871_v50 = vld [vmem:[#allocation11 + $0x1f8] sm:$0xff]  }
 0x4fa   :  { %v14410_v6 = vpop.f32.mrf.mxu0  ;;  %v14473_v25 = vadd.f32 %v14472_v22, %v14471_v51  ;;  %14880 = vmatprep.subr.bf16.mxu0 %v15871_v50 }
 0x4fb   :  { %18391 = vst [vmem:[#allocation49_spill] sm:$0xff] %v17512_v32  ;;  %v8001_v46 = vadd.f32 %v14409_v60, %v17473_v39  ;;  %v14474_v34 = vpop.f32.mrf.mxu1 }
 0x4fc   :  { %v14411_v44 = vpop.f32.mrf.mxu0 }
 0x4fd   :  { %v17515_v26 = vadd.f32 %v14473_v25, %v8001_v46  ;;  %v14412_v1 = vadd.f32 %v14411_v44, %v14410_v6  ;;  %v14475_v33 = vpop.f32.mrf.mxu1 }
 0x4fe   :  { %v14476_v59 = vadd.f32 %v14475_v33, %v14474_v34  ;;  %v14413_v4 = vpop.f32.mrf.mxu0 }
 0x4ff   :  { %18392 = vst [vmem:[#allocation44_spill] sm:$0xff] %v17515_v26  ;;  %v8006_v58 = vadd.f32 %v14412_v1, %v17473_v39  ;;  %v14477_v55 = vpop.f32.mrf.mxu1 }
 0x500   :  { %v14414_v54 = vpop.f32.mrf.mxu0 }
 0x501   :  { %v17518_v31 = vadd.f32 %v14476_v59, %v8006_v58  ;;  %v14415_v7 = vadd.f32 %v14414_v54, %v14413_v4  ;;  %v14478_v3 = vpop.f32.mrf.mxu1 }
 0x502   :  { %v17520_v28 = vpop.f32.mrf.mxu0  ;;  %v14479_v49 = vadd.f32 %v14478_v3, %v14477_v55 }
 0x503   :  { %18393 = vst [vmem:[#allocation46_spill] sm:$0xff] %v17518_v31  ;;  %v8009_v9 = vadd.f32 %v14415_v7, %v17473_v39  ;;  %v17523_v14 = vpop.f32.mrf.mxu1 }
 0x504   :  { %v14497_v38 = vpop.f32.mrf.mxu0 }
 0x505   :  { %v17525_v62 = vadd.f32 %v14479_v49, %v8009_v9  ;;  %v17527_v61 = vpop.f32.mrf.mxu1 }
 0x506   :  { %v17529_v2 = vpop.f32.mrf.mxu0 }
 0x507   :  { %18394 = vst [vmem:[#allocation48_spill] sm:$0xff] %v17525_v62  ;;  %v17531_v40 = vpop.f32.mrf.mxu1 }
 0x508   :  { %v14500_v12 = vpop.f32.mrf.mxu0 }
 0x509   :  { %v17533_v42 = vpop.f32.mrf.mxu1 }
 0x50a   :  { %v17535_v13 = vpop.f32.mrf.mxu0 }
 0x50b   :  { %v17537_v37 = vpop.f32.mrf.mxu1 }
 0x50c   :  { %v17539_v39 = vpop.f32.mrf.mxu0 }
 0x50d   :  { %v17541_v51 = vpop.f32.mrf.mxu1 }
 0x50e   :  { %v17543_v23 = vpop.f32.mrf.mxu0 }
 0x50f   :  { %v17545_v60 = vpop.f32.mrf.mxu1 }
 0x510   :  { %v17547_v22 = vpop.f32.mrf.mxu0 }
 0x511   :  { %v17549_v6 = vpop.f32.mrf.mxu1 }
 0x512   :  { %v17551_v46 = vpop.f32.mrf.mxu0 }
 0x513   :  { %v17553_v25 = vpop.f32.mrf.mxu1 }
 0x514   :  { %v17555_v34 = vpop.f32.mrf.mxu0 }
 0x515   :  { %v17557_v44 = vpop.f32.mrf.mxu1 }
 0x516   :  { %v17559_v1 = vpop.f32.mrf.mxu0 }
 0x517   :  { %v17561_v33 = vpop.f32.mrf.mxu1 }
 0x518   :  { %v17563_v59 = vpop.f32.mrf.mxu0 }
 0x519   :  { %v17565_v4 = vpop.f32.mrf.mxu1 }
 0x51a   :  { %v17567_v58 = vpop.f32.mrf.mxu0 }
 0x51b   :  { %v17569_v55 = vpop.f32.mrf.mxu1 }
 0x51c   :  { %v17571_v54 = vpop.f32.mrf.mxu0 }
 0x51d   :  { %v17573_v7 = vpop.f32.mrf.mxu1  ;;  %v14516_v16 = vadd.f32 %v17571_v54, %v17567_v58 }
 0x51e   :  { %v17575_v3 = vpop.f32.mrf.mxu0 }
 0x51f   :  { %v17577_v9 = vpop.f32.mrf.mxu1  ;;  %v8168_v54 = vadd.f32 %v14516_v16, %v17494_v63 }
 0x520   :  { %v17579_v49 = vpop.f32.mrf.mxu0 }
 0x521   :  { %v17581_v50 = vpop.f32.mrf.mxu1 }
 0x522   :  { %v17583_v36 = vpop.f32.mrf.mxu0 }
 0x523   :  { %v17585_v0 = vpop.f32.mrf.mxu1 }
 0x524   :  { %v17587_v48 = vpop.f32.mrf.mxu0 }
 0x525   :  { %v17589_v53 = vpop.f32.mrf.mxu1 }
 0x526   :  { %v17591_v62 = vpop.f32.mrf.mxu0 }
 0x527   :  { %v17593_v43 = vpop.f32.mrf.mxu1 }
 0x528   :  { %18395 = vst [vmem:[#allocation50_spill] sm:$0xff] %v17593_v43  ;;  %v17595_v41 = vpop.f32.mrf.mxu0 }
 0x529   :  { %v17597_v31 = vpop.f32.mrf.mxu1 }
 0x52a   :  { %18396 = vst [vmem:[#allocation34_spill] sm:$0xff] %v17597_v31  ;;  %v17599_v30 = vpop.f32.mrf.mxu0 }
 0x52b   :  { %18397 = vst [vmem:[#allocation19_spill] sm:$0xff] %v17599_v30  ;;  %v17601_v26 = vpop.f32.mrf.mxu1 }
 0x52c   :  { %18398 = vst [vmem:[#allocation33_spill] sm:$0xff] %v17601_v26  ;;  %v17603_v24 = vpop.f32.mrf.mxu0 }
 0x52d   :  { %18399 = vst [vmem:[#allocation35_spill] sm:$0xff] %v17603_v24  ;;  %v17605_v32 = vpop.f32.mrf.mxu1 }
 0x52e   :  { %18400 = vst [vmem:[#allocation38_spill] sm:$0xff] %v17605_v32  ;;  %v17607_v35 = vpop.f32.mrf.mxu0 }
 0x52f   :  { %18401 = vst [vmem:[#allocation17_spill] sm:$0xff] %v17607_v35  ;;  %v17609_v11 = vpop.f32.mrf.mxu1 }
 0x530   :  { %18402 = vst [vmem:[#allocation20_spill] sm:$0xff] %v17609_v11  ;;  %v17611_v57 = vpop.f32.mrf.mxu0 }
 0x531   :  { %18403 = vst [vmem:[#allocation37_spill] sm:$0xff] %v17611_v57  ;;  %v17613_v29 = vpop.f32.mrf.mxu1 }
 0x532   :  { %18404 = vst [vmem:[#allocation36_spill] sm:$0xff] %v17613_v29  ;;  %v17615_v21 = vpop.f32.mrf.mxu0 }
 0x533   :  { %18405 = vst [vmem:[#allocation18_spill] sm:$0xff] %v17615_v21  ;;  %v17617_v43 = vpop.f32.mrf.mxu1 }
 0x534   :  { %18406 = vst [vmem:[#allocation41_spill] sm:$0xff] %v17617_v43  ;;  %v17619_v31 = vpop.f32.mrf.mxu0  ;;  %v14498_v43 = vadd.f32 %v14497_v38, %v17520_v28 }
 0x535   :  { %18407 = vst [vmem:[#allocation39_spill] sm:$0xff] %v17619_v31  ;;  %v17621_v47 = vpop.f32.mrf.mxu1 }
 0x536   :  { %18408 = vst [vmem:[#allocation40_spill] sm:$0xff] %v17621_v47  ;;  %v17623_v26 = vpop.f32.mrf.mxu0 }
 0x537   :  { %18409 = vst [vmem:[#allocation42_spill] sm:$0xff] %v17623_v26  ;;  %v17625_v24 = vpop.f32.mrf.mxu1 }
 0x538   :  { %18410 = vst [vmem:[#allocation43_spill] sm:$0xff] %v17625_v24  ;;  %v17627_v32 = vpop.f32.mrf.mxu0  ;;  %v8144_v24 = vadd.f32 %v14498_v43, %v17476_v17  ;;  %v14565_v43 = vadd.f32 %v17533_v42, %v17531_v40 }
 0x539   :  { %18411 = vst [vmem:[#allocation51_spill] sm:$0xff] %v17627_v32  ;;  %v17629_v35 = vpop.f32.mrf.mxu1 }
 0x53a   :  { %18412 = vst [vmem:[#allocation52_spill] sm:$0xff] %v17629_v35  ;;  %v17631_v11 = vpop.f32.mrf.mxu0  ;;  %v14501_v35 = vadd.f32 %v14500_v12, %v17529_v2  ;;  %v14507_v2 = vadd.f32 %v17547_v22, %v17543_v23 }
 0x53b   :  { %18413 = vst [vmem:[#allocation53_spill] sm:$0xff] %v17631_v11  ;;  %v17633_v57 = vpop.f32.mrf.mxu1 }
 0x53c   :  { %18414 = vst [vmem:[#allocation54_spill] sm:$0xff] %v17633_v57  ;;  %v17635_v29 = vpop.f32.mrf.mxu0  ;;  %v14562_v57 = vadd.f32 %v17527_v61, %v17523_v14 }
 0x53d   :  { %18415 = vst [vmem:[#allocation55_spill] sm:$0xff] %v17635_v29  ;;  %v17638_v21 = vpop.f32.mrf.mxu1 }
 0x53e   :  { %18416 = vst [vmem:[#allocation56_spill] sm:$0xff] %v17638_v21  ;;  %v17640_v31 = vpop.f32.mrf.mxu0  ;;  %v8241_v38 = vadd.f32 %v14562_v57, %v8144_v24  ;;  %v8147_v21 = vadd.f32 %v14501_v35, %v17479_v45  ;;  %v14568_v45 = vadd.f32 %v17541_v51, %v17537_v37 }
 0x53f   :  { %18417 = vst [vmem:[#allocation57_spill] sm:$0xff] %v17640_v31  ;;  %v17642_v47 = vpop.f32.mrf.mxu1 }
 0x540   :  { %18418 = vst [vmem:[#allocation58_spill] sm:$0xff] %v17642_v47  ;;  %v17644_v26 = vpop.f32.mrf.mxu0  ;;  %v14504_v47 = vadd.f32 %v17539_v39, %v17535_v13  ;;  %v8244_v61 = vadd.f32 %v14565_v43, %v8147_v21  ;;  %v14510_v13 = vadd.f32 %v17555_v34, %v17551_v46  ;;  %v8155_v39 = vadd.f32 %v14507_v2, %v17485_v27 }
 0x541   :  { %18419 = vst [vmem:[#allocation59_spill] sm:$0xff] %v17644_v26  ;;  %v17648_v32 = vpop.f32.mrf.mxu1 }
 0x542   :  { %v14624_v11 = vpop.f32.mrf.mxu0  ;;  %v8152_v57 = vadd.f32 %v14504_v47, %v17482_v20  ;;  %v8160_v51 = vadd.f32 %v14510_v13, %v17488_v5  ;;  %v14577_v5 = vadd.f32 %v17565_v4, %v17561_v33  ;;  %v14583_v33 = vadd.f32 %v17581_v50, %v17577_v9 }
 0x543   :  { %v15154_v29 = vpop.f32.mrf.mxu1 }
 0x544   :  { %v14625_v28 = vpop.f32.mrf.mxu0  ;;  %v8249_v22 = vadd.f32 %v14568_v45, %v8152_v57 }
 0x545   :  { %v14626_v31 = vadd.f32 %v14625_v28, %v14624_v11  ;;  %v8434_v26 = vpop.f32.mrf.mxu1  ;;  %v14519_v28 = vadd.f32 %v17579_v49, %v17575_v3  ;;  %v14580_v3 = vadd.f32 %v17573_v7, %v17569_v55  ;;  %v14525_v55 = vadd.f32 %v17595_v41, %v17591_v62 }
 0x546   :  { %v14627_v30 = vpop.f32.mrf.mxu0 }
 0x547   :  { %v8338_v17 = vadd.f32 %v14626_v31, %v8241_v38  ;;  %v15155_v12 = vpop.f32.mrf.mxu1  ;;  %v14513_v31 = vadd.f32 %v17563_v59, %v17559_v1  ;;  %v14574_v59 = vadd.f32 %v17557_v44, %v17553_v25  ;;  %v8171_v49 = vadd.f32 %v14519_v28, %v17497_v52 }
 0x548   :  { %v14628_v14 = vpop.f32.mrf.mxu0 }
 0x549   :  { %v8435_v24 = vadd.f32 %v8434_v26, %v8338_v17  ;;  %v14629_v35 = vadd.f32 %v14628_v14, %v14627_v30  ;;  %v8437_v23 = vpop.f32.mrf.mxu1  ;;  %v14571_v26 = vadd.f32 %v17549_v6, %v17545_v60  ;;  %v8163_v46 = vadd.f32 %v14513_v31, %v17491_v56 }
 0x54a   :  { %v14630_v11 = vpop.f32.mrf.mxu0  ;;  %v8257_v25 = vadd.f32 %v14574_v59, %v8160_v51 }
 0x54b   :  { %v8497_v40 = vmax.f32 %v8435_v24, 0.0  ;;  %v8341_v42 = vadd.f32 %v14629_v35, %v8244_v61  ;;  %v8252_v27 = vadd.f32 %v14571_v26, %v8155_v39  ;;  %v17679_v38 = vpop.f32.mrf.mxu1  ;;  %v8260_v44 = vadd.f32 %v14577_v5, %v8163_v46  ;;  %v18420_v5 = vld [vmem:[#allocation19_spill] sm:$0xff] }
 0x54c   :  { %v14631_v21 = vpop.f32.mrf.mxu0 }
 0x54d   :  { %v8513_v47 = vsel %vm16265_vm0, %v8497_v40, 0.0  ;;  %v8438_v30 = vadd.f32 %v8437_v23, %v8341_v42  ;;  %v14632_v20 = vadd.f32 %v14631_v21, %v14630_v11  ;;  %v8450_v19 = vpop.f32.mrf.mxu1  ;;  %v17699_v40 = vadd.f32 %v14583_v33, %v8171_v49  ;;  %v18427_v49 = vld [vmem:[#allocation17_spill] sm:$0xff] }
 0x54e   :  { %8523 = vst [vmem:[#allocation2 + $0x5] sm:$0xff] %v8513_v47  ;;  %v14633_v37 = vpop.f32.mrf.mxu0  ;;  %v17703_v42 = vadd.f32 %v17589_v53, %v17585_v0  ;;  %v17713_v53 = vadd.f32 %v14525_v55, %v17503_v8 }
 0x54f   :  { %v8498_v34 = vmax.f32 %v8438_v30, 0.0  ;;  %v8346_v1 = vadd.f32 %v14632_v20, %v8249_v22  ;;  %v17705_v41 = vpop.f32.mrf.mxu1 }
 0x550   :  { %v14634_v60 = vpop.f32.mrf.mxu0 }
 0x551   :  { %v8514_v56 = vsel %vm16270_vm1, %v8498_v34, 0.0  ;;  %v8443_v6 = vadd.f32 %v15154_v29, %v8346_v1  ;;  %v14635_v43 = vadd.f32 %v14634_v60, %v14633_v37  ;;  %v14522_v29 = vadd.f32 %v17587_v48, %v17583_v36  ;;  %v8453_v8 = vpop.f32.mrf.mxu1 }
 0x552   :  { %8524 = vst [vmem:[#allocation2 + $0xd] sm:$0xff] %v8514_v56  ;;  %v14636_v17 = vpop.f32.mrf.mxu0  ;;  %v18421_v56 = vld [vmem:[#allocation35_spill] sm:$0xff] }
 0x553   :  { %v8499_v2 = vmax.f32 %v8443_v6, 0.0  ;;  %v8349_v58 = vadd.f32 %v14635_v43, %v8252_v27  ;;  %v17708_v23 = vadd.f32 %v14522_v29, %v17500_v15  ;;  %v14528_v6 = vadd.f32 %v18421_v56, %v18420_v5  ;;  %v15846_v5 = vld [vmem:[#allocation11 + $0x170] sm:$0xff]   ;;  %v15873_v56 = vld [vmem:[#allocation11 + $0x1b8] sm:$0xff]  }
 0x554   :  { %v14637_v4 = vpop.f32.mrf.mxu0 }
 0x555   :  { %v8515_v14 = vsel %vm16284_vm2, %v8499_v2, 0.0  ;;  %v8446_v61 = vadd.f32 %v15155_v12, %v8349_v58  ;;  %v14638_v57 = vadd.f32 %v14637_v4, %v14636_v17  ;;  %v8549_v24 = vld [vmem:[#allocation2] sm:$0xff]  ;;  %v17697_v12 = vadd.f32 %v14580_v3, %v8168_v54 }
 0x556   :  { %v8597_v63 = vld [vmem:[#allocation2 + $0x1] sm:$0xff]  ;;  %8525 = vst [vmem:[#allocation2 + $0x15] sm:$0xff] %v8515_v14  ;;  %v14639_v52 = vpop.f32.mrf.mxu0  ;;  %v13552_v7 = vpack.c.bf16 %v8549_v24, %v8549_v24 }
 0x557   :  { %v8645_v35 = vld [vmem:[#allocation2 + $0x2] sm:$0xff]  ;;  %v13560_v9 = vpack.c.bf16 %v8597_v63, %v8597_v63  ;;  %v8500_v48 = vmax.f32 %v8446_v61, 0.0  ;;  %v8354_v36 = vadd.f32 %v14638_v57, %v8257_v25 }
 0x558   :  { %v13568_v50 = vpack.c.bf16 %v8645_v35, %v8645_v35  ;;  %v8693_v45 = vld [vmem:[#allocation2 + $0x3] sm:$0xff]  ;;  %v14640_v62 = vpop.f32.mrf.mxu0  ;;  %8589 = vst [vmem:[#allocation3] sm:$0xf] %v13552_v7 }
 0x559   :  { %v8741_v11 = vld [vmem:[#allocation2 + $0x4] sm:$0xff]  ;;  %v13576_v18 = vpack.c.bf16 %v8693_v45, %v8693_v45  ;;  %8637 = vst [vmem:[#allocation3 + $0x4] sm:$0xf] %v13560_v9  ;;  %v8516_v21 = vsel %vm16301_vm3, %v8500_v48, 0.0  ;;  %v8451_v22 = vadd.f32 %v8450_v19, %v8354_v36  ;;  %v14641_v47 = vadd.f32 %v14640_v62, %v14639_v52  ;;  %v8742_v34 = vld [vmem:[#allocation2 + $0xc] sm:$0xff] }
 0x55a   :  { %v8789_v13 = vld [vmem:[#allocation2 + $0x5] sm:$0xff]  ;;  %v13584_v31 = vpack.c.bf16 %v8741_v11, %v8741_v11  ;;  %8685 = vst [vmem:[#allocation3 + $0x8] sm:$0xf] %v13568_v50  ;;  %8526 = vst [vmem:[#allocation2 + $0x1d] sm:$0xff] %v8516_v21  ;;  %v14642_v0 = vpop.f32.mrf.mxu0  ;;  %v8790_v1 = vld [vmem:[#allocation2 + $0xd] sm:$0xff]  ;;  %v13585_v16 = vpack.c.bf16 %v8742_v34, %v8742_v34 }
 0x55b   :  { %v13592_v39 = vpack.c.bf16 %v8789_v13, %v8789_v13  ;;  %v8550_v30 = vld [vmem:[#allocation2 + $0x8] sm:$0xff]  ;;  %8733 = vst [vmem:[#allocation3 + $0xc] sm:$0xf] %v13576_v18  ;;  %v8501_v10 = vmax.f32 %v8451_v22, 0.0  ;;  %v8357_v27 = vadd.f32 %v14641_v47, %v8260_v44  ;;  %v13593_v17 = vpack.c.bf16 %v8790_v1, %v8790_v1  ;;  %v17720_v18 = vpop.f32.mrf.mxu1  ;;  %v18426_v1 = vld [vmem:[#allocation45_spill] sm:$0xff] }
 0x55c   :  { %v8598_v20 = vld [vmem:[#allocation2 + $0x9] sm:$0xff]  ;;  %8781 = vst [vmem:[#allocation3 + $0x10] sm:$0xf] %v13584_v31  ;;  %v13553_v37 = vpack.c.bf16 %v8550_v30, %v8550_v30  ;;  %v14643_v43 = vpop.f32.mrf.mxu0  ;;  %8782 = vst [vmem:[#allocation3 + $0x40] sm:$0xf] %v13585_v16 }
 0x55d   :  { %v8646_v26 = vld [vmem:[#allocation2 + $0xa] sm:$0xff]  ;;  %v13561_v51 = vpack.c.bf16 %v8598_v20, %v8598_v20  ;;  %8829 = vst [vmem:[#allocation3 + $0x14] sm:$0xf] %v13592_v39  ;;  %v8517_v44 = vsel %vm16309_vm4, %v8501_v10, 0.0  ;;  %v8454_v33 = vadd.f32 %v8453_v8, %v8357_v27  ;;  %v14644_v19 = vadd.f32 %v14643_v43, %v14642_v0  ;;  %v8647_v14 = vld [vmem:[#allocation2 + $0x12] sm:$0xff] }
 0x55e   :  { %v13569_v46 = vpack.c.bf16 %v8646_v26, %v8646_v26  ;;  %v8694_v15 = vld [vmem:[#allocation2 + $0xb] sm:$0xff]  ;;  %8590 = vst [vmem:[#allocation3 + $0x30] sm:$0xf] %v13553_v37  ;;  %8527 = vst [vmem:[#allocation2 + $0x25] sm:$0xff] %v8517_v44  ;;  %v14645_v57 = vpop.f32.mrf.mxu0  ;;  %v13570_v35 = vpack.c.bf16 %v8647_v14, %v8647_v14  ;;  %v8695_v55 = vld [vmem:[#allocation2 + $0x13] sm:$0xff]  ;;  %v8184_v10 = vadd.f32 %v14528_v6, %v18426_v1 }
 0x55f   :  { %v13577_v59 = vpack.c.bf16 %v8694_v15, %v8694_v15  ;;  %v8837_v28 = vld [vmem:[#allocation2 + $0x6] sm:$0xff]  ;;  %8638 = vst [vmem:[#allocation3 + $0x34] sm:$0xf] %v13561_v51  ;;  %v8551_v4 = vld [vmem:[#allocation2 + $0x10] sm:$0xff]  ;;  %8830 = vst [vmem:[#allocation3 + $0x44] sm:$0xf] %v13593_v17  ;;  %v8362_v45 = vadd.f32 %v14644_v19, %v17697_v12  ;;  %v13578_v11 = vpack.c.bf16 %v8695_v55, %v8695_v55  ;;  %v8466_v19 = vpop.f32.mrf.mxu1 }
 0x560   :  { %v8885_v60 = vld [vmem:[#allocation2 + $0x7] sm:$0xff]  ;;  %8686 = vst [vmem:[#allocation3 + $0x38] sm:$0xf] %v13569_v46  ;;  %v13600_v25 = vpack.c.bf16 %v8837_v28, %v8837_v28  ;;  %v8599_v29 = vld [vmem:[#allocation2 + $0x11] sm:$0xff]  ;;  %v13554_v24 = vpack.c.bf16 %v8551_v4, %v8551_v4  ;;  %v8502_v50 = vmax.f32 %v8454_v33, 0.0  ;;  %v14646_v31 = vpop.f32.mrf.mxu0 }
 0x561   :  { %v13608_v2 = vpack.c.bf16 %v8885_v60, %v8885_v60  ;;  %v8933_v58 = vld [vmem:[#allocation2 + $0x8] sm:$0xff]  ;;  %8734 = vst [vmem:[#allocation3 + $0x3c] sm:$0xf] %v13577_v59  ;;  %v13562_v63 = vpack.c.bf16 %v8599_v29, %v8599_v29  ;;  %v8743_v48 = vld [vmem:[#allocation2 + $0x14] sm:$0xff]  ;;  %8687 = vst [vmem:[#allocation3 + $0x68] sm:$0xf] %v13570_v35  ;;  %v8459_v0 = vadd.f32 %v17679_v38, %v8362_v45 }
 0x562   :  { %v8981_v54 = vld [vmem:[#allocation2 + $0x9] sm:$0xff]  ;;  %v13616_v61 = vpack.c.bf16 %v8933_v58, %v8933_v58  ;;  %8877 = vst [vmem:[#allocation3 + $0x18] sm:$0xf] %v13600_v25  ;;  %v8791_v36 = vld [vmem:[#allocation2 + $0x15] sm:$0xff]  ;;  %8591 = vst [vmem:[#allocation3 + $0x60] sm:$0xf] %v13554_v24  ;;  %v13586_v39 = vpack.c.bf16 %v8743_v48, %v8743_v48  ;;  %v14647_v37 = vadd.f32 %v14646_v31, %v14645_v57  ;;  %v14648_v27 = vpop.f32.mrf.mxu0 }
 0x563   :  { %v9029_v3 = vld [vmem:[#allocation2 + $0xa] sm:$0xff]  ;;  %8925 = vst [vmem:[#allocation3 + $0x1c] sm:$0xf] %v13608_v2  ;;  %v13624_v9 = vpack.c.bf16 %v8981_v54, %v8981_v54  ;;  %8639 = vst [vmem:[#allocation3 + $0x64] sm:$0xf] %v13562_v63  ;;  %v13594_v21 = vpack.c.bf16 %v8791_v36, %v8791_v36  ;;  %v8518_v26 = vsel %vm16314_vm5, %v8502_v50, 0.0  ;;  %v8273_v54 = vadd.f32 %v17703_v42, %v17708_v23 }
 0x564   :  { %v8838_v52 = vld [vmem:[#allocation2 + $0xe] sm:$0xff]  ;;  %8973 = vst [vmem:[#allocation3 + $0x20] sm:$0xf] %v13616_v61  ;;  %v13632_v22 = vpack.c.bf16 %v9029_v3, %v9029_v3  ;;  %v15839_v51 = vld [vmem:[#allocation11 + $0x138] sm:$0xff]   ;;  %8735 = vst [vmem:[#allocation3 + $0x6c] sm:$0xf] %v13578_v11  ;;  %v8365_v43 = vadd.f32 %v14647_v37, %v17699_v40  ;;  %v14649_v4 = vpop.f32.mrf.mxu0  ;;  %v17750_v37 = vpop.f32.mrf.mxu1 }
 0x565   :  { %v8886_v7 = vld [vmem:[#allocation2 + $0xf] sm:$0xff]  ;;  %v13601_v13 = vpack.c.bf16 %v8838_v52, %v8838_v52  ;;  %9021 = vst [vmem:[#allocation3 + $0x24] sm:$0xf] %v13624_v9  ;;  %v8552_v46 = vld [vmem:[#allocation2 + $0x18] sm:$0xff]  ;;  %8528 = vst [vmem:[#allocation2 + $0x2d] sm:$0xff] %v8518_v26  ;;  %v8503_v38 = vmax.f32 %v8459_v0, 0.0  ;;  %v14650_v23 = vadd.f32 %v14649_v4, %v14648_v27 }
 0x566   :  { %v13609_v62 = vpack.c.bf16 %v8886_v7, %v8886_v7  ;;  %v18423_v47 = vld [vmem:[#allocation50_spill] sm:$0xff]  ;;  %v8600_v15 = vld [vmem:[#allocation2 + $0x19] sm:$0xff]  ;;  %v13555_v59 = vpack.c.bf16 %v8552_v46, %v8552_v46  ;;  %8783 = vst [vmem:[#allocation3 + $0x70] sm:$0xf] %v13586_v39  ;;  %8831 = vst [vmem:[#allocation3 + $0x74] sm:$0xf] %v13594_v21  ;;  %v8462_v42 = vadd.f32 %v17705_v41, %v8365_v43  ;;  %v14651_v7 = vpop.f32.mrf.mxu0 }
 0x567   :  { %v18424_v30 = vld [vmem:[#allocation34_spill] sm:$0xff]  ;;  %v8648_v34 = vld [vmem:[#allocation2 + $0x1a] sm:$0xff]  ;;  %8878 = vst [vmem:[#allocation3 + $0x48] sm:$0xf] %v13601_v13  ;;  %v13563_v16 = vpack.c.bf16 %v8600_v15, %v8600_v15  ;;  %9069 = vst [vmem:[#allocation3 + $0x28] sm:$0xf] %v13632_v22  ;;  %v8370_v31 = vadd.f32 %v14650_v23, %v8273_v54  ;;  %v8469_v23 = vpop.f32.mrf.mxu1 }
 0x568   :  { %v14589_v20 = vadd.f32 %v18424_v30, %v18423_v47  ;;  %v13571_v28 = vpack.c.bf16 %v8648_v34, %v8648_v34  ;;  %v8696_v60 = vld [vmem:[#allocation2 + $0x1b] sm:$0xff]  ;;  %8926 = vst [vmem:[#allocation3 + $0x4c] sm:$0xf] %v13609_v62  ;;  %v15834_v25 = vld [vmem:[#allocation3 + $0x4] ss:$48 sps:$4 sm:$0xff]   ;;  %v18430_v61 = vld [vmem:[#allocation38_spill] sm:$0xff]  ;;  %v14652_v46 = vpop.f32.mrf.mxu0 }
 0x569   :  { %v8744_v8 = vld [vmem:[#allocation2 + $0x1c] sm:$0xff]  ;;  %v13579_v2 = vpack.c.bf16 %v8696_v60, %v8696_v60  ;;  %v15874_v6 = vld [vmem:[#allocation11 + $0x1f0] sm:$0xff]   ;;  %v15835_v29 = vld [vmem:[#allocation3 + $0x8] ss:$48 sps:$4 sm:$0xff]   ;;  %8592 = vst [vmem:[#allocation3 + $0x90] sm:$0xf] %v13555_v59  ;;  %11068 = vmatprep.mubr.bf16.mxu1 %v15834_v25  ;;  %v14653_v27 = vadd.f32 %v14652_v46, %v14651_v7 }
 0x56a   :  { %v15832_v17 = vld [vmem:[#allocation3] ss:$48 sps:$4 sm:$0xff]   ;;  %v13587_v58 = vpack.c.bf16 %v8744_v8, %v8744_v8  ;;  %v17732_v3 = vadd.f32 %v14589_v20, %v17713_v53  ;;  %v15837_v14 = vld [vmem:[#allocation3 + $0xc] ss:$48 sps:$4 sm:$0xff]   ;;  %8640 = vst [vmem:[#allocation3 + $0x94] sm:$0xf] %v13563_v16 }
 0x56b   :  { %v18428_v44 = vld [vmem:[#allocation37_spill] sm:$0xff]  ;;  %8688 = vst [vmem:[#allocation3 + $0x98] sm:$0xf] %v13571_v28  ;;  %v8519_v63 = vsel %vm16336_vm6, %v8503_v38, 0.0  ;;  %8736 = vst [vmem:[#allocation3 + $0x9c] sm:$0xf] %v13579_v2  ;;  %11165 = vmatprep.mubr.bf16.mxu0 %v15837_v14  ;;  %11069 = vmatmul.mubr.bf16.vlgmr.msra.gmra.mxu1 %v15832_v17 }
 0x56c   :  { %v14531_v33 = vadd.f32 %v18428_v44, %v18427_v49  ;;  %v18429_v40 = vld [vmem:[#allocation33_spill] sm:$0xff]  ;;  %v15847_v53 = vld [vmem:[#allocation11 + $0x130] sm:$0xff]   ;;  %8784 = vst [vmem:[#allocation3 + $0xa0] sm:$0xf] %v13587_v58  ;;  %8529 = vst [vmem:[#allocation2 + $0x35] sm:$0xff] %v8519_v63  ;;  %v8504_v41 = vmax.f32 %v8462_v42, 0.0  ;;  %11166 = vmatmul.mubr.bf16.vlgmr.msra.gmra.mxu0 %v15835_v29  ;;  %14817 = vmatpush3.bf16.msra.mxu1 %v15839_v51 }
 0x56d   :  { %v14592_v57 = vadd.f32 %v18430_v61, %v18429_v40  ;;  %v8553_v35 = vld [vmem:[#allocation2 + $0x20] sm:$0xff]  ;;  %v15854_v13 = vld [vmem:[#allocation11 + $0x168] sm:$0xff]   ;;  %v15875_v48 = vld [vmem:[#allocation11 + $0x1b0] sm:$0xff]   ;;  %14818 = vmatprep.subr.bf16.mxu1 %v15846_v5  ;;  %14881 = vmatpush3.bf16.msra.mxu0 %v15873_v56  ;;  %v14654_v5 = vpop.f32.mrf.mxu0 }
 0x56e   :  { %v8601_v55 = vld [vmem:[#allocation2 + $0x21] sm:$0xff]  ;;  %v13556_v9 = vpack.c.bf16 %v8553_v35, %v8553_v35  ;;  %v18432_v21 = vld [vmem:[#allocation47_spill] sm:$0xff]  ;;  %v18433_v47 = vld [vmem:[#allocation20_spill] sm:$0xff]  ;;  %v8520_v1 = vsel %vm16341_vm7, %v8504_v41, 0.0  ;;  %14882 = vmatprep.subr.bf16.mxu0 %v15874_v6 }
 0x56f   :  { %v8649_v52 = vld [vmem:[#allocation2 + $0x22] sm:$0xff]  ;;  %v13564_v50 = vpack.c.bf16 %v8601_v55, %v8601_v55  ;;  %v17741_v36 = vadd.f32 %v14592_v57, %v8184_v10  ;;  %v8187_v22 = vadd.f32 %v14531_v33, %v18432_v21  ;;  %v18434_v30 = vld [vmem:[#allocation36_spill] sm:$0xff]  ;;  %v18436_v26 = vld [vmem:[#allocation39_spill] sm:$0xff]  ;;  %v8467_v10 = vadd.f32 %v8466_v19, %v8370_v31  ;;  %8530 = vst [vmem:[#allocation2 + $0x3d] sm:$0xff] %v8520_v1  ;;  %v14655_v35 = vpop.f32.mrf.mxu0 }
 0x570   :  { %v13572_v45 = vpack.c.bf16 %v8649_v52, %v8649_v52  ;;  %v8697_v11 = vld [vmem:[#allocation2 + $0x23] sm:$0xff]  ;;  %v14595_v20 = vadd.f32 %v18434_v30, %v18433_v47  ;;  %8593 = vst [vmem:[#allocation3 + $0xc0] sm:$0xf] %v13556_v9  ;;  %v8839_v15 = vld [vmem:[#allocation2 + $0x16] sm:$0xff]  ;;  %v8698_v56 = vld [vmem:[#allocation2 + $0x2b] sm:$0xff]  ;;  %v8373_v19 = vadd.f32 %v14653_v27, %v17732_v3  ;;  %14819 = vmatpush3.bf16.msra.mxu1 %v15847_v53 }
 0x571   :  { %v13580_v62 = vpack.c.bf16 %v8697_v11, %v8697_v11  ;;  %v17743_v39 = vld [vmem:[#allocation11 + $0x1e8] sm:$0xff]   ;;  %8641 = vst [vmem:[#allocation3 + $0xc4] sm:$0xf] %v13564_v50  ;;  %v8792_v51 = vld [vmem:[#allocation2 + $0x1d] sm:$0xff]  ;;  %v13602_v58 = vpack.c.bf16 %v8839_v15, %v8839_v15  ;;  %v18439_v49 = vld [vmem:[#allocation51_spill] sm:$0xff]  ;;  %v8505_v33 = vmax.f32 %v8467_v10, 0.0  ;;  %v13581_v6 = vpack.c.bf16 %v8698_v56, %v8698_v56  ;;  %14820 = vmatprep.subr.bf16.mxu1 %v15854_v13  ;;  %v14657_v13 = vpop.f32.mrf.mxu0 }
 0x572   :  { %v18435_v12 = vld [vmem:[#allocation18_spill] sm:$0xff]  ;;  %8689 = vst [vmem:[#allocation3 + $0xc8] sm:$0xf] %v13572_v45  ;;  %v13595_v8 = vpack.c.bf16 %v8792_v51, %v8792_v51  ;;  %v15862_v25 = vld [vmem:[#allocation11 + $0x160] sm:$0xff]   ;;  %v17759_v40 = vadd.f32 %v14595_v20, %v8187_v22  ;;  %v18442_v63 = vld [vmem:[#allocation40_spill] sm:$0xff]  ;;  %14883 = vmatpush3.bf16.msra.mxu0 %v15875_v48  ;;  %v8470_v45 = vadd.f32 %v8469_v23, %v8373_v19 }
 0x573   :  { %v14534_v0 = vadd.f32 %v18436_v26, %v18435_v12  ;;  %v8554_v59 = vld [vmem:[#allocation2 + $0x28] sm:$0xff]  ;;  %8737 = vst [vmem:[#allocation3 + $0xcc] sm:$0xf] %v13580_v62  ;;  %v15840_v4 = vld [vmem:[#allocation3 + $0x60] ss:$48 sps:$4 sm:$0xff]   ;;  %v18444_v52 = vld [vmem:[#allocation52_spill] sm:$0xff]  ;;  %v14656_v11 = vadd.f32 %v14655_v35, %v14654_v5  ;;  %14884 = vmatprep.subr.bf16.mxu0 %v17743_v39 }
 0x574   :  { %v8602_v16 = vld [vmem:[#allocation2 + $0x29] sm:$0xff]  ;;  %v13557_v38 = vpack.c.bf16 %v8554_v59, %v8554_v59  ;;  %v15842_v29 = vld [vmem:[#allocation3 + $0x64] ss:$48 sps:$4 sm:$0xff]   ;;  %8832 = vst [vmem:[#allocation3 + $0xa4] sm:$0xf] %v13595_v8  ;;  %v8531_v50 = vsel %vm16357_vm8, %v8505_v33, 0.0 }
 0x575   :  { %v8650_v28 = vld [vmem:[#allocation2 + $0x2a] sm:$0xff]  ;;  %v13565_v43 = vpack.c.bf16 %v8602_v16, %v8602_v16  ;;  %v17757_v14 = vld [vmem:[#allocation11 + $0x1e0] sm:$0xff]   ;;  %8879 = vst [vmem:[#allocation3 + $0x78] sm:$0xf] %v13602_v58  ;;  %11076 = vmatprep.mubr.bf16.mxu1 %v15842_v29  ;;  %8738 = vst [vmem:[#allocation3 + $0xfc] sm:$0xf] %v13581_v6  ;;  %v8378_v51 = vadd.f32 %v14656_v11, %v17741_v36  ;;  %v17781_v16 = vpop.f32.mrf.mxu1 }
 0x576   :  { %v15855_v60 = vld [vmem:[#allocation11 + $0x128] sm:$0xff]   ;;  %v13573_v17 = vpack.c.bf16 %v8650_v28, %v8650_v28  ;;  %v18440_v61 = vld [vmem:[#allocation49_spill] sm:$0xff]  ;;  %8594 = vst [vmem:[#allocation3 + $0xf0] sm:$0xf] %v13557_v38  ;;  %v18443_v53 = vld [vmem:[#allocation43_spill] sm:$0xff]  ;;  %11077 = vmatmul.mubr.bf16.gmra.mxu1 %v15840_v4  ;;  %v8506_v46 = vmax.f32 %v8470_v45, 0.0  ;;  %v14658_v28 = vpop.f32.mrf.mxu0 }
 0x577   :  { %v15885_v2 = vld [vmem:[#allocation11 + $0x1a8] sm:$0xff]   ;;  %v17762_v57 = vadd.f32 %v14534_v0, %v18440_v61  ;;  %v18441_v24 = vld [vmem:[#allocation41_spill] sm:$0xff]  ;;  %8642 = vst [vmem:[#allocation3 + $0xf4] sm:$0xf] %v13565_v43  ;;  %v17770_v7 = vadd.f32 %v18444_v52, %v18443_v53  ;;  %v8555_v41 = vld [vmem:[#allocation2 + $0x30] sm:$0xff]  ;;  %14821 = vmatpush3.bf16.msra.mxu1 %v15855_v60  ;;  %v14659_v56 = vadd.f32 %v14658_v28, %v14657_v13  ;;  %v8482_v45 = vpop.f32.mrf.mxu1 }
 0x578   :  { %v18438_v54 = vld [vmem:[#allocation42_spill] sm:$0xff]  ;;  %v17766_v42 = vadd.f32 %v18442_v63, %v18441_v24  ;;  %8690 = vst [vmem:[#allocation3 + $0xf8] sm:$0xf] %v13573_v17  ;;  %v8603_v31 = vld [vmem:[#allocation2 + $0x31] sm:$0xff]  ;;  %v15863_v21 = vld [vmem:[#allocation11 + $0x120] sm:$0xff]   ;;  %v13558_v48 = vpack.c.bf16 %v8555_v41, %v8555_v41  ;;  %14822 = vmatprep.subr.bf16.mxu1 %v15862_v25  ;;  %14885 = vmatpush3.bf16.msra.mxu0 %v15885_v2  ;;  %v8532_v43 = vsel %vm16363_vm9, %v8506_v46, 0.0  ;;  %v14660_v25 = vpop.f32.mrf.mxu0 }
 0x579   :  { %v14537_v44 = vadd.f32 %v18439_v49, %v18438_v54  ;;  %v15843_v55 = vld [vmem:[#allocation3 + $0x68] ss:$48 sps:$4 sm:$0xff]   ;;  %v15845_v3 = vld [vmem:[#allocation3 + $0x6c] ss:$48 sps:$4 sm:$0xff]   ;;  %8541 = vst [vmem:[#allocation2 + $0x55] sm:$0xff] %v8531_v50  ;;  %v13566_v22 = vpack.c.bf16 %v8603_v31, %v8603_v31  ;;  %v15887_v12 = vld [vmem:[#allocation11 + $0x1a0] sm:$0xff]   ;;  %v8475_v17 = vadd.f32 %v17720_v18, %v8378_v51  ;;  %14886 = vmatprep.subr.bf16.mxu0 %v17757_v14 }
 0x57a   :  { %v8651_v62 = vld [vmem:[#allocation2 + $0x32] sm:$0xff]  ;;  %11173 = vmatprep.mubr.bf16.mxu0 %v15845_v3  ;;  %v8840_v39 = vld [vmem:[#allocation2 + $0x1e] sm:$0xff]  ;;  %8595 = vst [vmem:[#allocation3 + $0x120] sm:$0xf] %v13558_v48  ;;  %8542 = vst [vmem:[#allocation2 + $0x5d] sm:$0xff] %v8532_v43  ;;  %v8381_v63 = vadd.f32 %v14659_v56, %v17759_v40  ;;  %v8289_v3 = vadd.f32 %v17766_v42, %v17762_v57  ;;  %v14661_v11 = vpop.f32.mrf.mxu0 }
 0x57b   :  { %v13574_v47 = vpack.c.bf16 %v8651_v62, %v8651_v62  ;;  %v8699_v30 = vld [vmem:[#allocation2 + $0x33] sm:$0xff]  ;;  %11174 = vmatmul.mubr.bf16.gmra.mxu0 %v15843_v55  ;;  %v18447_v10 = vld [vmem:[#allocation53_spill] sm:$0xff]  ;;  %8643 = vst [vmem:[#allocation3 + $0x124] sm:$0xf] %v13566_v22  ;;  %v13603_v8 = vpack.c.bf16 %v8840_v39, %v8840_v39  ;;  %v8507_v24 = vmax.f32 %v8475_v17, 0.0  ;;  %14823 = vmatpush3.bf16.msra.mxu1 %v15863_v21  ;;  %v18450_v52 = vld [vmem:[#allocation54_spill] sm:$0xff] }
 0x57c   :  { %v15870_v20 = vld [vmem:[#allocation11 + $0x158] sm:$0xff]   ;;  %v13582_v15 = vpack.c.bf16 %v8699_v30, %v8699_v30  ;;  %v18448_v27 = vld [vmem:[#allocation55_spill] sm:$0xff]  ;;  %v8745_v60 = vld [vmem:[#allocation2 + $0x24] sm:$0xff]  ;;  %14887 = vmatpush3.bf16.msra.mxu0 %v15887_v12  ;;  %v14662_v21 = vadd.f32 %v14661_v11, %v14660_v25  ;;  %v14663_v30 = vpop.f32.mrf.mxu0 }
 0x57d   :  { %v18446_v26 = vld [vmem:[#allocation44_spill] sm:$0xff]  ;;  %v14540_v59 = vadd.f32 %v18448_v27, %v18447_v10  ;;  %8691 = vst [vmem:[#allocation3 + $0x128] sm:$0xf] %v13574_v47  ;;  %v15882_v6 = vld [vmem:[#allocation11 + $0x150] sm:$0xff]   ;;  %8880 = vst [vmem:[#allocation3 + $0xa8] sm:$0xf] %v13603_v8  ;;  %v13588_v18 = vpack.c.bf16 %v8745_v60, %v8745_v60  ;;  %14824 = vmatprep.subr.bf16.mxu1 %v15870_v20 }
 0x57e   :  { %v8195_v0 = vadd.f32 %v14537_v44, %v18446_v26  ;;  %v17777_v34 = vld [vmem:[#allocation11 + $0x1d8] sm:$0xff]   ;;  %8739 = vst [vmem:[#allocation3 + $0x12c] sm:$0xf] %v13582_v15  ;;  %v15848_v23 = vld [vmem:[#allocation3 + $0xc0] ss:$48 sps:$4 sm:$0xff]   ;;  %v18452_v31 = vld [vmem:[#allocation46_spill] sm:$0xff]  ;;  %v8386_v39 = vadd.f32 %v14662_v21, %v8289_v3  ;;  %v14664_v60 = vpop.f32.mrf.mxu0 }
 0x57f   :  { %v8887_v1 = vld [vmem:[#allocation2 + $0x17] sm:$0xff]  ;;  %v8888_v36 = vld [vmem:[#allocation2 + $0x1f] sm:$0xff]  ;;  %8785 = vst [vmem:[#allocation3 + $0xd0] sm:$0xf] %v13588_v18  ;;  %v17800_v62 = vadd.f32 %v14540_v59, %v18452_v31  ;;  %v8533_v42 = vsel %vm16384_vm10, %v8507_v24, 0.0  ;;  %14888 = vmatprep.subr.bf16.mxu0 %v17777_v34  ;;  %v15894_v46 = vld [vmem:[#allocation11 + $0x148] sm:$0xff]  }
 0x580   :  { %v13610_v5 = vpack.c.bf16 %v8887_v1, %v8887_v1  ;;  %v8556_v58 = vld [vmem:[#allocation2 + $0x38] sm:$0xff]  ;;  %v13611_v33 = vpack.c.bf16 %v8888_v36, %v8888_v36  ;;  %v15850_v35 = vld [vmem:[#allocation3 + $0xc4] ss:$48 sps:$4 sm:$0xff]   ;;  %v17793_v53 = vadd.f32 %v17770_v7, %v8195_v0  ;;  %v8478_v7 = vadd.f32 %v17750_v37, %v8381_v63  ;;  %8543 = vst [vmem:[#allocation2 + $0x65] sm:$0xff] %v8533_v42  ;;  %v8746_v37 = vld [vmem:[#allocation2 + $0x2c] sm:$0xff] }
 0x581   :  { %v8604_v54 = vld [vmem:[#allocation2 + $0x39] sm:$0xff]  ;;  %v13559_v2 = vpack.c.bf16 %v8556_v58, %v8556_v58  ;;  %v17788_v14 = vld [vmem:[#allocation11 + $0x1d0] sm:$0xff]   ;;  %11084 = vmatprep.mubr.bf16.mxu1 %v15850_v35  ;;  %v17806_v10 = vld [vmem:[#allocation11 + $0x1c8] sm:$0xff]   ;;  %v13589_v27 = vpack.c.bf16 %v8746_v37, %v8746_v37 }
 0x582   :  { %v8652_v49 = vld [vmem:[#allocation2 + $0x3a] sm:$0xff]  ;;  %v13567_v19 = vpack.c.bf16 %v8604_v54, %v8604_v54  ;;  %8927 = vst [vmem:[#allocation3 + $0x7c] sm:$0xf] %v13610_v5  ;;  %8928 = vst [vmem:[#allocation3 + $0xac] sm:$0xf] %v13611_v33  ;;  %v9117_v13 = vld [vmem:[#allocation2 + $0x50] sm:$0xff]  ;;  %11085 = vmatmul.mubr.bf16.gmra.mxu1 %v15848_v23  ;;  %v17810_v5 = vpop.f32.mrf.mxu1 }
 0x583   :  { %v15872_v44 = vld [vmem:[#allocation11 + $0x118] sm:$0xff]   ;;  %v13575_v4 = vpack.c.bf16 %v8652_v49, %v8652_v49  ;;  %8596 = vst [vmem:[#allocation3 + $0x150] sm:$0xf] %v13559_v2  ;;  %v15884_v47 = vld [vmem:[#allocation11 + $0x110] sm:$0xff]   ;;  %v13648_v20 = vpack.c.bf16 %v9117_v13, %v9117_v13  ;;  %v8508_v15 = vmax.f32 %v8478_v7, 0.0  ;;  %v8793_v34 = vld [vmem:[#allocation2 + $0x25] sm:$0xff]  ;;  %v8483_v49 = vadd.f32 %v8482_v45, %v8386_v39 }
 0x584   :  { %v8700_v29 = vld [vmem:[#allocation2 + $0x3b] sm:$0xff]  ;;  %8644 = vst [vmem:[#allocation3 + $0x154] sm:$0xf] %v13567_v19  ;;  %v9165_v48 = vld [vmem:[#allocation2 + $0x51] sm:$0xff]  ;;  %14825 = vmatpush3.bf16.msra.mxu1 %v15872_v44  ;;  %v13596_v38 = vpack.c.bf16 %v8793_v34, %v8793_v34  ;;  %v8841_v17 = vld [vmem:[#allocation2 + $0x26] sm:$0xff]  ;;  %v14665_v44 = vadd.f32 %v14664_v60, %v14663_v30  ;;  %v8485_v31 = vpop.f32.mrf.mxu1 }
 0x585   :  { %v15897_v61 = vld [vmem:[#allocation11 + $0x198] sm:$0xff]   ;;  %v13583_v55 = vpack.c.bf16 %v8700_v29, %v8700_v29  ;;  %8692 = vst [vmem:[#allocation3 + $0x158] sm:$0xf] %v13575_v4  ;;  %v13656_v12 = vpack.c.bf16 %v9165_v48, %v9165_v48  ;;  %v15899_v51 = vld [vmem:[#allocation11 + $0x190] sm:$0xff]   ;;  %v18454_v28 = vld [vmem:[#allocation57_spill] sm:$0xff]  ;;  %14826 = vmatprep.subr.bf16.mxu1 %v15882_v6  ;;  %v8534_v54 = vsel %vm16397_vm11, %v8508_v15, 0.0  ;;  %v13604_v4 = vpack.c.bf16 %v8841_v17, %v8841_v17  ;;  %v14666_v29 = vpop.f32.mrf.mxu0 }
 0x586   :  { %v18451_v9 = vld [vmem:[#allocation56_spill] sm:$0xff]  ;;  %v8794_v59 = vld [vmem:[#allocation2 + $0x2d] sm:$0xff]  ;;  %9157 = vst [vmem:[#allocation3 + $0x180] sm:$0xf] %v13648_v20  ;;  %14889 = vmatpush3.bf16.msra.mxu0 %v15897_v61  ;;  %8786 = vst [vmem:[#allocation3 + $0x100] sm:$0xf] %v13589_v27  ;;  %v8389_v3 = vadd.f32 %v14665_v44, %v17793_v53 }
 0x587   :  { %v17797_v50 = vadd.f32 %v18451_v9, %v18450_v52  ;;  %v15851_v40 = vld [vmem:[#allocation3 + $0xc8] ss:$48 sps:$4 sm:$0xff]   ;;  %v15853_v41 = vld [vmem:[#allocation3 + $0xcc] ss:$48 sps:$4 sm:$0xff]   ;;  %8740 = vst [vmem:[#allocation3 + $0x15c] sm:$0xf] %v13583_v55  ;;  %v13597_v43 = vpack.c.bf16 %v8794_v59, %v8794_v59  ;;  %14890 = vmatprep.subr.bf16.mxu0 %v17788_v14  ;;  %v14667_v57 = vpop.f32.mrf.mxu0 }
 0x588   :  { %v9213_v22 = vld [vmem:[#allocation2 + $0x52] sm:$0xff]  ;;  %11181 = vmatprep.mubr.bf16.mxu0 %v15853_v41  ;;  %9205 = vst [vmem:[#allocation3 + $0x184] sm:$0xf] %v13656_v12  ;;  %v9214_v2 = vld [vmem:[#allocation2 + $0x5a] sm:$0xff]  ;;  %v15896_v19 = vld [vmem:[#allocation11 + $0x108] sm:$0xff]   ;;  %v8509_v55 = vmax.f32 %v8483_v49, 0.0  ;;  %14827 = vmatpush3.bf16.msra.mxu1 %v15884_v47 }
 0x589   :  { %v13664_v26 = vpack.c.bf16 %v9213_v22, %v9213_v22  ;;  %v9261_v0 = vld [vmem:[#allocation2 + $0x53] sm:$0xff]  ;;  %11182 = vmatmul.mubr.bf16.gmra.mxu0 %v15851_v40  ;;  %8544 = vst [vmem:[#allocation2 + $0x6d] sm:$0xff] %v8534_v54  ;;  %v13665_v18 = vpack.c.bf16 %v9214_v2, %v9214_v2  ;;  %v9262_v24 = vld [vmem:[#allocation2 + $0x5b] sm:$0xff]  ;;  %v15912_v23 = vld [vmem:[#allocation11 + $0x188] sm:$0xff]   ;;  %v8297_v11 = vadd.f32 %v17797_v50, %v17800_v62  ;;  %v14669_v12 = vpop.f32.mrf.mxu0 }
 0x58a   :  { %v13672_v1 = vpack.c.bf16 %v9261_v0, %v9261_v0  ;;  %v18455_v8 = vld [vmem:[#allocation59_spill] sm:$0xff]  ;;  %v9118_v33 = vld [vmem:[#allocation2 + $0x58] sm:$0xff]  ;;  %v15906_v63 = vld [vmem:[#allocation11 + $0x140] sm:$0xff]   ;;  %8833 = vst [vmem:[#allocation3 + $0xd4] sm:$0xf] %v13596_v38  ;;  %v13673_v45 = vpack.c.bf16 %v9262_v24, %v9262_v24  ;;  %14828 = vmatprep.subr.bf16.mxu1 %v15894_v46  ;;  %14891 = vmatpush3.bf16.msra.mxu0 %v15899_v51  ;;  %v8535_v48 = vsel %vm16408_vm12, %v8509_v55, 0.0 }
 0x58b   :  { %v14543_v36 = vadd.f32 %v18455_v8, %v18454_v28  ;;  %9253 = vst [vmem:[#allocation3 + $0x188] sm:$0xf] %v13664_v26  ;;  %v8842_v56 = vld [vmem:[#allocation2 + $0x2e] sm:$0xff]  ;;  %v9166_v25 = vld [vmem:[#allocation2 + $0x59] sm:$0xff]  ;;  %v13649_v6 = vpack.c.bf16 %v9118_v33, %v9118_v33  ;;  %8834 = vst [vmem:[#allocation3 + $0x104] sm:$0xf] %v13597_v43  ;;  %v8486_v22 = vadd.f32 %v8485_v31, %v8389_v3  ;;  %14892 = vmatprep.subr.bf16.mxu0 %v17806_v10  ;;  %v14670_v28 = vpop.f32.mrf.mxu0 }
 0x58c   :  { %9301 = vst [vmem:[#allocation3 + $0x18c] sm:$0xf] %v13672_v1  ;;  %v13657_v61 = vpack.c.bf16 %v9166_v25, %v9166_v25  ;;  %v13605_v35 = vpack.c.bf16 %v8842_v56, %v8842_v56  ;;  %v15856_v52 = vld [vmem:[#allocation3 + $0x120] ss:$48 sps:$4 sm:$0xff]   ;;  %v15858_v9 = vld [vmem:[#allocation3 + $0x124] ss:$48 sps:$4 sm:$0xff]   ;;  %v14668_v50 = vadd.f32 %v14667_v57, %v14666_v29  ;;  %14829 = vmatpush3.bf16.msra.mxu1 %v15896_v19 }
 0x58d   :  { %v15916_v14 = vld [vmem:[#allocation11 + $0x1c0] sm:$0xff]   ;;  %8881 = vst [vmem:[#allocation3 + $0xd8] sm:$0xf] %v13604_v4  ;;  %v18457_v40 = vld [vmem:[#allocation48_spill] sm:$0xff]  ;;  %9158 = vst [vmem:[#allocation3 + $0x1b0] sm:$0xf] %v13649_v6  ;;  %11092 = vmatprep.mubr.bf16.mxu1 %v15858_v9  ;;  %14830 = vmatprep.subr.bf16.mxu1 %v15906_v63  ;;  %v14671_v58 = vadd.f32 %v14670_v28, %v14669_v12 }
 0x58e   :  { %v8203_v41 = vadd.f32 %v14543_v36, %v18457_v40  ;;  %v15859_v42 = vld [vmem:[#allocation3 + $0x128] ss:$48 sps:$4 sm:$0xff]   ;;  %v15861_v7 = vld [vmem:[#allocation3 + $0x12c] ss:$48 sps:$4 sm:$0xff]   ;;  %9206 = vst [vmem:[#allocation3 + $0x1b4] sm:$0xf] %v13657_v61  ;;  %11093 = vmatmul.mubr.bf16.gmra.mxu1 %v15856_v52  ;;  %v8394_v39 = vadd.f32 %v14668_v50, %v8297_v11  ;;  %14893 = vmatpush3.bf16.msra.mxu0 %v15912_v23 }
 0x58f   :  { %9254 = vst [vmem:[#allocation3 + $0x1b8] sm:$0xf] %v13665_v18  ;;  %8882 = vst [vmem:[#allocation3 + $0x108] sm:$0xf] %v13605_v35  ;;  %v18458_v53 = vld [vmem:[#allocation58_spill] sm:$0xff]  ;;  %v9119_v62 = vld [vmem:[#allocation2 + $0x60] sm:$0xff]  ;;  %11189 = vmatprep.mubr.bf16.mxu0 %v15861_v7  ;;  %14894 = vmatprep.subr.bf16.mxu0 %v15916_v14 }
 0x590   :  { %v14607_v21 = vadd.f32 %v17648_v32, %v18458_v53  ;;  %9302 = vst [vmem:[#allocation3 + $0x1bc] sm:$0xf] %v13673_v45  ;;  %v9167_v47 = vld [vmem:[#allocation2 + $0x61] sm:$0xff]  ;;  %8545 = vst [vmem:[#allocation2 + $0x75] sm:$0xff] %v8535_v48  ;;  %v13650_v26 = vpack.c.bf16 %v9119_v62, %v9119_v62  ;;  %v15918_v37 = vld [vmem:[#allocation11 + $0x278] sm:$0xff]   ;;  %v8510_v15 = vmax.f32 %v8486_v22, 0.0  ;;  %v8491_v56 = vadd.f32 %v17781_v16, %v8394_v39 }
 0x591   :  { %v9215_v30 = vld [vmem:[#allocation2 + $0x62] sm:$0xff]  ;;  %v13658_v0 = vpack.c.bf16 %v9167_v47, %v9167_v47  ;;  %11190 = vmatmul.mubr.bf16.gmra.mxu0 %v15859_v42  ;;  %v8890_v34 = vld [vmem:[#allocation2 + $0x2f] sm:$0xff]  ;;  %v17824_v59 = vld [vmem:[#allocation11 + $0x2f8] sm:$0xff]  }
 0x592   :  { %v15908_v20 = vld [vmem:[#allocation11 + $0x100] sm:$0xff]   ;;  %v13666_v32 = vpack.c.bf16 %v9215_v30, %v9215_v30  ;;  %v8300_v10 = vadd.f32 %v14607_v21, %v8203_v41  ;;  %9159 = vst [vmem:[#allocation3 + $0x1e0] sm:$0xf] %v13650_v26  ;;  %v13613_v36 = vpack.c.bf16 %v8890_v34, %v8890_v34  ;;  %v8747_v60 = vld [vmem:[#allocation2 + $0x34] sm:$0xff]  ;;  %v8536_v17 = vsel %vm16414_vm13, %v8510_v15, 0.0  ;;  %v9120_v54 = vld [vmem:[#allocation2 + $0x68] sm:$0xff] }
 0x593   :  { %v9263_v46 = vld [vmem:[#allocation2 + $0x63] sm:$0xff]  ;;  %9207 = vst [vmem:[#allocation3 + $0x1e4] sm:$0xf] %v13658_v0  ;;  %v13590_v33 = vpack.c.bf16 %v8747_v60, %v8747_v60  ;;  %8546 = vst [vmem:[#allocation2 + $0x7d] sm:$0xff] %v8536_v17  ;;  %v13651_v25 = vpack.c.bf16 %v9120_v54, %v9120_v54  ;;  %v9264_v4 = vld [vmem:[#allocation2 + $0x6b] sm:$0xff]  ;;  %v8511_v6 = vmax.f32 %v8491_v56, 0.0  ;;  %14831 = vmatpush3.bf16.msra.mxu1 %v15908_v20 }
 0x594   :  { %v15917_v51 = vld [vmem:[#allocation11 + $0x180] sm:$0xff]   ;;  %v13674_v1 = vpack.c.bf16 %v9263_v46, %v9263_v46  ;;  %9255 = vst [vmem:[#allocation3 + $0x1e8] sm:$0xf] %v13666_v32  ;;  %v9168_v49 = vld [vmem:[#allocation2 + $0x69] sm:$0xff]  ;;  %8930 = vst [vmem:[#allocation3 + $0x10c] sm:$0xf] %v13613_v36  ;;  %v8397_v61 = vadd.f32 %v14671_v58, %v8300_v10  ;;  %v13675_v16 = vpack.c.bf16 %v9264_v4, %v9264_v4  ;;  %14944 = vmatprep.subr.bf16.mxu1 %v15918_v37 }
 0x595   :  { %v8889_v27 = vld [vmem:[#allocation2 + $0x27] sm:$0xff]  ;;  %v8748_v38 = vld [vmem:[#allocation2 + $0x3c] sm:$0xff]  ;;  %v13659_v2 = vpack.c.bf16 %v9168_v49, %v9168_v49  ;;  %8787 = vst [vmem:[#allocation3 + $0x130] sm:$0xf] %v13590_v33  ;;  %9160 = vst [vmem:[#allocation3 + $0x210] sm:$0xf] %v13651_v25  ;;  %14895 = vmatpush3.bf16.msra.mxu0 %v15917_v51 }
 0x596   :  { %v13612_v8 = vpack.c.bf16 %v8889_v27, %v8889_v27  ;;  %v9216_v44 = vld [vmem:[#allocation2 + $0x6a] sm:$0xff]  ;;  %9303 = vst [vmem:[#allocation3 + $0x1ec] sm:$0xf] %v13674_v1  ;;  %v13591_v29 = vpack.c.bf16 %v8748_v38, %v8748_v38  ;;  %v15866_v24 = vld [vmem:[#allocation3 + $0x184] ss:$48 sps:$4 sm:$0xff]   ;;  %v8537_v55 = vsel %vm16428_vm14, %v8511_v6, 0.0  ;;  %v8494_v3 = vadd.f32 %v17810_v5, %v8397_v61  ;;  %15008 = vmatprep.subr.bf16.mxu0 %v17824_v59 }
 0x597   :  { %v13667_v19 = vpack.c.bf16 %v9216_v44, %v9216_v44  ;;  %v15864_v18 = vld [vmem:[#allocation3 + $0x180] ss:$48 sps:$4 sm:$0xff]   ;;  %v15867_v63 = vld [vmem:[#allocation3 + $0x188] ss:$48 sps:$4 sm:$0xff]   ;;  %v15869_v23 = vld [vmem:[#allocation3 + $0x18c] ss:$48 sps:$4 sm:$0xff]   ;;  %11100 = vmatprep.mubr.bf16.mxu1 %v15866_v24 }
 0x598   :  { %8929 = vst [vmem:[#allocation3 + $0xdc] sm:$0xf] %v13612_v8  ;;  %9208 = vst [vmem:[#allocation3 + $0x214] sm:$0xf] %v13659_v2  ;;  %v9121_v52 = vld [vmem:[#allocation2 + $0x70] sm:$0xff]  ;;  %11197 = vmatprep.mubr.bf16.mxu0 %v15869_v23  ;;  %11101 = vmatmul.mubr.bf16.gmra.mxu1 %v15864_v18  ;;  %v8512_v31 = vmax.f32 %v8494_v3, 0.0 }
 0x599   :  { %9256 = vst [vmem:[#allocation3 + $0x218] sm:$0xf] %v13667_v19  ;;  %8788 = vst [vmem:[#allocation3 + $0x160] sm:$0xf] %v13591_v29  ;;  %v9169_v9 = vld [vmem:[#allocation2 + $0x71] sm:$0xff]  ;;  %v13652_v14 = vpack.c.bf16 %v9121_v52, %v9121_v52  ;;  %11198 = vmatmul.mubr.bf16.gmra.mxu0 %v15867_v63  ;;  %v8796_v7 = vld [vmem:[#allocation2 + $0x3d] sm:$0xff] }
 0x59a   :  { %9304 = vst [vmem:[#allocation3 + $0x21c] sm:$0xf] %v13675_v16  ;;  %v9217_v45 = vld [vmem:[#allocation2 + $0x72] sm:$0xff]  ;;  %8547 = vst [vmem:[#allocation2 + $0x85] sm:$0xff] %v8537_v55  ;;  %v13660_v11 = vpack.c.bf16 %v9169_v9, %v9169_v9  ;;  %v13599_v53 = vpack.c.bf16 %v8796_v7, %v8796_v7  ;;  %v8844_v13 = vld [vmem:[#allocation2 + $0x3e] sm:$0xff]  ;;  %v8538_v22 = vsel %vm16434_vm15, %v8512_v31, 0.0 }
 0x59b   :  { %v13668_v40 = vpack.c.bf16 %v9217_v45, %v9217_v45  ;;  %v9265_v41 = vld [vmem:[#allocation2 + $0x73] sm:$0xff]  ;;  %9161 = vst [vmem:[#allocation3 + $0x240] sm:$0xf] %v13652_v14  ;;  %v13607_v20 = vpack.c.bf16 %v8844_v13, %v8844_v13  ;;  %8548 = vst [vmem:[#allocation2 + $0x8d] sm:$0xff] %v8538_v22  ;;  %v9266_v32 = vld [vmem:[#allocation2 + $0x7b] sm:$0xff] }
 0x59c   :  { %v13676_v57 = vpack.c.bf16 %v9265_v41, %v9265_v41  ;;  %v8795_v42 = vld [vmem:[#allocation2 + $0x35] sm:$0xff]  ;;  %9209 = vst [vmem:[#allocation3 + $0x244] sm:$0xf] %v13660_v11  ;;  %8836 = vst [vmem:[#allocation3 + $0x164] sm:$0xf] %v13599_v53  ;;  %v13677_v37 = vpack.c.bf16 %v9266_v32, %v9266_v32  ;;  %v8892_v43 = vld [vmem:[#allocation2 + $0x3f] sm:$0xff] }
 0x59d   :  { %9257 = vst [vmem:[#allocation3 + $0x248] sm:$0xf] %v13668_v40  ;;  %v13598_v5 = vpack.c.bf16 %v8795_v42, %v8795_v42  ;;  %v8843_v21 = vld [vmem:[#allocation2 + $0x36] sm:$0xff]  ;;  %v15876_v46 = vld [vmem:[#allocation3 + $0x1e0] ss:$48 sps:$4 sm:$0xff]   ;;  %v13615_v56 = vpack.c.bf16 %v8892_v43, %v8892_v43  ;;  %v9359_v53 = vld [vmem:[#allocation2 + $0x65] sm:$0xff] }
 0x59e   :  { %v9122_v50 = vld [vmem:[#allocation2 + $0x78] sm:$0xff]  ;;  %9305 = vst [vmem:[#allocation3 + $0x24c] sm:$0xf] %v13676_v57  ;;  %v13606_v30 = vpack.c.bf16 %v8843_v21, %v8843_v21  ;;  %8884 = vst [vmem:[#allocation3 + $0x168] sm:$0xf] %v13607_v20  ;;  %v9311_v57 = vld [vmem:[#allocation2 + $0x64] sm:$0xff] }
 0x59f   :  { %v9170_v62 = vld [vmem:[#allocation2 + $0x79] sm:$0xff]  ;;  %v13653_v12 = vpack.c.bf16 %v9122_v50, %v9122_v50  ;;  %8835 = vst [vmem:[#allocation3 + $0x134] sm:$0xf] %v13598_v5  ;;  %v15878_v51 = vld [vmem:[#allocation3 + $0x1e4] ss:$48 sps:$4 sm:$0xff]   ;;  %v9312_v42 = vld [vmem:[#allocation2 + $0x6c] sm:$0xff]  ;;  %v13682_v7 = vpack.c.bf16 %v9311_v57, %v9311_v57  ;;  %v13690_v50 = vpack.c.bf16 %v9359_v53, %v9359_v53 }
 0x5a0   :  { %v9218_v47 = vld [vmem:[#allocation2 + $0x7a] sm:$0xff]  ;;  %v13661_v26 = vpack.c.bf16 %v9170_v62, %v9170_v62  ;;  %8883 = vst [vmem:[#allocation3 + $0x138] sm:$0xf] %v13606_v30  ;;  %11108 = vmatprep.mubr.bf16.mxu1 %v15878_v51  ;;  %9306 = vst [vmem:[#allocation3 + $0x27c] sm:$0xf] %v13677_v37  ;;  %v13683_v5 = vpack.c.bf16 %v9312_v42, %v9312_v42  ;;  %v9360_v21 = vld [vmem:[#allocation2 + $0x6d] sm:$0xff] }
 0x5a1   :  { %v13669_v0 = vpack.c.bf16 %v9218_v47, %v9218_v47  ;;  %v15879_v15 = vld [vmem:[#allocation3 + $0x1e8] ss:$48 sps:$4 sm:$0xff]   ;;  %v15881_v39 = vld [vmem:[#allocation3 + $0x1ec] ss:$48 sps:$4 sm:$0xff]   ;;  %9162 = vst [vmem:[#allocation3 + $0x270] sm:$0xf] %v13653_v12  ;;  %11109 = vmatmul.mubr.bf16.gmra.mxu1 %v15876_v46  ;;  %v13691_v62 = vpack.c.bf16 %v9360_v21, %v9360_v21 }
 0x5a2   :  { %9210 = vst [vmem:[#allocation3 + $0x274] sm:$0xf] %v13661_v26  ;;  %v9123_v1 = vld [vmem:[#allocation2 + $0x80] sm:$0xff]  ;;  %11205 = vmatprep.mubr.bf16.mxu0 %v15881_v39  ;;  %v8891_v38 = vld [vmem:[#allocation2 + $0x37] sm:$0xff]  ;;  %v9124_v49 = vld [vmem:[#allocation2 + $0x88] sm:$0xff] }
 0x5a3   :  { %9258 = vst [vmem:[#allocation3 + $0x278] sm:$0xf] %v13669_v0  ;;  %v9171_v27 = vld [vmem:[#allocation2 + $0x81] sm:$0xff]  ;;  %v13654_v10 = vpack.c.bf16 %v9123_v1, %v9123_v1  ;;  %11206 = vmatmul.mubr.bf16.gmra.mxu0 %v15879_v15  ;;  %v13614_v17 = vpack.c.bf16 %v8891_v38, %v8891_v38  ;;  %v9309_v58 = vld [vmem:[#allocation2 + $0x54] sm:$0xff]  ;;  %v9172_v44 = vld [vmem:[#allocation2 + $0x89] sm:$0xff]  ;;  %v13655_v19 = vpack.c.bf16 %v9124_v49, %v9124_v49 }
 0x5a4   :  { %v9219_v34 = vld [vmem:[#allocation2 + $0x82] sm:$0xff]  ;;  %v13662_v28 = vpack.c.bf16 %v9171_v27, %v9171_v27  ;;  %v9220_v33 = vld [vmem:[#allocation2 + $0x8a] sm:$0xff]  ;;  %v13680_v25 = vpack.c.bf16 %v9309_v58, %v9309_v58  ;;  %v13663_v4 = vpack.c.bf16 %v9172_v44, %v9172_v44  ;;  %8932 = vst [vmem:[#allocation3 + $0x16c] sm:$0xf] %v13615_v56  ;;  %v9357_v23 = vld [vmem:[#allocation2 + $0x55] sm:$0xff] }
 0x5a5   :  { %v13670_v8 = vpack.c.bf16 %v9219_v34, %v9219_v34  ;;  %v9267_v36 = vld [vmem:[#allocation2 + $0x83] sm:$0xff]  ;;  %9163 = vst [vmem:[#allocation3 + $0x2a0] sm:$0xf] %v13654_v10  ;;  %v13671_v29 = vpack.c.bf16 %v9220_v33, %v9220_v33  ;;  %v9268_v6 = vld [vmem:[#allocation2 + $0x8b] sm:$0xff]  ;;  %8931 = vst [vmem:[#allocation3 + $0x13c] sm:$0xf] %v13614_v17  ;;  %v13688_v55 = vpack.c.bf16 %v9357_v23, %v9357_v23 }
 0x5a6   :  { %v13678_v60 = vpack.c.bf16 %v9267_v36, %v9267_v36  ;;  %9211 = vst [vmem:[#allocation3 + $0x2a4] sm:$0xf] %v13662_v28  ;;  %v9310_v54 = vld [vmem:[#allocation2 + $0x5c] sm:$0xff]  ;;  %v13679_v24 = vpack.c.bf16 %v9268_v6, %v9268_v6  ;;  %9349 = vst [vmem:[#allocation3 + $0x190] sm:$0xf] %v13680_v25  ;;  %v9407_v12 = vld [vmem:[#allocation2 + $0x66] sm:$0xff] }
 0x5a7   :  { %9259 = vst [vmem:[#allocation3 + $0x2a8] sm:$0xf] %v13670_v8  ;;  %v13681_v2 = vpack.c.bf16 %v9310_v54, %v9310_v54  ;;  %v15893_v63 = vld [vmem:[#allocation3 + $0x24c] ss:$48 sps:$4 sm:$0xff]   ;;  %9164 = vst [vmem:[#allocation3 + $0x2d0] sm:$0xf] %v13655_v19  ;;  %v13698_v32 = vpack.c.bf16 %v9407_v12, %v9407_v12 }
 0x5a8   :  { %9307 = vst [vmem:[#allocation3 + $0x2ac] sm:$0xf] %v13678_v60  ;;  %v15888_v61 = vld [vmem:[#allocation3 + $0x240] ss:$48 sps:$4 sm:$0xff]   ;;  %9212 = vst [vmem:[#allocation3 + $0x2d4] sm:$0xf] %v13663_v4  ;;  %11213 = vmatprep.mubr.bf16.mxu0 %v15893_v63 }
 0x5a9   :  { %v15890_v18 = vld [vmem:[#allocation3 + $0x244] ss:$48 sps:$4 sm:$0xff]   ;;  %9350 = vst [vmem:[#allocation3 + $0x1c0] sm:$0xf] %v13681_v2  ;;  %9260 = vst [vmem:[#allocation3 + $0x2d8] sm:$0xf] %v13671_v29 }
 0x5aa   :  { %v15891_v16 = vld [vmem:[#allocation3 + $0x248] ss:$48 sps:$4 sm:$0xff]   ;;  %11116 = vmatprep.mubr.bf16.mxu1 %v15890_v18  ;;  %9308 = vst [vmem:[#allocation3 + $0x2dc] sm:$0xf] %v13679_v24  ;;  %v9358_v35 = vld [vmem:[#allocation2 + $0x5d] sm:$0xff]  ;;  %v9408_v26 = vld [vmem:[#allocation2 + $0x6e] sm:$0xff] }
 0x5ab   :  { %11117 = vmatmul.mubr.bf16.gmra.mxu1 %v15888_v61  ;;  %v9405_v3 = vld [vmem:[#allocation2 + $0x56] sm:$0xff]  ;;  %v9406_v52 = vld [vmem:[#allocation2 + $0x5e] sm:$0xff]  ;;  %11214 = vmatmul.mubr.bf16.gmra.mxu0 %v15891_v16  ;;  %v13689_v9 = vpack.c.bf16 %v9358_v35, %v9358_v35  ;;  %9397 = vst [vmem:[#allocation3 + $0x194] sm:$0xf] %v13688_v55  ;;  %9351 = vst [vmem:[#allocation3 + $0x1f0] sm:$0xf] %v13682_v7  ;;  %v13699_v46 = vpack.c.bf16 %v9408_v26, %v9408_v26 }
 0x5ac   :  { %v13696_v45 = vpack.c.bf16 %v9405_v3, %v9405_v3  ;;  %v13697_v14 = vpack.c.bf16 %v9406_v52, %v9406_v52  ;;  %v9453_v11 = vld [vmem:[#allocation2 + $0x57] sm:$0xff]  ;;  %v9454_v40 = vld [vmem:[#allocation2 + $0x5f] sm:$0xff]  ;;  %9352 = vst [vmem:[#allocation3 + $0x220] sm:$0xf] %v13683_v5  ;;  %9399 = vst [vmem:[#allocation3 + $0x1f4] sm:$0xf] %v13690_v50 }
 0x5ad   :  { %v13704_v41 = vpack.c.bf16 %v9453_v11, %v9453_v11  ;;  %v13705_v31 = vpack.c.bf16 %v9454_v40, %v9454_v40  ;;  %9398 = vst [vmem:[#allocation3 + $0x1c4] sm:$0xf] %v13689_v9  ;;  %v15911_v22 = vld [vmem:[#allocation3 + $0x14] ss:$48 sps:$4 sm:$0xff]   ;;  %v15915_v20 = vld [vmem:[#allocation3 + $0x1c] ss:$48 sps:$4 sm:$0xff]  }
 0x5ae   :  { %9445 = vst [vmem:[#allocation3 + $0x198] sm:$0xf] %v13696_v45  ;;  %9446 = vst [vmem:[#allocation3 + $0x1c8] sm:$0xf] %v13697_v14  ;;  %v15900_v13 = vld [vmem:[#allocation3 + $0x2a0] ss:$48 sps:$4 sm:$0xff]  }
 0x5af   :  { %9493 = vst [vmem:[#allocation3 + $0x19c] sm:$0xf] %v13704_v41  ;;  %9494 = vst [vmem:[#allocation3 + $0x1cc] sm:$0xf] %v13705_v31  ;;  %v15902_v48 = vld [vmem:[#allocation3 + $0x2a4] ss:$48 sps:$4 sm:$0xff]  }
 0x5b0   :  { %v15903_v47 = vld [vmem:[#allocation3 + $0x2a8] ss:$48 sps:$4 sm:$0xff]   ;;  %11124 = vmatprep.mubr.bf16.mxu1 %v15902_v48  ;;  %9400 = vst [vmem:[#allocation3 + $0x224] sm:$0xf] %v13691_v62  ;;  %v9456_v51 = vld [vmem:[#allocation2 + $0x6f] sm:$0xff]  ;;  %v9314_v39 = vld [vmem:[#allocation2 + $0x7c] sm:$0xff] }
 0x5b1   :  { %v15905_v30 = vld [vmem:[#allocation3 + $0x2ac] ss:$48 sps:$4 sm:$0xff]   ;;  %v9313_v15 = vld [vmem:[#allocation2 + $0x74] sm:$0xff]  ;;  %v13707_v1 = vpack.c.bf16 %v9456_v51, %v9456_v51  ;;  %v13685_v34 = vpack.c.bf16 %v9314_v39, %v9314_v39  ;;  %9447 = vst [vmem:[#allocation3 + $0x1f8] sm:$0xf] %v13698_v32  ;;  %v9315_v2 = vld [vmem:[#allocation2 + $0x84] sm:$0xff] }
 0x5b2   :  { %v9455_v0 = vld [vmem:[#allocation2 + $0x67] sm:$0xff]  ;;  %11221 = vmatprep.mubr.bf16.mxu0 %v15905_v30  ;;  %v13684_v27 = vpack.c.bf16 %v9313_v15, %v9313_v15  ;;  %v9361_v10 = vld [vmem:[#allocation2 + $0x75] sm:$0xff]  ;;  %v9362_v28 = vld [vmem:[#allocation2 + $0x7d] sm:$0xff]  ;;  %9448 = vst [vmem:[#allocation3 + $0x228] sm:$0xf] %v13699_v46  ;;  %v13686_v61 = vpack.c.bf16 %v9315_v2, %v9315_v2 }
 0x5b3   :  { %11125 = vmatmul.mubr.bf16.gmra.mxu1 %v15900_v13  ;;  %v13706_v37 = vpack.c.bf16 %v9455_v0, %v9455_v0  ;;  %11222 = vmatmul.mubr.bf16.gmra.mxu0 %v15903_v47  ;;  %v13692_v8 = vpack.c.bf16 %v9361_v10, %v9361_v10  ;;  %v13693_v36 = vpack.c.bf16 %v9362_v28, %v9362_v28  ;;  %v15909_v60 = vld [vmem:[#allocation3 + $0x10] ss:$48 sps:$4 sm:$0xff]   ;;  %v15925_v38 = vld [vmem:[#allocation11 + $0x238] sm:$0xff]   ;;  %v15921_v19 = vld [vmem:[#allocation3 + $0x74] ss:$48 sps:$4 sm:$0xff]  }
 0x5b4   :  { %11262 = vmatprep.mubr.bf16.mxu1 %v15911_v22  ;;  %11359 = vmatprep.mubr.bf16.mxu0 %v15915_v20  ;;  %9496 = vst [vmem:[#allocation3 + $0x22c] sm:$0xf] %v13707_v1  ;;  %9353 = vst [vmem:[#allocation3 + $0x250] sm:$0xf] %v13684_v27  ;;  %v9409_v43 = vld [vmem:[#allocation2 + $0x76] sm:$0xff]  ;;  %v9410_v17 = vld [vmem:[#allocation2 + $0x7e] sm:$0xff] }
 0x5b5   :  { %9495 = vst [vmem:[#allocation3 + $0x1fc] sm:$0xf] %v13706_v37  ;;  %9354 = vst [vmem:[#allocation3 + $0x280] sm:$0xf] %v13685_v34  ;;  %v15913_v56 = vld [vmem:[#allocation3 + $0x18] ss:$48 sps:$4 sm:$0xff]   ;;  %v13700_v49 = vpack.c.bf16 %v9409_v43, %v9409_v43  ;;  %v13701_v44 = vpack.c.bf16 %v9410_v17, %v9410_v17 }
 0x5b6   :  { %9401 = vst [vmem:[#allocation3 + $0x254] sm:$0xf] %v13692_v8  ;;  %9402 = vst [vmem:[#allocation3 + $0x284] sm:$0xf] %v13693_v36  ;;  %v15926_v58 = vld [vmem:[#allocation11 + $0x270] sm:$0xff]   ;;  %v17835_v54 = vld [vmem:[#allocation11 + $0x2b8] sm:$0xff]  }
 0x5b7   :  { %v9457_v33 = vld [vmem:[#allocation2 + $0x77] sm:$0xff]  ;;  %v9458_v25 = vld [vmem:[#allocation2 + $0x7f] sm:$0xff]  ;;  %9449 = vst [vmem:[#allocation3 + $0x258] sm:$0xf] %v13700_v49  ;;  %9450 = vst [vmem:[#allocation3 + $0x288] sm:$0xf] %v13701_v44 }
 0x5b8   :  { %v17837_v4 = vld [vmem:[#allocation11 + $0x2f0] sm:$0xff]   ;;  %v13708_v29 = vpack.c.bf16 %v9457_v33, %v9457_v33  ;;  %v13709_v6 = vpack.c.bf16 %v9458_v25, %v9458_v25  ;;  %v15924_v18 = vld [vmem:[#allocation3 + $0x7c] ss:$48 sps:$4 sm:$0xff]   ;;  %9355 = vst [vmem:[#allocation3 + $0x2b0] sm:$0xf] %v13686_v61  ;;  %v15942_v13 = vld [vmem:[#allocation11 + $0x260] sm:$0xff]  }
 0x5b9   :  { %v9316_v24 = vld [vmem:[#allocation2 + $0x8c] sm:$0xff]  ;;  %v15922_v62 = vld [vmem:[#allocation3 + $0x78] ss:$48 sps:$4 sm:$0xff]   ;;  %v15929_v20 = vld [vmem:[#allocation3 + $0xd4] ss:$48 sps:$4 sm:$0xff]  }
 0x5ba   :  { %v9363_v16 = vld [vmem:[#allocation2 + $0x85] sm:$0xff]  ;;  %9497 = vst [vmem:[#allocation3 + $0x25c] sm:$0xf] %v13708_v29  ;;  %9498 = vst [vmem:[#allocation3 + $0x28c] sm:$0xf] %v13709_v6  ;;  %v13687_v63 = vpack.c.bf16 %v9316_v24, %v9316_v24  ;;  %v9364_v23 = vld [vmem:[#allocation2 + $0x8d] sm:$0xff] }
 0x5bb   :  { %11263 = vmatmul.mubr.bf16.vlgmr.msra.gmra.mxu1 %v15909_v60  ;;  %v13694_v35 = vpack.c.bf16 %v9363_v16, %v9363_v16  ;;  %v9411_v55 = vld [vmem:[#allocation2 + $0x86] sm:$0xff]  ;;  %v9412_v3 = vld [vmem:[#allocation2 + $0x8e] sm:$0xff]  ;;  %11360 = vmatmul.mubr.bf16.vlgmr.msra.gmra.mxu0 %v15913_v56  ;;  %v13695_v52 = vpack.c.bf16 %v9364_v23, %v9364_v23  ;;  %v8935_v46 = vld [vmem:[#allocation2 + $0x18] sm:$0xff] }
 0x5bc   :  { %11270 = vmatprep.mubr.bf16.mxu1 %v15921_v19  ;;  %v13702_v9 = vpack.c.bf16 %v9411_v55, %v9411_v55  ;;  %v13703_v45 = vpack.c.bf16 %v9412_v3, %v9412_v3  ;;  %v9459_v14 = vld [vmem:[#allocation2 + $0x87] sm:$0xff]  ;;  %v9460_v11 = vld [vmem:[#allocation2 + $0x8f] sm:$0xff]  ;;  %11367 = vmatprep.mubr.bf16.mxu0 %v15924_v18  ;;  %9356 = vst [vmem:[#allocation3 + $0x2e0] sm:$0xf] %v13687_v63  ;;  %v8983_v15 = vld [vmem:[#allocation2 + $0x19] sm:$0xff] }
 0x5bd   :  { %14945 = vmatpush3.bf16.msra.mxu1 %v15925_v38  ;;  %v15933_v40 = vld [vmem:[#allocation11 + $0x230] sm:$0xff]   ;;  %v15934_v41 = vld [vmem:[#allocation11 + $0x268] sm:$0xff]   ;;  %9403 = vst [vmem:[#allocation3 + $0x2b4] sm:$0xf] %v13694_v35  ;;  %v13710_v31 = vpack.c.bf16 %v9459_v14, %v9459_v14  ;;  %v13711_v57 = vpack.c.bf16 %v9460_v11, %v9460_v11  ;;  %15009 = vmatpush3.bf16.msra.mxu0 %v17835_v54  ;;  %9404 = vst [vmem:[#allocation3 + $0x2e4] sm:$0xf] %v13695_v52 }
 0x5be   :  { %14946 = vmatprep.subr.bf16.mxu1 %v15926_v58  ;;  %v17840_v42 = vld [vmem:[#allocation11 + $0x2b0] sm:$0xff]   ;;  %9451 = vst [vmem:[#allocation3 + $0x2b8] sm:$0xf] %v13702_v9  ;;  %9452 = vst [vmem:[#allocation3 + $0x2e8] sm:$0xf] %v13703_v45  ;;  %v15941_v7 = vld [vmem:[#allocation11 + $0x228] sm:$0xff]   ;;  %15010 = vmatprep.subr.bf16.mxu0 %v17837_v4  ;;  %v13618_v37 = vpack.c.bf16 %v8935_v46, %v8935_v46  ;;  %v13626_v34 = vpack.c.bf16 %v8983_v15, %v8983_v15 }
 0x5bf   :  { %v17843_v5 = vld [vmem:[#allocation11 + $0x2e8] sm:$0xff]   ;;  %9499 = vst [vmem:[#allocation3 + $0x2bc] sm:$0xf] %v13710_v31  ;;  %9500 = vst [vmem:[#allocation3 + $0x2ec] sm:$0xf] %v13711_v57  ;;  %v8934_v53 = vld [vmem:[#allocation2 + $0x10] sm:$0xff] }
 0x5c0   :  { %v15919_v21 = vld [vmem:[#allocation3 + $0x70] ss:$48 sps:$4 sm:$0xff]   ;;  %v17845_v48 = vld [vmem:[#allocation11 + $0x2a8] sm:$0xff]   ;;  %v13617_v22 = vpack.c.bf16 %v8934_v53, %v8934_v53  ;;  %v15950_v39 = vld [vmem:[#allocation11 + $0x258] sm:$0xff]   ;;  %8975 = vst [vmem:[#allocation3 + $0x80] sm:$0xf] %v13618_v37 }
 0x5c1   :  { %v8982_v50 = vld [vmem:[#allocation2 + $0x11] sm:$0xff]  ;;  %14947 = vmatpush3.bf16.msra.mxu1 %v15933_v40  ;;  %15011 = vmatpush3.bf16.msra.mxu0 %v17840_v42  ;;  %v15932_v26 = vld [vmem:[#allocation3 + $0xdc] ss:$48 sps:$4 sm:$0xff]   ;;  %v15949_v0 = vld [vmem:[#allocation11 + $0x220] sm:$0xff]   ;;  %9023 = vst [vmem:[#allocation3 + $0x84] sm:$0xf] %v13626_v34 }
 0x5c2   :  { %v13625_v47 = vpack.c.bf16 %v8982_v50, %v8982_v50  ;;  %v9030_v30 = vld [vmem:[#allocation2 + $0x12] sm:$0xff]  ;;  %14948 = vmatprep.subr.bf16.mxu1 %v15934_v41  ;;  %8974 = vst [vmem:[#allocation3 + $0x50] sm:$0xf] %v13617_v22  ;;  %15012 = vmatprep.subr.bf16.mxu0 %v17843_v5  ;;  %v17849_v32 = vld [vmem:[#allocation11 + $0x2e0] sm:$0xff]   ;;  %v8937_v49 = vld [vmem:[#allocation2 + $0x28] sm:$0xff] }
 0x5c3   :  { %v13633_v12 = vpack.c.bf16 %v9030_v30, %v9030_v30  ;;  %11271 = vmatmul.mubr.bf16.gmra.mxu1 %v15919_v21  ;;  %11368 = vmatmul.mubr.bf16.gmra.mxu0 %v15922_v62  ;;  %v8936_v51 = vld [vmem:[#allocation2 + $0x20] sm:$0xff]  ;;  %v17854_v10 = vld [vmem:[#allocation11 + $0x2d8] sm:$0xff]   ;;  %v15962_v38 = vld [vmem:[#allocation11 + $0x250] sm:$0xff]   ;;  %v13620_v25 = vpack.c.bf16 %v8937_v49, %v8937_v49 }
 0x5c4   :  { %9022 = vst [vmem:[#allocation3 + $0x54] sm:$0xf] %v13625_v47  ;;  %11278 = vmatprep.mubr.bf16.mxu1 %v15929_v20  ;;  %11375 = vmatprep.mubr.bf16.mxu0 %v15932_v26  ;;  %v17851_v1 = vld [vmem:[#allocation11 + $0x2a0] sm:$0xff]   ;;  %v13619_v27 = vpack.c.bf16 %v8936_v51, %v8936_v51  ;;  %v15958_v8 = vld [vmem:[#allocation11 + $0x218] sm:$0xff]   ;;  %v8938_v44 = vld [vmem:[#allocation2 + $0x30] sm:$0xff] }
 0x5c5   :  { %9070 = vst [vmem:[#allocation3 + $0x58] sm:$0xf] %v13633_v12  ;;  %14949 = vmatpush3.bf16.msra.mxu1 %v15941_v7  ;;  %15013 = vmatpush3.bf16.msra.mxu0 %v17845_v48  ;;  %v15927_v28 = vld [vmem:[#allocation3 + $0xd0] ss:$48 sps:$4 sm:$0xff]   ;;  %v17857_v43 = vld [vmem:[#allocation11 + $0x298] sm:$0xff]   ;;  %v13621_v2 = vpack.c.bf16 %v8938_v44, %v8938_v44  ;;  %v15974_v3 = vld [vmem:[#allocation11 + $0x248] sm:$0xff]  }
 0x5c6   :  { %14950 = vmatprep.subr.bf16.mxu1 %v15942_v13  ;;  %15014 = vmatprep.subr.bf16.mxu0 %v17849_v32  ;;  %8976 = vst [vmem:[#allocation3 + $0xb0] sm:$0xf] %v13619_v27  ;;  %v8984_v36 = vld [vmem:[#allocation2 + $0x21] sm:$0xff]  ;;  %v8985_v19 = vld [vmem:[#allocation2 + $0x29] sm:$0xff]  ;;  %v8986_v29 = vld [vmem:[#allocation2 + $0x31] sm:$0xff] }
 0x5c7   :  { %v9031_v60 = vld [vmem:[#allocation2 + $0x1a] sm:$0xff]  ;;  %v13627_v17 = vpack.c.bf16 %v8984_v36, %v8984_v36  ;;  %v9032_v56 = vld [vmem:[#allocation2 + $0x22] sm:$0xff]  ;;  %v9033_v6 = vld [vmem:[#allocation2 + $0x2a] sm:$0xff]  ;;  %v13628_v24 = vpack.c.bf16 %v8985_v19, %v8985_v19  ;;  %v13629_v16 = vpack.c.bf16 %v8986_v29, %v8986_v29  ;;  %8977 = vst [vmem:[#allocation3 + $0xe0] sm:$0xf] %v13620_v25 }
 0x5c8   :  { %v13634_v58 = vpack.c.bf16 %v9031_v60, %v9031_v60  ;;  %v13635_v33 = vpack.c.bf16 %v9032_v56, %v9032_v56  ;;  %v15930_v61 = vld [vmem:[#allocation3 + $0xd8] ss:$48 sps:$4 sm:$0xff]   ;;  %v15937_v18 = vld [vmem:[#allocation3 + $0x134] ss:$48 sps:$4 sm:$0xff]   ;;  %v13636_v63 = vpack.c.bf16 %v9033_v6, %v9033_v6  ;;  %v15940_v23 = vld [vmem:[#allocation3 + $0x13c] ss:$48 sps:$4 sm:$0xff]  }
 0x5c9   :  { %14951 = vmatpush3.bf16.msra.mxu1 %v15949_v0  ;;  %15015 = vmatpush3.bf16.msra.mxu0 %v17851_v1  ;;  %9024 = vst [vmem:[#allocation3 + $0xb4] sm:$0xf] %v13627_v17  ;;  %v15970_v35 = vld [vmem:[#allocation11 + $0x210] sm:$0xff]   ;;  %8978 = vst [vmem:[#allocation3 + $0x110] sm:$0xf] %v13621_v2  ;;  %v8939_v45 = vld [vmem:[#allocation2 + $0x38] sm:$0xff] }
 0x5ca   :  { %14952 = vmatprep.subr.bf16.mxu1 %v15950_v39  ;;  %9071 = vst [vmem:[#allocation3 + $0x88] sm:$0xf] %v13634_v58  ;;  %15016 = vmatprep.subr.bf16.mxu0 %v17854_v10  ;;  %v17861_v55 = vld [vmem:[#allocation11 + $0x2d0] sm:$0xff]   ;;  %9072 = vst [vmem:[#allocation3 + $0xb8] sm:$0xf] %v13635_v33  ;;  %v8940_v14 = vld [vmem:[#allocation2 + $0x40] sm:$0xff]  ;;  %v13622_v41 = vpack.c.bf16 %v8939_v45, %v8939_v45 }
 0x5cb   :  { %11279 = vmatmul.mubr.bf16.gmra.mxu1 %v15927_v28  ;;  %11376 = vmatmul.mubr.bf16.gmra.mxu0 %v15930_v61  ;;  %v17863_v52 = vld [vmem:[#allocation11 + $0x290] sm:$0xff]   ;;  %9025 = vst [vmem:[#allocation3 + $0xe4] sm:$0xf] %v13628_v24  ;;  %9026 = vst [vmem:[#allocation3 + $0x114] sm:$0xf] %v13629_v16  ;;  %v17865_v11 = vld [vmem:[#allocation11 + $0x2c8] sm:$0xff]   ;;  %v13623_v31 = vpack.c.bf16 %v8940_v14, %v8940_v14 }
 0x5cc   :  { %11286 = vmatprep.mubr.bf16.mxu1 %v15937_v18  ;;  %v9034_v9 = vld [vmem:[#allocation2 + $0x32] sm:$0xff]  ;;  %9073 = vst [vmem:[#allocation3 + $0xe8] sm:$0xf] %v13636_v63  ;;  %11383 = vmatprep.mubr.bf16.mxu0 %v15940_v23  ;;  %v8988_v7 = vld [vmem:[#allocation2 + $0x41] sm:$0xff]  ;;  %8979 = vst [vmem:[#allocation3 + $0x140] sm:$0xf] %v13622_v41 }
 0x5cd   :  { %14953 = vmatpush3.bf16.msra.mxu1 %v15958_v8  ;;  %v13637_v40 = vpack.c.bf16 %v9034_v9, %v9034_v9  ;;  %v8987_v57 = vld [vmem:[#allocation2 + $0x39] sm:$0xff]  ;;  %15017 = vmatpush3.bf16.msra.mxu0 %v17857_v43  ;;  %v13631_v13 = vpack.c.bf16 %v8988_v7, %v8988_v7  ;;  %v9036_v22 = vld [vmem:[#allocation2 + $0x42] sm:$0xff]  ;;  %8980 = vst [vmem:[#allocation3 + $0x170] sm:$0xf] %v13623_v31  ;;  %v9504_v33 = vld [vmem:[#allocation2 + $0x70] sm:$0xff] }
 0x5ce   :  { %v9035_v53 = vld [vmem:[#allocation2 + $0x3a] sm:$0xff]  ;;  %14954 = vmatprep.subr.bf16.mxu1 %v15962_v38  ;;  %v13630_v21 = vpack.c.bf16 %v8987_v57, %v8987_v57  ;;  %v15982_v30 = vld [vmem:[#allocation11 + $0x208] sm:$0xff]   ;;  %15018 = vmatprep.subr.bf16.mxu0 %v17861_v55  ;;  %v13639_v20 = vpack.c.bf16 %v9036_v22, %v9036_v22  ;;  %v15945_v36 = vld [vmem:[#allocation3 + $0x194] ss:$48 sps:$4 sm:$0xff]   ;;  %v13715_v29 = vpack.c.bf16 %v9504_v33, %v9504_v33 }
 0x5cf   :  { %v13638_v50 = vpack.c.bf16 %v9035_v53, %v9035_v53  ;;  %v9501_v62 = vld [vmem:[#allocation2 + $0x58] sm:$0xff]  ;;  %v15935_v47 = vld [vmem:[#allocation3 + $0x130] ss:$48 sps:$4 sm:$0xff]   ;;  %9074 = vst [vmem:[#allocation3 + $0x118] sm:$0xf] %v13637_v40  ;;  %v9503_v8 = vld [vmem:[#allocation2 + $0x68] sm:$0xff] }
 0x5d0   :  { %v9502_v12 = vld [vmem:[#allocation2 + $0x60] sm:$0xff]  ;;  %v13712_v26 = vpack.c.bf16 %v9501_v62, %v9501_v62  ;;  %v15938_v51 = vld [vmem:[#allocation3 + $0x138] ss:$48 sps:$4 sm:$0xff]   ;;  %9027 = vst [vmem:[#allocation3 + $0x144] sm:$0xf] %v13630_v21  ;;  %v13714_v56 = vpack.c.bf16 %v9503_v8, %v9503_v8  ;;  %v9508_v21 = vld [vmem:[#allocation2 + $0x90] sm:$0xff] }
 0x5d1   :  { %v9549_v0 = vld [vmem:[#allocation2 + $0x59] sm:$0xff]  ;;  %v9550_v46 = vld [vmem:[#allocation2 + $0x61] sm:$0xff]  ;;  %9028 = vst [vmem:[#allocation3 + $0x174] sm:$0xf] %v13631_v13  ;;  %9075 = vst [vmem:[#allocation3 + $0x148] sm:$0xf] %v13638_v50  ;;  %v13713_v15 = vpack.c.bf16 %v9502_v12, %v9502_v12  ;;  %14955 = vmatpush3.bf16.msra.mxu1 %v15970_v35  ;;  %15019 = vmatpush3.bf16.msra.mxu0 %v17863_v52  ;;  %v13719_v22 = vpack.c.bf16 %v9508_v21, %v9508_v21 }
 0x5d2   :  { %v15986_v37 = vld [vmem:[#allocation11 + $0x240] sm:$0xff]   ;;  %v13720_v39 = vpack.c.bf16 %v9549_v0, %v9549_v0  ;;  %v13721_v27 = vpack.c.bf16 %v9550_v46, %v9550_v46  ;;  %v15948_v60 = vld [vmem:[#allocation3 + $0x19c] ss:$48 sps:$4 sm:$0xff]   ;;  %9076 = vst [vmem:[#allocation3 + $0x178] sm:$0xf] %v13639_v20  ;;  %14956 = vmatprep.subr.bf16.mxu1 %v15974_v3  ;;  %15020 = vmatprep.subr.bf16.mxu0 %v17865_v11  ;;  %v9552_v2 = vld [vmem:[#allocation2 + $0x71] sm:$0xff] }
 0x5d3   :  { %v9597_v34 = vld [vmem:[#allocation2 + $0x5a] sm:$0xff]  ;;  %v9598_v28 = vld [vmem:[#allocation2 + $0x62] sm:$0xff]  ;;  %9541 = vst [vmem:[#allocation3 + $0x1a0] sm:$0xf] %v13712_v26  ;;  %9542 = vst [vmem:[#allocation3 + $0x1d0] sm:$0xf] %v13713_v15  ;;  %11287 = vmatmul.mubr.bf16.gmra.mxu1 %v15935_v47  ;;  %11384 = vmatmul.mubr.bf16.gmra.mxu0 %v15938_v51  ;;  %v13723_v61 = vpack.c.bf16 %v9552_v2, %v9552_v2 }
 0x5d4   :  { %v13728_v38 = vpack.c.bf16 %v9597_v34, %v9597_v34  ;;  %v13729_v17 = vpack.c.bf16 %v9598_v28, %v9598_v28  ;;  %v17870_v58 = vld [vmem:[#allocation11 + $0x288] sm:$0xff]   ;;  %9589 = vst [vmem:[#allocation3 + $0x1a4] sm:$0xf] %v13720_v39  ;;  %9590 = vst [vmem:[#allocation3 + $0x1d4] sm:$0xf] %v13721_v27  ;;  %v17873_v49 = vld [vmem:[#allocation11 + $0x2c0] sm:$0xff]   ;;  %11294 = vmatprep.mubr.bf16.mxu1 %v15945_v36  ;;  %11391 = vmatprep.mubr.bf16.mxu0 %v15948_v60 }
 0x5d5   :  { %9543 = vst [vmem:[#allocation3 + $0x200] sm:$0xf] %v13714_v56  ;;  %v15988_v44 = vld [vmem:[#allocation11 + $0x200] sm:$0xff]   ;;  %14957 = vmatpush3.bf16.msra.mxu1 %v15982_v30  ;;  %v9551_v25 = vld [vmem:[#allocation2 + $0x69] sm:$0xff]  ;;  %15021 = vmatpush3.bf16.msra.mxu0 %v17870_v58  ;;  %9544 = vst [vmem:[#allocation3 + $0x230] sm:$0xf] %v13715_v29 }
 0x5d6   :  { %9637 = vst [vmem:[#allocation3 + $0x1a8] sm:$0xf] %v13728_v38  ;;  %9638 = vst [vmem:[#allocation3 + $0x1d8] sm:$0xf] %v13729_v17  ;;  %14958 = vmatprep.subr.bf16.mxu1 %v15986_v37  ;;  %v17876_v19 = vld [vmem:[#allocation11 + $0x280] sm:$0xff]   ;;  %v13722_v6 = vpack.c.bf16 %v9551_v25, %v9551_v25  ;;  %15022 = vmatprep.subr.bf16.mxu0 %v17873_v49  ;;  %v9599_v23 = vld [vmem:[#allocation2 + $0x6a] sm:$0xff] }
 0x5d7   :  { %9592 = vst [vmem:[#allocation3 + $0x234] sm:$0xf] %v13723_v61  ;;  %v15943_v18 = vld [vmem:[#allocation3 + $0x190] ss:$48 sps:$4 sm:$0xff]   ;;  %v15946_v24 = vld [vmem:[#allocation3 + $0x198] ss:$48 sps:$4 sm:$0xff]   ;;  %v13730_v3 = vpack.c.bf16 %v9599_v23, %v9599_v23 }
 0x5d8   :  { %9591 = vst [vmem:[#allocation3 + $0x204] sm:$0xf] %v13722_v6  ;;  %v15954_v16 = vld [vmem:[#allocation3 + $0x1f4] ss:$48 sps:$4 sm:$0xff]   ;;  %v15957_v63 = vld [vmem:[#allocation3 + $0x1fc] ss:$48 sps:$4 sm:$0xff]  }
 0x5d9   :  { %14959 = vmatpush3.bf16.msra.mxu1 %v15988_v44  ;;  %15023 = vmatpush3.bf16.msra.mxu0 %v17876_v19  ;;  %v9600_v35 = vld [vmem:[#allocation2 + $0x72] sm:$0xff]  ;;  %v9506_v14 = vld [vmem:[#allocation2 + $0x80] sm:$0xff]  ;;  %v9507_v53 = vld [vmem:[#allocation2 + $0x88] sm:$0xff]  ;;  %9639 = vst [vmem:[#allocation3 + $0x208] sm:$0xf] %v13730_v3 }
 0x5da   :  { %15168 = vmatprep.subr.bf16.mxu1 %v17824_v59  ;;  %v13731_v9 = vpack.c.bf16 %v9600_v35, %v9600_v35  ;;  %v9505_v45 = vld [vmem:[#allocation2 + $0x78] sm:$0xff]  ;;  %v13717_v31 = vpack.c.bf16 %v9506_v14, %v9506_v14  ;;  %v9554_v57 = vld [vmem:[#allocation2 + $0x81] sm:$0xff]  ;;  %v13718_v13 = vpack.c.bf16 %v9507_v53, %v9507_v53  ;;  %v9555_v62 = vld [vmem:[#allocation2 + $0x89] sm:$0xff]  ;;  %9548 = vst [vmem:[#allocation3 + $0x2f0] sm:$0xf] %v13719_v22 }
 0x5db   :  { %11295 = vmatmul.mubr.bf16.gmra.mxu1 %v15943_v18  ;;  %11392 = vmatmul.mubr.bf16.gmra.mxu0 %v15946_v24  ;;  %v9553_v40 = vld [vmem:[#allocation2 + $0x79] sm:$0xff]  ;;  %v13716_v41 = vpack.c.bf16 %v9505_v45, %v9505_v45  ;;  %v13725_v59 = vpack.c.bf16 %v9554_v57, %v9554_v57  ;;  %v9556_v47 = vld [vmem:[#allocation2 + $0x91] sm:$0xff]  ;;  %v13726_v30 = vpack.c.bf16 %v9555_v62, %v9555_v62  ;;  %v9602_v26 = vld [vmem:[#allocation2 + $0x82] sm:$0xff] }
 0x5dc   :  { %11302 = vmatprep.mubr.bf16.mxu1 %v15954_v16  ;;  %11399 = vmatprep.mubr.bf16.mxu0 %v15957_v63  ;;  %v13724_v7 = vpack.c.bf16 %v9553_v40, %v9553_v40  ;;  %9640 = vst [vmem:[#allocation3 + $0x238] sm:$0xf] %v13731_v9  ;;  %v15952_v50 = vld [vmem:[#allocation3 + $0x1f0] ss:$48 sps:$4 sm:$0xff]   ;;  %9546 = vst [vmem:[#allocation3 + $0x290] sm:$0xf] %v13717_v31  ;;  %v13727_v20 = vpack.c.bf16 %v9556_v47, %v9556_v47 }
 0x5dd   :  { %9545 = vst [vmem:[#allocation3 + $0x260] sm:$0xf] %v13716_v41  ;;  %9594 = vst [vmem:[#allocation3 + $0x294] sm:$0xf] %v13725_v59  ;;  %v9601_v12 = vld [vmem:[#allocation2 + $0x7a] sm:$0xff]  ;;  %v9603_v0 = vld [vmem:[#allocation2 + $0x8a] sm:$0xff]  ;;  %v13733_v15 = vpack.c.bf16 %v9602_v26, %v9602_v26 }
 0x5de   :  { %9593 = vst [vmem:[#allocation3 + $0x264] sm:$0xf] %v13724_v7  ;;  %9547 = vst [vmem:[#allocation3 + $0x2c0] sm:$0xf] %v13718_v13  ;;  %v15955_v46 = vld [vmem:[#allocation3 + $0x1f8] ss:$48 sps:$4 sm:$0xff]   ;;  %v13732_v37 = vpack.c.bf16 %v9601_v12, %v9601_v12  ;;  %v13734_v27 = vpack.c.bf16 %v9603_v0, %v9603_v0 }
 0x5df   :  { %v15966_v51 = vld [vmem:[#allocation3 + $0x254] ss:$48 sps:$4 sm:$0xff]   ;;  %v15969_v34 = vld [vmem:[#allocation3 + $0x25c] ss:$48 sps:$4 sm:$0xff]   ;;  %9595 = vst [vmem:[#allocation3 + $0x2c4] sm:$0xf] %v13726_v30 }
 0x5e0   :  { %v9604_v39 = vld [vmem:[#allocation2 + $0x92] sm:$0xff]  ;;  %9596 = vst [vmem:[#allocation3 + $0x2f4] sm:$0xf] %v13727_v20  ;;  %9641 = vst [vmem:[#allocation3 + $0x268] sm:$0xf] %v13732_v37 }
 0x5e1   :  { %v13735_v28 = vpack.c.bf16 %v9604_v39, %v9604_v39  ;;  %9642 = vst [vmem:[#allocation3 + $0x298] sm:$0xf] %v13733_v15  ;;  %9643 = vst [vmem:[#allocation3 + $0x2c8] sm:$0xf] %v13734_v27  ;;  %v15964_v8 = vld [vmem:[#allocation3 + $0x250] ss:$48 sps:$4 sm:$0xff]  }
 0x5e2   :  { %v15967_v36 = vld [vmem:[#allocation3 + $0x258] ss:$48 sps:$4 sm:$0xff]   ;;  %v15978_v60 = vld [vmem:[#allocation3 + $0x2b4] ss:$48 sps:$4 sm:$0xff]   ;;  %v15981_v38 = vld [vmem:[#allocation3 + $0x2bc] ss:$48 sps:$4 sm:$0xff]  }
 0x5e3   :  { %11303 = vmatmul.mubr.bf16.gmra.mxu1 %v15952_v50  ;;  %11400 = vmatmul.mubr.bf16.gmra.mxu0 %v15955_v46  ;;  %9644 = vst [vmem:[#allocation3 + $0x2f8] sm:$0xf] %v13735_v28  ;;  %v15976_v17 = vld [vmem:[#allocation3 + $0x2b0] ss:$48 sps:$4 sm:$0xff]   ;;  %v15979_v56 = vld [vmem:[#allocation3 + $0x2b8] ss:$48 sps:$4 sm:$0xff]  }
 0x5e4   :  { %11310 = vmatprep.mubr.bf16.mxu1 %v15966_v51  ;;  %11407 = vmatprep.mubr.bf16.mxu0 %v15969_v34  ;;  %v15991_v44 = vld [vmem:[#allocation3 + $0x24] ss:$48 sps:$4 sm:$0xff]   ;;  %v15995_v33 = vld [vmem:[#allocation3 + $0x2c] ss:$48 sps:$4 sm:$0xff]   ;;  %v15989_v25 = vld [vmem:[#allocation3 + $0x20] ss:$48 sps:$4 sm:$0xff]  }
 0x5e5   :  { %v15993_v2 = vld [vmem:[#allocation3 + $0x28] ss:$48 sps:$4 sm:$0xff]   ;;  %v16000_v29 = vld [vmem:[#allocation3 + $0x84] ss:$48 sps:$4 sm:$0xff]   ;;  %v16003_v6 = vld [vmem:[#allocation3 + $0x8c] ss:$48 sps:$4 sm:$0xff]  }
 0x5e6   :  { %v15998_v61 = vld [vmem:[#allocation3 + $0x80] ss:$48 sps:$4 sm:$0xff]   ;;  %v16001_v18 = vld [vmem:[#allocation3 + $0x88] ss:$48 sps:$4 sm:$0xff]   ;;  %v16006_v24 = vld [vmem:[#allocation3 + $0xe4] ss:$48 sps:$4 sm:$0xff]  }
 0x5e7   :  { %v16009_v16 = vld [vmem:[#allocation3 + $0xec] ss:$48 sps:$4 sm:$0xff]   ;;  %v16012_v63 = vld [vmem:[#allocation3 + $0x144] ss:$48 sps:$4 sm:$0xff]   ;;  %v16025_v23 = vld [vmem:[#allocation3 + $0x208] ss:$48 sps:$4 sm:$0xff]  }
 0x5e8   :  { %v16030_v35 = vld [vmem:[#allocation3 + $0x264] ss:$48 sps:$4 sm:$0xff]   ;;  %v16028_v3 = vld [vmem:[#allocation3 + $0x260] ss:$48 sps:$4 sm:$0xff]   ;;  %v16036_v9 = vld [vmem:[#allocation3 + $0x26c] ss:$48 sps:$4 sm:$0xff]  }
 0x5e9   :  { %v16039_v45 = vld [vmem:[#allocation3 + $0x2cc] ss:$48 sps:$4 sm:$0xff]   ;;  %v17899_v41 = vld [vmem:[%s18180_s11] ss:$0 sm:$0xff] }
 0x5ea   :  { %v16037_v22 = vld [vmem:[#allocation3 + $0x2c8] ss:$48 sps:$4 sm:$0xff]  }
 0x5eb   :  { %11311 = vmatmul.mubr.bf16.gmra.mxu1 %v15964_v8  ;;  %11408 = vmatmul.mubr.bf16.gmra.mxu0 %v15967_v36 }
 0x5ec   :  { %11318 = vmatprep.mubr.bf16.mxu1 %v15978_v60  ;;  %11415 = vmatprep.mubr.bf16.mxu0 %v15981_v38 }
 0x5f3   :  { %11319 = vmatmul.mubr.bf16.gmra.mxu1 %v15976_v17  ;;  %11416 = vmatmul.mubr.bf16.gmra.mxu0 %v15979_v56 }
 0x5f4   :  { %11456 = vmatprep.mubr.bf16.mxu1 %v15991_v44  ;;  %11553 = vmatprep.mubr.bf16.mxu0 %v15995_v33 }
 0x5fb   :  { %11457 = vmatmul.mubr.bf16.vlgmr.msra.gmra.mxu1 %v15989_v25  ;;  %11554 = vmatmul.mubr.bf16.vlgmr.msra.gmra.mxu0 %v15993_v2 }
 0x5fc   :  { %11464 = vmatprep.mubr.bf16.mxu1 %v16000_v29  ;;  %15176 = vmatpush3.bf16.msra.mxu1 %v17835_v54  ;;  %v16004_v54 = vld [vmem:[#allocation3 + $0xe0] ss:$48 sps:$4 sm:$0xff]  }
 0x5fd   :  { %11561 = vmatprep.mubr.bf16.mxu0 %v16003_v6  ;;  %15169 = vmatprep.subr.bf16.mxu1 %v17837_v4  ;;  %v16007_v4 = vld [vmem:[#allocation3 + $0xe8] ss:$48 sps:$4 sm:$0xff]  }
 0x600   :  { %15177 = vmatpush3.bf16.msra.mxu1 %v17840_v42  ;;  %v16015_v42 = vld [vmem:[#allocation3 + $0x14c] ss:$48 sps:$4 sm:$0xff]  }
 0x601   :  { %15170 = vmatprep.subr.bf16.mxu1 %v17843_v5  ;;  %v16010_v5 = vld [vmem:[#allocation3 + $0x140] ss:$48 sps:$4 sm:$0xff]  }
 0x603   :  { %11465 = vmatmul.mubr.bf16.gmra.mxu1 %v15998_v61  ;;  %11562 = vmatmul.mubr.bf16.gmra.mxu0 %v16001_v18 }
 0x604   :  { %11472 = vmatprep.mubr.bf16.mxu1 %v16006_v24  ;;  %11569 = vmatprep.mubr.bf16.mxu0 %v16009_v16 }
 0x605   :  { %15178 = vmatpush3.bf16.msra.mxu1 %v17845_v48  ;;  %v16013_v48 = vld [vmem:[#allocation3 + $0x148] ss:$48 sps:$4 sm:$0xff]  }
 0x606   :  { %15171 = vmatprep.subr.bf16.mxu1 %v17849_v32  ;;  %v16018_v32 = vld [vmem:[#allocation3 + $0x1a4] ss:$48 sps:$4 sm:$0xff]  }
 0x609   :  { %15179 = vmatpush3.bf16.msra.mxu1 %v17851_v1  ;;  %v16021_v1 = vld [vmem:[#allocation3 + $0x1ac] ss:$48 sps:$4 sm:$0xff]  }
 0x60a   :  { %15172 = vmatprep.subr.bf16.mxu1 %v17854_v10  ;;  %v16016_v10 = vld [vmem:[#allocation3 + $0x1a0] ss:$48 sps:$4 sm:$0xff]  }
 0x60b   :  { %11473 = vmatmul.mubr.bf16.gmra.mxu1 %v16004_v54  ;;  %11570 = vmatmul.mubr.bf16.gmra.mxu0 %v16007_v4 }
 0x60c   :  { %11480 = vmatprep.mubr.bf16.mxu1 %v16012_v63  ;;  %11577 = vmatprep.mubr.bf16.mxu0 %v16015_v42 }
 0x60d   :  { %15180 = vmatpush3.bf16.msra.mxu1 %v17857_v43  ;;  %v16019_v43 = vld [vmem:[#allocation3 + $0x1a8] ss:$48 sps:$4 sm:$0xff]  }
 0x60e   :  { %15173 = vmatprep.subr.bf16.mxu1 %v17861_v55  ;;  %v16024_v55 = vld [vmem:[#allocation3 + $0x204] ss:$48 sps:$4 sm:$0xff]  }
 0x611   :  { %15181 = vmatpush3.bf16.msra.mxu1 %v17863_v52  ;;  %v16027_v52 = vld [vmem:[#allocation3 + $0x20c] ss:$48 sps:$4 sm:$0xff]  }
 0x612   :  { %15174 = vmatprep.subr.bf16.mxu1 %v17865_v11  ;;  %v16022_v11 = vld [vmem:[#allocation3 + $0x200] ss:$48 sps:$4 sm:$0xff]  }
 0x613   :  { %11481 = vmatmul.mubr.bf16.gmra.mxu1 %v16010_v5  ;;  %11578 = vmatmul.mubr.bf16.gmra.mxu0 %v16013_v48 }
 0x614   :  { %11488 = vmatprep.mubr.bf16.mxu1 %v16018_v32  ;;  %11585 = vmatprep.mubr.bf16.mxu0 %v16021_v1 }
 0x615   :  { %15182 = vmatpush3.bf16.msra.mxu1 %v17870_v58  ;;  %v16033_v58 = vld [vmem:[#allocation3 + $0x2c4] ss:$48 sps:$4 sm:$0xff]  }
 0x616   :  { %15175 = vmatprep.subr.bf16.mxu1 %v17873_v49  ;;  %v16031_v49 = vld [vmem:[#allocation3 + $0x2c0] ss:$48 sps:$4 sm:$0xff]  }
 0x619   :  { %15183 = vmatpush3.bf16.msra.mxu1 %v17876_v19  ;;  %v16034_v19 = vld [vmem:[#allocation3 + $0x268] ss:$48 sps:$4 sm:$0xff]  }
 0x61b   :  { %11489 = vmatmul.mubr.bf16.gmra.mxu1 %v16016_v10  ;;  %11586 = vmatmul.mubr.bf16.gmra.mxu0 %v16019_v43 }
 0x61c   :  { %11496 = vmatprep.mubr.bf16.mxu1 %v16024_v55  ;;  %11593 = vmatprep.mubr.bf16.mxu0 %v16027_v52 }
 0x623   :  { %11497 = vmatmul.mubr.bf16.gmra.mxu1 %v16022_v11  ;;  %11594 = vmatmul.mubr.bf16.gmra.mxu0 %v16025_v23 }
 0x624   :  { %11504 = vmatprep.mubr.bf16.mxu1 %v16030_v35 }
 0x62b   :  { %11505 = vmatmul.mubr.bf16.gmra.mxu1 %v16028_v3  ;;  %v14704_v14 = vpop.f32.mrf.mxu1 }
 0x62c   :  { %11512 = vmatprep.mubr.bf16.mxu1 %v16033_v58  ;;  %v14768_v40 = vpop.f32.mrf.mxu0 }
 0x62d   :  { %v14705_v31 = vpop.f32.mrf.mxu1 }
 0x62e   :  { %v14706_v57 = vadd.f32 %v14705_v31, %v14704_v14  ;;  %v14769_v7 = vpop.f32.mrf.mxu0 }
 0x62f   :  { %v14770_v53 = vadd.f32 %v14769_v7, %v14768_v40  ;;  %v14707_v21 = vpop.f32.mrf.mxu1 }
 0x630   :  { %v11071_v59 = vadd.f32 %v14706_v57, %v17899_v41  ;;  %v14771_v13 = vpop.f32.mrf.mxu0 }
 0x631   :  { %v14708_v50 = vpop.f32.mrf.mxu1 }
 0x632   :  { %v17902_v62 = vadd.f32 %v14770_v53, %v11071_v59  ;;  %v14709_v47 = vadd.f32 %v14708_v50, %v14707_v21  ;;  %v14772_v30 = vpop.f32.mrf.mxu0 }
 0x633   :  { %11513 = vmatmul.mubr.bf16.gmra.mxu1 %v16031_v49  ;;  %v14773_v20 = vadd.f32 %v14772_v30, %v14771_v13 }
 0x634   :  { %11601 = vmatprep.mubr.bf16.mxu1 %v16036_v9  ;;  %v11074_v26 = vadd.f32 %v14709_v47, %v17899_v41 }
 0x636   :  { %v14710_v12 = vpop.f32.mrf.mxu1  ;;  %v17905_v51 = vadd.f32 %v14773_v20, %v11074_v26 }
 0x638   :  { %v14711_v46 = vpop.f32.mrf.mxu1 }
 0x639   :  { %v14712_v37 = vadd.f32 %v14711_v46, %v14710_v12 }
 0x63a   :  { %v14713_v27 = vpop.f32.mrf.mxu1 }
 0x63b   :  { %11602 = vmatmul.mubr.bf16.vlgmr.msra.gmra.mxu1 %v16034_v19  ;;  %v14774_v0 = vpop.f32.mrf.mxu0  ;;  %v11079_v34 = vadd.f32 %v14712_v37, %v17899_v41 }
 0x63c   :  { %11609 = vmatprep.mubr.bf16.mxu1 %v16039_v45  ;;  %v14714_v8 = vpop.f32.mrf.mxu1 }
 0x63d   :  { %v14775_v15 = vpop.f32.mrf.mxu0  ;;  %v14715_v60 = vadd.f32 %v14714_v8, %v14713_v27 }
 0x63e   :  { %v14776_v39 = vadd.f32 %v14775_v15, %v14774_v0 }
 0x63f   :  { %v14777_v28 = vpop.f32.mrf.mxu0  ;;  %v11082_v44 = vadd.f32 %v14715_v60, %v17899_v41 }
 0x640   :  { %v17908_v36 = vadd.f32 %v14776_v39, %v11079_v34 }
 0x641   :  { %v14778_v38 = vpop.f32.mrf.mxu0 }
 0x642   :  { %v14779_v17 = vadd.f32 %v14778_v38, %v14777_v28  ;;  %v14716_v56 = vpop.f32.mrf.mxu1 }
 0x643   :  { %11610 = vmatmul.mubr.bf16.gmra.mxu1 %v16037_v22 }
 0x644   :  { %v14717_v25 = vpop.f32.mrf.mxu1  ;;  %v17911_v2 = vadd.f32 %v14779_v17, %v11082_v44 }
 0x645   :  { %v14718_v29 = vadd.f32 %v14717_v25, %v14716_v56 }
 0x646   :  { %v14719_v18 = vpop.f32.mrf.mxu1 }
 0x647   :  { %v11087_v24 = vadd.f32 %v14718_v29, %v17899_v41 }
 0x648   :  { %v14720_v54 = vpop.f32.mrf.mxu1 }
 0x649   :  { %v14780_v33 = vpop.f32.mrf.mxu0  ;;  %v14721_v63 = vadd.f32 %v14720_v54, %v14719_v18 }
 0x64b   :  { %v14781_v6 = vpop.f32.mrf.mxu0  ;;  %v11090_v32 = vadd.f32 %v14721_v63, %v17899_v41 }
 0x64c   :  { %v14782_v61 = vadd.f32 %v14781_v6, %v14780_v33 }
 0x64d   :  { %v14783_v16 = vpop.f32.mrf.mxu0 }
 0x64e   :  { %v17914_v4 = vadd.f32 %v14782_v61, %v11087_v24  ;;  %v14722_v48 = vpop.f32.mrf.mxu1 }
 0x64f   :  { %v14784_v42 = vpop.f32.mrf.mxu0 }
 0x650   :  { %v14785_v5 = vadd.f32 %v14784_v42, %v14783_v16  ;;  %v14723_v10 = vpop.f32.mrf.mxu1 }
 0x651   :  { %v14786_v1 = vpop.f32.mrf.mxu0  ;;  %v14724_v55 = vadd.f32 %v14723_v10, %v14722_v48 }
 0x652   :  { %v17917_v43 = vadd.f32 %v14785_v5, %v11090_v32  ;;  %v14725_v23 = vpop.f32.mrf.mxu1 }
 0x653   :  { %v14787_v52 = vpop.f32.mrf.mxu0  ;;  %v11095_v35 = vadd.f32 %v14724_v55, %v17899_v41 }
 0x654   :  { %v14788_v11 = vadd.f32 %v14787_v52, %v14786_v1  ;;  %v14726_v58 = vpop.f32.mrf.mxu1 }
 0x655   :  { %v14789_v3 = vpop.f32.mrf.mxu0  ;;  %v14727_v9 = vadd.f32 %v14726_v58, %v14725_v23 }
 0x656   :  { %v17920_v49 = vadd.f32 %v14788_v11, %v11095_v35 }
 0x657   :  { %v14790_v19 = vpop.f32.mrf.mxu0  ;;  %v11098_v40 = vadd.f32 %v14727_v9, %v17899_v41 }
 0x658   :  { %v14791_v45 = vadd.f32 %v14790_v19, %v14789_v3  ;;  %v14728_v14 = vpop.f32.mrf.mxu1 }
 0x659   :  { %v14792_v31 = vpop.f32.mrf.mxu0 }
 0x65a   :  { %v14729_v57 = vpop.f32.mrf.mxu1  ;;  %v17923_v7 = vadd.f32 %v14791_v45, %v11098_v40 }
 0x65b   :  { %v14730_v53 = vadd.f32 %v14729_v57, %v14728_v14  ;;  %v14793_v21 = vpop.f32.mrf.mxu0 }
 0x65c   :  { %v14794_v59 = vadd.f32 %v14793_v21, %v14792_v31  ;;  %v14731_v13 = vpop.f32.mrf.mxu1 }
 0x65d   :  { %v11103_v22 = vadd.f32 %v14730_v53, %v17899_v41  ;;  %v14795_v50 = vpop.f32.mrf.mxu0 }
 0x65e   :  { %v14732_v47 = vpop.f32.mrf.mxu1 }
 0x65f   :  { %v17926_v30 = vadd.f32 %v14794_v59, %v11103_v22  ;;  %v14733_v20 = vadd.f32 %v14732_v47, %v14731_v13  ;;  %v14796_v12 = vpop.f32.mrf.mxu0 }
 0x660   :  { %v14797_v26 = vadd.f32 %v14796_v12, %v14795_v50 }
 0x661   :  { %18463 = vst [vmem:[#allocation19_spill] sm:$0xff] %v17926_v30  ;;  %v14734_v0 = vpop.f32.mrf.mxu1  ;;  %v11106_v46 = vadd.f32 %v14733_v20, %v17899_v41 }
 0x663   :  { %v14798_v37 = vpop.f32.mrf.mxu0  ;;  %v14735_v15 = vpop.f32.mrf.mxu1  ;;  %v17929_v39 = vadd.f32 %v14797_v26, %v11106_v46 }
 0x664   :  { %v14736_v27 = vadd.f32 %v14735_v15, %v14734_v0 }
 0x665   :  { %18464 = vst [vmem:[#allocation35_spill] sm:$0xff] %v17929_v39  ;;  %v14799_v34 = vpop.f32.mrf.mxu0  ;;  %v14737_v8 = vpop.f32.mrf.mxu1 }
 0x666   :  { %v14800_v28 = vadd.f32 %v14799_v34, %v14798_v37  ;;  %v11111_v60 = vadd.f32 %v14736_v27, %v17899_v41 }
 0x667   :  { %v14801_v38 = vpop.f32.mrf.mxu0  ;;  %v14738_v17 = vpop.f32.mrf.mxu1 }
 0x668   :  { %v17932_v56 = vadd.f32 %v14800_v28, %v11111_v60  ;;  %v14739_v44 = vadd.f32 %v14738_v17, %v14737_v8 }
 0x669   :  { %v14802_v33 = vpop.f32.mrf.mxu0 }
 0x66a   :  { %18465 = vst [vmem:[#allocation21_spill] sm:$0xff] %v17932_v56  ;;  %v14803_v25 = vadd.f32 %v14802_v33, %v14801_v38  ;;  %v11114_v6 = vadd.f32 %v14739_v44, %v17899_v41 }
 0x66b   :  { %v14740_v29 = vpop.f32.mrf.mxu1  ;;  %v14804_v61 = vpop.f32.mrf.mxu0 }
 0x66c   :  { %v17935_v24 = vadd.f32 %v14803_v25, %v11114_v6 }
 0x66d   :  { %v14741_v18 = vpop.f32.mrf.mxu1  ;;  %v14805_v54 = vpop.f32.mrf.mxu0 }
 0x66e   :  { %18466 = vst [vmem:[#allocation50_spill] sm:$0xff] %v17935_v24  ;;  %v14742_v16 = vadd.f32 %v14741_v18, %v14740_v29  ;;  %v14806_v63 = vadd.f32 %v14805_v54, %v14804_v61 }
 0x66f   :  { %v14743_v42 = vpop.f32.mrf.mxu1  ;;  %v14807_v48 = vpop.f32.mrf.mxu0 }
 0x670   :  { %v11119_v5 = vadd.f32 %v14742_v16, %v17899_v41 }
 0x671   :  { %v14744_v32 = vpop.f32.mrf.mxu1  ;;  %v14808_v55 = vpop.f32.mrf.mxu0 }
 0x672   :  { %v17938_v1 = vadd.f32 %v14806_v63, %v11119_v5  ;;  %v14745_v10 = vadd.f32 %v14744_v32, %v14743_v42  ;;  %v14809_v52 = vadd.f32 %v14808_v55, %v14807_v48 }
 0x673   :  { %v14746_v11 = vpop.f32.mrf.mxu1  ;;  %v14810_v35 = vpop.f32.mrf.mxu0 }
 0x674   :  { %v11122_v23 = vadd.f32 %v14745_v10, %v17899_v41 }
 0x675   :  { %v14747_v3 = vpop.f32.mrf.mxu1  ;;  %v14811_v19 = vpop.f32.mrf.mxu0 }
 0x676   :  { %v17941_v58 = vadd.f32 %v14809_v52, %v11122_v23  ;;  %v14748_v9 = vadd.f32 %v14747_v3, %v14746_v11  ;;  %v14812_v45 = vadd.f32 %v14811_v19, %v14810_v35 }
 0x677   :  { %v14749_v14 = vpop.f32.mrf.mxu1  ;;  %v14813_v31 = vpop.f32.mrf.mxu0 }
 0x678   :  { %v11127_v40 = vadd.f32 %v14748_v9, %v17899_v41 }
 0x679   :  { %v14750_v57 = vpop.f32.mrf.mxu1  ;;  %v14814_v59 = vpop.f32.mrf.mxu0 }
 0x67a   :  { %v17944_v53 = vadd.f32 %v14812_v45, %v11127_v40  ;;  %v14751_v21 = vadd.f32 %v14750_v57, %v14749_v14  ;;  %v14815_v13 = vadd.f32 %v14814_v59, %v14813_v31 }
 0x67b   :  { %v17946_v22 = vpop.f32.mrf.mxu1  ;;  %v17949_v47 = vpop.f32.mrf.mxu0 }
 0x67c   :  { %v11130_v50 = vadd.f32 %v14751_v21, %v17899_v41 }
 0x67d   :  { %v17951_v20 = vpop.f32.mrf.mxu1  ;;  %v17955_v26 = vpop.f32.mrf.mxu0 }
 0x67e   :  { %v17953_v12 = vadd.f32 %v14815_v13, %v11130_v50 }
 0x67f   :  { %v17957_v0 = vpop.f32.mrf.mxu1  ;;  %v17959_v46 = vpop.f32.mrf.mxu0 }
 0x681   :  { %v17961_v37 = vpop.f32.mrf.mxu1  ;;  %v17963_v15 = vpop.f32.mrf.mxu0 }
 0x683   :  { %v17965_v27 = vpop.f32.mrf.mxu1  ;;  %v17967_v34 = vpop.f32.mrf.mxu0 }
 0x685   :  { %v17969_v41 = vpop.f32.mrf.mxu1  ;;  %v17971_v28 = vpop.f32.mrf.mxu0 }
 0x687   :  { %v17973_v8 = vpop.f32.mrf.mxu1  ;;  %v17975_v60 = vpop.f32.mrf.mxu0 }
 0x689   :  { %v17977_v38 = vpop.f32.mrf.mxu1  ;;  %v17979_v17 = vpop.f32.mrf.mxu0 }
 0x68b   :  { %v17981_v44 = vpop.f32.mrf.mxu1  ;;  %v17983_v33 = vpop.f32.mrf.mxu0 }
 0x68d   :  { %v17985_v25 = vpop.f32.mrf.mxu1  ;;  %v17987_v29 = vpop.f32.mrf.mxu0 }
 0x68f   :  { %v17989_v6 = vpop.f32.mrf.mxu1  ;;  %v17991_v61 = vpop.f32.mrf.mxu0 }
 0x691   :  { %v17993_v18 = vpop.f32.mrf.mxu1  ;;  %v17995_v16 = vpop.f32.mrf.mxu0 }
 0x693   :  { %v17997_v54 = vpop.f32.mrf.mxu1  ;;  %v17999_v63 = vpop.f32.mrf.mxu0 }
 0x695   :  { %v18001_v42 = vpop.f32.mrf.mxu1  ;;  %v18003_v5 = vpop.f32.mrf.mxu0 }
 0x697   :  { %v18005_v48 = vpop.f32.mrf.mxu1  ;;  %v18007_v32 = vpop.f32.mrf.mxu0 }
 0x699   :  { %v18009_v10 = vpop.f32.mrf.mxu1  ;;  %v18011_v55 = vpop.f32.mrf.mxu0 }
 0x69b   :  { %v18013_v52 = vpop.f32.mrf.mxu1  ;;  %v18015_v11 = vpop.f32.mrf.mxu0 }
 0x69c   :  { %18467 = vst [vmem:[#allocation34_spill] sm:$0xff] %v18015_v11 }
 0x69d   :  { %v18017_v23 = vpop.f32.mrf.mxu1  ;;  %v18019_v35 = vpop.f32.mrf.mxu0 }
 0x69e   :  { %18468 = vst [vmem:[#allocation22_spill] sm:$0xff] %v18019_v35 }
 0x69f   :  { %v18021_v3 = vpop.f32.mrf.mxu1  ;;  %v18023_v9 = vpop.f32.mrf.mxu0 }
 0x6a0   :  { %18469 = vst [vmem:[#allocation45_spill] sm:$0xff] %v18021_v3  ;;  %18470 = vst [vmem:[#allocation17_spill] sm:$0xff] %v18023_v9  ;;  %v14834_v3 = vadd.f32 %v17951_v20, %v17946_v22  ;;  %v14898_v20 = vadd.f32 %v17955_v26, %v17949_v47  ;;  %v14901_v47 = vadd.f32 %v17963_v15, %v17959_v46 }
 0x6a1   :  { %v18025_v19 = vpop.f32.mrf.mxu1  ;;  %v18027_v45 = vpop.f32.mrf.mxu0 }
 0x6a2   :  { %18471 = vst [vmem:[#allocation37_spill] sm:$0xff] %v18025_v19  ;;  %18472 = vst [vmem:[#allocation33_spill] sm:$0xff] %v18027_v45 }
 0x6a3   :  { %v18029_v14 = vpop.f32.mrf.mxu1  ;;  %v18031_v40 = vpop.f32.mrf.mxu0 }
 0x6a4   :  { %18473 = vst [vmem:[#allocation38_spill] sm:$0xff] %v18029_v14  ;;  %18474 = vst [vmem:[#allocation23_spill] sm:$0xff] %v18031_v40 }
 0x6a5   :  { %v18033_v31 = vpop.f32.mrf.mxu1  ;;  %v18035_v57 = vpop.f32.mrf.mxu0 }
 0x6a6   :  { %18475 = vst [vmem:[#allocation47_spill] sm:$0xff] %v18033_v31  ;;  %18476 = vst [vmem:[#allocation20_spill] sm:$0xff] %v18035_v57 }
 0x6a7   :  { %v18037_v21 = vpop.f32.mrf.mxu1  ;;  %v18039_v59 = vpop.f32.mrf.mxu0 }
 0x6a8   :  { %18477 = vst [vmem:[#allocation36_spill] sm:$0xff] %v18037_v21  ;;  %18478 = vst [vmem:[#allocation18_spill] sm:$0xff] %v18039_v59 }
 0x6a9   :  { %v18041_v13 = vpop.f32.mrf.mxu1  ;;  %v18043_v50 = vpop.f32.mrf.mxu0 }
 0x6aa   :  { %18479 = vst [vmem:[#allocation39_spill] sm:$0xff] %v18041_v13  ;;  %18480 = vst [vmem:[#allocation24_spill] sm:$0xff] %v18043_v50 }
 0x6ab   :  { %v14868_v24 = vpop.f32.mrf.mxu1  ;;  %v14932_v56 = vpop.f32.mrf.mxu0 }
 0x6ad   :  { %v14869_v9 = vpop.f32.mrf.mxu1  ;;  %v14933_v39 = vpop.f32.mrf.mxu0 }
 0x6ae   :  { %v14870_v45 = vadd.f32 %v14869_v9, %v14868_v24  ;;  %v14934_v14 = vadd.f32 %v14933_v39, %v14932_v56 }
 0x6af   :  { %v14871_v35 = vpop.f32.mrf.mxu1  ;;  %v14935_v31 = vpop.f32.mrf.mxu0 }
 0x6b0   :  { %v11313_v40 = vadd.f32 %v14870_v45, %v17938_v1 }
 0x6b1   :  { %v14872_v11 = vpop.f32.mrf.mxu1  ;;  %v14936_v30 = vpop.f32.mrf.mxu0 }
 0x6b2   :  { %v18046_v57 = vadd.f32 %v14934_v14, %v11313_v40  ;;  %v14873_v21 = vadd.f32 %v14872_v11, %v14871_v35  ;;  %v14937_v59 = vadd.f32 %v14936_v30, %v14935_v31  ;;  %v11265_v11 = vadd.f32 %v14834_v3, %v17902_v62 }
 0x6b3   :  { %v14874_v19 = vpop.f32.mrf.mxu1  ;;  %v14938_v50 = vpop.f32.mrf.mxu0  ;;  %v14840_v3 = vadd.f32 %v17969_v41, %v17965_v27 }
 0x6b4   :  { %v11316_v13 = vadd.f32 %v14873_v21, %v17941_v58  ;;  %v14837_v58 = vadd.f32 %v17961_v37, %v17957_v0 }
 0x6b5   :  { %v14875_v24 = vpop.f32.mrf.mxu1  ;;  %v14939_v56 = vpop.f32.mrf.mxu0 }
 0x6b6   :  { %v18051_v9 = vadd.f32 %v14937_v59, %v11316_v13  ;;  %v14876_v39 = vadd.f32 %v14875_v24, %v14874_v19  ;;  %v14940_v1 = vadd.f32 %v14939_v56, %v14938_v50  ;;  %v11268_v62 = vadd.f32 %v14837_v58, %v17905_v51 }
 0x6b7   :  { %v14877_v45 = vpop.f32.mrf.mxu1  ;;  %v14941_v40 = vpop.f32.mrf.mxu0  ;;  %v11273_v51 = vadd.f32 %v14840_v3, %v17908_v36 }
 0x6b8   :  { %v11321_v14 = vadd.f32 %v14876_v39, %v17944_v53  ;;  %v11362_v53 = vadd.f32 %v14898_v20, %v11265_v11 }
 0x6b9   :  { %v14878_v30 = vpop.f32.mrf.mxu1  ;;  %v14942_v22 = vpop.f32.mrf.mxu0 }
 0x6ba   :  { %v18057_v35 = vadd.f32 %v14940_v1, %v11321_v14  ;;  %v14879_v31 = vadd.f32 %v14878_v30, %v14877_v45  ;;  %v14943_v19 = vadd.f32 %v14942_v22, %v14941_v40  ;;  %v11365_v14 = vadd.f32 %v14901_v47, %v11268_v62 }
 0x6bb   :  { %v14960_v21 = vpop.f32.mrf.mxu1  ;;  %v15024_v13 = vpop.f32.mrf.mxu0  ;;  %v14904_v30 = vadd.f32 %v17971_v28, %v17967_v34  ;;  %v14907_v34 = vadd.f32 %v17979_v17, %v17975_v60  ;;  %v14910_v17 = vadd.f32 %v17987_v29, %v17983_v33  ;;  %v14913_v33 = vadd.f32 %v17995_v16, %v17991_v61 }
 0x6bc   :  { %v11324_v59 = vadd.f32 %v14879_v31, %v17953_v12  ;;  %v14843_v12 = vadd.f32 %v17977_v38, %v17973_v8  ;;  %v14846_v8 = vadd.f32 %v17985_v25, %v17981_v44  ;;  %v14849_v44 = vadd.f32 %v17993_v18, %v17989_v6 }
 0x6bd   :  { %v14961_v50 = vpop.f32.mrf.mxu1  ;;  %v15025_v24 = vpop.f32.mrf.mxu0  ;;  %v14916_v61 = vadd.f32 %v18003_v5, %v17999_v63  ;;  %v14919_v5 = vadd.f32 %v18011_v55, %v18007_v32  ;;  %v18484_v32 = vld [vmem:[#allocation34_spill] sm:$0xff] }
 0x6be   :  { %v18065_v0 = vadd.f32 %v14943_v19, %v11324_v59  ;;  %v14962_v37 = vadd.f32 %v14961_v50, %v14960_v21  ;;  %v15026_v56 = vadd.f32 %v15025_v24, %v15024_v13  ;;  %v11276_v22 = vadd.f32 %v14843_v12, %v17911_v2  ;;  %v18485_v55 = vld [vmem:[#allocation22_spill] sm:$0xff] }
 0x6bf   :  { %v14963_v39 = vpop.f32.mrf.mxu1  ;;  %v15027_v1 = vpop.f32.mrf.mxu0  ;;  %v11370_v19 = vadd.f32 %v14904_v30, %v11273_v51  ;;  %v11281_v3 = vadd.f32 %v14846_v8, %v17914_v4  ;;  %v14852_v4 = vadd.f32 %v18001_v42, %v17997_v54  ;;  %v11284_v18 = vadd.f32 %v14849_v44, %v17917_v43 }
 0x6c0   :  { %v11459_v26 = vadd.f32 %v14962_v37, %v11362_v53  ;;  %v11373_v50 = vadd.f32 %v14907_v34, %v11276_v22  ;;  %v14855_v43 = vadd.f32 %v18009_v10, %v18005_v48  ;;  %v14858_v48 = vadd.f32 %v18017_v23, %v18013_v52  ;;  %v18483_v23 = vld [vmem:[#allocation19_spill] sm:$0xff] }
 0x6c1   :  { %v14964_v45 = vpop.f32.mrf.mxu1  ;;  %v15028_v41 = vpop.f32.mrf.mxu0  ;;  %v11378_v6 = vadd.f32 %v14910_v17, %v11281_v3  ;;  %v11289_v54 = vadd.f32 %v14852_v4, %v17920_v49 }
 0x6c2   :  { %v11556_v40 = vadd.f32 %v15026_v56, %v11459_v26  ;;  %v14965_v27 = vadd.f32 %v14964_v45, %v14963_v39  ;;  %v15029_v46 = vadd.f32 %v15028_v41, %v15027_v1  ;;  %v11292_v8 = vadd.f32 %v14855_v43, %v17923_v7  ;;  %v18482_v7 = vld [vmem:[#allocation37_spill] sm:$0xff] }
 0x6c3   :  { %v14966_v11 = vpop.f32.mrf.mxu1  ;;  %v15030_v15 = vpop.f32.mrf.mxu0 }
 0x6c4   :  { %v11618_v58 = vmax.f32 %v11556_v40, 0.0  ;;  %v11462_v31 = vadd.f32 %v14965_v27, %v11365_v14  ;;  %v11389_v52 = vadd.f32 %v14919_v5, %v11292_v8 }
 0x6c5   :  { %v14967_v20 = vpop.f32.mrf.mxu1  ;;  %v15031_v21 = vpop.f32.mrf.mxu0 }
 0x6c6   :  { %11634 = vst [vmem:[%s18181_s12] sm:$0xff] %v11618_v58  ;;  %v11559_v36 = vadd.f32 %v15029_v46, %v11462_v31  ;;  %v14968_v38 = vadd.f32 %v14967_v20, %v14966_v11  ;;  %v15032_v53 = vadd.f32 %v15031_v21, %v15030_v15  ;;  %v11381_v11 = vadd.f32 %v14913_v33, %v11284_v18  ;;  %v18490_v33 = vld [vmem:[#allocation33_spill] sm:$0xff] }
 0x6c7   :  { %v14969_v28 = vpop.f32.mrf.mxu1  ;;  %v15033_v2 = vpop.f32.mrf.mxu0  ;;  %v11386_v20 = vadd.f32 %v14916_v61, %v11289_v54  ;;  %v18493_v61 = vld [vmem:[#allocation39_spill] sm:$0xff] }
 0x6c8   :  { %v11619_v59 = vmax.f32 %v11559_v36, 0.0  ;;  %v11467_v13 = vadd.f32 %v14968_v38, %v11370_v19 }
 0x6c9   :  { %v14970_v62 = vpop.f32.mrf.mxu1  ;;  %v15034_v24 = vpop.f32.mrf.mxu0 }
 0x6ca   :  { %11635 = vst [vmem:[%s18181_s12 + $0x8] sm:$0xff] %v11619_v59  ;;  %v11564_v25 = vadd.f32 %v15032_v53, %v11467_v13  ;;  %v14971_v37 = vadd.f32 %v14970_v62, %v14969_v28  ;;  %v15035_v26 = vadd.f32 %v15034_v24, %v15033_v2  ;;  %v18481_v13 = vld [vmem:[#allocation45_spill] sm:$0xff] }
 0x6cb   :  { %v14972_v60 = vpop.f32.mrf.mxu1  ;;  %v15036_v56 = vpop.f32.mrf.mxu0  ;;  %v14861_v53 = vadd.f32 %v18482_v7, %v18481_v13 }
 0x6cc   :  { %v11620_v39 = vmax.f32 %v11564_v25, 0.0  ;;  %v11470_v47 = vadd.f32 %v14971_v37, %v11373_v50  ;;  %v11297_v50 = vadd.f32 %v14858_v48, %v18483_v23  ;;  %v14922_v37 = vadd.f32 %v18485_v55, %v18484_v32 }
 0x6cd   :  { %v14973_v1 = vpop.f32.mrf.mxu1  ;;  %v15037_v14 = vpop.f32.mrf.mxu0 }
 0x6ce   :  { %11636 = vst [vmem:[%s18181_s12 + $0x10] sm:$0xff] %v11620_v39  ;;  %v11567_v12 = vadd.f32 %v15035_v26, %v11470_v47  ;;  %v14974_v45 = vadd.f32 %v14973_v1, %v14972_v60  ;;  %v15038_v27 = vadd.f32 %v15037_v14, %v15036_v56  ;;  %v18486_v47 = vld [vmem:[#allocation35_spill] sm:$0xff]  ;;  %v11394_v4 = vadd.f32 %v14922_v37, %v11297_v50  ;;  %v18487_v1 = vld [vmem:[#allocation38_spill] sm:$0xff] }
 0x6cf   :  { %v14975_v51 = vpop.f32.mrf.mxu1  ;;  %v15039_v41 = vpop.f32.mrf.mxu0  ;;  %v11300_v26 = vadd.f32 %v14861_v53, %v18486_v47  ;;  %v18497_v53 = vld [vmem:[#allocation18_spill] sm:$0xff] }
 0x6d0   :  { %v11621_v29 = vmax.f32 %v11567_v12, 0.0  ;;  %v11475_v40 = vadd.f32 %v14974_v45, %v11378_v6  ;;  %v18488_v6 = vld [vmem:[#allocation47_spill] sm:$0xff] }
 0x6d1   :  { %v14976_v42 = vpop.f32.mrf.mxu1  ;;  %v15040_v31 = vpop.f32.mrf.mxu0  ;;  %v14864_v18 = vadd.f32 %v18488_v6, %v18487_v1 }
 0x6d2   :  { %11637 = vst [vmem:[%s18181_s12 + $0x18] sm:$0xff] %v11621_v29  ;;  %v11572_v30 = vadd.f32 %v15038_v27, %v11475_v40  ;;  %v14977_v58 = vadd.f32 %v14976_v42, %v14975_v51  ;;  %v15041_v22 = vadd.f32 %v15040_v31, %v15039_v41  ;;  %v18489_v51 = vld [vmem:[#allocation17_spill] sm:$0xff]  ;;  %v18492_v31 = vld [vmem:[#allocation36_spill] sm:$0xff] }
 0x6d3   :  { %v14978_v16 = vpop.f32.mrf.mxu1  ;;  %v15042_v49 = vpop.f32.mrf.mxu0  ;;  %v14925_v29 = vadd.f32 %v18490_v33, %v18489_v51 }
 0x6d4   :  { %v11622_v46 = vmax.f32 %v11572_v30, 0.0  ;;  %v11478_v15 = vadd.f32 %v14977_v58, %v11381_v11  ;;  %v18491_v30 = vld [vmem:[#allocation21_spill] sm:$0xff] }
 0x6d5   :  { %v14979_v19 = vpop.f32.mrf.mxu1  ;;  %v15043_v38 = vpop.f32.mrf.mxu0  ;;  %v11397_v11 = vadd.f32 %v14925_v29, %v11300_v26  ;;  %v11305_v58 = vadd.f32 %v14864_v18, %v18491_v30 }
 0x6d6   :  { %11638 = vst [vmem:[%s18181_s12 + $0x20] sm:$0xff] %v11622_v46  ;;  %v11575_v10 = vadd.f32 %v15041_v22, %v11478_v15  ;;  %v14980_v36 = vadd.f32 %v14979_v19, %v14978_v16  ;;  %v15044_v28 = vadd.f32 %v15043_v38, %v15042_v49  ;;  %v14867_v16 = vadd.f32 %v18493_v61, %v18492_v31  ;;  %v18495_v19 = vld [vmem:[#allocation20_spill] sm:$0xff] }
 0x6d7   :  { %v14981_v63 = vpop.f32.mrf.mxu1  ;;  %v15045_v59 = vpop.f32.mrf.mxu0 }
 0x6d8   :  { %v11623_v21 = vmax.f32 %v11575_v10, 0.0  ;;  %v11483_v34 = vadd.f32 %v14980_v36, %v11386_v20  ;;  %v18494_v20 = vld [vmem:[#allocation23_spill] sm:$0xff] }
 0x6d9   :  { %v14982_v2 = vpop.f32.mrf.mxu1  ;;  %v15046_v44 = vpop.f32.mrf.mxu0  ;;  %v14928_v8 = vadd.f32 %v18495_v19, %v18494_v20 }
 0x6da   :  { %11639 = vst [vmem:[%s18181_s12 + $0x28] sm:$0xff] %v11623_v21  ;;  %v11580_v62 = vadd.f32 %v15044_v28, %v11483_v34  ;;  %v14983_v3 = vadd.f32 %v14982_v2, %v14981_v63  ;;  %v15047_v17 = vadd.f32 %v15046_v44, %v15045_v59  ;;  %v18496_v21 = vld [vmem:[#allocation50_spill] sm:$0xff]  ;;  %v18498_v2 = vld [vmem:[#allocation24_spill] sm:$0xff] }
 0x6db   :  { %v14984_v25 = vpop.f32.mrf.mxu1  ;;  %v15048_v39 = vpop.f32.mrf.mxu0  ;;  %v11402_v5 = vadd.f32 %v14928_v8, %v11305_v58  ;;  %v11308_v34 = vadd.f32 %v14867_v16, %v18496_v21 }
 0x6dc   :  { %v11624_v24 = vmax.f32 %v11580_v62, 0.0  ;;  %v11486_v60 = vadd.f32 %v14983_v3, %v11389_v52  ;;  %v14931_v52 = vadd.f32 %v18498_v2, %v18497_v53 }
 0x6dd   :  { %v14985_v56 = vpop.f32.mrf.mxu1  ;;  %v15049_v14 = vpop.f32.mrf.mxu0 }
 0x6de   :  { %11640 = vst [vmem:[%s18181_s12 + $0x30] sm:$0xff] %v11624_v24  ;;  %v11583_v12 = vadd.f32 %v15047_v17, %v11486_v60  ;;  %v14986_v45 = vadd.f32 %v14985_v56, %v14984_v25  ;;  %v15050_v54 = vadd.f32 %v15049_v14, %v15048_v39  ;;  %v11405_v25 = vadd.f32 %v14931_v52, %v11308_v34 }
 0x6df   :  { %v14987_v40 = vpop.f32.mrf.mxu1  ;;  %v15051_v42 = vpop.f32.mrf.mxu0 }
 0x6e0   :  { %v11625_v27 = vmax.f32 %v11583_v12, 0.0  ;;  %v11491_v41 = vadd.f32 %v14986_v45, %v11394_v4 }
 0x6e1   :  { %v14988_v43 = vpop.f32.mrf.mxu1  ;;  %v15052_v22 = vpop.f32.mrf.mxu0 }
 0x6e2   :  { %11641 = vst [vmem:[%s18181_s12 + $0x38] sm:$0xff] %v11625_v27  ;;  %v11588_v46 = vadd.f32 %v15050_v54, %v11491_v41  ;;  %v14989_v15 = vadd.f32 %v14988_v43, %v14987_v40  ;;  %v15053_v36 = vadd.f32 %v15052_v22, %v15051_v42 }
 0x6e3   :  { %v14990_v49 = vpop.f32.mrf.mxu1  ;;  %v15054_v38 = vpop.f32.mrf.mxu0 }
 0x6e4   :  { %v11626_v48 = vmax.f32 %v11588_v46, 0.0  ;;  %v11494_v10 = vadd.f32 %v14989_v15, %v11397_v11 }
 0x6e5   :  { %v14991_v63 = vpop.f32.mrf.mxu1  ;;  %v15055_v13 = vpop.f32.mrf.mxu0 }
 0x6e6   :  { %13048 = vst [vmem:[%s18181_s12 + $0x40] sm:$0xff] %v11626_v48  ;;  %v11591_v28 = vadd.f32 %v15053_v36, %v11494_v10  ;;  %v14992_v59 = vadd.f32 %v14991_v63, %v14990_v49  ;;  %v15056_v62 = vadd.f32 %v15055_v13, %v15054_v38 }
 0x6e7   :  { %v14993_v7 = vpop.f32.mrf.mxu1  ;;  %v15057_v3 = vpop.f32.mrf.mxu0 }
 0x6e8   :  { %v11627_v23 = vmax.f32 %v11591_v28, 0.0  ;;  %v11499_v50 = vadd.f32 %v14992_v59, %v11402_v5 }
 0x6e9   :  { %v14994_v44 = vpop.f32.mrf.mxu1  ;;  %v15058_v37 = vpop.f32.mrf.mxu0 }
 0x6ea   :  { %13049 = vst [vmem:[%s18181_s12 + $0x48] sm:$0xff] %v11627_v23  ;;  %v11596_v32 = vadd.f32 %v15056_v62, %v11499_v50  ;;  %v14995_v55 = vadd.f32 %v14994_v44, %v14993_v7  ;;  %v15059_v39 = vadd.f32 %v15058_v37, %v15057_v3 }
 0x6eb   :  { %v14996_v24 = vpop.f32.mrf.mxu1 }
 0x6ec   :  { %v11628_v60 = vmax.f32 %v11596_v32, 0.0  ;;  %v11502_v17 = vadd.f32 %v14995_v55, %v11405_v25 }
 0x6ed   :  { %v14997_v47 = vpop.f32.mrf.mxu1 }
 0x6ee   :  { %13050 = vst [vmem:[%s18181_s12 + $0x50] sm:$0xff] %v11628_v60  ;;  %v11599_v26 = vadd.f32 %v15059_v39, %v11502_v17  ;;  %v14998_v14 = vadd.f32 %v14997_v47, %v14996_v24 }
 0x6ef   :  { %v14999_v56 = vpop.f32.mrf.mxu1 }
 0x6f0   :  { %v11629_v4 = vmax.f32 %v11599_v26, 0.0  ;;  %v11507_v29 = vadd.f32 %v14998_v14, %v18046_v57 }
 0x6f1   :  { %v15000_v1 = vpop.f32.mrf.mxu1 }
 0x6f2   :  { %13051 = vst [vmem:[%s18181_s12 + $0x58] sm:$0xff] %v11629_v4  ;;  %v15001_v40 = vadd.f32 %v15000_v1, %v14999_v56 }
 0x6f3   :  { %v15002_v6 = vpop.f32.mrf.mxu1 }
 0x6f4   :  { %v11510_v11 = vadd.f32 %v15001_v40, %v18051_v9 }
 0x6f5   :  { %v15003_v18 = vpop.f32.mrf.mxu1 }
 0x6f6   :  { %v15004_v43 = vadd.f32 %v15003_v18, %v15002_v6 }
 0x6f7   :  { %v15005_v12 = vpop.f32.mrf.mxu1 }
 0x6f8   :  { %v11515_v46 = vadd.f32 %v15004_v43, %v18057_v35 }
 0x6f9   :  { %v15006_v45 = vpop.f32.mrf.mxu1 }
 0x6fa   :  { %v15007_v57 = vadd.f32 %v15006_v45, %v15005_v12 }
 0x6fb   :  { %v15060_v51 = vpop.f32.mrf.mxu1 }
 0x6fc   :  { %v11518_v19 = vadd.f32 %v15007_v57, %v18065_v0 }
 0x6fd   :  { %v15061_v33 = vpop.f32.mrf.mxu1 }
 0x6fe   :  { %v15062_v27 = vadd.f32 %v15061_v33, %v15060_v51 }
 0x6ff   :  { %v15063_v41 = vpop.f32.mrf.mxu1 }
 0x700   :  { %v11604_v54 = vadd.f32 %v15062_v27, %v11507_v29 }
 0x701   :  { %v15064_v42 = vpop.f32.mrf.mxu1 }
 0x702   :  { %v11630_v30 = vmax.f32 %v11604_v54, 0.0  ;;  %v15065_v58 = vadd.f32 %v15064_v42, %v15063_v41 }
 0x703   :  { %v15066_v31 = vpop.f32.mrf.mxu1 }
 0x704   :  { %13052 = vst [vmem:[%s18181_s12 + $0x60] sm:$0xff] %v11630_v30  ;;  %v11607_v61 = vadd.f32 %v15065_v58, %v11510_v11 }
 0x705   :  { %v15067_v16 = vpop.f32.mrf.mxu1 }
 0x706   :  { %v11631_v15 = vmax.f32 %v11607_v61, 0.0  ;;  %v15068_v22 = vadd.f32 %v15067_v16, %v15066_v31 }
 0x707   :  { %v15069_v49 = vpop.f32.mrf.mxu1 }
 0x708   :  { %13053 = vst [vmem:[%s18181_s12 + $0x68] sm:$0xff] %v11631_v15  ;;  %v11612_v9 = vadd.f32 %v15068_v22, %v11515_v46 }
 0x709   :  { %v15070_v20 = vpop.f32.mrf.mxu1 }
 0x70a   :  { %v11632_v8 = vmax.f32 %v11612_v9, 0.0  ;;  %v15071_v48 = vadd.f32 %v15070_v20, %v15069_v49 }
 0x70c   :  { %13054 = vst [vmem:[%s18181_s12 + $0x70] sm:$0xff] %v11632_v8  ;;  %v11615_v10 = vadd.f32 %v15071_v48, %v11518_v19 }
 0x70e   :  { %v11633_v35 = vmax.f32 %v11615_v10, 0.0 }
 0x710   :  { %13055 = vst [vmem:[%s18181_s12 + $0x78] sm:$0xff] %v11633_v35 }
 0x711   :  { %11655 = vsyncpa [#allocation7], 1 }
 0x712   :  { %11656 = vsyncpa [#allocation9], 1 }
 0x713   :  { %11657 = vsyncpa [#allocation12], 1 }

</bundles_post_ra>
